<compile_context>
chip_gen: v7x
topology: tpu7x:2x2x1
jax: 0.10.0
libtpu: 0.0.40
codegen_flags: <defaults>
</compile_context>

<pallas_src>
import functools

import jax
import jax.numpy as jnp
from jax.experimental import pallas as pl
from jax.experimental.pallas import tpu as pltpu


# ----------------------------------------------------------------------------
# Fused Pallas kernel: whole AlphaZero forward pass
# ----------------------------------------------------------------------------
def _alphazero_kernel(N, H, W, Cin, Cmid, num_blocks,
                      xpad_ref, stem_w_ref, blk_w_ref, scale_ref, shift_ref,
                      pol_cw_ref, pol_bn_ref, pol_lw_ref, pol_lb_ref,
                      val_cw_ref, val_bn_ref, val_w1_ref, val_b1_ref,
                      val_w2_ref, val_b2_ref,
                      policy_ref, value_ref,
                      pad_ref):
    M = N * H * W
    HW = H * W
    taps = [(dy, dx) for dy in range(3) for dx in range(3)]

    def conv3x3(padded, cin, w_at):
        """padded: (N, H+2, W+2, cin) value; w_at(t) -> (cin, Cmid) weights."""
        acc = jnp.zeros((M, Cmid), jnp.float32)
        for t, (dy, dx) in enumerate(taps):
            patch = padded[:, dy:dy + H, dx:dx + W, :].reshape(M, cin)
            acc = acc + jnp.dot(patch, w_at(t),
                                preferred_element_type=jnp.float32)
        return acc

    # ---- stem: conv3x3 + folded BN + ReLU (input padded once in wrapper) ----
    acc = conv3x3(xpad_ref[...], Cin, lambda t: stem_w_ref[t])
    out = jnp.maximum(acc * scale_ref[0] + shift_ref[0], 0.0)      # (M, Cmid)

    # ---- residual tower: weights + activations stay in VMEM ----
    pad_ref[...] = jnp.zeros_like(pad_ref)    # zero border once; it stays zero
    for b in range(num_blocks):
        resid = out
        for j in range(2):
            li = 1 + 2 * b + j
            pad_ref[:, 1:H + 1, 1:W + 1, :] = out.reshape(N, H, W, Cmid)
            acc = conv3x3(pad_ref[...], Cmid,
                          lambda t, i=2 * b + j: blk_w_ref[i, t])
            out = acc * scale_ref[li] + shift_ref[li]
            if j == 0:                        # ReLU only after the first conv
                out = jnp.maximum(out, 0.0)
        out = jnp.maximum(out + resid, 0.0)   # residual add + ReLU

    x3 = out.reshape(N, HW, Cmid)             # (N, H*W, Cmid)

    # ---- policy head: conv1x1 + BN + ReLU -> flatten -> Linear -> softmax ----
    # PyTorch flattens NCHW channel-major; the Linear is decomposed over the
    # 4 conv channels (pol_lw pre-split per channel in the wrapper), so the
    # ordering is reproduced with no transpose of the 4-channel intermediate.
    pol_bn = pol_bn_ref[...]                  # (2, 4) folded BN scale/shift
    logits = jnp.zeros((N, HW), jnp.float32) + pol_lb_ref[...]
    for c in range(4):
        hc = jnp.sum(x3 * pol_cw_ref[c], axis=-1)                  # (N, HW)
        hc = jnp.maximum(hc * pol_bn[0:1, c:c + 1] + pol_bn[1:2, c:c + 1], 0.0)
        logits = logits + jnp.dot(hc, pol_lw_ref[c],
                                  preferred_element_type=jnp.float32)
    m = jnp.max(logits, axis=-1, keepdims=True)
    e = jnp.exp(logits - m)
    policy_ref[...] = e * pl.reciprocal(jnp.sum(e, axis=-1, keepdims=True),
                                        approx=True)

    # ---- value head: conv1x1+BN+ReLU -> flatten -> Linear -> ReLU
    #                  -> Linear -> tanh ----
    val_bn = val_bn_ref[...]                  # (2, 2)
    acc_v = jnp.zeros((N, 64), jnp.float32) + val_b1_ref[...]
    for c in range(2):
        hc = jnp.sum(x3 * val_cw_ref[c], axis=-1)                  # (N, HW)
        hc = jnp.maximum(hc * val_bn[0:1, c:c + 1] + val_bn[1:2, c:c + 1], 0.0)
        acc_v = acc_v + jnp.dot(hc, val_w1_ref[c],
                                preferred_element_type=jnp.float32)
    h = jnp.maximum(acc_v, 0.0)                                    # (N, 64)
    v = jnp.sum(h * val_w2_ref[...], axis=-1, keepdims=True) + val_b2_ref[...]
    value_ref[...] = jnp.tanh(v)


# ----------------------------------------------------------------------------
# Wrapper: weight packing (layout plumbing only) + single pallas_call
# ----------------------------------------------------------------------------
def alpha_zero_forward(params, x_nchw):
    p = params
    N, Cin, H, W = x_nchw.shape
    Cmid = p["stem_w"].shape[-1]
    num_blocks = len(p["blocks"])
    assert num_blocks >= 1

    # NCHW (PyTorch) -> NHWC, padded ONCE for the fused tower.
    x = jnp.transpose(x_nchw, (0, 2, 3, 1)).astype(jnp.float32)
    xpad = jnp.pad(x, ((0, 0), (1, 1), (1, 1), (0, 0)))

    # tower weights / folded BN params, stacked so the kernel indexes them.
    stem_w = p["stem_w"].reshape(9, Cin, Cmid)
    blk_w = jnp.stack([blk[k].reshape(9, Cmid, Cmid)
                       for blk in p["blocks"] for k in ("w1", "w2")])
    scales = jnp.stack(
        [p["stem_scale"]] + [blk[k] for blk in p["blocks"] for k in ("s1", "s2")]
    ).reshape(1 + 2 * num_blocks, 1, Cmid)
    shifts = jnp.stack(
        [p["stem_shift"]] + [blk[k] for blk in p["blocks"] for k in ("b1", "b2")]
    ).reshape(1 + 2 * num_blocks, 1, Cmid)

    # policy head: conv weight transposed per out-channel; linear weight split
    # per conv channel (rows of the PyTorch Linear are channel-major).
    pol_cw = jnp.transpose(p["pol_w"]).reshape(4, 1, Cmid)
    pol_bn = jnp.stack([p["pol_scale"], p["pol_shift"]])            # (2, 4)
    pol_lw = p["pol_lin_w"].reshape(4, H * W, H * W)
    pol_lb = p["pol_lin_b"].reshape(1, H * W)

    # value head
    val_cw = jnp.transpose(p["val_w"]).reshape(2, 1, Cmid)
    val_bn = jnp.stack([p["val_scale"], p["val_shift"]])            # (2, 2)
    val_w1 = p["val_l1_w"].reshape(2, H * W, 64)
    val_b1 = p["val_l1_b"].reshape(1, 64)
    val_w2 = p["val_l2_w"].reshape(1, 64)
    val_b2 = p["val_l2_b"].reshape(1, 1)

    kernel = functools.partial(_alphazero_kernel, N, H, W, Cin, Cmid, num_blocks)
    policy, value = pl.pallas_call(
        kernel,
        out_shape=(jax.ShapeDtypeStruct((N, H * W), jnp.float32),
                   jax.ShapeDtypeStruct((N, 1), jnp.float32)),
        scratch_shapes=[pltpu.VMEM((N, H + 2, W + 2, Cmid), jnp.float32)],
    )(xpad, stem_w, blk_w, scales, shifts,
      pol_cw, pol_bn, pol_lw, pol_lb,
      val_cw, val_bn, val_w1, val_b1, val_w2, val_b2)
    return [policy, value]


# ----------------------------------------------------------------------------
# Parameter init (deterministic, synthetic; BN folded into scale/shift)
# ----------------------------------------------------------------------------
def _bn_fold(key, c):
    k1, k2, k3, k4 = jax.random.split(key, 4)
    gamma = 1.0 + 0.1 * jax.random.normal(k1, (c,), jnp.float32)
    beta = 0.1 * jax.random.normal(k2, (c,), jnp.float32)
    mean = 0.1 * jax.random.normal(k3, (c,), jnp.float32)
    var = 1.0 + 0.1 * jnp.abs(jax.random.normal(k4, (c,), jnp.float32))
    scale = gamma / jnp.sqrt(var + 1e-5)
    shift = beta - mean * scale
    return scale, shift


def init_params(key, in_channels, mid_channels, num_blocks, board_size):
    keys = jax.random.split(key, 16 + 4 * num_blocks)
    ki = iter(keys)
    p = {}

    p["stem_w"] = 0.1 * jax.random.normal(
        next(ki), (3, 3, in_channels, mid_channels), jnp.float32)
    p["stem_scale"], p["stem_shift"] = _bn_fold(next(ki), mid_channels)

    blocks = []
    for _ in range(num_blocks):
        w1 = 0.1 * jax.random.normal(
            next(ki), (3, 3, mid_channels, mid_channels), jnp.float32)
        s1, b1 = _bn_fold(next(ki), mid_channels)
        w2 = 0.1 * jax.random.normal(
            next(ki), (3, 3, mid_channels, mid_channels), jnp.float32)
        s2, b2 = _bn_fold(next(ki), mid_channels)
        blocks.append(dict(w1=w1, s1=s1, b1=b1, w2=w2, s2=s2, b2=b2))
    p["blocks"] = blocks

    p["pol_w"] = 0.1 * jax.random.normal(
        next(ki), (mid_channels, 4), jnp.float32)
    p["pol_scale"], p["pol_shift"] = _bn_fold(next(ki), 4)
    p["pol_lin_w"] = 0.05 * jax.random.normal(
        next(ki), (board_size ** 2 * 4, board_size ** 2), jnp.float32)
    p["pol_lin_b"] = 0.05 * jax.random.normal(
        next(ki), (board_size ** 2,), jnp.float32)

    p["val_w"] = 0.1 * jax.random.normal(
        next(ki), (mid_channels, 2), jnp.float32)
    p["val_scale"], p["val_shift"] = _bn_fold(next(ki), 2)
    p["val_l1_w"] = 0.05 * jax.random.normal(
        next(ki), (board_size ** 2 * 2, 64), jnp.float32)
    p["val_l1_b"] = 0.05 * jax.random.normal(next(ki), (64,), jnp.float32)
    p["val_l2_w"] = 0.05 * jax.random.normal(next(ki), (64, 1), jnp.float32)
    p["val_l2_b"] = 0.05 * jax.random.normal(next(ki), (1,), jnp.float32)
    return p


# ----------------------------------------------------------------------------
# Pure-JAX reference (same math, XLA ops) for correctness checking
# ----------------------------------------------------------------------------
def _reference_forward(params, x_nchw):
    p = params
    x = jnp.transpose(x_nchw, (0, 2, 3, 1)).astype(jnp.float32)

    def conv3x3(a, w):
        return jax.lax.conv_general_dilated(
            a, w, (1, 1), "SAME", dimension_numbers=("NHWC", "HWIO", "NHWC"))

    def bn(a, s, b):
        return a * s + b

    out = jax.nn.relu(bn(conv3x3(x, p["stem_w"]),
                         p["stem_scale"], p["stem_shift"]))
    for blk in p["blocks"]:
        h = jax.nn.relu(bn(conv3x3(out, blk["w1"]), blk["s1"], blk["b1"]))
        h = bn(conv3x3(h, blk["w2"]), blk["s2"], blk["b2"])
        out = jax.nn.relu(h + out)

    ph = jax.nn.relu(bn(jnp.einsum("nhwc,cd->nhwd", out, p["pol_w"]),
                        p["pol_scale"], p["pol_shift"]))
    ph_flat = jnp.transpose(ph, (0, 3, 1, 2)).reshape(ph.shape[0], -1)
    policy = jax.nn.softmax(ph_flat @ p["pol_lin_w"] + p["pol_lin_b"], axis=-1)

    vh = jax.nn.relu(bn(jnp.einsum("nhwc,cd->nhwd", out, p["val_w"]),
                        p["val_scale"], p["val_shift"]))
    vh_flat = jnp.transpose(vh, (0, 3, 1, 2)).reshape(vh.shape[0], -1)
    hv = jax.nn.relu(vh_flat @ p["val_l1_w"] + p["val_l1_b"])
    value = jnp.tanh(hv @ p["val_l2_w"] + p["val_l2_b"])
    return policy, value


# ----------------------------------------------------------------------------
if __name__ == "__main__":
    in_channels = 4
    mid_channels = 32
    num_blocks = 2
    board_size = 8
    batch = 2

    key = jax.random.PRNGKey(0)
    kx, kp = jax.random.split(key)
    x = jax.random.normal(
        kx, (batch, in_channels, board_size, board_size), jnp.float32)
    params = init_params(kp, in_channels, mid_channels, num_blocks, board_size)

    fwd = jax.jit(alpha_zero_forward)
    policy, value = fwd(params, x)
    policy = jax.block_until_ready(policy)
    value = jax.block_until_ready(value)

    assert policy.shape == (batch, board_size ** 2), policy.shape
    assert value.shape == (batch, 1), value.shape
    assert bool(jnp.all(jnp.isfinite(policy)))
    assert bool(jnp.all(jnp.isfinite(value)))
    assert bool(jnp.allclose(jnp.sum(policy, axis=-1), 1.0, atol=2e-3))
    assert bool(jnp.all(jnp.abs(value) <= 1.0 + 1e-6))

    # numerical check against a pure-JAX reference of the same model
    ref_policy, ref_value = _reference_forward(params, x)
    assert bool(jnp.allclose(policy, ref_policy, atol=2e-3, rtol=2e-3)), (
        "policy mismatch vs reference")
    assert bool(jnp.allclose(value, ref_value, atol=2e-3, rtol=2e-3)), (
        "value mismatch vs reference")

    print("KERNEL_OK")
</pallas_src>

<mosaic_0001>
module attributes {stable_mosaic.version = 11 : i64} {
  func.func @_alphazero_kernel(%arg0: memref<2x10x10x4xf32, #tpu.memory_space<vmem>>, %arg1: memref<9x4x32xf32, #tpu.memory_space<vmem>>, %arg2: memref<4x9x32x32xf32, #tpu.memory_space<vmem>>, %arg3: memref<5x1x32xf32, #tpu.memory_space<vmem>>, %arg4: memref<5x1x32xf32, #tpu.memory_space<vmem>>, %arg5: memref<4x1x32xf32, #tpu.memory_space<vmem>>, %arg6: memref<2x4xf32, #tpu.memory_space<vmem>>, %arg7: memref<4x64x64xf32, #tpu.memory_space<vmem>>, %arg8: memref<1x64xf32, #tpu.memory_space<vmem>>, %arg9: memref<2x1x32xf32, #tpu.memory_space<vmem>>, %arg10: memref<2x2xf32, #tpu.memory_space<vmem>>, %arg11: memref<2x64x64xf32, #tpu.memory_space<vmem>>, %arg12: memref<1x64xf32, #tpu.memory_space<vmem>>, %arg13: memref<1x64xf32, #tpu.memory_space<vmem>>, %arg14: memref<1x1xf32, #tpu.memory_space<vmem>>, %arg15: memref<2x64xf32, #tpu.memory_space<vmem>>, %arg16: memref<2x1xf32, #tpu.memory_space<vmem>>, %arg17: memref<2x10x10x32xf32, #tpu.memory_space<vmem>>) attributes {dimension_semantics = [], scalar_prefetch = 0 : i64, scratch_operands = 1 : i64, tpu.core_type = #tpu.core_type<tc>} {
    %c0 = arith.constant 0 : index
    %c0_0 = arith.constant 0 : index
    %c0_1 = arith.constant 0 : index
    %c0_2 = arith.constant 0 : index
    %0 = vector.load %arg0[%c0, %c0_0, %c0_1, %c0_2] : memref<2x10x10x4xf32, #tpu.memory_space<vmem>>, vector<2x10x10x4xf32>
    %cst = arith.constant 0.000000e+00 : f32
    %1 = vector.broadcast %cst : f32 to vector<128x32xf32>
    %2 = vector.extract_strided_slice %0 {offsets = [0, 0, 0, 0], sizes = [2, 8, 8, 4], strides = [1, 1, 1, 1]} : vector<2x10x10x4xf32> to vector<2x8x8x4xf32>
    %3 = vector.shape_cast %2 : vector<2x8x8x4xf32> to vector<128x4xf32>
    %c0_3 = arith.constant 0 : index
    %c0_4 = arith.constant 0 : index
    %c0_5 = arith.constant 0 : index
    %4 = vector.load %arg1[%c0_3, %c0_4, %c0_5] : memref<9x4x32xf32, #tpu.memory_space<vmem>>, vector<1x4x32xf32>
    %5 = vector.shape_cast %4 : vector<1x4x32xf32> to vector<4x32xf32>
    %cst_6 = arith.constant dense<0.000000e+00> : vector<128x32xf32>
    %6 = tpu.matmul %3, %5, %cst_6 {dimension_numbers = #tpu.dot_dimension_numbers<[1], [0], [0], [1], [0, 0, 1, 1], [], []>} : vector<128x4xf32>, vector<4x32xf32>, vector<128x32xf32> -> vector<128x32xf32>
    %7 = arith.addf %1, %6 : vector<128x32xf32>
    %8 = vector.extract_strided_slice %0 {offsets = [0, 0, 1, 0], sizes = [2, 8, 8, 4], strides = [1, 1, 1, 1]} : vector<2x10x10x4xf32> to vector<2x8x8x4xf32>
    %9 = vector.shape_cast %8 : vector<2x8x8x4xf32> to vector<128x4xf32>
    %c1 = arith.constant 1 : index
    %c0_7 = arith.constant 0 : index
    %c0_8 = arith.constant 0 : index
    %10 = vector.load %arg1[%c1, %c0_7, %c0_8] : memref<9x4x32xf32, #tpu.memory_space<vmem>>, vector<1x4x32xf32>
    %11 = vector.shape_cast %10 : vector<1x4x32xf32> to vector<4x32xf32>
    %cst_9 = arith.constant dense<0.000000e+00> : vector<128x32xf32>
    %12 = tpu.matmul %9, %11, %cst_9 {dimension_numbers = #tpu.dot_dimension_numbers<[1], [0], [0], [1], [0, 0, 1, 1], [], []>} : vector<128x4xf32>, vector<4x32xf32>, vector<128x32xf32> -> vector<128x32xf32>
    %13 = arith.addf %7, %12 : vector<128x32xf32>
    %14 = vector.extract_strided_slice %0 {offsets = [0, 0, 2, 0], sizes = [2, 8, 8, 4], strides = [1, 1, 1, 1]} : vector<2x10x10x4xf32> to vector<2x8x8x4xf32>
    %15 = vector.shape_cast %14 : vector<2x8x8x4xf32> to vector<128x4xf32>
    %c2 = arith.constant 2 : index
    %c0_10 = arith.constant 0 : index
    %c0_11 = arith.constant 0 : index
    %16 = vector.load %arg1[%c2, %c0_10, %c0_11] : memref<9x4x32xf32, #tpu.memory_space<vmem>>, vector<1x4x32xf32>
    %17 = vector.shape_cast %16 : vector<1x4x32xf32> to vector<4x32xf32>
    %cst_12 = arith.constant dense<0.000000e+00> : vector<128x32xf32>
    %18 = tpu.matmul %15, %17, %cst_12 {dimension_numbers = #tpu.dot_dimension_numbers<[1], [0], [0], [1], [0, 0, 1, 1], [], []>} : vector<128x4xf32>, vector<4x32xf32>, vector<128x32xf32> -> vector<128x32xf32>
    %19 = arith.addf %13, %18 : vector<128x32xf32>
    %20 = vector.extract_strided_slice %0 {offsets = [0, 1, 0, 0], sizes = [2, 8, 8, 4], strides = [1, 1, 1, 1]} : vector<2x10x10x4xf32> to vector<2x8x8x4xf32>
    %21 = vector.shape_cast %20 : vector<2x8x8x4xf32> to vector<128x4xf32>
    %c3 = arith.constant 3 : index
    %c0_13 = arith.constant 0 : index
    %c0_14 = arith.constant 0 : index
    %22 = vector.load %arg1[%c3, %c0_13, %c0_14] : memref<9x4x32xf32, #tpu.memory_space<vmem>>, vector<1x4x32xf32>
    %23 = vector.shape_cast %22 : vector<1x4x32xf32> to vector<4x32xf32>
    %cst_15 = arith.constant dense<0.000000e+00> : vector<128x32xf32>
    %24 = tpu.matmul %21, %23, %cst_15 {dimension_numbers = #tpu.dot_dimension_numbers<[1], [0], [0], [1], [0, 0, 1, 1], [], []>} : vector<128x4xf32>, vector<4x32xf32>, vector<128x32xf32> -> vector<128x32xf32>
    %25 = arith.addf %19, %24 : vector<128x32xf32>
    %26 = vector.extract_strided_slice %0 {offsets = [0, 1, 1, 0], sizes = [2, 8, 8, 4], strides = [1, 1, 1, 1]} : vector<2x10x10x4xf32> to vector<2x8x8x4xf32>
    %27 = vector.shape_cast %26 : vector<2x8x8x4xf32> to vector<128x4xf32>
    %c4 = arith.constant 4 : index
    %c0_16 = arith.constant 0 : index
    %c0_17 = arith.constant 0 : index
    %28 = vector.load %arg1[%c4, %c0_16, %c0_17] : memref<9x4x32xf32, #tpu.memory_space<vmem>>, vector<1x4x32xf32>
    %29 = vector.shape_cast %28 : vector<1x4x32xf32> to vector<4x32xf32>
    %cst_18 = arith.constant dense<0.000000e+00> : vector<128x32xf32>
    %30 = tpu.matmul %27, %29, %cst_18 {dimension_numbers = #tpu.dot_dimension_numbers<[1], [0], [0], [1], [0, 0, 1, 1], [], []>} : vector<128x4xf32>, vector<4x32xf32>, vector<128x32xf32> -> vector<128x32xf32>
    %31 = arith.addf %25, %30 : vector<128x32xf32>
    %32 = vector.extract_strided_slice %0 {offsets = [0, 1, 2, 0], sizes = [2, 8, 8, 4], strides = [1, 1, 1, 1]} : vector<2x10x10x4xf32> to vector<2x8x8x4xf32>
    %33 = vector.shape_cast %32 : vector<2x8x8x4xf32> to vector<128x4xf32>
    %c5 = arith.constant 5 : index
    %c0_19 = arith.constant 0 : index
    %c0_20 = arith.constant 0 : index
    %34 = vector.load %arg1[%c5, %c0_19, %c0_20] : memref<9x4x32xf32, #tpu.memory_space<vmem>>, vector<1x4x32xf32>
    %35 = vector.shape_cast %34 : vector<1x4x32xf32> to vector<4x32xf32>
    %cst_21 = arith.constant dense<0.000000e+00> : vector<128x32xf32>
    %36 = tpu.matmul %33, %35, %cst_21 {dimension_numbers = #tpu.dot_dimension_numbers<[1], [0], [0], [1], [0, 0, 1, 1], [], []>} : vector<128x4xf32>, vector<4x32xf32>, vector<128x32xf32> -> vector<128x32xf32>
    %37 = arith.addf %31, %36 : vector<128x32xf32>
    %38 = vector.extract_strided_slice %0 {offsets = [0, 2, 0, 0], sizes = [2, 8, 8, 4], strides = [1, 1, 1, 1]} : vector<2x10x10x4xf32> to vector<2x8x8x4xf32>
    %39 = vector.shape_cast %38 : vector<2x8x8x4xf32> to vector<128x4xf32>
    %c6 = arith.constant 6 : index
    %c0_22 = arith.constant 0 : index
    %c0_23 = arith.constant 0 : index
    %40 = vector.load %arg1[%c6, %c0_22, %c0_23] : memref<9x4x32xf32, #tpu.memory_space<vmem>>, vector<1x4x32xf32>
    %41 = vector.shape_cast %40 : vector<1x4x32xf32> to vector<4x32xf32>
    %cst_24 = arith.constant dense<0.000000e+00> : vector<128x32xf32>
    %42 = tpu.matmul %39, %41, %cst_24 {dimension_numbers = #tpu.dot_dimension_numbers<[1], [0], [0], [1], [0, 0, 1, 1], [], []>} : vector<128x4xf32>, vector<4x32xf32>, vector<128x32xf32> -> vector<128x32xf32>
    %43 = arith.addf %37, %42 : vector<128x32xf32>
    %44 = vector.extract_strided_slice %0 {offsets = [0, 2, 1, 0], sizes = [2, 8, 8, 4], strides = [1, 1, 1, 1]} : vector<2x10x10x4xf32> to vector<2x8x8x4xf32>
    %45 = vector.shape_cast %44 : vector<2x8x8x4xf32> to vector<128x4xf32>
    %c7 = arith.constant 7 : index
    %c0_25 = arith.constant 0 : index
    %c0_26 = arith.constant 0 : index
    %46 = vector.load %arg1[%c7, %c0_25, %c0_26] : memref<9x4x32xf32, #tpu.memory_space<vmem>>, vector<1x4x32xf32>
    %47 = vector.shape_cast %46 : vector<1x4x32xf32> to vector<4x32xf32>
    %cst_27 = arith.constant dense<0.000000e+00> : vector<128x32xf32>
    %48 = tpu.matmul %45, %47, %cst_27 {dimension_numbers = #tpu.dot_dimension_numbers<[1], [0], [0], [1], [0, 0, 1, 1], [], []>} : vector<128x4xf32>, vector<4x32xf32>, vector<128x32xf32> -> vector<128x32xf32>
    %49 = arith.addf %43, %48 : vector<128x32xf32>
    %50 = vector.extract_strided_slice %0 {offsets = [0, 2, 2, 0], sizes = [2, 8, 8, 4], strides = [1, 1, 1, 1]} : vector<2x10x10x4xf32> to vector<2x8x8x4xf32>
    %51 = vector.shape_cast %50 : vector<2x8x8x4xf32> to vector<128x4xf32>
    %c8 = arith.constant 8 : index
    %c0_28 = arith.constant 0 : index
    %c0_29 = arith.constant 0 : index
    %52 = vector.load %arg1[%c8, %c0_28, %c0_29] : memref<9x4x32xf32, #tpu.memory_space<vmem>>, vector<1x4x32xf32>
    %53 = vector.shape_cast %52 : vector<1x4x32xf32> to vector<4x32xf32>
    %cst_30 = arith.constant dense<0.000000e+00> : vector<128x32xf32>
    %54 = tpu.matmul %51, %53, %cst_30 {dimension_numbers = #tpu.dot_dimension_numbers<[1], [0], [0], [1], [0, 0, 1, 1], [], []>} : vector<128x4xf32>, vector<4x32xf32>, vector<128x32xf32> -> vector<128x32xf32>
    %55 = arith.addf %49, %54 : vector<128x32xf32>
    %c0_31 = arith.constant 0 : index
    %c0_32 = arith.constant 0 : index
    %c0_33 = arith.constant 0 : index
    %56 = vector.load %arg3[%c0_31, %c0_32, %c0_33] : memref<5x1x32xf32, #tpu.memory_space<vmem>>, vector<1x1x32xf32>
    %57 = vector.shape_cast %56 : vector<1x1x32xf32> to vector<1x32xf32>
    %58 = vector.broadcast %57 : vector<1x32xf32> to vector<128x32xf32>
    %59 = arith.mulf %55, %58 : vector<128x32xf32>
    %c0_34 = arith.constant 0 : index
    %c0_35 = arith.constant 0 : index
    %c0_36 = arith.constant 0 : index
    %60 = vector.load %arg4[%c0_34, %c0_35, %c0_36] : memref<5x1x32xf32, #tpu.memory_space<vmem>>, vector<1x1x32xf32>
    %61 = vector.shape_cast %60 : vector<1x1x32xf32> to vector<1x32xf32>
    %62 = vector.broadcast %61 : vector<1x32xf32> to vector<128x32xf32>
    %63 = arith.addf %59, %62 : vector<128x32xf32>
    %cst_37 = arith.constant 0.000000e+00 : f32
    %64 = vector.broadcast %cst_37 : f32 to vector<128x32xf32>
    %65 = arith.maximumf %63, %64 : vector<128x32xf32>
    %cst_38 = arith.constant 0.000000e+00 : f32
    %66 = vector.broadcast %cst_38 : f32 to vector<2x10x10x32xf32>
    %c0_39 = arith.constant 0 : index
    %c0_40 = arith.constant 0 : index
    %c0_41 = arith.constant 0 : index
    %c0_42 = arith.constant 0 : index
    %67 = vector.load %arg17[%c0_39, %c0_40, %c0_41, %c0_42] : memref<2x10x10x32xf32, #tpu.memory_space<vmem>>, vector<2x10x10x32xf32>
    tpu.vector_store %arg17[%c0_39, %c0_40, %c0_41, %c0_42], %66 {strides = array<i32>} : memref<2x10x10x32xf32, #tpu.memory_space<vmem>>, vector<2x10x10x32xf32>,
    %68 = vector.shape_cast %65 : vector<128x32xf32> to vector<2x8x8x32xf32>
    %c0_43 = arith.constant 0 : index
    %c1_44 = arith.constant 1 : index
    %c1_45 = arith.constant 1 : index
    %c0_46 = arith.constant 0 : index
    %69 = vector.load %arg17[%c0_43, %c1_44, %c1_45, %c0_46] : memref<2x10x10x32xf32, #tpu.memory_space<vmem>>, vector<2x8x8x32xf32>
    tpu.vector_store %arg17[%c0_43, %c1_44, %c1_45, %c0_46], %68 {strides = array<i32>} : memref<2x10x10x32xf32, #tpu.memory_space<vmem>>, vector<2x8x8x32xf32>,
    %c0_47 = arith.constant 0 : index
    %c0_48 = arith.constant 0 : index
    %c0_49 = arith.constant 0 : index
    %c0_50 = arith.constant 0 : index
    %70 = vector.load %arg17[%c0_47, %c0_48, %c0_49, %c0_50] : memref<2x10x10x32xf32, #tpu.memory_space<vmem>>, vector<2x10x10x32xf32>
    %cst_51 = arith.constant 0.000000e+00 : f32
    %71 = vector.broadcast %cst_51 : f32 to vector<128x32xf32>
    %72 = vector.extract_strided_slice %70 {offsets = [0, 0, 0, 0], sizes = [2, 8, 8, 32], strides = [1, 1, 1, 1]} : vector<2x10x10x32xf32> to vector<2x8x8x32xf32>
    %73 = vector.shape_cast %72 : vector<2x8x8x32xf32> to vector<128x32xf32>
    %c0_52 = arith.constant 0 : index
    %c0_53 = arith.constant 0 : index
    %c0_54 = arith.constant 0 : index
    %c0_55 = arith.constant 0 : index
    %74 = vector.load %arg2[%c0_52, %c0_53, %c0_54, %c0_55] : memref<4x9x32x32xf32, #tpu.memory_space<vmem>>, vector<1x1x32x32xf32>
    %75 = vector.shape_cast %74 : vector<1x1x32x32xf32> to vector<32x32xf32>
    %cst_56 = arith.constant dense<0.000000e+00> : vector<128x32xf32>
    %76 = tpu.matmul %73, %75, %cst_56 {dimension_numbers = #tpu.dot_dimension_numbers<[1], [0], [0], [1], [0, 0, 1, 1], [], []>} : vector<128x32xf32>, vector<32x32xf32>, vector<128x32xf32> -> vector<128x32xf32>
    %77 = arith.addf %71, %76 : vector<128x32xf32>
    %78 = vector.extract_strided_slice %70 {offsets = [0, 0, 1, 0], sizes = [2, 8, 8, 32], strides = [1, 1, 1, 1]} : vector<2x10x10x32xf32> to vector<2x8x8x32xf32>
    %79 = vector.shape_cast %78 : vector<2x8x8x32xf32> to vector<128x32xf32>
    %c0_57 = arith.constant 0 : index
    %c1_58 = arith.constant 1 : index
    %c0_59 = arith.constant 0 : index
    %c0_60 = arith.constant 0 : index
    %80 = vector.load %arg2[%c0_57, %c1_58, %c0_59, %c0_60] : memref<4x9x32x32xf32, #tpu.memory_space<vmem>>, vector<1x1x32x32xf32>
    %81 = vector.shape_cast %80 : vector<1x1x32x32xf32> to vector<32x32xf32>
    %cst_61 = arith.constant dense<0.000000e+00> : vector<128x32xf32>
    %82 = tpu.matmul %79, %81, %cst_61 {dimension_numbers = #tpu.dot_dimension_numbers<[1], [0], [0], [1], [0, 0, 1, 1], [], []>} : vector<128x32xf32>, vector<32x32xf32>, vector<128x32xf32> -> vector<128x32xf32>
    %83 = arith.addf %77, %82 : vector<128x32xf32>
    %84 = vector.extract_strided_slice %70 {offsets = [0, 0, 2, 0], sizes = [2, 8, 8, 32], strides = [1, 1, 1, 1]} : vector<2x10x10x32xf32> to vector<2x8x8x32xf32>
    %85 = vector.shape_cast %84 : vector<2x8x8x32xf32> to vector<128x32xf32>
    %c0_62 = arith.constant 0 : index
    %c2_63 = arith.constant 2 : index
    %c0_64 = arith.constant 0 : index
    %c0_65 = arith.constant 0 : index
    %86 = vector.load %arg2[%c0_62, %c2_63, %c0_64, %c0_65] : memref<4x9x32x32xf32, #tpu.memory_space<vmem>>, vector<1x1x32x32xf32>
    %87 = vector.shape_cast %86 : vector<1x1x32x32xf32> to vector<32x32xf32>
    %cst_66 = arith.constant dense<0.000000e+00> : vector<128x32xf32>
    %88 = tpu.matmul %85, %87, %cst_66 {dimension_numbers = #tpu.dot_dimension_numbers<[1], [0], [0], [1], [0, 0, 1, 1], [], []>} : vector<128x32xf32>, vector<32x32xf32>, vector<128x32xf32> -> vector<128x32xf32>
    %89 = arith.addf %83, %88 : vector<128x32xf32>
    %90 = vector.extract_strided_slice %70 {offsets = [0, 1, 0, 0], sizes = [2, 8, 8, 32], strides = [1, 1, 1, 1]} : vector<2x10x10x32xf32> to vector<2x8x8x32xf32>
    %91 = vector.shape_cast %90 : vector<2x8x8x32xf32> to vector<128x32xf32>
    %c0_67 = arith.constant 0 : index
    %c3_68 = arith.constant 3 : index
    %c0_69 = arith.constant 0 : index
    %c0_70 = arith.constant 0 : index
    %92 = vector.load %arg2[%c0_67, %c3_68, %c0_69, %c0_70] : memref<4x9x32x32xf32, #tpu.memory_space<vmem>>, vector<1x1x32x32xf32>
    %93 = vector.shape_cast %92 : vector<1x1x32x32xf32> to vector<32x32xf32>
    %cst_71 = arith.constant dense<0.000000e+00> : vector<128x32xf32>
    %94 = tpu.matmul %91, %93, %cst_71 {dimension_numbers = #tpu.dot_dimension_numbers<[1], [0], [0], [1], [0, 0, 1, 1], [], []>} : vector<128x32xf32>, vector<32x32xf32>, vector<128x32xf32> -> vector<128x32xf32>
    %95 = arith.addf %89, %94 : vector<128x32xf32>
    %96 = vector.extract_strided_slice %70 {offsets = [0, 1, 1, 0], sizes = [2, 8, 8, 32], strides = [1, 1, 1, 1]} : vector<2x10x10x32xf32> to vector<2x8x8x32xf32>
    %97 = vector.shape_cast %96 : vector<2x8x8x32xf32> to vector<128x32xf32>
    %c0_72 = arith.constant 0 : index
    %c4_73 = arith.constant 4 : index
    %c0_74 = arith.constant 0 : index
    %c0_75 = arith.constant 0 : index
    %98 = vector.load %arg2[%c0_72, %c4_73, %c0_74, %c0_75] : memref<4x9x32x32xf32, #tpu.memory_space<vmem>>, vector<1x1x32x32xf32>
    %99 = vector.shape_cast %98 : vector<1x1x32x32xf32> to vector<32x32xf32>
    %cst_76 = arith.constant dense<0.000000e+00> : vector<128x32xf32>
    %100 = tpu.matmul %97, %99, %cst_76 {dimension_numbers = #tpu.dot_dimension_numbers<[1], [0], [0], [1], [0, 0, 1, 1], [], []>} : vector<128x32xf32>, vector<32x32xf32>, vector<128x32xf32> -> vector<128x32xf32>
    %101 = arith.addf %95, %100 : vector<128x32xf32>
    %102 = vector.extract_strided_slice %70 {offsets = [0, 1, 2, 0], sizes = [2, 8, 8, 32], strides = [1, 1, 1, 1]} : vector<2x10x10x32xf32> to vector<2x8x8x32xf32>
    %103 = vector.shape_cast %102 : vector<2x8x8x32xf32> to vector<128x32xf32>
    %c0_77 = arith.constant 0 : index
    %c5_78 = arith.constant 5 : index
    %c0_79 = arith.constant 0 : index
    %c0_80 = arith.constant 0 : index
    %104 = vector.load %arg2[%c0_77, %c5_78, %c0_79, %c0_80] : memref<4x9x32x32xf32, #tpu.memory_space<vmem>>, vector<1x1x32x32xf32>
    %105 = vector.shape_cast %104 : vector<1x1x32x32xf32> to vector<32x32xf32>
    %cst_81 = arith.constant dense<0.000000e+00> : vector<128x32xf32>
    %106 = tpu.matmul %103, %105, %cst_81 {dimension_numbers = #tpu.dot_dimension_numbers<[1], [0], [0], [1], [0, 0, 1, 1], [], []>} : vector<128x32xf32>, vector<32x32xf32>, vector<128x32xf32> -> vector<128x32xf32>
    %107 = arith.addf %101, %106 : vector<128x32xf32>
    %108 = vector.extract_strided_slice %70 {offsets = [0, 2, 0, 0], sizes = [2, 8, 8, 32], strides = [1, 1, 1, 1]} : vector<2x10x10x32xf32> to vector<2x8x8x32xf32>
    %109 = vector.shape_cast %108 : vector<2x8x8x32xf32> to vector<128x32xf32>
    %c0_82 = arith.constant 0 : index
    %c6_83 = arith.constant 6 : index
    %c0_84 = arith.constant 0 : index
    %c0_85 = arith.constant 0 : index
    %110 = vector.load %arg2[%c0_82, %c6_83, %c0_84, %c0_85] : memref<4x9x32x32xf32, #tpu.memory_space<vmem>>, vector<1x1x32x32xf32>
    %111 = vector.shape_cast %110 : vector<1x1x32x32xf32> to vector<32x32xf32>
    %cst_86 = arith.constant dense<0.000000e+00> : vector<128x32xf32>
    %112 = tpu.matmul %109, %111, %cst_86 {dimension_numbers = #tpu.dot_dimension_numbers<[1], [0], [0], [1], [0, 0, 1, 1], [], []>} : vector<128x32xf32>, vector<32x32xf32>, vector<128x32xf32> -> vector<128x32xf32>
    %113 = arith.addf %107, %112 : vector<128x32xf32>
    %114 = vector.extract_strided_slice %70 {offsets = [0, 2, 1, 0], sizes = [2, 8, 8, 32], strides = [1, 1, 1, 1]} : vector<2x10x10x32xf32> to vector<2x8x8x32xf32>
    %115 = vector.shape_cast %114 : vector<2x8x8x32xf32> to vector<128x32xf32>
    %c0_87 = arith.constant 0 : index
    %c7_88 = arith.constant 7 : index
    %c0_89 = arith.constant 0 : index
    %c0_90 = arith.constant 0 : index
    %116 = vector.load %arg2[%c0_87, %c7_88, %c0_89, %c0_90] : memref<4x9x32x32xf32, #tpu.memory_space<vmem>>, vector<1x1x32x32xf32>
    %117 = vector.shape_cast %116 : vector<1x1x32x32xf32> to vector<32x32xf32>
    %cst_91 = arith.constant dense<0.000000e+00> : vector<128x32xf32>
    %118 = tpu.matmul %115, %117, %cst_91 {dimension_numbers = #tpu.dot_dimension_numbers<[1], [0], [0], [1], [0, 0, 1, 1], [], []>} : vector<128x32xf32>, vector<32x32xf32>, vector<128x32xf32> -> vector<128x32xf32>
    %119 = arith.addf %113, %118 : vector<128x32xf32>
    %120 = vector.extract_strided_slice %70 {offsets = [0, 2, 2, 0], sizes = [2, 8, 8, 32], strides = [1, 1, 1, 1]} : vector<2x10x10x32xf32> to vector<2x8x8x32xf32>
    %121 = vector.shape_cast %120 : vector<2x8x8x32xf32> to vector<128x32xf32>
    %c0_92 = arith.constant 0 : index
    %c8_93 = arith.constant 8 : index
    %c0_94 = arith.constant 0 : index
    %c0_95 = arith.constant 0 : index
    %122 = vector.load %arg2[%c0_92, %c8_93, %c0_94, %c0_95] : memref<4x9x32x32xf32, #tpu.memory_space<vmem>>, vector<1x1x32x32xf32>
    %123 = vector.shape_cast %122 : vector<1x1x32x32xf32> to vector<32x32xf32>
    %cst_96 = arith.constant dense<0.000000e+00> : vector<128x32xf32>
    %124 = tpu.matmul %121, %123, %cst_96 {dimension_numbers = #tpu.dot_dimension_numbers<[1], [0], [0], [1], [0, 0, 1, 1], [], []>} : vector<128x32xf32>, vector<32x32xf32>, vector<128x32xf32> -> vector<128x32xf32>
    %125 = arith.addf %119, %124 : vector<128x32xf32>
    %c1_97 = arith.constant 1 : index
    %c0_98 = arith.constant 0 : index
    %c0_99 = arith.constant 0 : index
    %126 = vector.load %arg3[%c1_97, %c0_98, %c0_99] : memref<5x1x32xf32, #tpu.memory_space<vmem>>, vector<1x1x32xf32>
    %127 = vector.shape_cast %126 : vector<1x1x32xf32> to vector<1x32xf32>
    %128 = vector.broadcast %127 : vector<1x32xf32> to vector<128x32xf32>
    %129 = arith.mulf %125, %128 : vector<128x32xf32>
    %c1_100 = arith.constant 1 : index
    %c0_101 = arith.constant 0 : index
    %c0_102 = arith.constant 0 : index
    %130 = vector.load %arg4[%c1_100, %c0_101, %c0_102] : memref<5x1x32xf32, #tpu.memory_space<vmem>>, vector<1x1x32xf32>
    %131 = vector.shape_cast %130 : vector<1x1x32xf32> to vector<1x32xf32>
    %132 = vector.broadcast %131 : vector<1x32xf32> to vector<128x32xf32>
    %133 = arith.addf %129, %132 : vector<128x32xf32>
    %cst_103 = arith.constant 0.000000e+00 : f32
    %134 = vector.broadcast %cst_103 : f32 to vector<128x32xf32>
    %135 = arith.maximumf %133, %134 : vector<128x32xf32>
    %136 = vector.shape_cast %135 : vector<128x32xf32> to vector<2x8x8x32xf32>
    %c0_104 = arith.constant 0 : index
    %c1_105 = arith.constant 1 : index
    %c1_106 = arith.constant 1 : index
    %c0_107 = arith.constant 0 : index
    %137 = vector.load %arg17[%c0_104, %c1_105, %c1_106, %c0_107] : memref<2x10x10x32xf32, #tpu.memory_space<vmem>>, vector<2x8x8x32xf32>
    tpu.vector_store %arg17[%c0_104, %c1_105, %c1_106, %c0_107], %136 {strides = array<i32>} : memref<2x10x10x32xf32, #tpu.memory_space<vmem>>, vector<2x8x8x32xf32>,
    %c0_108 = arith.constant 0 : index
    %c0_109 = arith.constant 0 : index
    %c0_110 = arith.constant 0 : index
    %c0_111 = arith.constant 0 : index
    %138 = vector.load %arg17[%c0_108, %c0_109, %c0_110, %c0_111] : memref<2x10x10x32xf32, #tpu.memory_space<vmem>>, vector<2x10x10x32xf32>
    %cst_112 = arith.constant 0.000000e+00 : f32
    %139 = vector.broadcast %cst_112 : f32 to vector<128x32xf32>
    %140 = vector.extract_strided_slice %138 {offsets = [0, 0, 0, 0], sizes = [2, 8, 8, 32], strides = [1, 1, 1, 1]} : vector<2x10x10x32xf32> to vector<2x8x8x32xf32>
    %141 = vector.shape_cast %140 : vector<2x8x8x32xf32> to vector<128x32xf32>
    %c1_113 = arith.constant 1 : index
    %c0_114 = arith.constant 0 : index
    %c0_115 = arith.constant 0 : index
    %c0_116 = arith.constant 0 : index
    %142 = vector.load %arg2[%c1_113, %c0_114, %c0_115, %c0_116] : memref<4x9x32x32xf32, #tpu.memory_space<vmem>>, vector<1x1x32x32xf32>
    %143 = vector.shape_cast %142 : vector<1x1x32x32xf32> to vector<32x32xf32>
    %cst_117 = arith.constant dense<0.000000e+00> : vector<128x32xf32>
    %144 = tpu.matmul %141, %143, %cst_117 {dimension_numbers = #tpu.dot_dimension_numbers<[1], [0], [0], [1], [0, 0, 1, 1], [], []>} : vector<128x32xf32>, vector<32x32xf32>, vector<128x32xf32> -> vector<128x32xf32>
    %145 = arith.addf %139, %144 : vector<128x32xf32>
    %146 = vector.extract_strided_slice %138 {offsets = [0, 0, 1, 0], sizes = [2, 8, 8, 32], strides = [1, 1, 1, 1]} : vector<2x10x10x32xf32> to vector<2x8x8x32xf32>
    %147 = vector.shape_cast %146 : vector<2x8x8x32xf32> to vector<128x32xf32>
    %c1_118 = arith.constant 1 : index
    %c1_119 = arith.constant 1 : index
    %c0_120 = arith.constant 0 : index
    %c0_121 = arith.constant 0 : index
    %148 = vector.load %arg2[%c1_118, %c1_119, %c0_120, %c0_121] : memref<4x9x32x32xf32, #tpu.memory_space<vmem>>, vector<1x1x32x32xf32>
    %149 = vector.shape_cast %148 : vector<1x1x32x32xf32> to vector<32x32xf32>
    %cst_122 = arith.constant dense<0.000000e+00> : vector<128x32xf32>
    %150 = tpu.matmul %147, %149, %cst_122 {dimension_numbers = #tpu.dot_dimension_numbers<[1], [0], [0], [1], [0, 0, 1, 1], [], []>} : vector<128x32xf32>, vector<32x32xf32>, vector<128x32xf32> -> vector<128x32xf32>
    %151 = arith.addf %145, %150 : vector<128x32xf32>
    %152 = vector.extract_strided_slice %138 {offsets = [0, 0, 2, 0], sizes = [2, 8, 8, 32], strides = [1, 1, 1, 1]} : vector<2x10x10x32xf32> to vector<2x8x8x32xf32>
    %153 = vector.shape_cast %152 : vector<2x8x8x32xf32> to vector<128x32xf32>
    %c1_123 = arith.constant 1 : index
    %c2_124 = arith.constant 2 : index
    %c0_125 = arith.constant 0 : index
    %c0_126 = arith.constant 0 : index
    %154 = vector.load %arg2[%c1_123, %c2_124, %c0_125, %c0_126] : memref<4x9x32x32xf32, #tpu.memory_space<vmem>>, vector<1x1x32x32xf32>
    %155 = vector.shape_cast %154 : vector<1x1x32x32xf32> to vector<32x32xf32>
    %cst_127 = arith.constant dense<0.000000e+00> : vector<128x32xf32>
    %156 = tpu.matmul %153, %155, %cst_127 {dimension_numbers = #tpu.dot_dimension_numbers<[1], [0], [0], [1], [0, 0, 1, 1], [], []>} : vector<128x32xf32>, vector<32x32xf32>, vector<128x32xf32> -> vector<128x32xf32>
    %157 = arith.addf %151, %156 : vector<128x32xf32>
    %158 = vector.extract_strided_slice %138 {offsets = [0, 1, 0, 0], sizes = [2, 8, 8, 32], strides = [1, 1, 1, 1]} : vector<2x10x10x32xf32> to vector<2x8x8x32xf32>
    %159 = vector.shape_cast %158 : vector<2x8x8x32xf32> to vector<128x32xf32>
    %c1_128 = arith.constant 1 : index
    %c3_129 = arith.constant 3 : index
    %c0_130 = arith.constant 0 : index
    %c0_131 = arith.constant 0 : index
    %160 = vector.load %arg2[%c1_128, %c3_129, %c0_130, %c0_131] : memref<4x9x32x32xf32, #tpu.memory_space<vmem>>, vector<1x1x32x32xf32>
    %161 = vector.shape_cast %160 : vector<1x1x32x32xf32> to vector<32x32xf32>
    %cst_132 = arith.constant dense<0.000000e+00> : vector<128x32xf32>
    %162 = tpu.matmul %159, %161, %cst_132 {dimension_numbers = #tpu.dot_dimension_numbers<[1], [0], [0], [1], [0, 0, 1, 1], [], []>} : vector<128x32xf32>, vector<32x32xf32>, vector<128x32xf32> -> vector<128x32xf32>
    %163 = arith.addf %157, %162 : vector<128x32xf32>
    %164 = vector.extract_strided_slice %138 {offsets = [0, 1, 1, 0], sizes = [2, 8, 8, 32], strides = [1, 1, 1, 1]} : vector<2x10x10x32xf32> to vector<2x8x8x32xf32>
    %165 = vector.shape_cast %164 : vector<2x8x8x32xf32> to vector<128x32xf32>
    %c1_133 = arith.constant 1 : index
    %c4_134 = arith.constant 4 : index
    %c0_135 = arith.constant 0 : index
    %c0_136 = arith.constant 0 : index
    %166 = vector.load %arg2[%c1_133, %c4_134, %c0_135, %c0_136] : memref<4x9x32x32xf32, #tpu.memory_space<vmem>>, vector<1x1x32x32xf32>
    %167 = vector.shape_cast %166 : vector<1x1x32x32xf32> to vector<32x32xf32>
    %cst_137 = arith.constant dense<0.000000e+00> : vector<128x32xf32>
    %168 = tpu.matmul %165, %167, %cst_137 {dimension_numbers = #tpu.dot_dimension_numbers<[1], [0], [0], [1], [0, 0, 1, 1], [], []>} : vector<128x32xf32>, vector<32x32xf32>, vector<128x32xf32> -> vector<128x32xf32>
    %169 = arith.addf %163, %168 : vector<128x32xf32>
    %170 = vector.extract_strided_slice %138 {offsets = [0, 1, 2, 0], sizes = [2, 8, 8, 32], strides = [1, 1, 1, 1]} : vector<2x10x10x32xf32> to vector<2x8x8x32xf32>
    %171 = vector.shape_cast %170 : vector<2x8x8x32xf32> to vector<128x32xf32>
    %c1_138 = arith.constant 1 : index
    %c5_139 = arith.constant 5 : index
    %c0_140 = arith.constant 0 : index
    %c0_141 = arith.constant 0 : index
    %172 = vector.load %arg2[%c1_138, %c5_139, %c0_140, %c0_141] : memref<4x9x32x32xf32, #tpu.memory_space<vmem>>, vector<1x1x32x32xf32>
    %173 = vector.shape_cast %172 : vector<1x1x32x32xf32> to vector<32x32xf32>
    %cst_142 = arith.constant dense<0.000000e+00> : vector<128x32xf32>
    %174 = tpu.matmul %171, %173, %cst_142 {dimension_numbers = #tpu.dot_dimension_numbers<[1], [0], [0], [1], [0, 0, 1, 1], [], []>} : vector<128x32xf32>, vector<32x32xf32>, vector<128x32xf32> -> vector<128x32xf32>
    %175 = arith.addf %169, %174 : vector<128x32xf32>
    %176 = vector.extract_strided_slice %138 {offsets = [0, 2, 0, 0], sizes = [2, 8, 8, 32], strides = [1, 1, 1, 1]} : vector<2x10x10x32xf32> to vector<2x8x8x32xf32>
    %177 = vector.shape_cast %176 : vector<2x8x8x32xf32> to vector<128x32xf32>
    %c1_143 = arith.constant 1 : index
    %c6_144 = arith.constant 6 : index
    %c0_145 = arith.constant 0 : index
    %c0_146 = arith.constant 0 : index
    %178 = vector.load %arg2[%c1_143, %c6_144, %c0_145, %c0_146] : memref<4x9x32x32xf32, #tpu.memory_space<vmem>>, vector<1x1x32x32xf32>
    %179 = vector.shape_cast %178 : vector<1x1x32x32xf32> to vector<32x32xf32>
    %cst_147 = arith.constant dense<0.000000e+00> : vector<128x32xf32>
    %180 = tpu.matmul %177, %179, %cst_147 {dimension_numbers = #tpu.dot_dimension_numbers<[1], [0], [0], [1], [0, 0, 1, 1], [], []>} : vector<128x32xf32>, vector<32x32xf32>, vector<128x32xf32> -> vector<128x32xf32>
    %181 = arith.addf %175, %180 : vector<128x32xf32>
    %182 = vector.extract_strided_slice %138 {offsets = [0, 2, 1, 0], sizes = [2, 8, 8, 32], strides = [1, 1, 1, 1]} : vector<2x10x10x32xf32> to vector<2x8x8x32xf32>
    %183 = vector.shape_cast %182 : vector<2x8x8x32xf32> to vector<128x32xf32>
    %c1_148 = arith.constant 1 : index
    %c7_149 = arith.constant 7 : index
    %c0_150 = arith.constant 0 : index
    %c0_151 = arith.constant 0 : index
    %184 = vector.load %arg2[%c1_148, %c7_149, %c0_150, %c0_151] : memref<4x9x32x32xf32, #tpu.memory_space<vmem>>, vector<1x1x32x32xf32>
    %185 = vector.shape_cast %184 : vector<1x1x32x32xf32> to vector<32x32xf32>
    %cst_152 = arith.constant dense<0.000000e+00> : vector<128x32xf32>
    %186 = tpu.matmul %183, %185, %cst_152 {dimension_numbers = #tpu.dot_dimension_numbers<[1], [0], [0], [1], [0, 0, 1, 1], [], []>} : vector<128x32xf32>, vector<32x32xf32>, vector<128x32xf32> -> vector<128x32xf32>
    %187 = arith.addf %181, %186 : vector<128x32xf32>
    %188 = vector.extract_strided_slice %138 {offsets = [0, 2, 2, 0], sizes = [2, 8, 8, 32], strides = [1, 1, 1, 1]} : vector<2x10x10x32xf32> to vector<2x8x8x32xf32>
    %189 = vector.shape_cast %188 : vector<2x8x8x32xf32> to vector<128x32xf32>
    %c1_153 = arith.constant 1 : index
    %c8_154 = arith.constant 8 : index
    %c0_155 = arith.constant 0 : index
    %c0_156 = arith.constant 0 : index
    %190 = vector.load %arg2[%c1_153, %c8_154, %c0_155, %c0_156] : memref<4x9x32x32xf32, #tpu.memory_space<vmem>>, vector<1x1x32x32xf32>
    %191 = vector.shape_cast %190 : vector<1x1x32x32xf32> to vector<32x32xf32>
    %cst_157 = arith.constant dense<0.000000e+00> : vector<128x32xf32>
    %192 = tpu.matmul %189, %191, %cst_157 {dimension_numbers = #tpu.dot_dimension_numbers<[1], [0], [0], [1], [0, 0, 1, 1], [], []>} : vector<128x32xf32>, vector<32x32xf32>, vector<128x32xf32> -> vector<128x32xf32>
    %193 = arith.addf %187, %192 : vector<128x32xf32>
    %c2_158 = arith.constant 2 : index
    %c0_159 = arith.constant 0 : index
    %c0_160 = arith.constant 0 : index
    %194 = vector.load %arg3[%c2_158, %c0_159, %c0_160] : memref<5x1x32xf32, #tpu.memory_space<vmem>>, vector<1x1x32xf32>
    %195 = vector.shape_cast %194 : vector<1x1x32xf32> to vector<1x32xf32>
    %196 = vector.broadcast %195 : vector<1x32xf32> to vector<128x32xf32>
    %197 = arith.mulf %193, %196 : vector<128x32xf32>
    %c2_161 = arith.constant 2 : index
    %c0_162 = arith.constant 0 : index
    %c0_163 = arith.constant 0 : index
    %198 = vector.load %arg4[%c2_161, %c0_162, %c0_163] : memref<5x1x32xf32, #tpu.memory_space<vmem>>, vector<1x1x32xf32>
    %199 = vector.shape_cast %198 : vector<1x1x32xf32> to vector<1x32xf32>
    %200 = vector.broadcast %199 : vector<1x32xf32> to vector<128x32xf32>
    %201 = arith.addf %197, %200 : vector<128x32xf32>
    %202 = arith.addf %201, %65 : vector<128x32xf32>
    %cst_164 = arith.constant 0.000000e+00 : f32
    %203 = vector.broadcast %cst_164 : f32 to vector<128x32xf32>
    %204 = arith.maximumf %202, %203 : vector<128x32xf32>
    %205 = vector.shape_cast %204 : vector<128x32xf32> to vector<2x8x8x32xf32>
    %c0_165 = arith.constant 0 : index
    %c1_166 = arith.constant 1 : index
    %c1_167 = arith.constant 1 : index
    %c0_168 = arith.constant 0 : index
    %206 = vector.load %arg17[%c0_165, %c1_166, %c1_167, %c0_168] : memref<2x10x10x32xf32, #tpu.memory_space<vmem>>, vector<2x8x8x32xf32>
    tpu.vector_store %arg17[%c0_165, %c1_166, %c1_167, %c0_168], %205 {strides = array<i32>} : memref<2x10x10x32xf32, #tpu.memory_space<vmem>>, vector<2x8x8x32xf32>,
    %c0_169 = arith.constant 0 : index
    %c0_170 = arith.constant 0 : index
    %c0_171 = arith.constant 0 : index
    %c0_172 = arith.constant 0 : index
    %207 = vector.load %arg17[%c0_169, %c0_170, %c0_171, %c0_172] : memref<2x10x10x32xf32, #tpu.memory_space<vmem>>, vector<2x10x10x32xf32>
    %cst_173 = arith.constant 0.000000e+00 : f32
    %208 = vector.broadcast %cst_173 : f32 to vector<128x32xf32>
    %209 = vector.extract_strided_slice %207 {offsets = [0, 0, 0, 0], sizes = [2, 8, 8, 32], strides = [1, 1, 1, 1]} : vector<2x10x10x32xf32> to vector<2x8x8x32xf32>
    %210 = vector.shape_cast %209 : vector<2x8x8x32xf32> to vector<128x32xf32>
    %c2_174 = arith.constant 2 : index
    %c0_175 = arith.constant 0 : index
    %c0_176 = arith.constant 0 : index
    %c0_177 = arith.constant 0 : index
    %211 = vector.load %arg2[%c2_174, %c0_175, %c0_176, %c0_177] : memref<4x9x32x32xf32, #tpu.memory_space<vmem>>, vector<1x1x32x32xf32>
    %212 = vector.shape_cast %211 : vector<1x1x32x32xf32> to vector<32x32xf32>
    %cst_178 = arith.constant dense<0.000000e+00> : vector<128x32xf32>
    %213 = tpu.matmul %210, %212, %cst_178 {dimension_numbers = #tpu.dot_dimension_numbers<[1], [0], [0], [1], [0, 0, 1, 1], [], []>} : vector<128x32xf32>, vector<32x32xf32>, vector<128x32xf32> -> vector<128x32xf32>
    %214 = arith.addf %208, %213 : vector<128x32xf32>
    %215 = vector.extract_strided_slice %207 {offsets = [0, 0, 1, 0], sizes = [2, 8, 8, 32], strides = [1, 1, 1, 1]} : vector<2x10x10x32xf32> to vector<2x8x8x32xf32>
    %216 = vector.shape_cast %215 : vector<2x8x8x32xf32> to vector<128x32xf32>
    %c2_179 = arith.constant 2 : index
    %c1_180 = arith.constant 1 : index
    %c0_181 = arith.constant 0 : index
    %c0_182 = arith.constant 0 : index
    %217 = vector.load %arg2[%c2_179, %c1_180, %c0_181, %c0_182] : memref<4x9x32x32xf32, #tpu.memory_space<vmem>>, vector<1x1x32x32xf32>
    %218 = vector.shape_cast %217 : vector<1x1x32x32xf32> to vector<32x32xf32>
    %cst_183 = arith.constant dense<0.000000e+00> : vector<128x32xf32>
    %219 = tpu.matmul %216, %218, %cst_183 {dimension_numbers = #tpu.dot_dimension_numbers<[1], [0], [0], [1], [0, 0, 1, 1], [], []>} : vector<128x32xf32>, vector<32x32xf32>, vector<128x32xf32> -> vector<128x32xf32>
    %220 = arith.addf %214, %219 : vector<128x32xf32>
    %221 = vector.extract_strided_slice %207 {offsets = [0, 0, 2, 0], sizes = [2, 8, 8, 32], strides = [1, 1, 1, 1]} : vector<2x10x10x32xf32> to vector<2x8x8x32xf32>
    %222 = vector.shape_cast %221 : vector<2x8x8x32xf32> to vector<128x32xf32>
    %c2_184 = arith.constant 2 : index
    %c2_185 = arith.constant 2 : index
    %c0_186 = arith.constant 0 : index
    %c0_187 = arith.constant 0 : index
    %223 = vector.load %arg2[%c2_184, %c2_185, %c0_186, %c0_187] : memref<4x9x32x32xf32, #tpu.memory_space<vmem>>, vector<1x1x32x32xf32>
    %224 = vector.shape_cast %223 : vector<1x1x32x32xf32> to vector<32x32xf32>
    %cst_188 = arith.constant dense<0.000000e+00> : vector<128x32xf32>
    %225 = tpu.matmul %222, %224, %cst_188 {dimension_numbers = #tpu.dot_dimension_numbers<[1], [0], [0], [1], [0, 0, 1, 1], [], []>} : vector<128x32xf32>, vector<32x32xf32>, vector<128x32xf32> -> vector<128x32xf32>
    %226 = arith.addf %220, %225 : vector<128x32xf32>
    %227 = vector.extract_strided_slice %207 {offsets = [0, 1, 0, 0], sizes = [2, 8, 8, 32], strides = [1, 1, 1, 1]} : vector<2x10x10x32xf32> to vector<2x8x8x32xf32>
    %228 = vector.shape_cast %227 : vector<2x8x8x32xf32> to vector<128x32xf32>
    %c2_189 = arith.constant 2 : index
    %c3_190 = arith.constant 3 : index
    %c0_191 = arith.constant 0 : index
    %c0_192 = arith.constant 0 : index
    %229 = vector.load %arg2[%c2_189, %c3_190, %c0_191, %c0_192] : memref<4x9x32x32xf32, #tpu.memory_space<vmem>>, vector<1x1x32x32xf32>
    %230 = vector.shape_cast %229 : vector<1x1x32x32xf32> to vector<32x32xf32>
    %cst_193 = arith.constant dense<0.000000e+00> : vector<128x32xf32>
    %231 = tpu.matmul %228, %230, %cst_193 {dimension_numbers = #tpu.dot_dimension_numbers<[1], [0], [0], [1], [0, 0, 1, 1], [], []>} : vector<128x32xf32>, vector<32x32xf32>, vector<128x32xf32> -> vector<128x32xf32>
    %232 = arith.addf %226, %231 : vector<128x32xf32>
    %233 = vector.extract_strided_slice %207 {offsets = [0, 1, 1, 0], sizes = [2, 8, 8, 32], strides = [1, 1, 1, 1]} : vector<2x10x10x32xf32> to vector<2x8x8x32xf32>
    %234 = vector.shape_cast %233 : vector<2x8x8x32xf32> to vector<128x32xf32>
    %c2_194 = arith.constant 2 : index
    %c4_195 = arith.constant 4 : index
    %c0_196 = arith.constant 0 : index
    %c0_197 = arith.constant 0 : index
    %235 = vector.load %arg2[%c2_194, %c4_195, %c0_196, %c0_197] : memref<4x9x32x32xf32, #tpu.memory_space<vmem>>, vector<1x1x32x32xf32>
    %236 = vector.shape_cast %235 : vector<1x1x32x32xf32> to vector<32x32xf32>
    %cst_198 = arith.constant dense<0.000000e+00> : vector<128x32xf32>
    %237 = tpu.matmul %234, %236, %cst_198 {dimension_numbers = #tpu.dot_dimension_numbers<[1], [0], [0], [1], [0, 0, 1, 1], [], []>} : vector<128x32xf32>, vector<32x32xf32>, vector<128x32xf32> -> vector<128x32xf32>
    %238 = arith.addf %232, %237 : vector<128x32xf32>
    %239 = vector.extract_strided_slice %207 {offsets = [0, 1, 2, 0], sizes = [2, 8, 8, 32], strides = [1, 1, 1, 1]} : vector<2x10x10x32xf32> to vector<2x8x8x32xf32>
    %240 = vector.shape_cast %239 : vector<2x8x8x32xf32> to vector<128x32xf32>
    %c2_199 = arith.constant 2 : index
    %c5_200 = arith.constant 5 : index
    %c0_201 = arith.constant 0 : index
    %c0_202 = arith.constant 0 : index
    %241 = vector.load %arg2[%c2_199, %c5_200, %c0_201, %c0_202] : memref<4x9x32x32xf32, #tpu.memory_space<vmem>>, vector<1x1x32x32xf32>
    %242 = vector.shape_cast %241 : vector<1x1x32x32xf32> to vector<32x32xf32>
    %cst_203 = arith.constant dense<0.000000e+00> : vector<128x32xf32>
    %243 = tpu.matmul %240, %242, %cst_203 {dimension_numbers = #tpu.dot_dimension_numbers<[1], [0], [0], [1], [0, 0, 1, 1], [], []>} : vector<128x32xf32>, vector<32x32xf32>, vector<128x32xf32> -> vector<128x32xf32>
    %244 = arith.addf %238, %243 : vector<128x32xf32>
    %245 = vector.extract_strided_slice %207 {offsets = [0, 2, 0, 0], sizes = [2, 8, 8, 32], strides = [1, 1, 1, 1]} : vector<2x10x10x32xf32> to vector<2x8x8x32xf32>
    %246 = vector.shape_cast %245 : vector<2x8x8x32xf32> to vector<128x32xf32>
    %c2_204 = arith.constant 2 : index
    %c6_205 = arith.constant 6 : index
    %c0_206 = arith.constant 0 : index
    %c0_207 = arith.constant 0 : index
    %247 = vector.load %arg2[%c2_204, %c6_205, %c0_206, %c0_207] : memref<4x9x32x32xf32, #tpu.memory_space<vmem>>, vector<1x1x32x32xf32>
    %248 = vector.shape_cast %247 : vector<1x1x32x32xf32> to vector<32x32xf32>
    %cst_208 = arith.constant dense<0.000000e+00> : vector<128x32xf32>
    %249 = tpu.matmul %246, %248, %cst_208 {dimension_numbers = #tpu.dot_dimension_numbers<[1], [0], [0], [1], [0, 0, 1, 1], [], []>} : vector<128x32xf32>, vector<32x32xf32>, vector<128x32xf32> -> vector<128x32xf32>
    %250 = arith.addf %244, %249 : vector<128x32xf32>
    %251 = vector.extract_strided_slice %207 {offsets = [0, 2, 1, 0], sizes = [2, 8, 8, 32], strides = [1, 1, 1, 1]} : vector<2x10x10x32xf32> to vector<2x8x8x32xf32>
    %252 = vector.shape_cast %251 : vector<2x8x8x32xf32> to vector<128x32xf32>
    %c2_209 = arith.constant 2 : index
    %c7_210 = arith.constant 7 : index
    %c0_211 = arith.constant 0 : index
    %c0_212 = arith.constant 0 : index
    %253 = vector.load %arg2[%c2_209, %c7_210, %c0_211, %c0_212] : memref<4x9x32x32xf32, #tpu.memory_space<vmem>>, vector<1x1x32x32xf32>
    %254 = vector.shape_cast %253 : vector<1x1x32x32xf32> to vector<32x32xf32>
    %cst_213 = arith.constant dense<0.000000e+00> : vector<128x32xf32>
    %255 = tpu.matmul %252, %254, %cst_213 {dimension_numbers = #tpu.dot_dimension_numbers<[1], [0], [0], [1], [0, 0, 1, 1], [], []>} : vector<128x32xf32>, vector<32x32xf32>, vector<128x32xf32> -> vector<128x32xf32>
    %256 = arith.addf %250, %255 : vector<128x32xf32>
    %257 = vector.extract_strided_slice %207 {offsets = [0, 2, 2, 0], sizes = [2, 8, 8, 32], strides = [1, 1, 1, 1]} : vector<2x10x10x32xf32> to vector<2x8x8x32xf32>
    %258 = vector.shape_cast %257 : vector<2x8x8x32xf32> to vector<128x32xf32>
    %c2_214 = arith.constant 2 : index
    %c8_215 = arith.constant 8 : index
    %c0_216 = arith.constant 0 : index
    %c0_217 = arith.constant 0 : index
    %259 = vector.load %arg2[%c2_214, %c8_215, %c0_216, %c0_217] : memref<4x9x32x32xf32, #tpu.memory_space<vmem>>, vector<1x1x32x32xf32>
    %260 = vector.shape_cast %259 : vector<1x1x32x32xf32> to vector<32x32xf32>
    %cst_218 = arith.constant dense<0.000000e+00> : vector<128x32xf32>
    %261 = tpu.matmul %258, %260, %cst_218 {dimension_numbers = #tpu.dot_dimension_numbers<[1], [0], [0], [1], [0, 0, 1, 1], [], []>} : vector<128x32xf32>, vector<32x32xf32>, vector<128x32xf32> -> vector<128x32xf32>
    %262 = arith.addf %256, %261 : vector<128x32xf32>
    %c3_219 = arith.constant 3 : index
    %c0_220 = arith.constant 0 : index
    %c0_221 = arith.constant 0 : index
    %263 = vector.load %arg3[%c3_219, %c0_220, %c0_221] : memref<5x1x32xf32, #tpu.memory_space<vmem>>, vector<1x1x32xf32>
    %264 = vector.shape_cast %263 : vector<1x1x32xf32> to vector<1x32xf32>
    %265 = vector.broadcast %264 : vector<1x32xf32> to vector<128x32xf32>
    %266 = arith.mulf %262, %265 : vector<128x32xf32>
    %c3_222 = arith.constant 3 : index
    %c0_223 = arith.constant 0 : index
    %c0_224 = arith.constant 0 : index
    %267 = vector.load %arg4[%c3_222, %c0_223, %c0_224] : memref<5x1x32xf32, #tpu.memory_space<vmem>>, vector<1x1x32xf32>
    %268 = vector.shape_cast %267 : vector<1x1x32xf32> to vector<1x32xf32>
    %269 = vector.broadcast %268 : vector<1x32xf32> to vector<128x32xf32>
    %270 = arith.addf %266, %269 : vector<128x32xf32>
    %cst_225 = arith.constant 0.000000e+00 : f32
    %271 = vector.broadcast %cst_225 : f32 to vector<128x32xf32>
    %272 = arith.maximumf %270, %271 : vector<128x32xf32>
    %273 = vector.shape_cast %272 : vector<128x32xf32> to vector<2x8x8x32xf32>
    %c0_226 = arith.constant 0 : index
    %c1_227 = arith.constant 1 : index
    %c1_228 = arith.constant 1 : index
    %c0_229 = arith.constant 0 : index
    %274 = vector.load %arg17[%c0_226, %c1_227, %c1_228, %c0_229] : memref<2x10x10x32xf32, #tpu.memory_space<vmem>>, vector<2x8x8x32xf32>
    tpu.vector_store %arg17[%c0_226, %c1_227, %c1_228, %c0_229], %273 {strides = array<i32>} : memref<2x10x10x32xf32, #tpu.memory_space<vmem>>, vector<2x8x8x32xf32>,
    %c0_230 = arith.constant 0 : index
    %c0_231 = arith.constant 0 : index
    %c0_232 = arith.constant 0 : index
    %c0_233 = arith.constant 0 : index
    %275 = vector.load %arg17[%c0_230, %c0_231, %c0_232, %c0_233] : memref<2x10x10x32xf32, #tpu.memory_space<vmem>>, vector<2x10x10x32xf32>
    %cst_234 = arith.constant 0.000000e+00 : f32
    %276 = vector.broadcast %cst_234 : f32 to vector<128x32xf32>
    %277 = vector.extract_strided_slice %275 {offsets = [0, 0, 0, 0], sizes = [2, 8, 8, 32], strides = [1, 1, 1, 1]} : vector<2x10x10x32xf32> to vector<2x8x8x32xf32>
    %278 = vector.shape_cast %277 : vector<2x8x8x32xf32> to vector<128x32xf32>
    %c3_235 = arith.constant 3 : index
    %c0_236 = arith.constant 0 : index
    %c0_237 = arith.constant 0 : index
    %c0_238 = arith.constant 0 : index
    %279 = vector.load %arg2[%c3_235, %c0_236, %c0_237, %c0_238] : memref<4x9x32x32xf32, #tpu.memory_space<vmem>>, vector<1x1x32x32xf32>
    %280 = vector.shape_cast %279 : vector<1x1x32x32xf32> to vector<32x32xf32>
    %cst_239 = arith.constant dense<0.000000e+00> : vector<128x32xf32>
    %281 = tpu.matmul %278, %280, %cst_239 {dimension_numbers = #tpu.dot_dimension_numbers<[1], [0], [0], [1], [0, 0, 1, 1], [], []>} : vector<128x32xf32>, vector<32x32xf32>, vector<128x32xf32> -> vector<128x32xf32>
    %282 = arith.addf %276, %281 : vector<128x32xf32>
    %283 = vector.extract_strided_slice %275 {offsets = [0, 0, 1, 0], sizes = [2, 8, 8, 32], strides = [1, 1, 1, 1]} : vector<2x10x10x32xf32> to vector<2x8x8x32xf32>
    %284 = vector.shape_cast %283 : vector<2x8x8x32xf32> to vector<128x32xf32>
    %c3_240 = arith.constant 3 : index
    %c1_241 = arith.constant 1 : index
    %c0_242 = arith.constant 0 : index
    %c0_243 = arith.constant 0 : index
    %285 = vector.load %arg2[%c3_240, %c1_241, %c0_242, %c0_243] : memref<4x9x32x32xf32, #tpu.memory_space<vmem>>, vector<1x1x32x32xf32>
    %286 = vector.shape_cast %285 : vector<1x1x32x32xf32> to vector<32x32xf32>
    %cst_244 = arith.constant dense<0.000000e+00> : vector<128x32xf32>
    %287 = tpu.matmul %284, %286, %cst_244 {dimension_numbers = #tpu.dot_dimension_numbers<[1], [0], [0], [1], [0, 0, 1, 1], [], []>} : vector<128x32xf32>, vector<32x32xf32>, vector<128x32xf32> -> vector<128x32xf32>
    %288 = arith.addf %282, %287 : vector<128x32xf32>
    %289 = vector.extract_strided_slice %275 {offsets = [0, 0, 2, 0], sizes = [2, 8, 8, 32], strides = [1, 1, 1, 1]} : vector<2x10x10x32xf32> to vector<2x8x8x32xf32>
    %290 = vector.shape_cast %289 : vector<2x8x8x32xf32> to vector<128x32xf32>
    %c3_245 = arith.constant 3 : index
    %c2_246 = arith.constant 2 : index
    %c0_247 = arith.constant 0 : index
    %c0_248 = arith.constant 0 : index
    %291 = vector.load %arg2[%c3_245, %c2_246, %c0_247, %c0_248] : memref<4x9x32x32xf32, #tpu.memory_space<vmem>>, vector<1x1x32x32xf32>
    %292 = vector.shape_cast %291 : vector<1x1x32x32xf32> to vector<32x32xf32>
    %cst_249 = arith.constant dense<0.000000e+00> : vector<128x32xf32>
    %293 = tpu.matmul %290, %292, %cst_249 {dimension_numbers = #tpu.dot_dimension_numbers<[1], [0], [0], [1], [0, 0, 1, 1], [], []>} : vector<128x32xf32>, vector<32x32xf32>, vector<128x32xf32> -> vector<128x32xf32>
    %294 = arith.addf %288, %293 : vector<128x32xf32>
    %295 = vector.extract_strided_slice %275 {offsets = [0, 1, 0, 0], sizes = [2, 8, 8, 32], strides = [1, 1, 1, 1]} : vector<2x10x10x32xf32> to vector<2x8x8x32xf32>
    %296 = vector.shape_cast %295 : vector<2x8x8x32xf32> to vector<128x32xf32>
    %c3_250 = arith.constant 3 : index
    %c3_251 = arith.constant 3 : index
    %c0_252 = arith.constant 0 : index
    %c0_253 = arith.constant 0 : index
    %297 = vector.load %arg2[%c3_250, %c3_251, %c0_252, %c0_253] : memref<4x9x32x32xf32, #tpu.memory_space<vmem>>, vector<1x1x32x32xf32>
    %298 = vector.shape_cast %297 : vector<1x1x32x32xf32> to vector<32x32xf32>
    %cst_254 = arith.constant dense<0.000000e+00> : vector<128x32xf32>
    %299 = tpu.matmul %296, %298, %cst_254 {dimension_numbers = #tpu.dot_dimension_numbers<[1], [0], [0], [1], [0, 0, 1, 1], [], []>} : vector<128x32xf32>, vector<32x32xf32>, vector<128x32xf32> -> vector<128x32xf32>
    %300 = arith.addf %294, %299 : vector<128x32xf32>
    %301 = vector.extract_strided_slice %275 {offsets = [0, 1, 1, 0], sizes = [2, 8, 8, 32], strides = [1, 1, 1, 1]} : vector<2x10x10x32xf32> to vector<2x8x8x32xf32>
    %302 = vector.shape_cast %301 : vector<2x8x8x32xf32> to vector<128x32xf32>
    %c3_255 = arith.constant 3 : index
    %c4_256 = arith.constant 4 : index
    %c0_257 = arith.constant 0 : index
    %c0_258 = arith.constant 0 : index
    %303 = vector.load %arg2[%c3_255, %c4_256, %c0_257, %c0_258] : memref<4x9x32x32xf32, #tpu.memory_space<vmem>>, vector<1x1x32x32xf32>
    %304 = vector.shape_cast %303 : vector<1x1x32x32xf32> to vector<32x32xf32>
    %cst_259 = arith.constant dense<0.000000e+00> : vector<128x32xf32>
    %305 = tpu.matmul %302, %304, %cst_259 {dimension_numbers = #tpu.dot_dimension_numbers<[1], [0], [0], [1], [0, 0, 1, 1], [], []>} : vector<128x32xf32>, vector<32x32xf32>, vector<128x32xf32> -> vector<128x32xf32>
    %306 = arith.addf %300, %305 : vector<128x32xf32>
    %307 = vector.extract_strided_slice %275 {offsets = [0, 1, 2, 0], sizes = [2, 8, 8, 32], strides = [1, 1, 1, 1]} : vector<2x10x10x32xf32> to vector<2x8x8x32xf32>
    %308 = vector.shape_cast %307 : vector<2x8x8x32xf32> to vector<128x32xf32>
    %c3_260 = arith.constant 3 : index
    %c5_261 = arith.constant 5 : index
    %c0_262 = arith.constant 0 : index
    %c0_263 = arith.constant 0 : index
    %309 = vector.load %arg2[%c3_260, %c5_261, %c0_262, %c0_263] : memref<4x9x32x32xf32, #tpu.memory_space<vmem>>, vector<1x1x32x32xf32>
    %310 = vector.shape_cast %309 : vector<1x1x32x32xf32> to vector<32x32xf32>
    %cst_264 = arith.constant dense<0.000000e+00> : vector<128x32xf32>
    %311 = tpu.matmul %308, %310, %cst_264 {dimension_numbers = #tpu.dot_dimension_numbers<[1], [0], [0], [1], [0, 0, 1, 1], [], []>} : vector<128x32xf32>, vector<32x32xf32>, vector<128x32xf32> -> vector<128x32xf32>
    %312 = arith.addf %306, %311 : vector<128x32xf32>
    %313 = vector.extract_strided_slice %275 {offsets = [0, 2, 0, 0], sizes = [2, 8, 8, 32], strides = [1, 1, 1, 1]} : vector<2x10x10x32xf32> to vector<2x8x8x32xf32>
    %314 = vector.shape_cast %313 : vector<2x8x8x32xf32> to vector<128x32xf32>
    %c3_265 = arith.constant 3 : index
    %c6_266 = arith.constant 6 : index
    %c0_267 = arith.constant 0 : index
    %c0_268 = arith.constant 0 : index
    %315 = vector.load %arg2[%c3_265, %c6_266, %c0_267, %c0_268] : memref<4x9x32x32xf32, #tpu.memory_space<vmem>>, vector<1x1x32x32xf32>
    %316 = vector.shape_cast %315 : vector<1x1x32x32xf32> to vector<32x32xf32>
    %cst_269 = arith.constant dense<0.000000e+00> : vector<128x32xf32>
    %317 = tpu.matmul %314, %316, %cst_269 {dimension_numbers = #tpu.dot_dimension_numbers<[1], [0], [0], [1], [0, 0, 1, 1], [], []>} : vector<128x32xf32>, vector<32x32xf32>, vector<128x32xf32> -> vector<128x32xf32>
    %318 = arith.addf %312, %317 : vector<128x32xf32>
    %319 = vector.extract_strided_slice %275 {offsets = [0, 2, 1, 0], sizes = [2, 8, 8, 32], strides = [1, 1, 1, 1]} : vector<2x10x10x32xf32> to vector<2x8x8x32xf32>
    %320 = vector.shape_cast %319 : vector<2x8x8x32xf32> to vector<128x32xf32>
    %c3_270 = arith.constant 3 : index
    %c7_271 = arith.constant 7 : index
    %c0_272 = arith.constant 0 : index
    %c0_273 = arith.constant 0 : index
    %321 = vector.load %arg2[%c3_270, %c7_271, %c0_272, %c0_273] : memref<4x9x32x32xf32, #tpu.memory_space<vmem>>, vector<1x1x32x32xf32>
    %322 = vector.shape_cast %321 : vector<1x1x32x32xf32> to vector<32x32xf32>
    %cst_274 = arith.constant dense<0.000000e+00> : vector<128x32xf32>
    %323 = tpu.matmul %320, %322, %cst_274 {dimension_numbers = #tpu.dot_dimension_numbers<[1], [0], [0], [1], [0, 0, 1, 1], [], []>} : vector<128x32xf32>, vector<32x32xf32>, vector<128x32xf32> -> vector<128x32xf32>
    %324 = arith.addf %318, %323 : vector<128x32xf32>
    %325 = vector.extract_strided_slice %275 {offsets = [0, 2, 2, 0], sizes = [2, 8, 8, 32], strides = [1, 1, 1, 1]} : vector<2x10x10x32xf32> to vector<2x8x8x32xf32>
    %326 = vector.shape_cast %325 : vector<2x8x8x32xf32> to vector<128x32xf32>
    %c3_275 = arith.constant 3 : index
    %c8_276 = arith.constant 8 : index
    %c0_277 = arith.constant 0 : index
    %c0_278 = arith.constant 0 : index
    %327 = vector.load %arg2[%c3_275, %c8_276, %c0_277, %c0_278] : memref<4x9x32x32xf32, #tpu.memory_space<vmem>>, vector<1x1x32x32xf32>
    %328 = vector.shape_cast %327 : vector<1x1x32x32xf32> to vector<32x32xf32>
    %cst_279 = arith.constant dense<0.000000e+00> : vector<128x32xf32>
    %329 = tpu.matmul %326, %328, %cst_279 {dimension_numbers = #tpu.dot_dimension_numbers<[1], [0], [0], [1], [0, 0, 1, 1], [], []>} : vector<128x32xf32>, vector<32x32xf32>, vector<128x32xf32> -> vector<128x32xf32>
    %330 = arith.addf %324, %329 : vector<128x32xf32>
    %c4_280 = arith.constant 4 : index
    %c0_281 = arith.constant 0 : index
    %c0_282 = arith.constant 0 : index
    %331 = vector.load %arg3[%c4_280, %c0_281, %c0_282] : memref<5x1x32xf32, #tpu.memory_space<vmem>>, vector<1x1x32xf32>
    %332 = vector.shape_cast %331 : vector<1x1x32xf32> to vector<1x32xf32>
    %333 = vector.broadcast %332 : vector<1x32xf32> to vector<128x32xf32>
    %334 = arith.mulf %330, %333 : vector<128x32xf32>
    %c4_283 = arith.constant 4 : index
    %c0_284 = arith.constant 0 : index
    %c0_285 = arith.constant 0 : index
    %335 = vector.load %arg4[%c4_283, %c0_284, %c0_285] : memref<5x1x32xf32, #tpu.memory_space<vmem>>, vector<1x1x32xf32>
    %336 = vector.shape_cast %335 : vector<1x1x32xf32> to vector<1x32xf32>
    %337 = vector.broadcast %336 : vector<1x32xf32> to vector<128x32xf32>
    %338 = arith.addf %334, %337 : vector<128x32xf32>
    %339 = arith.addf %338, %204 : vector<128x32xf32>
    %cst_286 = arith.constant 0.000000e+00 : f32
    %340 = vector.broadcast %cst_286 : f32 to vector<128x32xf32>
    %341 = arith.maximumf %339, %340 : vector<128x32xf32>
    %342 = vector.shape_cast %341 : vector<128x32xf32> to vector<2x64x32xf32>
    %c0_287 = arith.constant 0 : index
    %c0_288 = arith.constant 0 : index
    %343 = vector.load %arg6[%c0_287, %c0_288] : memref<2x4xf32, #tpu.memory_space<vmem>>, vector<2x4xf32>
    %cst_289 = arith.constant 0.000000e+00 : f32
    %344 = vector.broadcast %cst_289 : f32 to vector<2x64xf32>
    %c0_290 = arith.constant 0 : index
    %c0_291 = arith.constant 0 : index
    %345 = vector.load %arg8[%c0_290, %c0_291] : memref<1x64xf32, #tpu.memory_space<vmem>>, vector<1x64xf32>
    %346 = vector.broadcast %345 : vector<1x64xf32> to vector<2x64xf32>
    %347 = arith.addf %344, %346 : vector<2x64xf32>
    %c0_292 = arith.constant 0 : index
    %c0_293 = arith.constant 0 : index
    %c0_294 = arith.constant 0 : index
    %348 = vector.load %arg5[%c0_292, %c0_293, %c0_294] : memref<4x1x32xf32, #tpu.memory_space<vmem>>, vector<1x1x32xf32>
    %349 = vector.shape_cast %348 : vector<1x1x32xf32> to vector<1x32xf32>
    %350 = vector.shape_cast %349 : vector<1x32xf32> to vector<1x1x32xf32>
    %351 = vector.broadcast %350 : vector<1x1x32xf32> to vector<2x64x32xf32>
    %352 = arith.mulf %342, %351 : vector<2x64x32xf32>
    %cst_295 = arith.constant dense<0.000000e+00> : vector<2x64xf32>
    %353 = vector.multi_reduction <add>, %352, %cst_295 [2] : vector<2x64x32xf32> to vector<2x64xf32>
    %354 = vector.extract_strided_slice %343 {offsets = [0, 0], sizes = [1, 1], strides = [1, 1]} : vector<2x4xf32> to vector<1x1xf32>
    %355 = vector.broadcast %354 : vector<1x1xf32> to vector<2x64xf32>
    %356 = arith.mulf %353, %355 : vector<2x64xf32>
    %357 = vector.extract_strided_slice %343 {offsets = [1, 0], sizes = [1, 1], strides = [1, 1]} : vector<2x4xf32> to vector<1x1xf32>
    %358 = vector.broadcast %357 : vector<1x1xf32> to vector<2x64xf32>
    %359 = arith.addf %356, %358 : vector<2x64xf32>
    %cst_296 = arith.constant 0.000000e+00 : f32
    %360 = vector.broadcast %cst_296 : f32 to vector<2x64xf32>
    %361 = arith.maximumf %359, %360 : vector<2x64xf32>
    %c0_297 = arith.constant 0 : index
    %c0_298 = arith.constant 0 : index
    %c0_299 = arith.constant 0 : index
    %362 = vector.load %arg7[%c0_297, %c0_298, %c0_299] : memref<4x64x64xf32, #tpu.memory_space<vmem>>, vector<1x64x64xf32>
    %363 = vector.shape_cast %362 : vector<1x64x64xf32> to vector<64x64xf32>
    %cst_300 = arith.constant dense<0.000000e+00> : vector<2x64xf32>
    %364 = tpu.matmul %361, %363, %cst_300 {dimension_numbers = #tpu.dot_dimension_numbers<[1], [0], [0], [1], [0, 0, 1, 1], [], []>} : vector<2x64xf32>, vector<64x64xf32>, vector<2x64xf32> -> vector<2x64xf32>
    %365 = arith.addf %347, %364 : vector<2x64xf32>
    %c1_301 = arith.constant 1 : index
    %c0_302 = arith.constant 0 : index
    %c0_303 = arith.constant 0 : index
    %366 = vector.load %arg5[%c1_301, %c0_302, %c0_303] : memref<4x1x32xf32, #tpu.memory_space<vmem>>, vector<1x1x32xf32>
    %367 = vector.shape_cast %366 : vector<1x1x32xf32> to vector<1x32xf32>
    %368 = vector.shape_cast %367 : vector<1x32xf32> to vector<1x1x32xf32>
    %369 = vector.broadcast %368 : vector<1x1x32xf32> to vector<2x64x32xf32>
    %370 = arith.mulf %342, %369 : vector<2x64x32xf32>
    %cst_304 = arith.constant dense<0.000000e+00> : vector<2x64xf32>
    %371 = vector.multi_reduction <add>, %370, %cst_304 [2] : vector<2x64x32xf32> to vector<2x64xf32>
    %372 = vector.extract_strided_slice %343 {offsets = [0, 1], sizes = [1, 1], strides = [1, 1]} : vector<2x4xf32> to vector<1x1xf32>
    %373 = vector.broadcast %372 : vector<1x1xf32> to vector<2x64xf32>
    %374 = arith.mulf %371, %373 : vector<2x64xf32>
    %375 = vector.extract_strided_slice %343 {offsets = [1, 1], sizes = [1, 1], strides = [1, 1]} : vector<2x4xf32> to vector<1x1xf32>
    %376 = vector.broadcast %375 : vector<1x1xf32> to vector<2x64xf32>
    %377 = arith.addf %374, %376 : vector<2x64xf32>
    %cst_305 = arith.constant 0.000000e+00 : f32
    %378 = vector.broadcast %cst_305 : f32 to vector<2x64xf32>
    %379 = arith.maximumf %377, %378 : vector<2x64xf32>
    %c1_306 = arith.constant 1 : index
    %c0_307 = arith.constant 0 : index
    %c0_308 = arith.constant 0 : index
    %380 = vector.load %arg7[%c1_306, %c0_307, %c0_308] : memref<4x64x64xf32, #tpu.memory_space<vmem>>, vector<1x64x64xf32>
    %381 = vector.shape_cast %380 : vector<1x64x64xf32> to vector<64x64xf32>
    %cst_309 = arith.constant dense<0.000000e+00> : vector<2x64xf32>
    %382 = tpu.matmul %379, %381, %cst_309 {dimension_numbers = #tpu.dot_dimension_numbers<[1], [0], [0], [1], [0, 0, 1, 1], [], []>} : vector<2x64xf32>, vector<64x64xf32>, vector<2x64xf32> -> vector<2x64xf32>
    %383 = arith.addf %365, %382 : vector<2x64xf32>
    %c2_310 = arith.constant 2 : index
    %c0_311 = arith.constant 0 : index
    %c0_312 = arith.constant 0 : index
    %384 = vector.load %arg5[%c2_310, %c0_311, %c0_312] : memref<4x1x32xf32, #tpu.memory_space<vmem>>, vector<1x1x32xf32>
    %385 = vector.shape_cast %384 : vector<1x1x32xf32> to vector<1x32xf32>
    %386 = vector.shape_cast %385 : vector<1x32xf32> to vector<1x1x32xf32>
    %387 = vector.broadcast %386 : vector<1x1x32xf32> to vector<2x64x32xf32>
    %388 = arith.mulf %342, %387 : vector<2x64x32xf32>
    %cst_313 = arith.constant dense<0.000000e+00> : vector<2x64xf32>
    %389 = vector.multi_reduction <add>, %388, %cst_313 [2] : vector<2x64x32xf32> to vector<2x64xf32>
    %390 = vector.extract_strided_slice %343 {offsets = [0, 2], sizes = [1, 1], strides = [1, 1]} : vector<2x4xf32> to vector<1x1xf32>
    %391 = vector.broadcast %390 : vector<1x1xf32> to vector<2x64xf32>
    %392 = arith.mulf %389, %391 : vector<2x64xf32>
    %393 = vector.extract_strided_slice %343 {offsets = [1, 2], sizes = [1, 1], strides = [1, 1]} : vector<2x4xf32> to vector<1x1xf32>
    %394 = vector.broadcast %393 : vector<1x1xf32> to vector<2x64xf32>
    %395 = arith.addf %392, %394 : vector<2x64xf32>
    %cst_314 = arith.constant 0.000000e+00 : f32
    %396 = vector.broadcast %cst_314 : f32 to vector<2x64xf32>
    %397 = arith.maximumf %395, %396 : vector<2x64xf32>
    %c2_315 = arith.constant 2 : index
    %c0_316 = arith.constant 0 : index
    %c0_317 = arith.constant 0 : index
    %398 = vector.load %arg7[%c2_315, %c0_316, %c0_317] : memref<4x64x64xf32, #tpu.memory_space<vmem>>, vector<1x64x64xf32>
    %399 = vector.shape_cast %398 : vector<1x64x64xf32> to vector<64x64xf32>
    %cst_318 = arith.constant dense<0.000000e+00> : vector<2x64xf32>
    %400 = tpu.matmul %397, %399, %cst_318 {dimension_numbers = #tpu.dot_dimension_numbers<[1], [0], [0], [1], [0, 0, 1, 1], [], []>} : vector<2x64xf32>, vector<64x64xf32>, vector<2x64xf32> -> vector<2x64xf32>
    %401 = arith.addf %383, %400 : vector<2x64xf32>
    %c3_319 = arith.constant 3 : index
    %c0_320 = arith.constant 0 : index
    %c0_321 = arith.constant 0 : index
    %402 = vector.load %arg5[%c3_319, %c0_320, %c0_321] : memref<4x1x32xf32, #tpu.memory_space<vmem>>, vector<1x1x32xf32>
    %403 = vector.shape_cast %402 : vector<1x1x32xf32> to vector<1x32xf32>
    %404 = vector.shape_cast %403 : vector<1x32xf32> to vector<1x1x32xf32>
    %405 = vector.broadcast %404 : vector<1x1x32xf32> to vector<2x64x32xf32>
    %406 = arith.mulf %342, %405 : vector<2x64x32xf32>
    %cst_322 = arith.constant dense<0.000000e+00> : vector<2x64xf32>
    %407 = vector.multi_reduction <add>, %406, %cst_322 [2] : vector<2x64x32xf32> to vector<2x64xf32>
    %408 = vector.extract_strided_slice %343 {offsets = [0, 3], sizes = [1, 1], strides = [1, 1]} : vector<2x4xf32> to vector<1x1xf32>
    %409 = vector.broadcast %408 : vector<1x1xf32> to vector<2x64xf32>
    %410 = arith.mulf %407, %409 : vector<2x64xf32>
    %411 = vector.extract_strided_slice %343 {offsets = [1, 3], sizes = [1, 1], strides = [1, 1]} : vector<2x4xf32> to vector<1x1xf32>
    %412 = vector.broadcast %411 : vector<1x1xf32> to vector<2x64xf32>
    %413 = arith.addf %410, %412 : vector<2x64xf32>
    %cst_323 = arith.constant 0.000000e+00 : f32
    %414 = vector.broadcast %cst_323 : f32 to vector<2x64xf32>
    %415 = arith.maximumf %413, %414 : vector<2x64xf32>
    %c3_324 = arith.constant 3 : index
    %c0_325 = arith.constant 0 : index
    %c0_326 = arith.constant 0 : index
    %416 = vector.load %arg7[%c3_324, %c0_325, %c0_326] : memref<4x64x64xf32, #tpu.memory_space<vmem>>, vector<1x64x64xf32>
    %417 = vector.shape_cast %416 : vector<1x64x64xf32> to vector<64x64xf32>
    %cst_327 = arith.constant dense<0.000000e+00> : vector<2x64xf32>
    %418 = tpu.matmul %415, %417, %cst_327 {dimension_numbers = #tpu.dot_dimension_numbers<[1], [0], [0], [1], [0, 0, 1, 1], [], []>} : vector<2x64xf32>, vector<64x64xf32>, vector<2x64xf32> -> vector<2x64xf32>
    %419 = arith.addf %401, %418 : vector<2x64xf32>
    %cst_328 = arith.constant dense<0xFF800000> : vector<2xf32>
    %420 = vector.multi_reduction <maximumf>, %419, %cst_328 [1] : vector<2x64xf32> to vector<2xf32>
    %421 = vector.shape_cast %420 : vector<2xf32> to vector<2x1xf32>
    %422 = vector.broadcast %421 : vector<2x1xf32> to vector<2x64xf32>
    %423 = arith.subf %419, %422 : vector<2x64xf32>
    %424 = math.exp %423 : vector<2x64xf32>
    %cst_329 = arith.constant dense<0.000000e+00> : vector<2xf32>
    %425 = vector.multi_reduction <add>, %424, %cst_329 [1] : vector<2x64xf32> to vector<2xf32>
    %426 = vector.shape_cast %425 : vector<2xf32> to vector<2x1xf32>
    %427 = tpu.reciprocal %426 {approx = true} : vector<2x1xf32> -> vector<2x1xf32>
    %428 = vector.broadcast %427 : vector<2x1xf32> to vector<2x64xf32>
    %429 = arith.mulf %424, %428 : vector<2x64xf32>
    %c0_330 = arith.constant 0 : index
    %c0_331 = arith.constant 0 : index
    %430 = vector.load %arg15[%c0_330, %c0_331] : memref<2x64xf32, #tpu.memory_space<vmem>>, vector<2x64xf32>
    tpu.vector_store %arg15[%c0_330, %c0_331], %429 {strides = array<i32>} : memref<2x64xf32, #tpu.memory_space<vmem>>, vector<2x64xf32>,
    %c0_332 = arith.constant 0 : index
    %c0_333 = arith.constant 0 : index
    %431 = vector.load %arg10[%c0_332, %c0_333] : memref<2x2xf32, #tpu.memory_space<vmem>>, vector<2x2xf32>
    %cst_334 = arith.constant 0.000000e+00 : f32
    %432 = vector.broadcast %cst_334 : f32 to vector<2x64xf32>
    %c0_335 = arith.constant 0 : index
    %c0_336 = arith.constant 0 : index
    %433 = vector.load %arg12[%c0_335, %c0_336] : memref<1x64xf32, #tpu.memory_space<vmem>>, vector<1x64xf32>
    %434 = vector.broadcast %433 : vector<1x64xf32> to vector<2x64xf32>
    %435 = arith.addf %432, %434 : vector<2x64xf32>
    %c0_337 = arith.constant 0 : index
    %c0_338 = arith.constant 0 : index
    %c0_339 = arith.constant 0 : index
    %436 = vector.load %arg9[%c0_337, %c0_338, %c0_339] : memref<2x1x32xf32, #tpu.memory_space<vmem>>, vector<1x1x32xf32>
    %437 = vector.shape_cast %436 : vector<1x1x32xf32> to vector<1x32xf32>
    %438 = vector.shape_cast %437 : vector<1x32xf32> to vector<1x1x32xf32>
    %439 = vector.broadcast %438 : vector<1x1x32xf32> to vector<2x64x32xf32>
    %440 = arith.mulf %342, %439 : vector<2x64x32xf32>
    %cst_340 = arith.constant dense<0.000000e+00> : vector<2x64xf32>
    %441 = vector.multi_reduction <add>, %440, %cst_340 [2] : vector<2x64x32xf32> to vector<2x64xf32>
    %442 = vector.extract_strided_slice %431 {offsets = [0, 0], sizes = [1, 1], strides = [1, 1]} : vector<2x2xf32> to vector<1x1xf32>
    %443 = vector.broadcast %442 : vector<1x1xf32> to vector<2x64xf32>
    %444 = arith.mulf %441, %443 : vector<2x64xf32>
    %445 = vector.extract_strided_slice %431 {offsets = [1, 0], sizes = [1, 1], strides = [1, 1]} : vector<2x2xf32> to vector<1x1xf32>
    %446 = vector.broadcast %445 : vector<1x1xf32> to vector<2x64xf32>
    %447 = arith.addf %444, %446 : vector<2x64xf32>
    %cst_341 = arith.constant 0.000000e+00 : f32
    %448 = vector.broadcast %cst_341 : f32 to vector<2x64xf32>
    %449 = arith.maximumf %447, %448 : vector<2x64xf32>
    %c0_342 = arith.constant 0 : index
    %c0_343 = arith.constant 0 : index
    %c0_344 = arith.constant 0 : index
    %450 = vector.load %arg11[%c0_342, %c0_343, %c0_344] : memref<2x64x64xf32, #tpu.memory_space<vmem>>, vector<1x64x64xf32>
    %451 = vector.shape_cast %450 : vector<1x64x64xf32> to vector<64x64xf32>
    %cst_345 = arith.constant dense<0.000000e+00> : vector<2x64xf32>
    %452 = tpu.matmul %449, %451, %cst_345 {dimension_numbers = #tpu.dot_dimension_numbers<[1], [0], [0], [1], [0, 0, 1, 1], [], []>} : vector<2x64xf32>, vector<64x64xf32>, vector<2x64xf32> -> vector<2x64xf32>
    %453 = arith.addf %435, %452 : vector<2x64xf32>
    %c1_346 = arith.constant 1 : index
    %c0_347 = arith.constant 0 : index
    %c0_348 = arith.constant 0 : index
    %454 = vector.load %arg9[%c1_346, %c0_347, %c0_348] : memref<2x1x32xf32, #tpu.memory_space<vmem>>, vector<1x1x32xf32>
    %455 = vector.shape_cast %454 : vector<1x1x32xf32> to vector<1x32xf32>
    %456 = vector.shape_cast %455 : vector<1x32xf32> to vector<1x1x32xf32>
    %457 = vector.broadcast %456 : vector<1x1x32xf32> to vector<2x64x32xf32>
    %458 = arith.mulf %342, %457 : vector<2x64x32xf32>
    %cst_349 = arith.constant dense<0.000000e+00> : vector<2x64xf32>
    %459 = vector.multi_reduction <add>, %458, %cst_349 [2] : vector<2x64x32xf32> to vector<2x64xf32>
    %460 = vector.extract_strided_slice %431 {offsets = [0, 1], sizes = [1, 1], strides = [1, 1]} : vector<2x2xf32> to vector<1x1xf32>
    %461 = vector.broadcast %460 : vector<1x1xf32> to vector<2x64xf32>
    %462 = arith.mulf %459, %461 : vector<2x64xf32>
    %463 = vector.extract_strided_slice %431 {offsets = [1, 1], sizes = [1, 1], strides = [1, 1]} : vector<2x2xf32> to vector<1x1xf32>
    %464 = vector.broadcast %463 : vector<1x1xf32> to vector<2x64xf32>
    %465 = arith.addf %462, %464 : vector<2x64xf32>
    %cst_350 = arith.constant 0.000000e+00 : f32
    %466 = vector.broadcast %cst_350 : f32 to vector<2x64xf32>
    %467 = arith.maximumf %465, %466 : vector<2x64xf32>
    %c1_351 = arith.constant 1 : index
    %c0_352 = arith.constant 0 : index
    %c0_353 = arith.constant 0 : index
    %468 = vector.load %arg11[%c1_351, %c0_352, %c0_353] : memref<2x64x64xf32, #tpu.memory_space<vmem>>, vector<1x64x64xf32>
    %469 = vector.shape_cast %468 : vector<1x64x64xf32> to vector<64x64xf32>
    %cst_354 = arith.constant dense<0.000000e+00> : vector<2x64xf32>
    %470 = tpu.matmul %467, %469, %cst_354 {dimension_numbers = #tpu.dot_dimension_numbers<[1], [0], [0], [1], [0, 0, 1, 1], [], []>} : vector<2x64xf32>, vector<64x64xf32>, vector<2x64xf32> -> vector<2x64xf32>
    %471 = arith.addf %453, %470 : vector<2x64xf32>
    %cst_355 = arith.constant 0.000000e+00 : f32
    %472 = vector.broadcast %cst_355 : f32 to vector<2x64xf32>
    %473 = arith.maximumf %471, %472 : vector<2x64xf32>
    %c0_356 = arith.constant 0 : index
    %c0_357 = arith.constant 0 : index
    %474 = vector.load %arg13[%c0_356, %c0_357] : memref<1x64xf32, #tpu.memory_space<vmem>>, vector<1x64xf32>
    %475 = vector.broadcast %474 : vector<1x64xf32> to vector<2x64xf32>
    %476 = arith.mulf %473, %475 : vector<2x64xf32>
    %cst_358 = arith.constant dense<0.000000e+00> : vector<2xf32>
    %477 = vector.multi_reduction <add>, %476, %cst_358 [1] : vector<2x64xf32> to vector<2xf32>
    %478 = vector.shape_cast %477 : vector<2xf32> to vector<2x1xf32>
    %c0_359 = arith.constant 0 : index
    %c0_360 = arith.constant 0 : index
    %479 = vector.load %arg14[%c0_359, %c0_360] : memref<1x1xf32, #tpu.memory_space<vmem>>, vector<1x1xf32>
    %480 = vector.broadcast %479 : vector<1x1xf32> to vector<2x1xf32>
    %481 = arith.addf %478, %480 : vector<2x1xf32>
    %482 = math.tanh %481 : vector<2x1xf32>
    %c0_361 = arith.constant 0 : index
    %c0_362 = arith.constant 0 : index
    %483 = vector.load %arg16[%c0_361, %c0_362] : memref<2x1xf32, #tpu.memory_space<vmem>>, vector<2x1xf32>
    tpu.vector_store %arg16[%c0_361, %c0_362], %482 {strides = array<i32>} : memref<2x1xf32, #tpu.memory_space<vmem>>, vector<2x1xf32>,
    return
  }
}

</mosaic_0001>

<bundles_post_ra>
// kernel: alpha_zero_forward.1
= control target key start
LH: loop header
LB: loop body
LE: loop exit
PB: predicated region body
PF: predicated region fallthrough
CT: control target
= control target key end

     0   :  { %s21166_s0 = inlined_call_operand.vmem [shape: f32[2,10,10,4], index: 0, kind: input, shape index: {}]   ;;  %s21167_s1 = inlined_call_operand.vmem [shape: f32[9,4,32], index: 1, kind: input, shape index: {}]   ;;  %s21168_s2 = inlined_call_operand.vmem [shape: f32[4,9,32,32], index: 2, kind: input, shape index: {}]   ;;  %s21169_s3 = inlined_call_operand.vmem [shape: f32[5,1,32], index: 3, kind: input, shape index: {}]   ;;  %s21170_s4 = inlined_call_operand.vmem [shape: f32[5,1,32], index: 4, kind: input, shape index: {}]   ;;  %s21171_s5 = inlined_call_operand.vmem [shape: f32[4,1,32], index: 5, kind: input, shape index: {}]   ;;  %s21172_s6 = inlined_call_operand.vmem [shape: f32[2,4], index: 6, kind: input, shape index: {}]   ;;  %s21173_s7 = inlined_call_operand.vmem [shape: f32[4,64,64], index: 7, kind: input, shape index: {}]   ;;  %s21174_s8 = inlined_call_operand.vmem [shape: f32[1,64], index: 8, kind: input, shape index: {}]   ;;  %s21175_s9 = inlined_call_operand.vmem [shape: f32[2,1,32], index: 9, kind: input, shape index: {}]   ;;  %s21176_s10 = inlined_call_operand.vmem [shape: f32[2,2], index: 10, kind: input, shape index: {}]   ;;  %s21177_s11 = inlined_call_operand.vmem [shape: f32[2,64,64], index: 11, kind: input, shape index: {}]   ;;  %s21178_s12 = inlined_call_operand.vmem [shape: f32[1,64], index: 12, kind: input, shape index: {}]   ;;  %s21179_s13 = inlined_call_operand.vmem [shape: f32[1,64], index: 13, kind: input, shape index: {}]   ;;  %s21180_s14 = inlined_call_operand.<no memory space> [shape: f32[1,1], index: 14, kind: input, shape index: {}]   ;;  %s21181_s15 = inlined_call_operand.hbm [shape: f32[2,64], index: 15, kind: output, shape index: {0}]   ;;  %s21182_s16 = inlined_call_operand.vmem [shape: f32[2,1], index: 16, kind: output, shape index: {1}]  }
   0x1   :  { %21264 = sst [smem:[#allocation19_spill]] %s21166_s0  ;;  %v22_v0 = vstv %s21180_s14 }
   0x2   :  { %23 = vst [vmem:[#allocation3] sm:$0x1] %v22_v0 }
   0x3   :  { %vm212_vm0 = vcmask 1043456   ;;  %v11401_v1 = vld [vmem:[%s21167_s1 + $0xc] sm:$0xf]  ;;  %s21265_s27 = sld [smem:[#allocation19_spill]]  ;;  %vm179_vm1 = vcmask 31744   ;;  %vm128_vm2 = vcmask 1046528  }
   0x4   :  { %13300 = vmatprep.subr.msk.mxu0 %vm212_vm0, %v11401_v1  ;;  %v11419_v4 = vld [vmem:[%s21167_s1 + $0x10] sm:$0xf]  ;;  %v11348_v8 = vld [vmem:[%s21167_s1 + $0x4] sm:$0xf]  ;;  %v15980_v20 = vld [vmem:[%s21167_s1 + $0x14] sm:$0xf] }
   0x5   :  { %13301 = vmatpush3.msk.msra.mxu0 %vm212_vm0, %v11401_v1  ;;  %13222 = vmatprep.subr.msk.mxu1 %vm212_vm0, %v11348_v8  ;;  %v95_v49 = vld [vmem:[%s21167_s1] sm:$0xf]  ;;  %v16097_v53 = vld [vmem:[%s21167_s1 + $0x8] sm:$0xf] }
   0x6   :  { %13326 = vmatprep.subr.msk.mxu0 %vm212_vm0, %v11419_v4  ;;  %13223 = vmatpush3.msk.msra.mxu1 %vm212_vm0, %v11348_v8 }
   0x7   :  { %13248 = vmatprep.subr.msk.mxu1 %vm212_vm0, %v95_v49 }
   0x9   :  { %v15898_v2 = vld [vmem:[%s21265_s27 + $0x10] sm:$0xff]  ;;  %v15903_v3 = vld [vmem:[%s21265_s27 + $0x20] sm:$0xff]  ;;  %v15949_v12 = vld [vmem:[%s21265_s27 + $0x8] sm:$0x3] }
   0xa   :  { %13302 = vmatprep.mubr.msk.f32.mxu0 %vm179_vm1, %v15898_v2  ;;  %v15915_v5 = vld [vmem:[%s21265_s27 + $0x30] sm:$0xff]  ;;  %v15926_v6 = vld [vmem:[%s21265_s27 + $0x40] sm:$0xff]  ;;  %v132_v9 = vrot.slane %v15898_v2, 1  ;;  %v135_v10 = vrot.slane %v15903_v3, 1  ;;  %v130_v16 = vrot.slane %v15949_v12, 1 }
   0xb   :  { %13303 = vmatmul.mubr.msk.f32.vlgmr.msra.gmra.mrb[0].mxu0 %vm179_vm1, %v15903_v3  ;;  %v15931_v7 = vld [vmem:[%s21265_s27 + $0x50] sm:$0xff]  ;;  %v15944_v11 = vld [vmem:[%s21265_s27] sm:$0xff]  ;;  %v15969_v17 = vld [vmem:[%s21265_s27 + $0x18] sm:$0x3]  ;;  %v138_v21 = vrot.slane %v15915_v5, 1  ;;  %v141_v31 = vrot.slane %v15926_v6, 1 }
   0xc   :  { %13327 = vmatpush3.msk.msra.mxu0 %vm212_vm0, %v11419_v4  ;;  %13305 = vmatprep.mubr.msk.f32.mxu0 %vm179_vm1, %v15915_v5  ;;  %v15956_v13 = vld [vmem:[%s21265_s27 + $0x60] sm:$0xff]  ;;  %v15961_v14 = vld [vmem:[%s21265_s27 + $0x70] sm:$0xff]  ;;  %v129_v15 = vrot.slane %v15944_v11, 1  ;;  %v133_v18 = vrot.slane %v15969_v17, 1  ;;  %v15975_v19 = vld [vmem:[%s21265_s27 + $0x28] sm:$0x3] }
   0xd   :  { %v136_v23 = vrot.slane %v15975_v19, 1  ;;  %13352 = vmatprep.subr.msk.mxu0 %vm212_vm0, %v15980_v20  ;;  %v15990_v24 = vld [vmem:[%s21265_s27 + $0x38] sm:$0x3]  ;;  %v15995_v25 = vld [vmem:[%s21265_s27 + $0x48] sm:$0x3]  ;;  %v16014_v29 = vld [vmem:[%s21265_s27 + $0x80] sm:$0xff] }
   0xe   :  { %v131_v22 = vsel %vm128_vm2, %v129_v15, %v130_v16  ;;  %v16001_v26 = vsel %vm128_vm2, %v132_v9, %v133_v18  ;;  %v139_v27 = vrot.slane %v15990_v24, 1  ;;  %v16007_v28 = vld [vmem:[%s21265_s27 + $0x58] sm:$0x3]  ;;  %v142_v32 = vrot.slane %v15995_v25, 1  ;;  %v16026_v33 = vld [vmem:[%s21265_s27 + $0xb0] sm:$0xff]  ;;  %v16050_v39 = vld [vmem:[%s21265_s27 + $0xa0] sm:$0xff] }
   0xf   :  { %13306 = vmatmul.mubr.msk.f32.gmra.mrb[2].mxu0 %vm179_vm1, %v15926_v6  ;;  %13224 = vmatprep.mubr.msk.f32.mxu1 %vm179_vm1, %v131_v22  ;;  %v16019_v30 = vsel %vm128_vm2, %v135_v10, %v136_v23  ;;  %v144_v35 = vrot.slane %v15931_v7, 1  ;;  %v145_v36 = vrot.slane %v16007_v28, 1  ;;  %v16038_v37 = vld [vmem:[%s21265_s27 + $0x68] sm:$0x3]  ;;  %v16043_v38 = vld [vmem:[%s21265_s27 + $0x78] sm:$0x3] }
  0x10   :  { %13308 = vmatprep.mubr.msk.f32.mxu0 %vm179_vm1, %v15931_v7  ;;  %13225 = vmatmul.mubr.msk.f32.vlgmr.msra.gmra.mrb[0].mxu1 %vm179_vm1, %v16001_v26  ;;  %v16031_v34 = vsel %vm128_vm2, %v138_v21, %v139_v27  ;;  %v16055_v40 = vld [vmem:[%s21265_s27 + $0xa8] sm:$0x3]  ;;  %v16062_v41 = vld [vmem:[%s21265_s27 + $0xc0] sm:$0xff]  ;;  %v16067_v42 = vsel %vm128_vm2, %v141_v31, %v142_v32  ;;  %v147_v43 = vrot.slane %v15956_v13, 1  ;;  %v148_v44 = vrot.slane %v16038_v37, 1  ;;  %v16074_v45 = vld [vmem:[%s21265_s27 + $0xd0] sm:$0xff] }
  0x11   :  { %13227 = vmatprep.mubr.msk.f32.mxu1 %vm179_vm1, %v16019_v30  ;;  %v16079_v46 = vsel %vm128_vm2, %v144_v35, %v145_v36  ;;  %v150_v47 = vrot.slane %v15961_v14, 1  ;;  %v151_v48 = vrot.slane %v16043_v38, 1  ;;  %v153_v50 = vrot.slane %v16050_v39, 1  ;;  %v16091_v52 = vld [vmem:[%s21265_s27 + $0xb8] sm:$0x3]  ;;  %13249 = vmatpush3.msk.msra.mxu1 %vm212_vm0, %v95_v49  ;;  %v16108_v55 = vld [vmem:[%s21265_s27 + $0xe0] sm:$0xff] }
  0x12   :  { %v154_v51 = vrot.slane %v16055_v40, 1  ;;  %v156_v54 = vrot.slane %v16026_v33, 1  ;;  %v16113_v56 = vsel %vm128_vm2, %v147_v43, %v148_v44  ;;  %v16118_v57 = vld [vmem:[%s21265_s27 + $0xf0] sm:$0xff]  ;;  %v157_v59 = vrot.slane %v16091_v52, 1  ;;  %v16129_v60 = vld [vmem:[%s21265_s27 + $0xc8] sm:$0x3]  ;;  %13274 = vmatprep.subr.msk.mxu1 %vm212_vm0, %v16097_v53 }
  0x13   :  { %13309 = vmatmul.mubr.msk.f32.gmra.mrb[4].mxu0 %vm179_vm1, %v15956_v13  ;;  %v16123_v58 = vsel %vm128_vm2, %v150_v47, %v151_v48 }
  0x14   :  { %13311 = vmatprep.mubr.msk.f32.mxu0 %vm179_vm1, %v15961_v14  ;;  %13228 = vmatmul.mubr.msk.f32.gmra.mrb[2].mxu1 %vm179_vm1, %v16031_v34 }
  0x15   :  { %13230 = vmatprep.mubr.msk.f32.mxu1 %vm179_vm1, %v16067_v42 }
  0x17   :  { %13312 = vmatmul.mubr.msk.f32.gmra.mrb[6].mxu0 %vm179_vm1, %v16014_v29 }
  0x18   :  { %13314 = vmatprep.mubr.msk.f32.mxu0 %vm179_vm1, %v16026_v33  ;;  %13231 = vmatmul.mubr.msk.f32.gmra.mrb[4].mxu1 %vm179_vm1, %v16079_v46 }
  0x19   :  { %13233 = vmatprep.mubr.msk.f32.mxu1 %vm179_vm1, %v16113_v56 }
  0x1b   :  { %13315 = vmatmul.mubr.msk.f32.gmra.mrb[8].mxu0 %vm179_vm1, %v16062_v41 }
  0x1c   :  { %13317 = vmatprep.mubr.msk.f32.mxu0 %vm179_vm1, %v16074_v45 }
  0x1d   :  { %24 = vsyncpa [#allocation5], 0  ;;  %v155_v61 = vsel %vm128_vm2, %v153_v50, %v154_v51  ;;  %v16137_v62 = vld [vmem:[%s21265_s27 + $0xd8] sm:$0x3]  ;;  %v16146_v63 = vld [vmem:[%s21265_s27 + $0x100] sm:$0xff]  ;;  %13234 = vmatmul.mubr.msk.f32.gmra.mrb[6].mxu1 %vm179_vm1, %v16123_v58  ;;  %v159_v0 = vrot.slane %v16062_v41, 1  ;;  %v158_v8 = vsel %vm128_vm2, %v156_v54, %v157_v59 }
  0x1e   :  { %v160_v1 = vrot.slane %v16129_v60, 1  ;;  %v16155_v4 = vld [vmem:[%s21265_s27 + $0x110] sm:$0xff]  ;;  %13236 = vmatprep.mubr.msk.f32.mxu1 %vm179_vm1, %v155_v61  ;;  %v162_v9 = vrot.slane %v16074_v45, 1  ;;  %v163_v10 = vrot.slane %v16137_v62, 1  ;;  %v16164_v15 = vld [vmem:[%s21265_s27 + $0xe8] sm:$0x3] }
  0x1f   :  { %13318 = vmatmul.mubr.msk.f32.gmra.mrb[10].mxu0 %vm179_vm1, %v16108_v55  ;;  %v16171_v16 = vld [vmem:[%s21265_s27 + $0xf8] sm:$0x3]  ;;  %v16178_v18 = vld [vmem:[%s21265_s27 + $0x120] sm:$0xff]  ;;  %v165_v22 = vrot.slane %v16108_v55, 1  ;;  %v166_v23 = vrot.slane %v16164_v15, 1  ;;  %v168_v31 = vrot.slane %v16118_v57, 1 }
  0x20   :  { %13320 = vmatprep.mubr.msk.f32.mxu0 %vm179_vm1, %v16118_v57  ;;  %v16182_v21 = vsel %vm128_vm2, %v159_v0, %v160_v1  ;;  %v16189_v27 = vsel %vm128_vm2, %v162_v9, %v163_v10  ;;  %v169_v32 = vrot.slane %v16171_v16, 1  ;;  %v16196_v35 = vld [vmem:[%s21265_s27 + $0x108] sm:$0x3]  ;;  %v16203_v36 = vld [vmem:[%s21265_s27 + $0x118] sm:$0x3]  ;;  %v566_v43 = vrot.slane %v16050_v39, 2 }
  0x21   :  { %13237 = vmatmul.mubr.msk.f32.gmra.mrb[8].mxu1 %vm179_vm1, %v158_v8  ;;  %v567_v44 = vrot.slane %v16055_v40, 2  ;;  %v16212_v47 = vsel %vm128_vm2, %v165_v22, %v166_v23  ;;  %vm541_vm3 = vcmask 1045504   ;;  %v171_v48 = vrot.slane %v16146_v63, 1  ;;  %v16229_v54 = vld [vmem:[%s21167_s1 + $0x18] sm:$0xf]  ;;  %s15798_s30 = smov 126  }
  0x22   :  { %13239 = vmatprep.mubr.msk.f32.mxu1 %vm179_vm1, %v16182_v21  ;;  %v172_v49 = vrot.slane %v16196_v35, 1  ;;  %v16222_v40 = vsel %vm128_vm2, %v168_v31, %v169_v32  ;;  %v175_v51 = vrot.slane %v16203_v36, 1  ;;  %v16240_v59 = vld [vmem:[%s21265_s27 + $0x88] sm:$0x3]  ;;  %v962_v0 = vrot.slane %v16014_v29, 1  ;;  %s15799_s0 = smov 127  }
  0x23   :  { %13321 = vmatmul.mubr.msk.f32.gmra.mrb[12].mxu0 %vm179_vm1, %v16146_v63  ;;  %v16219_v50 = vsel %vm541_vm3, %v566_v43, %v567_v44  ;;  %v963_v1 = vrot.slane %v16240_v59, 1  ;;  %v545_v22 = vrot.slane %v15898_v2, 2  ;;  %v546_v23 = vrot.slane %v15969_v17, 2 }
  0x24   :  { %13323 = vmatprep.mubr.msk.f32.mxu0 %vm179_vm1, %v16155_v4  ;;  %v16245_v61 = vsel %vm128_vm2, %v171_v48, %v172_v49  ;;  %v548_v31 = vrot.slane %v15903_v3, 2  ;;  %v551_v43 = vrot.slane %v15915_v5, 2  ;;  %v552_v44 = vrot.slane %v15990_v24, 2 }
  0x25   :  { %13240 = vmatmul.mubr.msk.f32.gmra.mrb[10].mxu1 %vm179_vm1, %v16189_v27  ;;  %v16269_v9 = vsel %vm128_vm2, %v962_v0, %v963_v1  ;;  %v547_v17 = vsel %vm541_vm3, %v545_v22, %v546_v23  ;;  %v555_v48 = vrot.slane %v15995_v25, 2  ;;  %v557_v49 = vrot.slane %v15931_v7, 2 }
  0x26   :  { %13242 = vmatprep.mubr.msk.f32.mxu1 %vm179_vm1, %v16212_v47  ;;  %v16334_v24 = vsel %vm541_vm3, %v551_v43, %v552_v44  ;;  %v543_v25 = vrot.slane %v15949_v12, 2  ;;  %v542_v0 = vrot.slane %v15944_v11, 2  ;;  %v560_v1 = vrot.slane %v15956_v13, 2 }
  0x27   :  { %13324 = vmatmul.mubr.msk.f32.gmra.mrb[14].mxu0 %vm179_vm1, %v16178_v18  ;;  %v1139_v22 = vrot.slane %v16240_v59, 2  ;;  %v569_v23 = vrot.slane %v16026_v33, 2  ;;  %v573_v43 = vrot.slane %v16129_v60, 2  ;;  %v575_v44 = vrot.slane %v16074_v45, 2 }
  0x28   :  { %13328 = vmatprep.mubr.msk.f32.mxu0 %vm179_vm1, %v16001_v26  ;;  %v174_v26 = vrot.slane %v16155_v4, 1  ;;  %v578_v60 = vrot.slane %v16108_v55, 2  ;;  %vm1902_vm4 = vcmask 261120   ;;  %vm1904_vm5 = vcmask 254976  }
  0x29   :  { %13243 = vmatmul.mubr.msk.f32.gmra.mrb[12].mxu1 %vm179_vm1, %v16222_v40  ;;  %vm15802_vm6 = vmmov 0   ;;  %vm9595_vm7 = vcmask 130112   ;;  %vm9602_vm8 = vcmask 195712   ;;  %vm9609_vm9 = vcmask 261312  }
  0x2a   :  { %13245 = vmatprep.mubr.msk.f32.mxu1 %vm179_vm1, %v16245_v61  ;;  %vm9616_vm10 = vcmask 326912   ;;  %vm9623_vm11 = vcmask 392512   ;;  %vm9630_vm12 = vcmask 458112   ;;  %vm9637_vm13 = vcmask 523712  }
  0x2b   :  { %13329 = vmatmul.mubr.msk.f32.vlgmr.msra.gmra.mrb[0].mxu0 %vm179_vm1, %v16019_v30  ;;  %vm9678_vm14 = vcmask 1041409   ;;  %vm9680_vm15 = vcmask 523264  }
  0x2c   :  { %13353 = vmatpush3.msk.msra.mxu0 %vm212_vm0, %v15980_v20  ;;  %13331 = vmatprep.mubr.msk.f32.mxu0 %vm179_vm1, %v16031_v34  ;;  %v16252_v20 = vsel %vm128_vm2, %v174_v26, %v175_v51  ;;  %v558_v26 = vrot.slane %v16007_v28, 2  ;;  %v16345_v51 = vld [vmem:[%s21167_s1 + $0x1c] sm:$0xf] }
  0x2d   :  { %13378 = vmatprep.subr.msk.mxu0 %vm212_vm0, %v16229_v54  ;;  %13246 = vmatmul.mubr.msk.f32.gmra.mrb[14].mxu1 %vm179_vm1, %v16252_v20 }
  0x2e   :  { %13250 = vmatprep.mubr.msk.f32.mxu1 %vm179_vm1, %v15944_v11  ;;  %v16361_v12 = vsel %vm541_vm3, %v557_v49, %v558_v26  ;;  %v564_v11 = vrot.slane %v16043_v38, 2  ;;  %v579_v49 = vrot.slane %v16164_v15, 2 }
  0x2f   :  { %13332 = vmatmul.mubr.msk.f32.gmra.mrb[2].mxu0 %vm179_vm1, %v16067_v42 }
  0x30   :  { %13334 = vmatprep.mubr.msk.f32.mxu0 %vm179_vm1, %v16079_v46  ;;  %v16426_v15 = vsel %vm541_vm3, %v578_v60, %v579_v49  ;;  %v16718_v49 = vld [vmem:[%s21169_s3] ss:$0 sm:$0xff] }
  0x31   :  { %13251 = vmatmul.mubr.msk.f32.vlgmr.msra.gmra.mrb[0].mxu1 %vm179_vm1, %v15898_v2  ;;  %v549_v2 = vrot.slane %v15975_v19, 2  ;;  %v554_v19 = vrot.slane %v15926_v6, 2 }
  0x32   :  { %13253 = vmatprep.mubr.msk.f32.mxu1 %vm179_vm1, %v15903_v3  ;;  %13275 = vmatpush3.msk.msra.mxu1 %vm212_vm0, %v16097_v53  ;;  %v16291_v53 = vld [vmem:[%s21265_s27 + $0x128] sm:$0x3] }
  0x33   :  { %13335 = vmatmul.mubr.msk.f32.gmra.mrb[4].mxu0 %vm179_vm1, %v16113_v56  ;;  %v966_v10 = vrot.slane %v16291_v53, 1  ;;  %v16356_v28 = vsel %vm541_vm3, %v554_v19, %v555_v48  ;;  %v576_v19 = vrot.slane %v16137_v62, 2  ;;  %v581_v62 = vrot.slane %v16118_v57, 2 }
  0x34   :  { %13337 = vmatprep.mubr.msk.f32.mxu0 %vm179_vm1, %v16123_v58 }
  0x35   :  { %13254 = vmatmul.mubr.msk.f32.gmra.mrb[2].mxu1 %vm179_vm1, %v15915_v5  ;;  %v16413_v26 = vsel %vm541_vm3, %v575_v44, %v576_v19 }
  0x36   :  { %13256 = vmatprep.mubr.msk.f32.mxu1 %vm179_vm1, %v15926_v6 }
  0x37   :  { %13338 = vmatmul.mubr.msk.f32.gmra.mrb[6].mxu0 %vm179_vm1, %v16269_v9 }
  0x38   :  { %13340 = vmatprep.mubr.msk.f32.mxu0 %vm179_vm1, %v158_v8  ;;  %v965_v8 = vrot.slane %v16178_v18, 1 }
  0x39   :  { %13257 = vmatmul.mubr.msk.f32.gmra.mrb[4].mxu1 %vm179_vm1, %v15931_v7 }
  0x3a   :  { %13259 = vmatprep.mubr.msk.f32.mxu1 %vm179_vm1, %v15956_v13  ;;  %v16315_v32 = vsel %vm128_vm2, %v965_v8, %v966_v10  ;;  %v561_v8 = vrot.slane %v16038_v37, 2  ;;  %v563_v10 = vrot.slane %v15961_v14, 2  ;;  %v544_v37 = vsel %vm541_vm3, %v542_v0, %v543_v25 }
  0x3b   :  { %13341 = vmatmul.mubr.msk.f32.gmra.mrb[8].mxu0 %vm179_vm1, %v16182_v21  ;;  %v584_v25 = vrot.slane %v16146_v63, 2  ;;  %v585_v0 = vrot.slane %v16196_v35, 2 }
  0x3c   :  { %13343 = vmatprep.mubr.msk.f32.mxu0 %vm179_vm1, %v16189_v27  ;;  %v16378_v38 = vsel %vm541_vm3, %v560_v1, %v561_v8  ;;  %v587_v1 = vrot.slane %v16155_v4, 2  ;;  %v588_v8 = vrot.slane %v16203_v36, 2 }
  0x3d   :  { %13260 = vmatmul.mubr.msk.f32.gmra.mrb[6].mxu1 %vm179_vm1, %v15961_v14  ;;  %v16445_v35 = vsel %vm541_vm3, %v584_v25, %v585_v0 }
  0x3e   :  { %13262 = vmatprep.mubr.msk.f32.mxu1 %vm179_vm1, %v16050_v39  ;;  %v16329_v39 = vsel %vm541_vm3, %v548_v31, %v549_v2  ;;  %v16383_v31 = vsel %vm541_vm3, %v563_v10, %v564_v11  ;;  %v570_v2 = vrot.slane %v16091_v52, 2  ;;  %v1141_v10 = vrot.slane %v16178_v18, 2 }
  0x3f   :  { %13344 = vmatmul.mubr.msk.f32.gmra.mrb[10].mxu0 %vm179_vm1, %v16212_v47  ;;  %v1142_v11 = vrot.slane %v16291_v53, 2  ;;  %v16449_v36 = vsel %vm541_vm3, %v587_v1, %v588_v8 }
  0x40   :  { %13346 = vmatprep.mubr.msk.f32.mxu0 %vm179_vm1, %v16222_v40  ;;  %v571_v52 = vsel %vm541_vm3, %v569_v23, %v570_v2 }
  0x41   :  { %13263 = vmatmul.mubr.msk.f32.gmra.mrb[8].mxu1 %vm179_vm1, %v16026_v33  ;;  %v572_v33 = vrot.slane %v16062_v41, 2 }
  0x42   :  { %13265 = vmatprep.mubr.msk.f32.mxu1 %vm179_vm1, %v16062_v41 }
  0x43   :  { %13347 = vmatmul.mubr.msk.f32.gmra.mrb[12].mxu0 %vm179_vm1, %v16245_v61  ;;  %v16408_v48 = vsel %vm541_vm3, %v572_v33, %v573_v43 }
  0x44   :  { %13349 = vmatprep.mubr.msk.f32.mxu0 %vm179_vm1, %v16252_v20 }
  0x45   :  { %13266 = vmatmul.mubr.msk.f32.gmra.mrb[10].mxu1 %vm179_vm1, %v16074_v45 }
  0x46   :  { %13268 = vmatprep.mubr.msk.f32.mxu1 %vm179_vm1, %v16108_v55 }
  0x47   :  { %13350 = vmatmul.mubr.msk.f32.gmra.mrb[14].mxu0 %vm179_vm1, %v16315_v32 }
  0x48   :  { %13354 = vmatprep.mubr.msk.f32.mxu0 %vm179_vm1, %v547_v17 }
  0x49   :  { %13269 = vmatmul.mubr.msk.f32.gmra.mrb[12].mxu1 %vm179_vm1, %v16118_v57 }
  0x4a   :  { %13271 = vmatprep.mubr.msk.f32.mxu1 %vm179_vm1, %v16146_v63 }
  0x4b   :  { %13355 = vmatmul.mubr.msk.f32.vlgmr.msra.gmra.mrb[0].mxu0 %vm179_vm1, %v16329_v39 }
  0x4c   :  { %13379 = vmatpush3.msk.msra.mxu0 %vm212_vm0, %v16229_v54  ;;  %13357 = vmatprep.mubr.msk.f32.mxu0 %vm179_vm1, %v16334_v24  ;;  %v1138_v54 = vrot.slane %v16014_v29, 2 }
  0x4d   :  { %13404 = vmatprep.subr.msk.mxu0 %vm212_vm0, %v16345_v51  ;;  %13272 = vmatmul.mubr.msk.f32.gmra.mrb[14].mxu1 %vm179_vm1, %v16155_v4 }
  0x4e   :  { %13276 = vmatprep.mubr.msk.f32.mxu1 %vm179_vm1, %v544_v37  ;;  %v16394_v59 = vsel %vm541_vm3, %v1138_v54, %v1139_v22  ;;  %v16460_v37 = vsel %vm541_vm3, %v1141_v10, %v1142_v11 }
  0x4f   :  { %13358 = vmatmul.mubr.msk.f32.gmra.mrb[2].mxu0 %vm179_vm1, %v16356_v28 }
  0x50   :  { %13360 = vmatprep.mubr.msk.f32.mxu0 %vm179_vm1, %v16361_v12 }
  0x51   :  { %13277 = vmatmul.mubr.msk.f32.vlgmr.msra.gmra.mrb[0].mxu1 %vm179_vm1, %v547_v17  ;;  %v582_v17 = vrot.slane %v16171_v16, 2 }
  0x52   :  { %13279 = vmatprep.mubr.msk.f32.mxu1 %vm179_vm1, %v16329_v39 }
  0x53   :  { %13361 = vmatmul.mubr.msk.f32.gmra.mrb[4].mxu0 %vm179_vm1, %v16378_v38  ;;  %v16431_v16 = vsel %vm541_vm3, %v581_v62, %v582_v17  ;;  %v16723_v17 = vld [vmem:[%s21170_s4] ss:$0 sm:$0xff] }
  0x54   :  { %13363 = vmatprep.mubr.msk.f32.mxu0 %vm179_vm1, %v16383_v31 }
  0x55   :  { %13280 = vmatmul.mubr.msk.f32.gmra.mrb[2].mxu1 %vm179_vm1, %v16334_v24 }
  0x56   :  { %13282 = vmatprep.mubr.msk.f32.mxu1 %vm179_vm1, %v16356_v28 }
  0x57   :  { %13364 = vmatmul.mubr.msk.f32.gmra.mrb[6].mxu0 %vm179_vm1, %v16394_v59 }
  0x58   :  { %13366 = vmatprep.mubr.msk.f32.mxu0 %vm179_vm1, %v571_v52 }
  0x59   :  { %13283 = vmatmul.mubr.msk.f32.gmra.mrb[4].mxu1 %vm179_vm1, %v16361_v12 }
  0x5a   :  { %13285 = vmatprep.mubr.msk.f32.mxu1 %vm179_vm1, %v16378_v38 }
  0x5b   :  { %13367 = vmatmul.mubr.msk.f32.gmra.mrb[8].mxu0 %vm179_vm1, %v16408_v48 }
  0x5c   :  { %13369 = vmatprep.mubr.msk.f32.mxu0 %vm179_vm1, %v16413_v26 }
  0x5d   :  { %13286 = vmatmul.mubr.msk.f32.gmra.mrb[6].mxu1 %vm179_vm1, %v16383_v31 }
  0x5e   :  { %13288 = vmatprep.mubr.msk.f32.mxu1 %vm179_vm1, %v16219_v50  ;;  %v11491_v50 = vld [vmem:[%s21167_s1 + $0x20] sm:$0xf] }
  0x5f   :  { %13370 = vmatmul.mubr.msk.f32.gmra.mrb[10].mxu0 %vm179_vm1, %v16426_v15 }
  0x60   :  { %13372 = vmatprep.mubr.msk.f32.mxu0 %vm179_vm1, %v16431_v16 }
  0x61   :  { %13289 = vmatmul.mubr.msk.f32.gmra.mrb[8].mxu1 %vm179_vm1, %v571_v52 }
  0x62   :  { %13291 = vmatprep.mubr.msk.f32.mxu1 %vm179_vm1, %v16408_v48 }
  0x63   :  { %13373 = vmatmul.mubr.msk.f32.gmra.mrb[12].mxu0 %vm179_vm1, %v16445_v35 }
  0x64   :  { %13375 = vmatprep.mubr.msk.f32.mxu0 %vm179_vm1, %v16449_v36 }
  0x65   :  { %13292 = vmatmul.mubr.msk.f32.gmra.mrb[10].mxu1 %vm179_vm1, %v16413_v26 }
  0x66   :  { %13294 = vmatprep.mubr.msk.f32.mxu1 %vm179_vm1, %v16426_v15 }
  0x67   :  { %13376 = vmatmul.mubr.msk.f32.gmra.mrb[14].mxu0 %vm179_vm1, %v16460_v37 }
  0x68   :  { %13380 = vmatprep.mubr.msk.f32.mxu0 %vm179_vm1, %v15903_v3  ;;  %v73_v3 = vld [vmem:[%s21265_s27 + $0x90] sm:$0xff] }
  0x69   :  { %13295 = vmatmul.mubr.msk.f32.gmra.mrb[12].mxu1 %vm179_vm1, %v16431_v16 }
  0x6a   :  { %13297 = vmatprep.mubr.msk.f32.mxu1 %vm179_vm1, %v16445_v35 }
  0x6b   :  { %13381 = vmatmul.mubr.msk.f32.vlgmr.msra.gmra.mrb[0].mxu0 %vm179_vm1, %v15915_v5  ;;  %v93_v5 = vld [vmem:[%s21265_s27 + $0x130] sm:$0xff] }
  0x6c   :  { %13405 = vmatpush3.msk.msra.mxu0 %vm212_vm0, %v16345_v51  ;;  %13383 = vmatprep.mubr.msk.f32.mxu0 %vm179_vm1, %v15926_v6  ;;  %v74_v6 = vld [vmem:[%s21265_s27 + $0x98] sm:$0x3] }
  0x6d   :  { %13430 = vmatprep.subr.msk.mxu0 %vm212_vm0, %v11491_v50  ;;  %13298 = vmatmul.mubr.msk.f32.gmra.mrb[14].mxu1 %vm179_vm1, %v16449_v36 }
  0x6f   :  { %13384 = vmatmul.mubr.msk.f32.gmra.mrb[2].mxu0 %vm179_vm1, %v15931_v7  ;;  %v1488_v7 = vrot.slane %v73_v3, 1 }
  0x70   :  { %13386 = vmatprep.mubr.msk.f32.mxu0 %vm179_vm1, %v15956_v13  ;;  %v1489_v13 = vrot.slane %v74_v6, 1 }
  0x73   :  { %13387 = vmatmul.mubr.msk.f32.gmra.mrb[4].mxu0 %vm179_vm1, %v15961_v14  ;;  %v1490_v14 = vsel %vm128_vm2, %v1488_v7, %v1489_v13 }
  0x74   :  { %13389 = vmatprep.mubr.msk.f32.mxu0 %vm179_vm1, %v16014_v29  ;;  %v94_v29 = vld [vmem:[%s21265_s27 + $0x138] sm:$0x3] }
  0x77   :  { %13390 = vmatmul.mubr.msk.f32.gmra.mrb[6].mxu0 %vm179_vm1, %v73_v3 }
  0x78   :  { %13392 = vmatprep.mubr.msk.f32.mxu0 %vm179_vm1, %v16062_v41 }
  0x7b   :  { %13393 = vmatmul.mubr.msk.f32.gmra.mrb[8].mxu0 %vm179_vm1, %v16074_v45  ;;  %v1665_v45 = vrot.slane %v74_v6, 2 }
  0x7c   :  { %13395 = vmatprep.mubr.msk.f32.mxu0 %vm179_vm1, %v16108_v55  ;;  %v1667_v55 = vrot.slane %v93_v5, 2 }
  0x7f   :  { %13396 = vmatmul.mubr.msk.f32.gmra.mrb[10].mxu0 %vm179_vm1, %v16118_v57 }
  0x80   :  { %13398 = vmatprep.mubr.msk.f32.mxu0 %vm179_vm1, %v16146_v63  ;;  %v11512_v63 = vld [vmem:[%s21168_s2 + $0x28] sm:$0xff] }
  0x83   :  { %13399 = vmatmul.mubr.msk.f32.gmra.mrb[12].mxu0 %vm179_vm1, %v16155_v4 }
  0x84   :  { %13401 = vmatprep.mubr.msk.f32.mxu0 %vm179_vm1, %v16178_v18  ;;  %v21184_v18 = vmov 0.0  }
  0x85   :  { %1908 = vst.msk [vmem:[#allocation2 + $0x20] sm:$0xff] %vm1902_vm4, %v21184_v18  ;;  %1903 = vst.msk [vmem:[#allocation2] sm:$0xff] %vm1902_vm4, %v21184_v18 }
  0x86   :  { %1909 = vst.msk [vmem:[#allocation2 + $0x28] sm:$0x3] %vm1904_vm5, %v21184_v18  ;;  %1905 = vst.msk [vmem:[#allocation2 + $0x8] sm:$0x3] %vm1904_vm5, %v21184_v18 }
  0x87   :  { %13402 = vmatmul.mubr.msk.f32.gmra.mrb[14].mxu0 %vm179_vm1, %v93_v5  ;;  %1906 = vst.msk [vmem:[#allocation2 + $0x10] sm:$0xff] %vm1902_vm4, %v21184_v18  ;;  %1910 = vst.msk [vmem:[#allocation2 + $0x30] sm:$0xff] %vm1902_vm4, %v21184_v18 }
  0x88   :  { %13406 = vmatprep.mubr.msk.f32.mxu0 %vm179_vm1, %v16019_v30  ;;  %v1491_v30 = vrot.slane %v93_v5, 1  ;;  %1907 = vst.msk [vmem:[#allocation2 + $0x18] sm:$0x3] %vm1904_vm5, %v21184_v18  ;;  %1911 = vst.msk [vmem:[#allocation2 + $0x38] sm:$0x3] %vm1904_vm5, %v21184_v18 }
  0x89   :  { %1912 = vst.msk [vmem:[#allocation2 + $0x40] sm:$0xff] %vm1902_vm4, %v21184_v18  ;;  %1914 = vst.msk [vmem:[#allocation2 + $0x50] sm:$0xff] %vm1902_vm4, %v21184_v18 }
  0x8a   :  { %1913 = vst.msk [vmem:[#allocation2 + $0x48] sm:$0x3] %vm1904_vm5, %v21184_v18  ;;  %1915 = vst.msk [vmem:[#allocation2 + $0x58] sm:$0x3] %vm1904_vm5, %v21184_v18 }
  0x8b   :  { %13407 = vmatmul.mubr.msk.f32.vlgmr.msra.gmra.mrb[0].mxu0 %vm179_vm1, %v16031_v34  ;;  %v1492_v34 = vrot.slane %v94_v29, 1  ;;  %1916 = vst.msk [vmem:[#allocation2 + $0x60] sm:$0xff] %vm1902_vm4, %v21184_v18  ;;  %1918 = vst.msk [vmem:[#allocation2 + $0x70] sm:$0xff] %vm1902_vm4, %v21184_v18 }
  0x8c   :  { %13431 = vmatpush3.msk.msra.mxu0 %vm212_vm0, %v11491_v50  ;;  %13409 = vmatprep.mubr.msk.f32.mxu0 %vm179_vm1, %v16067_v42  ;;  %v1664_v42 = vrot.slane %v73_v3, 2  ;;  %1917 = vst.msk [vmem:[#allocation2 + $0x68] sm:$0x3] %vm1904_vm5, %v21184_v18  ;;  %1919 = vst.msk [vmem:[#allocation2 + $0x78] sm:$0x3] %vm1904_vm5, %v21184_v18  ;;  %vm10675_vm0 = vcmask 517120  }
  0x8d   :  { %v1493_v41 = vsel %vm128_vm2, %v1491_v30, %v1492_v34  ;;  %1920 = vst.msk [vmem:[#allocation2 + $0x80] sm:$0xff] %vm1902_vm4, %v21184_v18  ;;  %1922 = vst.msk [vmem:[#allocation2 + $0x90] sm:$0xff] %vm1902_vm4, %v21184_v18 }
  0x8e   :  { %1921 = vst.msk [vmem:[#allocation2 + $0x88] sm:$0x3] %vm1904_vm5, %v21184_v18  ;;  %1923 = vst.msk [vmem:[#allocation2 + $0x98] sm:$0x3] %vm1904_vm5, %v21184_v18 }
  0x8f   :  { %13410 = vmatmul.mubr.msk.f32.gmra.mrb[2].mxu0 %vm179_vm1, %v16079_v46  ;;  %v1666_v46 = vsel %vm541_vm3, %v1664_v42, %v1665_v45  ;;  %1924 = vst.msk [vmem:[#allocation2 + $0xa0] sm:$0xff] %vm1902_vm4, %v21184_v18  ;;  %1926 = vst.msk [vmem:[#allocation2 + $0xb0] sm:$0xff] %vm1902_vm4, %v21184_v18 }
  0x90   :  { %13412 = vmatprep.mubr.msk.f32.mxu0 %vm179_vm1, %v16113_v56  ;;  %v1668_v56 = vrot.slane %v94_v29, 2  ;;  %1925 = vst.msk [vmem:[#allocation2 + $0xa8] sm:$0x3] %vm1904_vm5, %v21184_v18  ;;  %1927 = vst.msk [vmem:[#allocation2 + $0xb8] sm:$0x3] %vm1904_vm5, %v21184_v18 }
  0x91   :  { %1928 = vst.msk [vmem:[#allocation2 + $0xc0] sm:$0xff] %vm1902_vm4, %v21184_v18  ;;  %1930 = vst.msk [vmem:[#allocation2 + $0xd0] sm:$0xff] %vm1902_vm4, %v21184_v18 }
  0x92   :  { %v1669_v57 = vsel %vm541_vm3, %v1667_v55, %v1668_v56  ;;  %1929 = vst.msk [vmem:[#allocation2 + $0xc8] sm:$0x3] %vm1904_vm5, %v21184_v18  ;;  %1931 = vst.msk [vmem:[#allocation2 + $0xd8] sm:$0x3] %vm1904_vm5, %v21184_v18 }
  0x93   :  { %13413 = vmatmul.mubr.msk.f32.gmra.mrb[4].mxu0 %vm179_vm1, %v16123_v58  ;;  %v11511_v58 = vld [vmem:[%s21168_s2 + $0x20] sm:$0xff]  ;;  %1932 = vst.msk [vmem:[#allocation2 + $0xe0] sm:$0xff] %vm1902_vm4, %v21184_v18  ;;  %1934 = vst.msk [vmem:[#allocation2 + $0xf0] sm:$0xff] %vm1902_vm4, %v21184_v18 }
  0x94   :  { %13415 = vmatprep.mubr.msk.f32.mxu0 %vm179_vm1, %v16269_v9  ;;  %v14722_v4 = vpack.c.bf16 %v11512_v63, %v11511_v58  ;;  %1933 = vst.msk [vmem:[#allocation2 + $0xe8] sm:$0x3] %vm1904_vm5, %v21184_v18  ;;  %1935 = vst.msk [vmem:[#allocation2 + $0xf8] sm:$0x3] %vm1904_vm5, %v21184_v18 }
  0x95   :  { %1936 = vst.msk [vmem:[#allocation2 + $0x100] sm:$0xff] %vm1902_vm4, %v21184_v18  ;;  %1938 = vst.msk [vmem:[#allocation2 + $0x110] sm:$0xff] %vm1902_vm4, %v21184_v18 }
  0x96   :  { %14723 = vmatprep.subr.bf16.mxu1 %v14722_v4  ;;  %1937 = vst.msk [vmem:[#allocation2 + $0x108] sm:$0x3] %vm1904_vm5, %v21184_v18  ;;  %1939 = vst.msk [vmem:[#allocation2 + $0x118] sm:$0x3] %vm1904_vm5, %v21184_v18 }
  0x97   :  { %13416 = vmatmul.mubr.msk.f32.gmra.mrb[6].mxu0 %vm179_vm1, %v1490_v14  ;;  %14725 = vmatpush3.bf16.msra.mxu1 %v14722_v4  ;;  %1940 = vst.msk [vmem:[#allocation2 + $0x120] sm:$0xff] %vm1902_vm4, %v21184_v18  ;;  %1942 = vst.msk [vmem:[#allocation2 + $0x130] sm:$0xff] %vm1902_vm4, %v21184_v18 }
  0x98   :  { %13418 = vmatprep.mubr.msk.f32.mxu0 %vm179_vm1, %v16182_v21  ;;  %1941 = vst.msk [vmem:[#allocation2 + $0x128] sm:$0x3] %vm1904_vm5, %v21184_v18  ;;  %1943 = vst.msk [vmem:[#allocation2 + $0x138] sm:$0x3] %vm1904_vm5, %v21184_v18  ;;  %v11513_v21 = vld [vmem:[%s21168_s2 + $0x30] sm:$0xff] }
  0x9b   :  { %13419 = vmatmul.mubr.msk.f32.gmra.mrb[8].mxu0 %vm179_vm1, %v16189_v27  ;;  %v11514_v27 = vld [vmem:[%s21168_s2 + $0x38] sm:$0xff] }
  0x9c   :  { %13421 = vmatprep.mubr.msk.f32.mxu0 %vm179_vm1, %v16212_v47  ;;  %v14726_v47 = vpack.c.bf16 %v11514_v27, %v11513_v21  ;;  %v2003_v21 = vld [vmem:[%s21168_s2 + $0x10] sm:$0xff] }
  0x9e   :  { %14727 = vmatprep.subr.bf16.mxu1 %v14726_v47 }
  0x9f   :  { %13422 = vmatmul.mubr.msk.f32.gmra.mrb[10].mxu0 %vm179_vm1, %v16222_v40  ;;  %v16682_v40 = vld [vmem:[#allocation2] sm:$0xff]  ;;  %14729 = vmatpush3.bf16.msra.mxu1 %v14726_v47 }
  0xa0   :  { %13424 = vmatprep.mubr.msk.f32.mxu0 %vm179_vm1, %v16245_v61  ;;  %v16684_v61 = vld [vmem:[#allocation2 + $0x8] sm:$0x3] }
  0xa1   :  { %v2038_v9 = vrot.slane %v16684_v61, 1 }
  0xa3   :  { %13425 = vmatmul.mubr.msk.f32.gmra.mrb[12].mxu0 %vm179_vm1, %v16252_v20  ;;  %v21203_v20 = vrot.slane %v16682_v40, 1 }
  0xa4   :  { %13427 = vmatprep.mubr.msk.f32.mxu0 %vm179_vm1, %v16315_v32  ;;  %v2001_v32 = vld [vmem:[%s21168_s2] sm:$0xff] }
  0xa5   :  { %v2039_v53 = vsel %vm128_vm2, %v21203_v20, %v2038_v9 }
  0xa6   :  { %13464 = vmatprep.mubr.msk.f32.mxu1 %vm1902_vm4, %v2039_v53 }
  0xa7   :  { %13428 = vmatmul.mubr.msk.f32.gmra.mrb[14].mxu0 %vm179_vm1, %v1493_v41 }
  0xa8   :  { %13432 = vmatprep.mubr.msk.f32.mxu0 %vm179_vm1, %v16329_v39  ;;  %v2002_v39 = vld [vmem:[%s21168_s2 + $0x8] sm:$0xff] }
  0xab   :  { %13433 = vmatmul.mubr.msk.f32.vlgmr.msra.gmra.mrb[0].mxu0 %vm179_vm1, %v16334_v24  ;;  %v16698_v24 = vpack.c.bf16 %v2002_v39, %v2001_v32  ;;  %v2004_v39 = vld [vmem:[%s21168_s2 + $0x18] sm:$0xff] }
  0xac   :  { %13435 = vmatprep.mubr.msk.f32.mxu0 %vm179_vm1, %v16356_v28 }
  0xad   :  { %14731 = vmatprep.subr.bf16.mxu1 %v16698_v24 }
  0xaf   :  { %13436 = vmatmul.mubr.msk.f32.gmra.mrb[2].mxu0 %vm179_vm1, %v16361_v12 }
  0xb0   :  { %13438 = vmatprep.mubr.msk.f32.mxu0 %vm179_vm1, %v16378_v38 }
  0xb3   :  { %13439 = vmatmul.mubr.msk.f32.gmra.mrb[4].mxu0 %vm179_vm1, %v16383_v31 }
  0xb4   :  { %13441 = vmatprep.mubr.msk.f32.mxu0 %vm179_vm1, %v16394_v59 }
  0xb7   :  { %13442 = vmatmul.mubr.msk.f32.gmra.mrb[6].mxu0 %vm179_vm1, %v1666_v46 }
  0xb8   :  { %13444 = vmatprep.mubr.msk.f32.mxu0 %vm179_vm1, %v16408_v48 }
  0xbb   :  { %13445 = vmatmul.mubr.msk.f32.gmra.mrb[8].mxu0 %vm179_vm1, %v16413_v26 }
  0xbc   :  { %13447 = vmatprep.mubr.msk.f32.mxu0 %vm179_vm1, %v16426_v15 }
  0xbf   :  { %13448 = vmatmul.mubr.msk.f32.gmra.mrb[10].mxu0 %vm179_vm1, %v16431_v16 }
  0xc0   :  { %13450 = vmatprep.mubr.msk.f32.mxu0 %vm179_vm1, %v16445_v35 }
  0xc3   :  { %13451 = vmatmul.mubr.msk.f32.gmra.mrb[12].mxu0 %vm179_vm1, %v16449_v36 }
  0xc4   :  { %13453 = vmatprep.mubr.msk.f32.mxu0 %vm179_vm1, %v16460_v37 }
  0xc7   :  { %13454 = vmatmul.mubr.msk.f32.gmra.mrb[14].mxu0 %vm179_vm1, %v1669_v57  ;;  %vm11328_vm1 = vcmask 1024  }
 0x124   :  { %v13278_v51 = vpop.f32.mrb[0].mxu1 }
 0x125   :  { %v693_v28 = vpop.f32.mrb[1].mxu1 }
 0x128   :  { %v13281_v12 = vpop.f32.mrb[2].mxu1 }
 0x129   :  { %v703_v54 = vpop.f32.mrb[3].mxu1 }
 0x12c   :  { %v13284_v38 = vpop.f32.mrb[4].mxu1 }
 0x12d   :  { %v713_v22 = vpop.f32.mrb[5].mxu1 }
 0x130   :  { %v13287_v23 = vpop.f32.mrb[6].mxu1 }
 0x131   :  { %v723_v31 = vpop.f32.mrb[7].mxu1 }
 0x134   :  { %v13290_v2 = vpop.f32.mrb[8].mxu1 }
 0x135   :  { %v16701_v59 = vpop.f32.mrb[9].mxu1 }
 0x138   :  { %v16703_v33 = vpop.f32.mrb[10].mxu1 }
 0x139   :  { %v16705_v43 = vpop.f32.mrb[11].mxu1 }
 0x13c   :  { %v16707_v52 = vpop.f32.mrb[12].mxu1 }
 0x13d   :  { %v16709_v44 = vpop.f32.mrb[13].mxu1 }
 0x140   :  { %v16711_v19 = vpop.f32.mrb[14].mxu1 }
 0x141   :  { %v16713_v48 = vpop.f32.mrb[15].mxu1 }
 0x17e   :  { %v13434_v60 = vpop.f32.mrb[0].mxu0 }
 0x17f   :  { %v15082_v26 = vadd.f32 %v13434_v60, %v13278_v51  ;;  %v1745_v62 = vpop.f32.mrb[1].mxu0 }
 0x180   :  { %v15083_v15 = vadd.f32 %v1745_v62, %v693_v28 }
 0x181   :  { %v1848_v25 = vmul.f32 %v15082_v26, %v16718_v49 }
 0x182   :  { %v1847_v0 = vmul.f32 %v15083_v15, %v16718_v49  ;;  %v13437_v16 = vpop.f32.mrb[2].mxu0 }
 0x183   :  { %v16728_v1 = vadd.f32 %v16723_v17, %v1848_v25  ;;  %v15084_v8 = vadd.f32 %v13437_v16, %v13281_v12  ;;  %v1755_v10 = vpop.f32.mrb[3].mxu0  ;;  %v14734_v25 = vpack.c.bf16 %v2004_v39, %v2003_v21 }
 0x184   :  { %v16731_v35 = vadd.f32 %v16723_v17, %v1847_v0  ;;  %v15085_v11 = vadd.f32 %v1755_v10, %v703_v54  ;;  %v11547_v0 = vld [vmem:[%s21168_s2 + $0x40] sm:$0xff] }
 0x185   :  { %v21201_v36 = vmax.f32 %v16728_v1, 0.0  ;;  %v1850_v37 = vmul.f32 %v15084_v8, %v16718_v49 }
 0x186   :  { %v21199_v50 = vmax.f32 %v16731_v35, 0.0  ;;  %v1849_v3 = vmul.f32 %v15085_v11, %v16718_v49  ;;  %v13440_v5 = vpop.f32.mrb[4].mxu0 }
 0x187   :  { %1946 = vst.msk [vmem:[#allocation2 + $0x21] sm:$0xff] %vm1902_vm4, %v21201_v36  ;;  %v16741_v6 = vadd.f32 %v16723_v17, %v1850_v37  ;;  %v15086_v7 = vadd.f32 %v13440_v5, %v13284_v38  ;;  %v1765_v13 = vpop.f32.mrb[5].mxu0  ;;  %v11548_v5 = vld [vmem:[%s21168_s2 + $0x48] sm:$0xff] }
 0x188   :  { %1945 = vst.msk [vmem:[#allocation2 + $0x11] sm:$0xff] %vm1902_vm4, %v21199_v50  ;;  %v16747_v14 = vadd.f32 %v16723_v17, %v1849_v3  ;;  %v15087_v29 = vadd.f32 %v1765_v13, %v713_v22  ;;  %v16851_v39 = vpack.c.bf16 %v11548_v5, %v11547_v0 }
 0x189   :  { %v21198_v30 = vmax.f32 %v16741_v6, 0.0  ;;  %v1852_v34 = vmul.f32 %v15086_v7, %v16718_v49 }
 0x18a   :  { %v21195_v41 = vmax.f32 %v16747_v14, 0.0  ;;  %v1851_v42 = vmul.f32 %v15087_v29, %v16718_v49  ;;  %v13443_v45 = vpop.f32.mrb[6].mxu0 }
 0x18b   :  { %1948 = vst.msk [vmem:[#allocation2 + $0x41] sm:$0xff] %vm1902_vm4, %v21198_v30  ;;  %v16757_v46 = vadd.f32 %v16723_v17, %v1852_v34  ;;  %v15088_v55 = vadd.f32 %v13443_v45, %v13287_v23  ;;  %v1775_v56 = vpop.f32.mrb[7].mxu0 }
 0x18c   :  { %1947 = vst.msk [vmem:[#allocation2 + $0x31] sm:$0xff] %vm1902_vm4, %v21195_v41  ;;  %v16763_v57 = vadd.f32 %v16723_v17, %v1851_v42  ;;  %v15089_v58 = vadd.f32 %v1775_v56, %v723_v31 }
 0x18d   :  { %v21194_v63 = vmax.f32 %v16757_v46, 0.0  ;;  %v1854_v4 = vmul.f32 %v15088_v55, %v16718_v49 }
 0x18e   :  { %21266 = vst [vmem:[#allocation7_spill] sm:$0xff] %v16763_v57  ;;  %v21193_v27 = vmax.f32 %v16763_v57, 0.0  ;;  %v1853_v47 = vmul.f32 %v15089_v58, %v16718_v49  ;;  %v13446_v9 = vpop.f32.mrb[8].mxu0  ;;  %v16772_v53 = vld [vmem:[#allocation2 + $0x20] sm:$0xff]  ;;  %v16774_v32 = vld [vmem:[#allocation2 + $0x28] sm:$0x3] }
 0x18f   :  { %1950 = vst.msk [vmem:[#allocation2 + $0x61] sm:$0xff] %vm1902_vm4, %v21194_v63  ;;  %v16783_v51 = vadd.f32 %v16723_v17, %v1854_v4  ;;  %v15090_v28 = vadd.f32 %v13446_v9, %v13290_v2  ;;  %v1785_v12 = vpop.f32.mrb[9].mxu0  ;;  %v16785_v54 = vld [vmem:[#allocation2 + $0x10] sm:$0xff]  ;;  %v16787_v38 = vld [vmem:[#allocation2 + $0x18] sm:$0x3]  ;;  %v2043_v22 = vrot.slane %v16772_v53, 1 }
 0x190   :  { %v2044_v23 = vrot.slane %v16774_v32, 1  ;;  %1949 = vst.msk [vmem:[#allocation2 + $0x51] sm:$0xff] %vm1902_vm4, %v21193_v27  ;;  %v16795_v31 = vadd.f32 %v16723_v17, %v1853_v47  ;;  %v15091_v60 = vadd.f32 %v1785_v12, %v16701_v59  ;;  %v2040_v2 = vrot.slane %v16785_v54, 1  ;;  %v16849_v9 = vld [vmem:[#allocation2 + $0xa8] sm:$0x3] }
 0x191   :  { %21267 = vst [vmem:[#allocation8_spill] sm:$0xff] %v16783_v51  ;;  %v2041_v26 = vrot.slane %v16787_v38, 1  ;;  %v21192_v62 = vmax.f32 %v16783_v51, 0.0  ;;  %v1856_v15 = vmul.f32 %v15090_v28, %v16718_v49  ;;  %v11588_v51 = vld [vmem:[%s21168_s2 + $0x88] sm:$0xff] }
 0x192   :  { %21268 = vst [vmem:[#allocation9_spill] sm:$0xff] %v16795_v31  ;;  %v21191_v16 = vmax.f32 %v16795_v31, 0.0  ;;  %v1855_v8 = vmul.f32 %v15091_v60, %v16718_v49  ;;  %v13449_v10 = vpop.f32.mrb[10].mxu0  ;;  %v16811_v11 = vsel %vm128_vm2, %v2043_v22, %v2044_v23  ;;  %v16813_v37 = vld [vmem:[#allocation2 + $0x40] sm:$0xff]  ;;  %v16815_v3 = vld [vmem:[#allocation2 + $0x48] sm:$0x3] }
 0x193   :  { %v16808_v59 = vsel %vm128_vm2, %v2040_v2, %v2041_v26  ;;  %1952 = vst.msk [vmem:[#allocation2 + $0x81] sm:$0xff] %vm1902_vm4, %v21192_v62  ;;  %v16824_v7 = vadd.f32 %v16723_v17, %v1856_v15  ;;  %v15092_v13 = vadd.f32 %v13449_v10, %v16703_v33  ;;  %v1795_v29 = vpop.f32.mrb[11].mxu0  ;;  %v16829_v34 = vld [vmem:[#allocation2 + $0x30] sm:$0xff]  ;;  %v16831_v42 = vld [vmem:[#allocation2 + $0x38] sm:$0x3]  ;;  %v2049_v45 = vrot.slane %v16813_v37, 1 }
 0x194   :  { %13465 = vmatmul.mubr.msk.f32.vlgmr.msra.gmra.mrb[16].mxu1 %vm1902_vm4, %v16808_v59  ;;  %v2050_v55 = vrot.slane %v16815_v3, 1  ;;  %1951 = vst.msk [vmem:[#allocation2 + $0x71] sm:$0xff] %vm1902_vm4, %v21191_v16  ;;  %v16839_v56 = vadd.f32 %v16723_v17, %v1855_v8  ;;  %v15093_v33 = vadd.f32 %v1795_v29, %v16705_v43  ;;  %v2046_v58 = vrot.slane %v16829_v34, 1  ;;  %v16865_v2 = vld [vmem:[#allocation2 + $0xa0] sm:$0xff]  ;;  %v11772_v57 = vld [vmem:[%s21168_s2 + $0x1a8] sm:$0xff] }
 0x195   :  { %21269 = vst [vmem:[#allocation10_spill] sm:$0xff] %v16824_v7  ;;  %13467 = vmatprep.mubr.msk.f32.mxu1 %vm1902_vm4, %v16811_v11  ;;  %14733 = vmatpush3.bf16.msra.mxu1 %v16698_v24  ;;  %v2047_v4 = vrot.slane %v16831_v42, 1  ;;  %v21189_v21 = vmax.f32 %v16824_v7, 0.0  ;;  %v1858_v47 = vmul.f32 %v15092_v13, %v16718_v49  ;;  %v2454_v7 = vrot.slane %v16831_v42, 2  ;;  %v11587_v31 = vld [vmem:[%s21168_s2 + $0x80] sm:$0xff] }
 0x196   :  { %21270 = vst [vmem:[#allocation11_spill] sm:$0xff] %v16839_v56  ;;  %14735 = vmatprep.subr.bf16.mxu1 %v14734_v25  ;;  %v21186_v43 = vmax.f32 %v16839_v56, 0.0  ;;  %v1857_v28 = vmul.f32 %v15093_v33, %v16718_v49  ;;  %v13452_v12 = vpop.f32.mrb[12].mxu0  ;;  %v16859_v22 = vsel %vm128_vm2, %v2049_v45, %v2050_v55  ;;  %v16861_v23 = vld [vmem:[#allocation2 + $0x60] sm:$0xff]  ;;  %v16863_v60 = vld [vmem:[#allocation2 + $0x68] sm:$0x3]  ;;  %v14754_v42 = vpack.c.bf16 %v11588_v51, %v11587_v31 }
 0x197   :  { %v16856_v24 = vsel %vm128_vm2, %v2046_v58, %v2047_v4  ;;  %1954 = vst.msk [vmem:[#allocation2 + $0xc1] sm:$0xff] %vm1902_vm4, %v21189_v21  ;;  %v16871_v26 = vadd.f32 %v16723_v17, %v1858_v47  ;;  %v15094_v15 = vadd.f32 %v13452_v12, %v16707_v52  ;;  %v1805_v0 = vpop.f32.mrb[13].mxu0  ;;  %v16876_v8 = vld [vmem:[#allocation2 + $0x50] sm:$0xff]  ;;  %v16878_v10 = vld [vmem:[#allocation2 + $0x58] sm:$0x3]  ;;  %v2055_v5 = vrot.slane %v16861_v23, 1 }
 0x198   :  { %13468 = vmatmul.mubr.msk.f32.gmra.mrb[18].mxu1 %vm1902_vm4, %v16856_v24  ;;  %v2056_v13 = vrot.slane %v16863_v60, 1  ;;  %1953 = vst.msk [vmem:[#allocation2 + $0xb1] sm:$0xff] %vm1902_vm4, %v21186_v43  ;;  %v16886_v29 = vadd.f32 %v16723_v17, %v1857_v28  ;;  %v15095_v52 = vadd.f32 %v1805_v0, %v16709_v44  ;;  %v2052_v45 = vrot.slane %v16876_v8, 1 }
 0x199   :  { %21271 = vst [vmem:[#allocation12_spill] sm:$0xff] %v16871_v26  ;;  %13470 = vmatprep.mubr.msk.f32.mxu1 %vm1902_vm4, %v16859_v22  ;;  %v2053_v55 = vrot.slane %v16878_v10, 1  ;;  %14737 = vmatpush3.bf16.msra.mxu1 %v14734_v25  ;;  %v21188_v33 = vmax.f32 %v16871_v26, 0.0  ;;  %v1860_v58 = vmul.f32 %v15094_v15, %v16718_v49  ;;  %v21202_v4 = vrot.slane %v16865_v2, 1 }
 0x19a   :  { %21272 = vst [vmem:[#allocation13_spill] sm:$0xff] %v16886_v29  ;;  %v2062_v47 = vrot.slane %v16849_v9, 1  ;;  %14739 = vmatprep.subr.bf16.mxu1 %v16851_v39  ;;  %v21187_v44 = vmax.f32 %v16886_v29, 0.0  ;;  %v1859_v28 = vmul.f32 %v15095_v52, %v16718_v49  ;;  %v13455_v12 = vpop.f32.mrb[14].mxu0  ;;  %v16913_v43 = vsel %vm128_vm2, %v2055_v5, %v2056_v13 }
 0x19b   :  { %v16901_v0 = vsel %vm128_vm2, %v2052_v45, %v2053_v55  ;;  %1956 = vst.msk [vmem:[#allocation2 + $0xe1] sm:$0xff] %vm1902_vm4, %v21188_v33  ;;  %v16907_v25 = vadd.f32 %v16723_v17, %v1860_v58  ;;  %v15096_v15 = vadd.f32 %v13455_v12, %v16711_v19  ;;  %v1815_v18 = vpop.f32.mrb[15].mxu0  ;;  %v16915_v52 = vld [vmem:[#allocation2 + $0x70] sm:$0xff]  ;;  %v16917_v45 = vld [vmem:[#allocation2 + $0x78] sm:$0x3]  ;;  %v2450_v26 = vrot.slane %v16772_v53, 2 }
 0x19c   :  { %13471 = vmatmul.mubr.msk.f32.gmra.mrb[20].mxu1 %vm1902_vm4, %v16901_v0  ;;  %1955 = vst.msk [vmem:[#allocation2 + $0xd1] sm:$0xff] %vm1902_vm4, %v21187_v44  ;;  %v16923_v55 = vadd.f32 %v16723_v17, %v1859_v28  ;;  %v15097_v19 = vadd.f32 %v1815_v18, %v16713_v48  ;;  %v2058_v58 = vrot.slane %v16915_v52, 1  ;;  %v2059_v5 = vrot.slane %v16917_v45, 1 }
 0x19d   :  { %21273 = vst [vmem:[#allocation14_spill] sm:$0xff] %v16907_v25  ;;  %13473 = vmatprep.mubr.msk.f32.mxu1 %vm1902_vm4, %v16913_v43  ;;  %v21190_v13 = vmax.f32 %v16907_v25, 0.0  ;;  %v1862_v12 = vmul.f32 %v15096_v15, %v16718_v49  ;;  %v2063_v44 = vsel %vm128_vm2, %v21202_v4, %v2062_v47  ;;  %v2451_v56 = vrot.slane %v16774_v32, 2 }
 0x19e   :  { %21274 = vst [vmem:[#allocation15_spill] sm:$0xff] %v16923_v55  ;;  %v21197_v28 = vmax.f32 %v16923_v55, 0.0  ;;  %v1861_v33 = vmul.f32 %v15097_v19, %v16718_v49  ;;  %v16938_v18 = vsel %vm128_vm2, %v2058_v58, %v2059_v5  ;;  %v16940_v48 = vld [vmem:[#allocation2 + $0xc0] sm:$0xff]  ;;  %v16942_v21 = vld [vmem:[#allocation2 + $0xc8] sm:$0x3]  ;;  %v21219_v51 = vrot.slane %v16865_v2, 2 }
 0x19f   :  { %1958 = vst.msk [vmem:[#allocation2 + $0x101] sm:$0xff] %vm1902_vm4, %v21190_v13  ;;  %v16948_v15 = vadd.f32 %v16723_v17, %v1862_v12  ;;  %v16952_v47 = vld [vmem:[#allocation2 + $0xb0] sm:$0xff]  ;;  %v16954_v49 = vld [vmem:[#allocation2 + $0xb8] sm:$0x3]  ;;  %v2067_v19 = vrot.slane %v16940_v48, 1  ;;  %v2068_v58 = vrot.slane %v16942_v21, 1  ;;  %v17115_v32 = vsel %vm541_vm3, %v2450_v26, %v2451_v56 }
 0x1a0   :  { %13474 = vmatmul.mubr.msk.f32.gmra.mrb[22].mxu1 %vm1902_vm4, %v16938_v18  ;;  %1957 = vst.msk [vmem:[#allocation2 + $0xf1] sm:$0xff] %vm1902_vm4, %v21197_v28  ;;  %v16962_v5 = vadd.f32 %v16723_v17, %v1861_v33  ;;  %v2064_v12 = vrot.slane %v16952_v47, 1  ;;  %v2065_v13 = vrot.slane %v16954_v49, 1  ;;  %v2463_v26 = vrot.slane %v16863_v60, 2 }
 0x1a1   :  { %21275 = vst [vmem:[#allocation16_spill] sm:$0xff] %v16948_v15  ;;  %13476 = vmatprep.mubr.msk.f32.mxu1 %vm1902_vm4, %v2063_v44  ;;  %v21196_v16 = vmax.f32 %v16948_v15, 0.0  ;;  %v16982_v17 = vsel %vm128_vm2, %v2067_v19, %v2068_v58  ;;  %v2469_v31 = vrot.slane %v16849_v9, 2 }
 0x1a2   :  { %21276 = vst [vmem:[#allocation17_spill] sm:$0xff] %v16962_v5  ;;  %v21200_v62 = vmax.f32 %v16962_v5, 0.0  ;;  %v16970_v27 = vsel %vm128_vm2, %v2064_v12, %v2065_v13  ;;  %v16972_v63 = vld [vmem:[#allocation2 + $0xe0] sm:$0xff]  ;;  %v16974_v41 = vld [vmem:[#allocation2 + $0xe8] sm:$0x3] }
 0x1a3   :  { %1960 = vst.msk [vmem:[#allocation2 + $0x121] sm:$0xff] %vm1902_vm4, %v21196_v16  ;;  %v16984_v33 = vld [vmem:[#allocation2 + $0xd0] sm:$0xff]  ;;  %v16986_v44 = vld [vmem:[#allocation2 + $0xd8] sm:$0x3]  ;;  %v2073_v13 = vrot.slane %v16972_v63, 1  ;;  %v2074_v12 = vrot.slane %v16974_v41, 1  ;;  %v2470_v9 = vsel %vm541_vm3, %v21219_v51, %v2469_v31 }
 0x1a4   :  { %13477 = vmatmul.mubr.msk.f32.gmra.mrb[24].mxu1 %vm1902_vm4, %v16970_v27  ;;  %1959 = vst.msk [vmem:[#allocation2 + $0x111] sm:$0xff] %vm1902_vm4, %v21200_v62  ;;  %v2070_v16 = vrot.slane %v16984_v33, 1  ;;  %v2071_v19 = vrot.slane %v16986_v44, 1  ;;  %v2481_v31 = vrot.slane %v16974_v41, 2  ;;  %v11771_v51 = vld [vmem:[%s21168_s2 + $0x1a0] sm:$0xff] }
 0x1a5   :  { %13479 = vmatprep.mubr.msk.f32.mxu1 %vm1902_vm4, %v16982_v17  ;;  %v17007_v50 = vsel %vm128_vm2, %v2073_v13, %v2074_v12 }
 0x1a6   :  { %v16998_v58 = vsel %vm128_vm2, %v2070_v16, %v2071_v19  ;;  %v17000_v28 = vld [vmem:[#allocation2 + $0x100] sm:$0xff]  ;;  %v17002_v30 = vld [vmem:[#allocation2 + $0x108] sm:$0x3] }
 0x1a7   :  { %v17009_v62 = vld [vmem:[#allocation2 + $0xf0] sm:$0xff]  ;;  %v17011_v36 = vld [vmem:[#allocation2 + $0xf8] sm:$0x3]  ;;  %v2079_v4 = vrot.slane %v17000_v28, 1  ;;  %v2080_v20 = vrot.slane %v17002_v30, 1  ;;  %v2487_v41 = vrot.slane %v17002_v30, 2 }
 0x1a8   :  { %13480 = vmatmul.mubr.msk.f32.gmra.mrb[26].mxu1 %vm1902_vm4, %v16998_v58  ;;  %v2076_v16 = vrot.slane %v17009_v62, 1  ;;  %v2077_v19 = vrot.slane %v17011_v36, 1 }
 0x1a9   :  { %13482 = vmatprep.mubr.msk.f32.mxu1 %vm1902_vm4, %v17007_v50  ;;  %v17025_v13 = vsel %vm128_vm2, %v2079_v4, %v2080_v20  ;;  %v11550_v20 = vld [vmem:[%s21168_s2 + $0x58] sm:$0xff] }
 0x1aa   :  { %v17020_v5 = vsel %vm128_vm2, %v2076_v16, %v2077_v19  ;;  %v11549_v19 = vld [vmem:[%s21168_s2 + $0x50] sm:$0xff] }
 0x1ab   :  { %v17027_v12 = vld [vmem:[#allocation2 + $0x110] sm:$0xff]  ;;  %v17029_v15 = vld [vmem:[#allocation2 + $0x118] sm:$0x3]  ;;  %v14742_v4 = vpack.c.bf16 %v11550_v20, %v11549_v19  ;;  %v2445_v19 = vrot.slane %v16684_v61, 2 }
 0x1ac   :  { %13483 = vmatmul.mubr.msk.f32.gmra.mrb[28].mxu1 %vm1902_vm4, %v17020_v5  ;;  %v2082_v55 = vrot.slane %v17027_v12, 1  ;;  %v2083_v25 = vrot.slane %v17029_v15, 1  ;;  %v11570_v61 = vld [vmem:[%s21168_s2 + $0x78] sm:$0xff] }
 0x1ad   :  { %13485 = vmatprep.mubr.msk.f32.mxu1 %vm1902_vm4, %v17025_v13 }
 0x1ae   :  { %v17036_v16 = vsel %vm128_vm2, %v2082_v55, %v2083_v25  ;;  %v11567_v25 = vld [vmem:[%s21168_s2 + $0x60] sm:$0xff]  ;;  %v11568_v55 = vld [vmem:[%s21168_s2 + $0x68] sm:$0xff] }
 0x1af   :  { %v14746_v29 = vpack.c.bf16 %v11568_v55, %v11567_v25  ;;  %v2448_v25 = vrot.slane %v16787_v38, 2  ;;  %v11569_v55 = vld [vmem:[%s21168_s2 + $0x70] sm:$0xff] }
 0x1b0   :  { %13486 = vmatmul.mubr.msk.f32.gmra.mrb[30].mxu1 %vm1902_vm4, %v17036_v16 }
 0x1b1   :  { %13496 = vmatprep.mubr.msk.f32.mxu1 %vm1902_vm4, %v16682_v40 }
 0x1b4   :  { %13497 = vmatmul.mubr.msk.f32.vlgmr.msra.gmra.mrb[16].mxu1 %vm1902_vm4, %v16785_v54 }
 0x1b5   :  { %13499 = vmatprep.mubr.msk.f32.mxu1 %vm1902_vm4, %v16772_v53  ;;  %14741 = vmatpush3.bf16.msra.mxu1 %v16851_v39  ;;  %v21211_v39 = vrot.slane %v16682_v40, 2 }
 0x1b6   :  { %14743 = vmatprep.subr.bf16.mxu1 %v14742_v4 }
 0x1b7   :  { %v2446_v20 = vsel %vm541_vm3, %v21211_v39, %v2445_v19  ;;  %v14750_v19 = vpack.c.bf16 %v11570_v61, %v11569_v55  ;;  %v2453_v39 = vrot.slane %v16829_v34, 2  ;;  %v2459_v55 = vrot.slane %v16876_v8, 2 }
 0x1b8   :  { %13500 = vmatmul.mubr.msk.f32.gmra.mrb[18].mxu1 %vm1902_vm4, %v16829_v34  ;;  %v2460_v61 = vrot.slane %v16878_v10, 2  ;;  %v2465_v10 = vrot.slane %v16915_v52, 2 }
 0x1b9   :  { %13502 = vmatprep.mubr.msk.f32.mxu1 %vm1902_vm4, %v16813_v37  ;;  %14745 = vmatpush3.bf16.msra.mxu1 %v14742_v4  ;;  %v2447_v4 = vrot.slane %v16785_v54, 2 }
 0x1ba   :  { %14747 = vmatprep.subr.bf16.mxu1 %v14746_v29 }
 0x1bb   :  { %v17102_v38 = vsel %vm541_vm3, %v2447_v4, %v2448_v25  ;;  %v2457_v4 = vrot.slane %v16815_v3, 2  ;;  %v17122_v25 = vsel %vm541_vm3, %v2453_v39, %v2454_v7  ;;  %v2462_v3 = vrot.slane %v16861_v23, 2 }
 0x1bc   :  { %13503 = vmatmul.mubr.msk.f32.gmra.mrb[20].mxu1 %vm1902_vm4, %v16876_v8  ;;  %v17138_v7 = vsel %vm541_vm3, %v2459_v55, %v2460_v61  ;;  %v2477_v61 = vrot.slane %v16984_v33, 2 }
 0x1bd   :  { %13505 = vmatprep.mubr.msk.f32.mxu1 %vm1902_vm4, %v16861_v23  ;;  %v17145_v60 = vsel %vm541_vm3, %v2462_v3, %v2463_v26  ;;  %v2478_v3 = vrot.slane %v16986_v44, 2  ;;  %v2480_v26 = vrot.slane %v16972_v63, 2  ;;  %v2484_v44 = vrot.slane %v17011_v36, 2 }
 0x1be   :  { %v2490_v36 = vrot.slane %v17029_v15, 2  ;;  %v11590_v15 = vld [vmem:[%s21168_s2 + $0x98] sm:$0xff] }
 0x1c0   :  { %13506 = vmatmul.mubr.msk.f32.gmra.mrb[22].mxu1 %vm1902_vm4, %v16915_v52 }
 0x1c1   :  { %13508 = vmatprep.mubr.msk.f32.mxu1 %vm1902_vm4, %v16865_v2 }
 0x1c4   :  { %13509 = vmatmul.mubr.msk.f32.gmra.mrb[24].mxu1 %vm1902_vm4, %v16952_v47 }
 0x1c5   :  { %13511 = vmatprep.mubr.msk.f32.mxu1 %vm1902_vm4, %v16940_v48 }
 0x1c8   :  { %13512 = vmatmul.mubr.msk.f32.gmra.mrb[26].mxu1 %vm1902_vm4, %v16984_v33 }
 0x1c9   :  { %13514 = vmatprep.mubr.msk.f32.mxu1 %vm1902_vm4, %v16972_v63 }
 0x1cc   :  { %13515 = vmatmul.mubr.msk.f32.gmra.mrb[28].mxu1 %vm1902_vm4, %v17009_v62 }
 0x1cd   :  { %13517 = vmatprep.mubr.msk.f32.mxu1 %vm1902_vm4, %v17000_v28 }
 0x1d0   :  { %13518 = vmatmul.mubr.msk.f32.gmra.mrb[30].mxu1 %vm1902_vm4, %v17027_v12 }
 0x1d1   :  { %13528 = vmatprep.mubr.msk.f32.mxu1 %vm1902_vm4, %v2446_v20  ;;  %v2456_v20 = vrot.slane %v16813_v37, 2 }
 0x1d3   :  { %v17129_v56 = vsel %vm541_vm3, %v2456_v20, %v2457_v4  ;;  %v2474_v20 = vrot.slane %v16940_v48, 2  ;;  %v2475_v4 = vrot.slane %v16942_v21, 2  ;;  %v17177_v21 = vsel %vm541_vm3, %v2477_v61, %v2478_v3  ;;  %v11607_v3 = vld [vmem:[%s21168_s2 + $0xa0] sm:$0xff] }
 0x1d4   :  { %13529 = vmatmul.mubr.msk.f32.vlgmr.msra.gmra.mrb[16].mxu1 %vm1902_vm4, %v17102_v38 }
 0x1d5   :  { %13531 = vmatprep.mubr.msk.f32.mxu1 %vm1902_vm4, %v17115_v32  ;;  %14749 = vmatpush3.bf16.msra.mxu1 %v14746_v29  ;;  %v2466_v29 = vrot.slane %v16917_v45, 2  ;;  %v2472_v45 = vrot.slane %v16954_v49, 2  ;;  %v17170_v49 = vsel %vm541_vm3, %v2474_v20, %v2475_v4  ;;  %v11589_v4 = vld [vmem:[%s21168_s2 + $0x90] sm:$0xff] }
 0x1d6   :  { %14751 = vmatprep.subr.bf16.mxu1 %v14750_v19  ;;  %v14758_v61 = vpack.c.bf16 %v11590_v15, %v11589_v4 }
 0x1d7   :  { %v17153_v39 = vsel %vm541_vm3, %v2465_v10, %v2466_v29  ;;  %v2483_v10 = vrot.slane %v17009_v62, 2  ;;  %v17184_v29 = vsel %vm541_vm3, %v2480_v26, %v2481_v31  ;;  %v11608_v26 = vld [vmem:[%s21168_s2 + $0xa8] sm:$0xff] }
 0x1d8   :  { %13532 = vmatmul.mubr.msk.f32.gmra.mrb[18].mxu1 %vm1902_vm4, %v17122_v25  ;;  %v14762_v31 = vpack.c.bf16 %v11608_v26, %v11607_v3 }
 0x1d9   :  { %13534 = vmatprep.mubr.msk.f32.mxu1 %vm1902_vm4, %v17129_v56  ;;  %14753 = vmatpush3.bf16.msra.mxu1 %v14750_v19  ;;  %v2471_v19 = vrot.slane %v16952_v47, 2 }
 0x1da   :  { %14755 = vmatprep.subr.bf16.mxu1 %v14754_v42 }
 0x1db   :  { %v17163_v55 = vsel %vm541_vm3, %v2471_v19, %v2472_v45  ;;  %v17191_v19 = vsel %vm541_vm3, %v2483_v10, %v2484_v44  ;;  %v2489_v45 = vrot.slane %v17027_v12, 2  ;;  %v11610_v10 = vld [vmem:[%s21168_s2 + $0xb8] sm:$0xff] }
 0x1dc   :  { %13535 = vmatmul.mubr.msk.f32.gmra.mrb[20].mxu1 %vm1902_vm4, %v17138_v7 }
 0x1dd   :  { %13537 = vmatprep.mubr.msk.f32.mxu1 %vm1902_vm4, %v17145_v60  ;;  %v17203_v30 = vsel %vm541_vm3, %v2489_v45, %v2490_v36 }
 0x1e0   :  { %13538 = vmatmul.mubr.msk.f32.gmra.mrb[22].mxu1 %vm1902_vm4, %v17153_v39 }
 0x1e1   :  { %13540 = vmatprep.mubr.msk.f32.mxu1 %vm1902_vm4, %v2470_v9  ;;  %v2486_v9 = vrot.slane %v17000_v28, 2 }
 0x1e3   :  { %v17198_v20 = vsel %vm541_vm3, %v2486_v9, %v2487_v41  ;;  %v11627_v9 = vld [vmem:[%s21168_s2 + $0xc0] sm:$0xff]  ;;  %v11628_v41 = vld [vmem:[%s21168_s2 + $0xc8] sm:$0xff] }
 0x1e4   :  { %13541 = vmatmul.mubr.msk.f32.gmra.mrb[24].mxu1 %vm1902_vm4, %v17163_v55  ;;  %v14770_v45 = vpack.c.bf16 %v11628_v41, %v11627_v9 }
 0x1e5   :  { %13543 = vmatprep.mubr.msk.f32.mxu1 %vm1902_vm4, %v17170_v49 }
 0x1e8   :  { %13544 = vmatmul.mubr.msk.f32.gmra.mrb[26].mxu1 %vm1902_vm4, %v17177_v21 }
 0x1e9   :  { %13546 = vmatprep.mubr.msk.f32.mxu1 %vm1902_vm4, %v17184_v29 }
 0x1ec   :  { %13547 = vmatmul.mubr.msk.f32.gmra.mrb[28].mxu1 %vm1902_vm4, %v17191_v19 }
 0x1ed   :  { %13549 = vmatprep.mubr.msk.f32.mxu1 %vm1902_vm4, %v17198_v20 }
 0x1f0   :  { %13550 = vmatmul.mubr.msk.f32.gmra.mrb[30].mxu1 %vm1902_vm4, %v17203_v30 }
 0x1f1   :  { %13560 = vmatprep.mubr.msk.f32.mxu1 %vm1902_vm4, %v16785_v54  ;;  %v17233_v54 = vld [vmem:[#allocation2 + $0x80] sm:$0xff] }
 0x1f2   :  { %v2864_v36 = vrot.slane %v17233_v54, 1 }
 0x1f4   :  { %13561 = vmatmul.mubr.msk.f32.vlgmr.msra.gmra.mrb[16].mxu1 %vm1902_vm4, %v16772_v53 }
 0x1f5   :  { %13563 = vmatprep.mubr.msk.f32.mxu1 %vm1902_vm4, %v16829_v34  ;;  %14757 = vmatpush3.bf16.msra.mxu1 %v14754_v42  ;;  %v17251_v42 = vld [vmem:[#allocation2 + $0x120] sm:$0xff] }
 0x1f6   :  { %14759 = vmatprep.subr.bf16.mxu1 %v14758_v61  ;;  %v2867_v3 = vrot.slane %v17251_v42, 1 }
 0x1f8   :  { %13564 = vmatmul.mubr.msk.f32.gmra.mrb[18].mxu1 %vm1902_vm4, %v16813_v37 }
 0x1f9   :  { %13566 = vmatprep.mubr.msk.f32.mxu1 %vm1902_vm4, %v16876_v8  ;;  %14761 = vmatpush3.bf16.msra.mxu1 %v14758_v61  ;;  %v1998_v61 = vld [vmem:[#allocation2 + $0x128] sm:$0x3] }
 0x1fa   :  { %14763 = vmatprep.subr.bf16.mxu1 %v14762_v31  ;;  %v2868_v26 = vrot.slane %v1998_v61, 1 }
 0x1fc   :  { %13567 = vmatmul.mubr.msk.f32.gmra.mrb[20].mxu1 %vm1902_vm4, %v16861_v23 }
 0x1fd   :  { %13569 = vmatprep.mubr.msk.f32.mxu1 %vm1902_vm4, %v16915_v52 }
 0x200   :  { %13570 = vmatmul.mubr.msk.f32.gmra.mrb[22].mxu1 %vm1902_vm4, %v17233_v54 }
 0x201   :  { %13572 = vmatprep.mubr.msk.f32.mxu1 %vm1902_vm4, %v16952_v47  ;;  %v11609_v47 = vld [vmem:[%s21168_s2 + $0xb0] sm:$0xff] }
 0x202   :  { %v14766_v44 = vpack.c.bf16 %v11610_v10, %v11609_v47  ;;  %v11630_v47 = vld [vmem:[%s21168_s2 + $0xd8] sm:$0xff]  ;;  %v11695_v10 = vld [vmem:[%s21168_s2 + $0x140] sm:$0xff] }
 0x204   :  { %13573 = vmatmul.mubr.msk.f32.gmra.mrb[24].mxu1 %vm1902_vm4, %v16940_v48 }
 0x205   :  { %13575 = vmatprep.mubr.msk.f32.mxu1 %vm1902_vm4, %v16984_v33 }
 0x208   :  { %13576 = vmatmul.mubr.msk.f32.gmra.mrb[26].mxu1 %vm1902_vm4, %v16972_v63 }
 0x209   :  { %13578 = vmatprep.mubr.msk.f32.mxu1 %vm1902_vm4, %v17009_v62 }
 0x20c   :  { %13579 = vmatmul.mubr.msk.f32.gmra.mrb[28].mxu1 %vm1902_vm4, %v17000_v28 }
 0x20d   :  { %13581 = vmatprep.mubr.msk.f32.mxu1 %vm1902_vm4, %v17027_v12 }
 0x210   :  { %13582 = vmatmul.mubr.msk.f32.gmra.mrb[30].mxu1 %vm1902_vm4, %v17251_v42 }
 0x211   :  { %13592 = vmatprep.mubr.msk.f32.mxu1 %vm1902_vm4, %v16808_v59  ;;  %v1978_v59 = vld [vmem:[#allocation2 + $0x88] sm:$0x3] }
 0x212   :  { %v2865_v4 = vrot.slane %v1978_v59, 1 }
 0x214   :  { %13593 = vmatmul.mubr.msk.f32.vlgmr.msra.gmra.mrb[16].mxu1 %vm1902_vm4, %v16811_v11  ;;  %v17283_v15 = vsel %vm128_vm2, %v2864_v36, %v2865_v4  ;;  %v11647_v36 = vld [vmem:[%s21168_s2 + $0xe0] sm:$0xff]  ;;  %v11648_v4 = vld [vmem:[%s21168_s2 + $0xe8] sm:$0xff] }
 0x215   :  { %13595 = vmatprep.mubr.msk.f32.mxu1 %vm1902_vm4, %v16856_v24  ;;  %14765 = vmatpush3.bf16.msra.mxu1 %v14762_v31  ;;  %v11629_v31 = vld [vmem:[%s21168_s2 + $0xd0] sm:$0xff] }
 0x216   :  { %14767 = vmatprep.subr.bf16.mxu1 %v14766_v44  ;;  %v14774_v41 = vpack.c.bf16 %v11630_v47, %v11629_v31  ;;  %v3044_v31 = vrot.slane %v1998_v61, 2  ;;  %v11649_v47 = vld [vmem:[%s21168_s2 + $0xf0] sm:$0xff] }
 0x218   :  { %13596 = vmatmul.mubr.msk.f32.gmra.mrb[18].mxu1 %vm1902_vm4, %v16859_v22 }
 0x219   :  { %13598 = vmatprep.mubr.msk.f32.mxu1 %vm1902_vm4, %v16901_v0  ;;  %14769 = vmatpush3.bf16.msra.mxu1 %v14766_v44  ;;  %v11696_v44 = vld [vmem:[%s21168_s2 + $0x148] sm:$0xff] }
 0x21a   :  { %14771 = vmatprep.subr.bf16.mxu1 %v14770_v45  ;;  %v14794_v9 = vpack.c.bf16 %v11696_v44, %v11695_v10  ;;  %v11650_v10 = vld [vmem:[%s21168_s2 + $0xf8] sm:$0xff]  ;;  %v11667_v44 = vld [vmem:[%s21168_s2 + $0x100] sm:$0xff] }
 0x21b   :  { %v14782_v61 = vpack.c.bf16 %v11650_v10, %v11649_v47 }
 0x21c   :  { %13599 = vmatmul.mubr.msk.f32.gmra.mrb[20].mxu1 %vm1902_vm4, %v16913_v43  ;;  %14795 = vmatprep.subr.bf16.mxu0 %v14794_v9 }
 0x21d   :  { %13601 = vmatprep.mubr.msk.f32.mxu1 %vm1902_vm4, %v16938_v18  ;;  %14797 = vmatpush3.bf16.msra.mxu0 %v14794_v9  ;;  %v11668_v9 = vld [vmem:[%s21168_s2 + $0x108] sm:$0xff] }
 0x220   :  { %13602 = vmatmul.mubr.msk.f32.gmra.mrb[22].mxu1 %vm1902_vm4, %v17283_v15 }
 0x221   :  { %13604 = vmatprep.mubr.msk.f32.mxu1 %vm1902_vm4, %v16970_v27  ;;  %v17303_v27 = vsel %vm128_vm2, %v2867_v3, %v2868_v26  ;;  %v3040_v3 = vrot.slane %v17233_v54, 2  ;;  %v3041_v26 = vrot.slane %v1978_v59, 2  ;;  %v3043_v59 = vrot.slane %v17251_v42, 2 }
 0x224   :  { %13605 = vmatmul.mubr.msk.f32.gmra.mrb[24].mxu1 %vm1902_vm4, %v16982_v17 }
 0x225   :  { %13607 = vmatprep.mubr.msk.f32.mxu1 %vm1902_vm4, %v16998_v58 }
 0x228   :  { %13608 = vmatmul.mubr.msk.f32.gmra.mrb[26].mxu1 %vm1902_vm4, %v17007_v50 }
 0x229   :  { %13610 = vmatprep.mubr.msk.f32.mxu1 %vm1902_vm4, %v17020_v5 }
 0x22c   :  { %13611 = vmatmul.mubr.msk.f32.gmra.mrb[28].mxu1 %vm1902_vm4, %v17025_v13 }
 0x22d   :  { %13613 = vmatprep.mubr.msk.f32.mxu1 %vm1902_vm4, %v17036_v16 }
 0x230   :  { %13614 = vmatmul.mubr.msk.f32.gmra.mrb[30].mxu1 %vm1902_vm4, %v17303_v27 }
 0x231   :  { %13624 = vmatprep.mubr.msk.f32.mxu1 %vm1902_vm4, %v17102_v38  ;;  %v14778_v38 = vpack.c.bf16 %v11648_v4, %v11647_v36 }
 0x234   :  { %13625 = vmatmul.mubr.msk.f32.vlgmr.msra.gmra.mrb[16].mxu1 %vm1902_vm4, %v17115_v32 }
 0x235   :  { %13627 = vmatprep.mubr.msk.f32.mxu1 %vm1902_vm4, %v17122_v25  ;;  %14773 = vmatpush3.bf16.msra.mxu1 %v14770_v45  ;;  %v17341_v45 = vsel %vm541_vm3, %v3040_v3, %v3041_v26 }
 0x236   :  { %14775 = vmatprep.subr.bf16.mxu1 %v14774_v41 }
 0x238   :  { %13628 = vmatmul.mubr.msk.f32.gmra.mrb[18].mxu1 %vm1902_vm4, %v17129_v56 }
 0x239   :  { %13630 = vmatprep.mubr.msk.f32.mxu1 %vm1902_vm4, %v17138_v7  ;;  %14777 = vmatpush3.bf16.msra.mxu1 %v14774_v41  ;;  %v14786_v41 = vpack.c.bf16 %v11668_v9, %v11667_v44 }
 0x23a   :  { %14779 = vmatprep.subr.bf16.mxu1 %v14778_v38 }
 0x23c   :  { %13631 = vmatmul.mubr.msk.f32.gmra.mrb[20].mxu1 %vm1902_vm4, %v17145_v60 }
 0x23d   :  { %13633 = vmatprep.mubr.msk.f32.mxu1 %vm1902_vm4, %v17153_v39 }
 0x240   :  { %13634 = vmatmul.mubr.msk.f32.gmra.mrb[22].mxu1 %vm1902_vm4, %v17341_v45 }
 0x241   :  { %13636 = vmatprep.mubr.msk.f32.mxu1 %vm1902_vm4, %v17163_v55  ;;  %v17361_v55 = vsel %vm541_vm3, %v3043_v59, %v3044_v31 }
 0x244   :  { %13637 = vmatmul.mubr.msk.f32.gmra.mrb[24].mxu1 %vm1902_vm4, %v17170_v49 }
 0x245   :  { %13639 = vmatprep.mubr.msk.f32.mxu1 %vm1902_vm4, %v17177_v21 }
 0x248   :  { %13640 = vmatmul.mubr.msk.f32.gmra.mrb[26].mxu1 %vm1902_vm4, %v17184_v29 }
 0x249   :  { %13642 = vmatprep.mubr.msk.f32.mxu1 %vm1902_vm4, %v17191_v19 }
 0x24c   :  { %13643 = vmatmul.mubr.msk.f32.gmra.mrb[28].mxu1 %vm1902_vm4, %v17198_v20 }
 0x24d   :  { %13645 = vmatprep.mubr.msk.f32.mxu1 %vm1902_vm4, %v17203_v30 }
 0x250   :  { %13646 = vmatmul.mubr.msk.f32.gmra.mrb[30].mxu1 %vm1902_vm4, %v17361_v55 }
 0x251   :  { %13656 = vmatprep.mubr.msk.f32.mxu1 %vm1902_vm4, %v16772_v53  ;;  %v17391_v53 = vld [vmem:[#allocation2 + $0x90] sm:$0xff] }
 0x254   :  { %13657 = vmatmul.mubr.msk.f32.vlgmr.msra.gmra.mrb[16].mxu1 %vm1902_vm4, %v16829_v34  ;;  %v11669_v34 = vld [vmem:[%s21168_s2 + $0x110] sm:$0xff] }
 0x255   :  { %13659 = vmatprep.mubr.msk.f32.mxu1 %vm1902_vm4, %v16813_v37  ;;  %14781 = vmatpush3.bf16.msra.mxu1 %v14778_v38  ;;  %v17409_v37 = vld [vmem:[#allocation2 + $0x130] sm:$0xff] }
 0x256   :  { %14783 = vmatprep.subr.bf16.mxu1 %v14782_v61 }
 0x258   :  { %13660 = vmatmul.mubr.msk.f32.gmra.mrb[18].mxu1 %vm1902_vm4, %v16876_v8  ;;  %v21218_v8 = vrot.slane %v17391_v53, 1 }
 0x259   :  { %13662 = vmatprep.mubr.msk.f32.mxu1 %vm1902_vm4, %v16861_v23  ;;  %14785 = vmatpush3.bf16.msra.mxu1 %v14782_v61  ;;  %v1980_v23 = vld [vmem:[#allocation2 + $0x98] sm:$0x3] }
 0x25a   :  { %14787 = vmatprep.subr.bf16.mxu1 %v14786_v41 }
 0x25c   :  { %13663 = vmatmul.mubr.msk.f32.gmra.mrb[20].mxu1 %vm1902_vm4, %v16915_v52  ;;  %v3391_v52 = vrot.slane %v1980_v23, 1 }
 0x25d   :  { %13665 = vmatprep.mubr.msk.f32.mxu1 %vm1902_vm4, %v17233_v54 }
 0x260   :  { %13666 = vmatmul.mubr.msk.f32.gmra.mrb[22].mxu1 %vm1902_vm4, %v17391_v53 }
 0x261   :  { %13668 = vmatprep.mubr.msk.f32.mxu1 %vm1902_vm4, %v16940_v48  ;;  %v21215_v48 = vrot.slane %v17409_v37, 2 }
 0x264   :  { %13669 = vmatmul.mubr.msk.f32.gmra.mrb[24].mxu1 %vm1902_vm4, %v16984_v33  ;;  %v11697_v33 = vld [vmem:[%s21168_s2 + $0x150] sm:$0xff] }
 0x265   :  { %13671 = vmatprep.mubr.msk.f32.mxu1 %vm1902_vm4, %v16972_v63  ;;  %v11670_v63 = vld [vmem:[%s21168_s2 + $0x118] sm:$0xff] }
 0x268   :  { %13672 = vmatmul.mubr.msk.f32.gmra.mrb[26].mxu1 %vm1902_vm4, %v17009_v62  ;;  %v14790_v62 = vpack.c.bf16 %v11670_v63, %v11669_v34 }
 0x269   :  { %13674 = vmatprep.mubr.msk.f32.mxu1 %vm1902_vm4, %v17000_v28  ;;  %v3567_v28 = vrot.slane %v1980_v23, 2 }
 0x26c   :  { %13675 = vmatmul.mubr.msk.f32.gmra.mrb[28].mxu1 %vm1902_vm4, %v17027_v12  ;;  %v17501_v12 = vld [vmem:[#allocation2 + $0x8] sm:$0x3] }
 0x26d   :  { %13677 = vmatprep.mubr.msk.f32.mxu1 %vm1902_vm4, %v17251_v42 }
 0x270   :  { %13678 = vmatmul.mubr.msk.f32.gmra.mrb[30].mxu1 %vm1902_vm4, %v17409_v37 }
 0x271   :  { %13688 = vmatprep.mubr.msk.f32.mxu1 %vm1902_vm4, %v16811_v11  ;;  %v3392_v11 = vsel %vm128_vm2, %v21218_v8, %v3391_v52 }
 0x274   :  { %13689 = vmatmul.mubr.msk.f32.vlgmr.msra.gmra.mrb[16].mxu1 %vm1902_vm4, %v16856_v24  ;;  %v21217_v24 = vrot.slane %v17409_v37, 1 }
 0x275   :  { %13691 = vmatprep.mubr.msk.f32.mxu1 %vm1902_vm4, %v16859_v22  ;;  %14789 = vmatpush3.bf16.msra.mxu1 %v14786_v41 }
 0x276   :  { %14791 = vmatprep.subr.bf16.mxu1 %v14790_v62 }
 0x278   :  { %13692 = vmatmul.mubr.msk.f32.gmra.mrb[18].mxu1 %vm1902_vm4, %v16901_v0  ;;  %v21216_v0 = vrot.slane %v17391_v53, 2 }
 0x279   :  { %13694 = vmatprep.mubr.msk.f32.mxu1 %vm1902_vm4, %v16913_v43  ;;  %14793 = vmatpush3.bf16.msra.mxu1 %v14790_v62  ;;  %v2000_v43 = vld [vmem:[#allocation2 + $0x138] sm:$0x3]  ;;  %v11693_v62 = vld [vmem:[%s21168_s2 + $0x130] sm:$0xff] }
 0x27a   :  { %v3394_v22 = vrot.slane %v2000_v43, 1 }
 0x27c   :  { %13695 = vmatmul.mubr.msk.f32.gmra.mrb[20].mxu1 %vm1902_vm4, %v16938_v18  ;;  %v3568_v18 = vsel %vm541_vm3, %v21216_v0, %v3567_v28 }
 0x27d   :  { %13697 = vmatprep.mubr.msk.f32.mxu1 %vm1902_vm4, %v17283_v15 }
 0x280   :  { %13698 = vmatmul.mubr.msk.f32.gmra.mrb[22].mxu1 %vm1902_vm4, %v3392_v11 }
 0x281   :  { %13700 = vmatprep.mubr.msk.f32.mxu1 %vm1902_vm4, %v16982_v17 }
 0x284   :  { %13701 = vmatmul.mubr.msk.f32.gmra.mrb[24].mxu1 %vm1902_vm4, %v16998_v58  ;;  %v11698_v58 = vld [vmem:[%s21168_s2 + $0x158] sm:$0xff] }
 0x285   :  { %13703 = vmatprep.mubr.msk.f32.mxu1 %vm1902_vm4, %v17007_v50  ;;  %v3395_v50 = vsel %vm128_vm2, %v21217_v24, %v3394_v22  ;;  %v11694_v22 = vld [vmem:[%s21168_s2 + $0x138] sm:$0xff] }
 0x288   :  { %13704 = vmatmul.mubr.msk.f32.gmra.mrb[26].mxu1 %vm1902_vm4, %v17020_v5  ;;  %v3570_v5 = vrot.slane %v2000_v43, 2 }
 0x289   :  { %13706 = vmatprep.mubr.msk.f32.mxu1 %vm1902_vm4, %v17025_v13  ;;  %v14798_v13 = vpack.c.bf16 %v11698_v58, %v11697_v33 }
 0x28a   :  { %v3571_v17 = vsel %vm541_vm3, %v21215_v48, %v3570_v5 }
 0x28b   :  { %14799 = vmatprep.subr.bf16.mxu0 %v14798_v13 }
 0x28c   :  { %13707 = vmatmul.mubr.msk.f32.gmra.mrb[28].mxu1 %vm1902_vm4, %v17036_v16  ;;  %14801 = vmatpush3.bf16.msra.mxu0 %v14798_v13  ;;  %v11691_v16 = vld [vmem:[%s21168_s2 + $0x120] sm:$0xff] }
 0x28d   :  { %13709 = vmatprep.mubr.msk.f32.mxu1 %vm1902_vm4, %v17303_v27 }
 0x290   :  { %13710 = vmatmul.mubr.msk.f32.gmra.mrb[30].mxu1 %vm1902_vm4, %v3395_v50 }
 0x291   :  { %13720 = vmatprep.mubr.msk.f32.mxu1 %vm1902_vm4, %v17115_v32  ;;  %v11692_v32 = vld [vmem:[%s21168_s2 + $0x128] sm:$0xff] }
 0x294   :  { %13721 = vmatmul.mubr.msk.f32.vlgmr.msra.gmra.mrb[16].mxu1 %vm1902_vm4, %v17122_v25  ;;  %v3900_v25 = vrot.slane %v17501_v12, 1 }
 0x295   :  { %13723 = vmatprep.mubr.msk.f32.mxu1 %vm1902_vm4, %v17129_v56  ;;  %v17510_v56 = vpack.c.bf16 %v11692_v32, %v11691_v16 }
 0x297   :  { %14803 = vmatprep.subr.bf16.mxu0 %v17510_v56 }
 0x298   :  { %13724 = vmatmul.mubr.msk.f32.gmra.mrb[18].mxu1 %vm1902_vm4, %v17138_v7  ;;  %v21277_v7 = vrot.slane %v16682_v40, 1 }
 0x299   :  { %13726 = vmatprep.mubr.msk.f32.mxu1 %vm1902_vm4, %v17145_v60 }
 0x29a   :  { %v3901_v60 = vsel %vm128_vm2, %v21277_v7, %v3900_v25 }
 0x29b   :  { %13752 = vmatprep.mubr.msk.f32.mxu0 %vm1902_vm4, %v3901_v60  ;;  %v14806_v60 = vpack.c.bf16 %v11694_v22, %v11693_v62 }
 0x29c   :  { %13727 = vmatmul.mubr.msk.f32.gmra.mrb[20].mxu1 %vm1902_vm4, %v17153_v39  ;;  %v17520_v39 = vld [vmem:[%s21169_s3 + $0x1] ss:$0 sm:$0xff] }
 0x29d   :  { %13729 = vmatprep.mubr.msk.f32.mxu1 %vm1902_vm4, %v17341_v45 }
 0x2a0   :  { %13730 = vmatmul.mubr.msk.f32.gmra.mrb[22].mxu1 %vm1902_vm4, %v3568_v18 }
 0x2a1   :  { %13732 = vmatprep.mubr.msk.f32.mxu1 %vm1902_vm4, %v17170_v49 }
 0x2a4   :  { %13733 = vmatmul.mubr.msk.f32.gmra.mrb[24].mxu1 %vm1902_vm4, %v17177_v21  ;;  %v17525_v21 = vld [vmem:[%s21170_s4 + $0x1] ss:$0 sm:$0xff] }
 0x2a5   :  { %13735 = vmatprep.mubr.msk.f32.mxu1 %vm1902_vm4, %v17184_v29 }
 0x2a8   :  { %13736 = vmatmul.mubr.msk.f32.gmra.mrb[26].mxu1 %vm1902_vm4, %v17191_v19 }
 0x2a9   :  { %13738 = vmatprep.mubr.msk.f32.mxu1 %vm1902_vm4, %v17198_v20 }
 0x2ac   :  { %13739 = vmatmul.mubr.msk.f32.gmra.mrb[28].mxu1 %vm1902_vm4, %v17203_v30 }
 0x2ad   :  { %13741 = vmatprep.mubr.msk.f32.mxu1 %vm1902_vm4, %v17361_v55 }
 0x2b0   :  { %13742 = vmatmul.mubr.msk.f32.gmra.mrb[30].mxu1 %vm1902_vm4, %v3571_v17 }
 0x367   :  { %v13722_v49 = vpop.f32.mrb[16].mxu1 }
 0x368   :  { %v3751_v29 = vmul.f32 %v13722_v49, %v17520_v39  ;;  %v3647_v19 = vpop.f32.mrb[17].mxu1  ;;  %v11731_v49 = vld [vmem:[%s21168_s2 + $0x160] sm:$0xff] }
 0x369   :  { %v3750_v20 = vmul.f32 %v17520_v39, %v3647_v19 }
 0x36a   :  { %v3775_v30 = vadd.f32 %v17525_v21, %v3751_v29 }
 0x36b   :  { %v3774_v54 = vadd.f32 %v17525_v21, %v3750_v20  ;;  %v13725_v42 = vpop.f32.mrb[18].mxu1 }
 0x36c   :  { %v3791_v15 = vmax.f32 %v3775_v30, 0.0  ;;  %v3753_v27 = vmul.f32 %v13725_v42, %v17520_v39  ;;  %v3657_v36 = vpop.f32.mrb[19].mxu1  ;;  %v11732_v42 = vld [vmem:[%s21168_s2 + $0x168] sm:$0xff] }
 0x36d   :  { %v3790_v4 = vmax.f32 %v3774_v54, 0.0  ;;  %v3752_v38 = vmul.f32 %v17520_v39, %v3657_v36 }
 0x36e   :  { %3807 = vst.msk [vmem:[#allocation2 + $0x21] sm:$0xff] %vm1902_vm4, %v3791_v15  ;;  %v3777_v3 = vadd.f32 %v17525_v21, %v3753_v27 }
 0x36f   :  { %3806 = vst.msk [vmem:[#allocation2 + $0x11] sm:$0xff] %vm1902_vm4, %v3790_v4  ;;  %v3776_v26 = vadd.f32 %v17525_v21, %v3752_v38  ;;  %v13728_v45 = vpop.f32.mrb[20].mxu1 }
 0x370   :  { %v3793_v59 = vmax.f32 %v3777_v3, 0.0  ;;  %v3755_v31 = vmul.f32 %v13728_v45, %v17520_v39  ;;  %v3667_v55 = vpop.f32.mrb[21].mxu1 }
 0x371   :  { %v3792_v47 = vmax.f32 %v3776_v26, 0.0  ;;  %v3754_v10 = vmul.f32 %v17520_v39, %v3667_v55 }
 0x372   :  { %3809 = vst.msk [vmem:[#allocation2 + $0x41] sm:$0xff] %vm1902_vm4, %v3793_v59  ;;  %v3779_v61 = vadd.f32 %v17525_v21, %v3755_v31 }
 0x373   :  { %3808 = vst.msk [vmem:[#allocation2 + $0x31] sm:$0xff] %vm1902_vm4, %v3792_v47  ;;  %v3778_v44 = vadd.f32 %v17525_v21, %v3754_v10  ;;  %v13731_v9 = vpop.f32.mrb[22].mxu1 }
 0x374   :  { %v3795_v41 = vmax.f32 %v3779_v61, 0.0  ;;  %v3757_v34 = vmul.f32 %v13731_v9, %v17520_v39  ;;  %v3677_v63 = vpop.f32.mrb[23].mxu1  ;;  %v17603_v61 = vpack.c.bf16 %v11732_v42, %v11731_v49 }
 0x375   :  { %v3794_v23 = vmax.f32 %v3778_v44, 0.0  ;;  %v3756_v52 = vmul.f32 %v17520_v39, %v3677_v63  ;;  %v17548_v11 = vld [vmem:[#allocation2 + $0x20] sm:$0xff]  ;;  %v17550_v43 = vld [vmem:[#allocation2 + $0x28] sm:$0x3] }
 0x376   :  { %3811 = vst.msk [vmem:[#allocation2 + $0x61] sm:$0xff] %vm1902_vm4, %v3795_v41  ;;  %v3781_v50 = vadd.f32 %v17525_v21, %v3757_v34  ;;  %v17557_v28 = vld [vmem:[#allocation2 + $0x10] sm:$0xff]  ;;  %v17559_v18 = vld [vmem:[#allocation2 + $0x18] sm:$0x3]  ;;  %v3905_v5 = vrot.slane %v17548_v11, 1  ;;  %v3906_v17 = vrot.slane %v17550_v43, 1 }
 0x377   :  { %3810 = vst.msk [vmem:[#allocation2 + $0x51] sm:$0xff] %vm1902_vm4, %v3794_v23  ;;  %v3780_v33 = vadd.f32 %v17525_v21, %v3756_v52  ;;  %v13734_v58 = vpop.f32.mrb[24].mxu1  ;;  %v3902_v13 = vrot.slane %v17557_v28, 1  ;;  %v3903_v16 = vrot.slane %v17559_v18, 1  ;;  %v17613_v63 = vld [vmem:[#allocation2 + $0xa8] sm:$0x3] }
 0x378   :  { %v3797_v32 = vmax.f32 %v3781_v50, 0.0  ;;  %v3759_v25 = vmul.f32 %v13734_v58, %v17520_v39  ;;  %v3687_v7 = vpop.f32.mrb[25].mxu1  ;;  %v17587_v27 = vsel %vm128_vm2, %v3905_v5, %v3906_v17 }
 0x379   :  { %v3796_v29 = vmax.f32 %v3780_v33, 0.0  ;;  %v3758_v19 = vmul.f32 %v17520_v39, %v3687_v7  ;;  %v17573_v20 = vsel %vm128_vm2, %v3902_v13, %v3903_v16  ;;  %v17575_v30 = vld [vmem:[#allocation2 + $0x40] sm:$0xff]  ;;  %v17577_v54 = vld [vmem:[#allocation2 + $0x48] sm:$0x3]  ;;  %v3924_v7 = vrot.slane %v17613_v63, 1 }
 0x37a   :  { %3813 = vst.msk [vmem:[#allocation2 + $0x81] sm:$0xff] %vm1902_vm4, %v3797_v32  ;;  %v3783_v15 = vadd.f32 %v17525_v21, %v3759_v25  ;;  %13753 = vmatmul.mubr.msk.f32.vlgmr.msra.gmra.mrb[16].mxu0 %vm1902_vm4, %v17573_v20  ;;  %v17589_v36 = vld [vmem:[#allocation2 + $0x30] sm:$0xff]  ;;  %v17591_v4 = vld [vmem:[#allocation2 + $0x38] sm:$0x3]  ;;  %v3911_v38 = vrot.slane %v17575_v30, 1  ;;  %v3912_v3 = vrot.slane %v17577_v54, 1 }
 0x37b   :  { %3812 = vst.msk [vmem:[#allocation2 + $0x71] sm:$0xff] %vm1902_vm4, %v3796_v29  ;;  %v3782_v26 = vadd.f32 %v17525_v21, %v3758_v19  ;;  %v13737_v45 = vpop.f32.mrb[26].mxu1  ;;  %13755 = vmatprep.mubr.msk.f32.mxu0 %vm1902_vm4, %v17587_v27  ;;  %14805 = vmatpush3.bf16.msra.mxu0 %v17510_v56  ;;  %v3908_v59 = vrot.slane %v17589_v36, 1  ;;  %v3909_v31 = vrot.slane %v17591_v4, 1  ;;  %v4316_v8 = vrot.slane %v17591_v4, 2 }
 0x37c   :  { %v3799_v55 = vmax.f32 %v3783_v15, 0.0  ;;  %v3761_v47 = vmul.f32 %v13737_v45, %v17520_v39  ;;  %v3697_v10 = vpop.f32.mrb[27].mxu1  ;;  %14807 = vmatprep.subr.bf16.mxu0 %v14806_v60  ;;  %v17620_v23 = vsel %vm128_vm2, %v3911_v38, %v3912_v3  ;;  %v14826_v4 = vpack.c.bf16 %v11772_v57, %v11771_v51 }
 0x37d   :  { %v3798_v44 = vmax.f32 %v3782_v26, 0.0  ;;  %v3760_v9 = vmul.f32 %v17520_v39, %v3697_v10  ;;  %v17607_v41 = vsel %vm128_vm2, %v3908_v59, %v3909_v31  ;;  %v17609_v34 = vld [vmem:[#allocation2 + $0x60] sm:$0xff]  ;;  %v17611_v56 = vld [vmem:[#allocation2 + $0x68] sm:$0x3]  ;;  %v21278_v10 = vrot.slane %v16865_v2, 1 }
 0x37e   :  { %3815 = vst.msk [vmem:[#allocation2 + $0xc1] sm:$0xff] %vm1902_vm4, %v3799_v55  ;;  %v3785_v62 = vadd.f32 %v17525_v21, %v3761_v47  ;;  %13756 = vmatmul.mubr.msk.f32.gmra.mrb[18].mxu0 %vm1902_vm4, %v17607_v41  ;;  %v17622_v52 = vld [vmem:[#allocation2 + $0x50] sm:$0xff]  ;;  %v17624_v22 = vld [vmem:[#allocation2 + $0x58] sm:$0x3]  ;;  %v3917_v50 = vrot.slane %v17609_v34, 1  ;;  %v3918_v5 = vrot.slane %v17611_v56, 1 }
 0x37f   :  { %3814 = vst.msk [vmem:[#allocation2 + $0xb1] sm:$0xff] %vm1902_vm4, %v3798_v44  ;;  %v3784_v17 = vadd.f32 %v17525_v21, %v3760_v9  ;;  %v13740_v33 = vpop.f32.mrb[28].mxu1  ;;  %13758 = vmatprep.mubr.msk.f32.mxu0 %vm1902_vm4, %v17620_v23  ;;  %v3914_v58 = vrot.slane %v17622_v52, 1  ;;  %v3915_v13 = vrot.slane %v17624_v22, 1  ;;  %14809 = vmatpush3.bf16.msra.mxu0 %v14806_v60  ;;  %v3925_v44 = vsel %vm128_vm2, %v21278_v10, %v3924_v7 }
 0x380   :  { %v3801_v16 = vmax.f32 %v3785_v62, 0.0  ;;  %v3763_v32 = vmul.f32 %v13740_v33, %v17520_v39  ;;  %v3707_v25 = vpop.f32.mrb[29].mxu1  ;;  %14811 = vmatprep.subr.bf16.mxu0 %v17603_v61  ;;  %v17646_v60 = vsel %vm128_vm2, %v3917_v50, %v3918_v5  ;;  %v4331_v57 = vrot.slane %v17613_v63, 2 }
 0x381   :  { %v3800_v49 = vmax.f32 %v3784_v17, 0.0  ;;  %v3762_v29 = vmul.f32 %v17520_v39, %v3707_v25  ;;  %v17639_v19 = vsel %vm128_vm2, %v3914_v58, %v3915_v13 }
 0x382   :  { %3817 = vst.msk [vmem:[#allocation2 + $0xe1] sm:$0xff] %vm1902_vm4, %v3801_v16  ;;  %v3787_v42 = vadd.f32 %v17525_v21, %v3763_v32  ;;  %13759 = vmatmul.mubr.msk.f32.gmra.mrb[20].mxu0 %vm1902_vm4, %v17639_v19  ;;  %v17648_v15 = vld [vmem:[#allocation2 + $0x70] sm:$0xff]  ;;  %v17650_v38 = vld [vmem:[#allocation2 + $0x78] sm:$0x3] }
 0x383   :  { %3816 = vst.msk [vmem:[#allocation2 + $0xd1] sm:$0xff] %vm1902_vm4, %v3800_v49  ;;  %v3786_v3 = vadd.f32 %v17525_v21, %v3762_v29  ;;  %v13743_v26 = vpop.f32.mrb[30].mxu1  ;;  %13761 = vmatprep.mubr.msk.f32.mxu0 %vm1902_vm4, %v17646_v60  ;;  %v3920_v45 = vrot.slane %v17648_v15, 1  ;;  %v3921_v59 = vrot.slane %v17650_v38, 1 }
 0x384   :  { %v3803_v31 = vmax.f32 %v3787_v42, 0.0  ;;  %v3765_v55 = vmul.f32 %v13743_v26, %v17520_v39  ;;  %v3717_v47 = vpop.f32.mrb[31].mxu1 }
 0x385   :  { %v3802_v9 = vmax.f32 %v3786_v3, 0.0  ;;  %v3764_v62 = vmul.f32 %v17520_v39, %v3717_v47  ;;  %v17664_v50 = vsel %vm128_vm2, %v3920_v45, %v3921_v59  ;;  %v17666_v5 = vld [vmem:[#allocation2 + $0xc0] sm:$0xff]  ;;  %v17668_v17 = vld [vmem:[#allocation2 + $0xc8] sm:$0x3] }
 0x386   :  { %3819 = vst.msk [vmem:[#allocation2 + $0x101] sm:$0xff] %vm1902_vm4, %v3803_v31  ;;  %v3789_v33 = vadd.f32 %v17525_v21, %v3765_v55  ;;  %13762 = vmatmul.mubr.msk.f32.gmra.mrb[22].mxu0 %vm1902_vm4, %v17664_v50  ;;  %v17674_v58 = vld [vmem:[#allocation2 + $0xb0] sm:$0xff]  ;;  %v17676_v13 = vld [vmem:[#allocation2 + $0xb8] sm:$0x3]  ;;  %v3929_v39 = vrot.slane %v17666_v5, 1  ;;  %v3930_v16 = vrot.slane %v17668_v17, 1 }
 0x387   :  { %3818 = vst.msk [vmem:[#allocation2 + $0xf1] sm:$0xff] %vm1902_vm4, %v3802_v9  ;;  %v3788_v32 = vadd.f32 %v17525_v21, %v3764_v62  ;;  %13764 = vmatprep.mubr.msk.f32.mxu0 %vm1902_vm4, %v3925_v44  ;;  %v3926_v25 = vrot.slane %v17674_v58, 1  ;;  %v3927_v7 = vrot.slane %v17676_v13, 1 }
 0x388   :  { %v3805_v49 = vmax.f32 %v3789_v33, 0.0  ;;  %v17696_v21 = vsel %vm128_vm2, %v3929_v39, %v3930_v16 }
 0x389   :  { %v3804_v29 = vmax.f32 %v3788_v32, 0.0  ;;  %v17686_v42 = vsel %vm128_vm2, %v3926_v25, %v3927_v7  ;;  %v17688_v3 = vld [vmem:[#allocation2 + $0xe0] sm:$0xff]  ;;  %v17690_v26 = vld [vmem:[#allocation2 + $0xe8] sm:$0x3] }
 0x38a   :  { %3821 = vst.msk [vmem:[#allocation2 + $0x121] sm:$0xff] %vm1902_vm4, %v3805_v49  ;;  %13765 = vmatmul.mubr.msk.f32.gmra.mrb[24].mxu0 %vm1902_vm4, %v17686_v42  ;;  %v17698_v45 = vld [vmem:[#allocation2 + $0xd0] sm:$0xff]  ;;  %v17700_v59 = vld [vmem:[#allocation2 + $0xd8] sm:$0x3]  ;;  %v3935_v31 = vrot.slane %v17688_v3, 1  ;;  %v3936_v55 = vrot.slane %v17690_v26, 1 }
 0x38b   :  { %3820 = vst.msk [vmem:[#allocation2 + $0x111] sm:$0xff] %vm1902_vm4, %v3804_v29  ;;  %13767 = vmatprep.mubr.msk.f32.mxu0 %vm1902_vm4, %v17696_v21  ;;  %v3932_v47 = vrot.slane %v17698_v45, 1  ;;  %v3933_v10 = vrot.slane %v17700_v59, 1 }
 0x38c   :  { %v17719_v33 = vsel %vm128_vm2, %v3935_v31, %v3936_v55 }
 0x38d   :  { %v17710_v44 = vsel %vm128_vm2, %v3932_v47, %v3933_v10  ;;  %v17712_v9 = vld [vmem:[#allocation2 + $0x100] sm:$0xff]  ;;  %v17714_v62 = vld [vmem:[#allocation2 + $0x108] sm:$0x3] }
 0x38e   :  { %13768 = vmatmul.mubr.msk.f32.gmra.mrb[26].mxu0 %vm1902_vm4, %v17710_v44  ;;  %v17721_v39 = vld [vmem:[#allocation2 + $0xf0] sm:$0xff]  ;;  %v17723_v16 = vld [vmem:[#allocation2 + $0xf8] sm:$0x3]  ;;  %v3941_v32 = vrot.slane %v17712_v9, 1  ;;  %v3942_v25 = vrot.slane %v17714_v62, 1 }
 0x38f   :  { %13770 = vmatprep.mubr.msk.f32.mxu0 %vm1902_vm4, %v17719_v33  ;;  %v3938_v7 = vrot.slane %v17721_v39, 1  ;;  %v3939_v49 = vrot.slane %v17723_v16, 1 }
 0x390   :  { %v17737_v31 = vsel %vm128_vm2, %v3941_v32, %v3942_v25  ;;  %v11734_v32 = vld [vmem:[%s21168_s2 + $0x178] sm:$0xff]  ;;  %v15769_v25 = vld [vmem:[#allocation2] sm:$0xff] }
 0x391   :  { %v17732_v29 = vsel %vm128_vm2, %v3938_v7, %v3939_v49  ;;  %v11733_v49 = vld [vmem:[%s21168_s2 + $0x170] sm:$0xff] }
 0x392   :  { %13771 = vmatmul.mubr.msk.f32.gmra.mrb[28].mxu0 %vm1902_vm4, %v17732_v29  ;;  %v17739_v55 = vld [vmem:[#allocation2 + $0x110] sm:$0xff]  ;;  %v17741_v47 = vld [vmem:[#allocation2 + $0x118] sm:$0x3]  ;;  %v14814_v0 = vpack.c.bf16 %v11734_v32, %v11733_v49  ;;  %v21279_v49 = vrot.slane %v16682_v40, 2  ;;  %v4313_v40 = vrot.slane %v17550_v43, 2 }
 0x393   :  { %13773 = vmatprep.mubr.msk.f32.mxu0 %vm1902_vm4, %v17737_v31  ;;  %v3944_v10 = vrot.slane %v17739_v55, 1  ;;  %v3945_v48 = vrot.slane %v17741_v47, 1 }
 0x395   :  { %v17748_v7 = vsel %vm128_vm2, %v3944_v10, %v3945_v48  ;;  %v11751_v48 = vld [vmem:[%s21168_s2 + $0x180] sm:$0xff]  ;;  %v11752_v10 = vld [vmem:[%s21168_s2 + $0x188] sm:$0xff] }
 0x396   :  { %13774 = vmatmul.mubr.msk.f32.gmra.mrb[30].mxu0 %vm1902_vm4, %v17748_v7  ;;  %v14818_v24 = vpack.c.bf16 %v11752_v10, %v11751_v48  ;;  %v4310_v48 = vrot.slane %v17559_v18, 2  ;;  %v11753_v10 = vld [vmem:[%s21168_s2 + $0x190] sm:$0xff] }
 0x397   :  { %13784 = vmatprep.mubr.msk.f32.mxu0 %vm1902_vm4, %v15769_v25  ;;  %v4309_v25 = vrot.slane %v17557_v28, 2 }
 0x399   :  { %v17811_v18 = vsel %vm541_vm3, %v4309_v25, %v4310_v48  ;;  %v4319_v25 = vrot.slane %v17577_v54, 2  ;;  %v4324_v54 = vrot.slane %v17609_v34, 2 }
 0x39a   :  { %13785 = vmatmul.mubr.msk.f32.vlgmr.msra.gmra.mrb[16].mxu0 %vm1902_vm4, %v17557_v28 }
 0x39b   :  { %13787 = vmatprep.mubr.msk.f32.mxu0 %vm1902_vm4, %v17548_v11  ;;  %14813 = vmatpush3.bf16.msra.mxu0 %v17603_v61  ;;  %v15770_v61 = vld [vmem:[#allocation2 + $0xa0] sm:$0xff] }
 0x39c   :  { %14815 = vmatprep.subr.bf16.mxu0 %v14814_v0 }
 0x39e   :  { %13788 = vmatmul.mubr.msk.f32.gmra.mrb[18].mxu0 %vm1902_vm4, %v17589_v36 }
 0x39f   :  { %13790 = vmatprep.mubr.msk.f32.mxu0 %vm1902_vm4, %v17575_v30  ;;  %14817 = vmatpush3.bf16.msra.mxu0 %v14814_v0  ;;  %v4307_v0 = vrot.slane %v17501_v12, 2  ;;  %v11754_v12 = vld [vmem:[%s21168_s2 + $0x198] sm:$0xff] }
 0x3a0   :  { %14819 = vmatprep.subr.bf16.mxu0 %v14818_v24 }
 0x3a1   :  { %v4308_v32 = vsel %vm541_vm3, %v21279_v49, %v4307_v0  ;;  %v14822_v0 = vpack.c.bf16 %v11754_v12, %v11753_v10  ;;  %v4315_v49 = vrot.slane %v17589_v36, 2  ;;  %v4321_v10 = vrot.slane %v17622_v52, 2 }
 0x3a2   :  { %13791 = vmatmul.mubr.msk.f32.gmra.mrb[20].mxu0 %vm1902_vm4, %v17622_v52  ;;  %v4322_v12 = vrot.slane %v17624_v22, 2 }
 0x3a3   :  { %13793 = vmatprep.mubr.msk.f32.mxu0 %vm1902_vm4, %v17609_v34  ;;  %v17831_v48 = vsel %vm541_vm3, %v4315_v49, %v4316_v8  ;;  %v4327_v8 = vrot.slane %v17648_v15, 2  ;;  %v4333_v49 = vrot.slane %v17674_v58, 2 }
 0x3a4   :  { %v17846_v51 = vsel %vm541_vm3, %v4321_v10, %v4322_v12  ;;  %v4339_v10 = vrot.slane %v17698_v45, 2  ;;  %v4340_v12 = vrot.slane %v17700_v59, 2  ;;  %v4346_v59 = vrot.slane %v17723_v16, 2 }
 0x3a5   :  { %v4352_v16 = vrot.slane %v17741_v47, 2  ;;  %v11774_v47 = vld [vmem:[%s21168_s2 + $0x1b8] sm:$0xff] }
 0x3a6   :  { %13794 = vmatmul.mubr.msk.f32.gmra.mrb[22].mxu0 %vm1902_vm4, %v17648_v15 }
 0x3a7   :  { %13796 = vmatprep.mubr.msk.f32.mxu0 %vm1902_vm4, %v15770_v61  ;;  %v4312_v61 = vrot.slane %v17548_v11, 2 }
 0x3a9   :  { %v17824_v43 = vsel %vm541_vm3, %v4312_v61, %v4313_v40  ;;  %v4325_v40 = vrot.slane %v17611_v56, 2  ;;  %v21280_v56 = vrot.slane %v16865_v2, 2 }
 0x3aa   :  { %13797 = vmatmul.mubr.msk.f32.gmra.mrb[24].mxu0 %vm1902_vm4, %v17674_v58 }
 0x3ab   :  { %13799 = vmatprep.mubr.msk.f32.mxu0 %vm1902_vm4, %v17666_v5  ;;  %v17853_v22 = vsel %vm541_vm3, %v4324_v54, %v4325_v40  ;;  %v4332_v63 = vsel %vm541_vm3, %v21280_v56, %v4331_v57  ;;  %v4342_v54 = vrot.slane %v17688_v3, 2  ;;  %v4343_v40 = vrot.slane %v17690_v26, 2 }
 0x3ac   :  { %v4345_v57 = vrot.slane %v17721_v39, 2  ;;  %v4349_v26 = vrot.slane %v17714_v62, 2 }
 0x3ae   :  { %13800 = vmatmul.mubr.msk.f32.gmra.mrb[26].mxu0 %vm1902_vm4, %v17698_v45  ;;  %v17899_v56 = vsel %vm541_vm3, %v4345_v57, %v4346_v59  ;;  %v11811_v57 = vld [vmem:[%s21168_s2 + $0x1e0] sm:$0xff]  ;;  %v11812_v59 = vld [vmem:[%s21168_s2 + $0x1e8] sm:$0xff] }
 0x3af   :  { %13802 = vmatprep.mubr.msk.f32.mxu0 %vm1902_vm4, %v17688_v3 }
 0x3b2   :  { %13803 = vmatmul.mubr.msk.f32.gmra.mrb[28].mxu0 %vm1902_vm4, %v17721_v39 }
 0x3b3   :  { %13805 = vmatprep.mubr.msk.f32.mxu0 %vm1902_vm4, %v17712_v9 }
 0x3b6   :  { %13806 = vmatmul.mubr.msk.f32.gmra.mrb[30].mxu0 %vm1902_vm4, %v17739_v55 }
 0x3b7   :  { %13816 = vmatprep.mubr.msk.f32.mxu0 %vm1902_vm4, %v4308_v32  ;;  %v4318_v32 = vrot.slane %v17575_v30, 2 }
 0x3b9   :  { %v17838_v61 = vsel %vm541_vm3, %v4318_v32, %v4319_v25  ;;  %v4336_v32 = vrot.slane %v17666_v5, 2  ;;  %v4337_v25 = vrot.slane %v17668_v17, 2  ;;  %v17885_v17 = vsel %vm541_vm3, %v4339_v10, %v4340_v12  ;;  %v11792_v10 = vld [vmem:[%s21168_s2 + $0x1c8] sm:$0xff] }
 0x3ba   :  { %13817 = vmatmul.mubr.msk.f32.vlgmr.msra.gmra.mrb[16].mxu0 %vm1902_vm4, %v17811_v18 }
 0x3bb   :  { %13819 = vmatprep.mubr.msk.f32.mxu0 %vm1902_vm4, %v17824_v43  ;;  %14821 = vmatpush3.bf16.msra.mxu0 %v14818_v24  ;;  %v4328_v24 = vrot.slane %v17650_v38, 2  ;;  %v4334_v38 = vrot.slane %v17676_v13, 2  ;;  %v17878_v13 = vsel %vm541_vm3, %v4336_v32, %v4337_v25  ;;  %v11791_v25 = vld [vmem:[%s21168_s2 + $0x1c0] sm:$0xff] }
 0x3bc   :  { %14823 = vmatprep.subr.bf16.mxu0 %v14822_v0  ;;  %v14834_v12 = vpack.c.bf16 %v11792_v10, %v11791_v25  ;;  %v11813_v25 = vld [vmem:[%s21168_s2 + $0x1f0] sm:$0xff]  ;;  %v11814_v10 = vld [vmem:[%s21168_s2 + $0x1f8] sm:$0xff] }
 0x3bd   :  { %v17871_v2 = vsel %vm541_vm3, %v4333_v49, %v4334_v38  ;;  %v11773_v38 = vld [vmem:[%s21168_s2 + $0x1b0] sm:$0xff] }
 0x3be   :  { %13820 = vmatmul.mubr.msk.f32.gmra.mrb[18].mxu0 %vm1902_vm4, %v17831_v48  ;;  %v14830_v32 = vpack.c.bf16 %v11774_v47, %v11773_v38  ;;  %v3859_v38 = vld [vmem:[#allocation2 + $0x128] sm:$0x3] }
 0x3bf   :  { %13822 = vmatprep.mubr.msk.f32.mxu0 %vm1902_vm4, %v17838_v61  ;;  %14825 = vmatpush3.bf16.msra.mxu0 %v14822_v0  ;;  %v17861_v0 = vsel %vm541_vm3, %v4327_v8, %v4328_v24  ;;  %v17892_v8 = vsel %vm541_vm3, %v4342_v54, %v4343_v40  ;;  %v4348_v24 = vrot.slane %v17712_v9, 2  ;;  %v11794_v54 = vld [vmem:[%s21168_s2 + $0x1d8] sm:$0xff] }
 0x3c0   :  { %14827 = vmatprep.subr.bf16.mxu0 %v14826_v4 }
 0x3c1   :  { %v17906_v49 = vsel %vm541_vm3, %v4348_v24, %v4349_v26  ;;  %v14842_v24 = vpack.c.bf16 %v11812_v59, %v11811_v57  ;;  %v11831_v57 = vld [vmem:[%s21168_s2 + $0x200] sm:$0xff]  ;;  %v11832_v59 = vld [vmem:[%s21168_s2 + $0x208] sm:$0xff] }
 0x3c2   :  { %13823 = vmatmul.mubr.msk.f32.gmra.mrb[20].mxu0 %vm1902_vm4, %v17846_v51 }
 0x3c3   :  { %13825 = vmatprep.mubr.msk.f32.mxu0 %vm1902_vm4, %v17853_v22 }
 0x3c6   :  { %13826 = vmatmul.mubr.msk.f32.gmra.mrb[22].mxu0 %vm1902_vm4, %v17861_v0 }
 0x3c7   :  { %13828 = vmatprep.mubr.msk.f32.mxu0 %vm1902_vm4, %v4332_v63  ;;  %v4351_v63 = vrot.slane %v17739_v55, 2 }
 0x3c9   :  { %v17911_v62 = vsel %vm541_vm3, %v4351_v63, %v4352_v16 }
 0x3ca   :  { %13829 = vmatmul.mubr.msk.f32.gmra.mrb[24].mxu0 %vm1902_vm4, %v17871_v2 }
 0x3cb   :  { %13831 = vmatprep.mubr.msk.f32.mxu0 %vm1902_vm4, %v17878_v13 }
 0x3ce   :  { %13832 = vmatmul.mubr.msk.f32.gmra.mrb[26].mxu0 %vm1902_vm4, %v17885_v17 }
 0x3cf   :  { %13834 = vmatprep.mubr.msk.f32.mxu0 %vm1902_vm4, %v17892_v8 }
 0x3d2   :  { %13835 = vmatmul.mubr.msk.f32.gmra.mrb[28].mxu0 %vm1902_vm4, %v17899_v56 }
 0x3d3   :  { %13837 = vmatprep.mubr.msk.f32.mxu0 %vm1902_vm4, %v17906_v49 }
 0x3d6   :  { %13838 = vmatmul.mubr.msk.f32.gmra.mrb[30].mxu0 %vm1902_vm4, %v17911_v62 }
 0x3d7   :  { %13848 = vmatprep.mubr.msk.f32.mxu0 %vm1902_vm4, %v17557_v28  ;;  %v17941_v28 = vld [vmem:[#allocation2 + $0x80] sm:$0xff] }
 0x3d8   :  { %v4726_v26 = vrot.slane %v17941_v28, 1 }
 0x3da   :  { %13849 = vmatmul.mubr.msk.f32.vlgmr.msra.gmra.mrb[16].mxu0 %vm1902_vm4, %v17548_v11 }
 0x3db   :  { %13851 = vmatprep.mubr.msk.f32.mxu0 %vm1902_vm4, %v17589_v36  ;;  %14829 = vmatpush3.bf16.msra.mxu0 %v14826_v4  ;;  %v17959_v4 = vld [vmem:[#allocation2 + $0x120] sm:$0xff] }
 0x3dc   :  { %14831 = vmatprep.subr.bf16.mxu0 %v14830_v32  ;;  %v4729_v47 = vrot.slane %v17959_v4, 1 }
 0x3de   :  { %13852 = vmatmul.mubr.msk.f32.gmra.mrb[18].mxu0 %vm1902_vm4, %v17575_v30 }
 0x3df   :  { %13854 = vmatprep.mubr.msk.f32.mxu0 %vm1902_vm4, %v17622_v52  ;;  %14833 = vmatpush3.bf16.msra.mxu0 %v14830_v32  ;;  %v4730_v32 = vrot.slane %v3859_v38, 1 }
 0x3e0   :  { %14835 = vmatprep.subr.bf16.mxu0 %v14834_v12 }
 0x3e2   :  { %13855 = vmatmul.mubr.msk.f32.gmra.mrb[20].mxu0 %vm1902_vm4, %v17609_v34 }
 0x3e3   :  { %13857 = vmatprep.mubr.msk.f32.mxu0 %vm1902_vm4, %v17648_v15 }
 0x3e6   :  { %13858 = vmatmul.mubr.msk.f32.gmra.mrb[22].mxu0 %vm1902_vm4, %v17941_v28 }
 0x3e7   :  { %13860 = vmatprep.mubr.msk.f32.mxu0 %vm1902_vm4, %v17674_v58  ;;  %v11793_v58 = vld [vmem:[%s21168_s2 + $0x1d0] sm:$0xff] }
 0x3e8   :  { %v14838_v40 = vpack.c.bf16 %v11794_v54, %v11793_v58  ;;  %v11880_v58 = vld [vmem:[%s21168_s2 + $0x268] sm:$0xff] }
 0x3ea   :  { %13861 = vmatmul.mubr.msk.f32.gmra.mrb[24].mxu0 %vm1902_vm4, %v17666_v5 }
 0x3eb   :  { %13863 = vmatprep.mubr.msk.f32.mxu0 %vm1902_vm4, %v17698_v45 }
 0x3ee   :  { %13864 = vmatmul.mubr.msk.f32.gmra.mrb[26].mxu0 %vm1902_vm4, %v17688_v3 }
 0x3ef   :  { %13866 = vmatprep.mubr.msk.f32.mxu0 %vm1902_vm4, %v17721_v39 }
 0x3f2   :  { %13867 = vmatmul.mubr.msk.f32.gmra.mrb[28].mxu0 %vm1902_vm4, %v17712_v9 }
 0x3f3   :  { %13869 = vmatprep.mubr.msk.f32.mxu0 %vm1902_vm4, %v17739_v55 }
 0x3f6   :  { %13870 = vmatmul.mubr.msk.f32.gmra.mrb[30].mxu0 %vm1902_vm4, %v17959_v4 }
 0x3f7   :  { %13880 = vmatprep.mubr.msk.f32.mxu0 %vm1902_vm4, %v17573_v20  ;;  %v3839_v20 = vld [vmem:[#allocation2 + $0x88] sm:$0x3] }
 0x3f8   :  { %v4727_v63 = vrot.slane %v3839_v20, 1 }
 0x3fa   :  { %13881 = vmatmul.mubr.msk.f32.vlgmr.msra.gmra.mrb[16].mxu0 %vm1902_vm4, %v17587_v27  ;;  %v17991_v16 = vsel %vm128_vm2, %v4726_v26, %v4727_v63  ;;  %v4902_v26 = vrot.slane %v17941_v28, 2  ;;  %v4903_v63 = vrot.slane %v3839_v20, 2  ;;  %v4905_v20 = vrot.slane %v17959_v4, 2 }
 0x3fb   :  { %13883 = vmatprep.mubr.msk.f32.mxu0 %vm1902_vm4, %v17607_v41  ;;  %14837 = vmatpush3.bf16.msra.mxu0 %v14834_v12  ;;  %v11879_v12 = vld [vmem:[%s21168_s2 + $0x260] sm:$0xff] }
 0x3fc   :  { %14839 = vmatprep.subr.bf16.mxu0 %v14838_v40  ;;  %v14866_v54 = vpack.c.bf16 %v11880_v58, %v11879_v12  ;;  %v11852_v12 = vld [vmem:[%s21168_s2 + $0x228] sm:$0xff] }
 0x3fe   :  { %13884 = vmatmul.mubr.msk.f32.gmra.mrb[18].mxu0 %vm1902_vm4, %v17620_v23  ;;  %14867 = vmatprep.subr.bf16.mxu1 %v14866_v54 }
 0x3ff   :  { %13886 = vmatprep.mubr.msk.f32.mxu0 %vm1902_vm4, %v17639_v19  ;;  %14841 = vmatpush3.bf16.msra.mxu0 %v14838_v40  ;;  %v14846_v40 = vpack.c.bf16 %v11814_v10, %v11813_v25  ;;  %v11834_v25 = vld [vmem:[%s21168_s2 + $0x218] sm:$0xff]  ;;  %v11851_v10 = vld [vmem:[%s21168_s2 + $0x220] sm:$0xff] }
 0x400   :  { %14843 = vmatprep.subr.bf16.mxu0 %v14842_v24  ;;  %14869 = vmatpush3.bf16.msra.mxu1 %v14866_v54  ;;  %v14858_v58 = vpack.c.bf16 %v11852_v12, %v11851_v10 }
 0x402   :  { %13887 = vmatmul.mubr.msk.f32.gmra.mrb[20].mxu0 %vm1902_vm4, %v17646_v60 }
 0x403   :  { %13889 = vmatprep.mubr.msk.f32.mxu0 %vm1902_vm4, %v17664_v50 }
 0x406   :  { %13890 = vmatmul.mubr.msk.f32.gmra.mrb[22].mxu0 %vm1902_vm4, %v17991_v16 }
 0x407   :  { %13892 = vmatprep.mubr.msk.f32.mxu0 %vm1902_vm4, %v17686_v42  ;;  %v18011_v42 = vsel %vm128_vm2, %v4729_v47, %v4730_v32  ;;  %v4906_v47 = vrot.slane %v3859_v38, 2  ;;  %v11833_v32 = vld [vmem:[%s21168_s2 + $0x210] sm:$0xff] }
 0x408   :  { %v14854_v38 = vpack.c.bf16 %v11834_v25, %v11833_v32 }
 0x40a   :  { %13893 = vmatmul.mubr.msk.f32.gmra.mrb[24].mxu0 %vm1902_vm4, %v17696_v21 }
 0x40b   :  { %13895 = vmatprep.mubr.msk.f32.mxu0 %vm1902_vm4, %v17710_v44 }
 0x40e   :  { %13896 = vmatmul.mubr.msk.f32.gmra.mrb[26].mxu0 %vm1902_vm4, %v17719_v33 }
 0x40f   :  { %13898 = vmatprep.mubr.msk.f32.mxu0 %vm1902_vm4, %v17732_v29 }
 0x412   :  { %13899 = vmatmul.mubr.msk.f32.gmra.mrb[28].mxu0 %vm1902_vm4, %v17737_v31 }
 0x413   :  { %13901 = vmatprep.mubr.msk.f32.mxu0 %vm1902_vm4, %v17748_v7 }
 0x416   :  { %13902 = vmatmul.mubr.msk.f32.gmra.mrb[30].mxu0 %vm1902_vm4, %v18011_v42 }
 0x417   :  { %13912 = vmatprep.mubr.msk.f32.mxu0 %vm1902_vm4, %v17811_v18  ;;  %v14850_v18 = vpack.c.bf16 %v11832_v59, %v11831_v57 }
 0x41a   :  { %13913 = vmatmul.mubr.msk.f32.vlgmr.msra.gmra.mrb[16].mxu0 %vm1902_vm4, %v17824_v43 }
 0x41b   :  { %13915 = vmatprep.mubr.msk.f32.mxu0 %vm1902_vm4, %v17831_v48  ;;  %14845 = vmatpush3.bf16.msra.mxu0 %v14842_v24  ;;  %v18049_v24 = vsel %vm541_vm3, %v4902_v26, %v4903_v63  ;;  %v21287_v63 = vmax.f32 %v16741_v6, 0.0 }
 0x41c   :  { %14847 = vmatprep.subr.bf16.mxu0 %v14846_v40 }
 0x41e   :  { %13916 = vmatmul.mubr.msk.f32.gmra.mrb[18].mxu0 %vm1902_vm4, %v17838_v61 }
 0x41f   :  { %13918 = vmatprep.mubr.msk.f32.mxu0 %vm1902_vm4, %v17846_v51  ;;  %14849 = vmatpush3.bf16.msra.mxu0 %v14846_v40 }
 0x420   :  { %14851 = vmatprep.subr.bf16.mxu0 %v14850_v18 }
 0x422   :  { %13919 = vmatmul.mubr.msk.f32.gmra.mrb[20].mxu0 %vm1902_vm4, %v17853_v22 }
 0x423   :  { %13921 = vmatprep.mubr.msk.f32.mxu0 %vm1902_vm4, %v17861_v0 }
 0x426   :  { %13922 = vmatmul.mubr.msk.f32.gmra.mrb[22].mxu0 %vm1902_vm4, %v18049_v24 }
 0x427   :  { %13924 = vmatprep.mubr.msk.f32.mxu0 %vm1902_vm4, %v17871_v2  ;;  %v18069_v2 = vsel %vm541_vm3, %v4905_v20, %v4906_v47  ;;  %v21288_v47 = vmax.f32 %v16747_v14, 0.0 }
 0x42a   :  { %13925 = vmatmul.mubr.msk.f32.gmra.mrb[24].mxu0 %vm1902_vm4, %v17878_v13 }
 0x42b   :  { %13927 = vmatprep.mubr.msk.f32.mxu0 %vm1902_vm4, %v17885_v17 }
 0x42e   :  { %13928 = vmatmul.mubr.msk.f32.gmra.mrb[26].mxu0 %vm1902_vm4, %v17892_v8 }
 0x42f   :  { %13930 = vmatprep.mubr.msk.f32.mxu0 %vm1902_vm4, %v17899_v56 }
 0x432   :  { %13931 = vmatmul.mubr.msk.f32.gmra.mrb[28].mxu0 %vm1902_vm4, %v17906_v49 }
 0x433   :  { %13933 = vmatprep.mubr.msk.f32.mxu0 %vm1902_vm4, %v17911_v62 }
 0x436   :  { %13934 = vmatmul.mubr.msk.f32.gmra.mrb[30].mxu0 %vm1902_vm4, %v18069_v2 }
 0x437   :  { %13944 = vmatprep.mubr.msk.f32.mxu0 %vm1902_vm4, %v17548_v11  ;;  %v11853_v11 = vld [vmem:[%s21168_s2 + $0x230] sm:$0xff] }
 0x43a   :  { %13945 = vmatmul.mubr.msk.f32.vlgmr.msra.gmra.mrb[16].mxu0 %vm1902_vm4, %v17589_v36 }
 0x43b   :  { %13947 = vmatprep.mubr.msk.f32.mxu0 %vm1902_vm4, %v17575_v30  ;;  %14853 = vmatpush3.bf16.msra.mxu0 %v14850_v18  ;;  %v11854_v30 = vld [vmem:[%s21168_s2 + $0x238] sm:$0xff] }
 0x43c   :  { %14855 = vmatprep.subr.bf16.mxu0 %v14854_v38  ;;  %v14862_v36 = vpack.c.bf16 %v11854_v30, %v11853_v11 }
 0x43e   :  { %13948 = vmatmul.mubr.msk.f32.gmra.mrb[18].mxu0 %vm1902_vm4, %v17622_v52 }
 0x43f   :  { %13950 = vmatprep.mubr.msk.f32.mxu0 %vm1902_vm4, %v17609_v34  ;;  %14857 = vmatpush3.bf16.msra.mxu0 %v14854_v38  ;;  %v3841_v34 = vld [vmem:[#allocation2 + $0x98] sm:$0x3] }
 0x440   :  { %14859 = vmatprep.subr.bf16.mxu0 %v14858_v58  ;;  %v5253_v52 = vrot.slane %v3841_v34, 1 }
 0x442   :  { %13951 = vmatmul.mubr.msk.f32.gmra.mrb[20].mxu0 %vm1902_vm4, %v17648_v15 }
 0x443   :  { %13953 = vmatprep.mubr.msk.f32.mxu0 %vm1902_vm4, %v17941_v28 }
 0x446   :  { %13954 = vmatmul.mubr.msk.f32.gmra.mrb[22].mxu0 %vm1902_vm4, %v17391_v53 }
 0x447   :  { %13956 = vmatprep.mubr.msk.f32.mxu0 %vm1902_vm4, %v17666_v5  ;;  %v21283_v5 = vrot.slane %v17391_v53, 2 }
 0x44a   :  { %13957 = vmatmul.mubr.msk.f32.gmra.mrb[24].mxu0 %vm1902_vm4, %v17698_v45 }
 0x44b   :  { %13959 = vmatprep.mubr.msk.f32.mxu0 %vm1902_vm4, %v17688_v3 }
 0x44e   :  { %13960 = vmatmul.mubr.msk.f32.gmra.mrb[26].mxu0 %vm1902_vm4, %v17721_v39  ;;  %v18201_v39 = vld [vmem:[#allocation2] sm:$0xff] }
 0x44f   :  { %13962 = vmatprep.mubr.msk.f32.mxu0 %vm1902_vm4, %v17712_v9  ;;  %v11882_v9 = vld [vmem:[%s21168_s2 + $0x278] sm:$0xff] }
 0x452   :  { %13963 = vmatmul.mubr.msk.f32.gmra.mrb[28].mxu0 %vm1902_vm4, %v17739_v55  ;;  %v11875_v55 = vld [vmem:[%s21168_s2 + $0x240] sm:$0xff] }
 0x453   :  { %13965 = vmatprep.mubr.msk.f32.mxu0 %vm1902_vm4, %v17959_v4 }
 0x456   :  { %13966 = vmatmul.mubr.msk.f32.gmra.mrb[30].mxu0 %vm1902_vm4, %v17409_v37 }
 0x457   :  { %13976 = vmatprep.mubr.msk.f32.mxu0 %vm1902_vm4, %v17587_v27  ;;  %v21281_v27 = vrot.slane %v17391_v53, 1 }
 0x45a   :  { %13977 = vmatmul.mubr.msk.f32.vlgmr.msra.gmra.mrb[16].mxu0 %vm1902_vm4, %v17607_v41  ;;  %v5254_v41 = vsel %vm128_vm2, %v21281_v27, %v5253_v52 }
 0x45b   :  { %13979 = vmatprep.mubr.msk.f32.mxu0 %vm1902_vm4, %v17620_v23  ;;  %14861 = vmatpush3.bf16.msra.mxu0 %v14858_v58  ;;  %v3861_v23 = vld [vmem:[#allocation2 + $0x138] sm:$0x3]  ;;  %v21289_v58 = vmax.f32 %v16757_v46, 0.0  ;;  %v11877_v46 = vld [vmem:[%s21168_s2 + $0x250] sm:$0xff] }
 0x45c   :  { %14863 = vmatprep.subr.bf16.mxu0 %v14862_v36  ;;  %v5432_v53 = vrot.slane %v3861_v23, 2 }
 0x45e   :  { %13980 = vmatmul.mubr.msk.f32.gmra.mrb[18].mxu0 %vm1902_vm4, %v17639_v19  ;;  %v5256_v19 = vrot.slane %v3861_v23, 1 }
 0x45f   :  { %13982 = vmatprep.mubr.msk.f32.mxu0 %vm1902_vm4, %v17646_v60  ;;  %14865 = vmatpush3.bf16.msra.mxu0 %v14862_v36  ;;  %v21282_v60 = vrot.slane %v17409_v37, 1  ;;  %v21291_v36 = vld [vmem:[#allocation7_spill] sm:$0xff] }
 0x461   :  { %v5257_v15 = vsel %vm128_vm2, %v21282_v60, %v5256_v19 }
 0x462   :  { %13983 = vmatmul.mubr.msk.f32.gmra.mrb[20].mxu0 %vm1902_vm4, %v17664_v50  ;;  %v5429_v50 = vrot.slane %v3841_v34, 2  ;;  %v21292_v34 = vmax.f32 %v21291_v36, 0.0  ;;  %v21302_v36 = vld [vmem:[#allocation11_spill] sm:$0xff] }
 0x463   :  { %13985 = vmatprep.mubr.msk.f32.mxu0 %vm1902_vm4, %v17991_v16 }
 0x464   :  { %v5430_v3 = vsel %vm541_vm3, %v21283_v5, %v5429_v50 }
 0x466   :  { %13986 = vmatmul.mubr.msk.f32.gmra.mrb[22].mxu0 %vm1902_vm4, %v5254_v41 }
 0x467   :  { %13988 = vmatprep.mubr.msk.f32.mxu0 %vm1902_vm4, %v17696_v21  ;;  %v21284_v21 = vrot.slane %v17409_v37, 2  ;;  %v21238_v37 = vrot.slane %v18201_v39, 1 }
 0x469   :  { %v5433_v45 = vsel %vm541_vm3, %v21284_v21, %v5432_v53  ;;  %v21294_v53 = vld [vmem:[#allocation8_spill] sm:$0xff] }
 0x46a   :  { %13989 = vmatmul.mubr.msk.f32.gmra.mrb[24].mxu0 %vm1902_vm4, %v17710_v44  ;;  %v11881_v44 = vld [vmem:[%s21168_s2 + $0x270] sm:$0xff]  ;;  %v21295_v21 = vmax.f32 %v21294_v53, 0.0  ;;  %v18373_v53 = vld [vmem:[#allocation2 + $0xa8] sm:$0x3] }
 0x46b   :  { %13991 = vmatprep.mubr.msk.f32.mxu0 %vm1902_vm4, %v17719_v33  ;;  %v14870_v33 = vpack.c.bf16 %v11882_v9, %v11881_v44 }
 0x46d   :  { %14871 = vmatprep.subr.bf16.mxu1 %v14870_v33 }
 0x46e   :  { %13992 = vmatmul.mubr.msk.f32.gmra.mrb[26].mxu0 %vm1902_vm4, %v17732_v29  ;;  %14873 = vmatpush3.bf16.msra.mxu1 %v14870_v33  ;;  %v18203_v29 = vld [vmem:[#allocation2 + $0x8] sm:$0x3] }
 0x46f   :  { %13994 = vmatprep.mubr.msk.f32.mxu0 %vm1902_vm4, %v17737_v31  ;;  %v5778_v31 = vrot.slane %v18203_v29, 1 }
 0x472   :  { %13995 = vmatmul.mubr.msk.f32.gmra.mrb[28].mxu0 %vm1902_vm4, %v17748_v7  ;;  %v11876_v7 = vld [vmem:[%s21168_s2 + $0x248] sm:$0xff] }
 0x473   :  { %13997 = vmatprep.mubr.msk.f32.mxu0 %vm1902_vm4, %v18011_v42  ;;  %v21286_v42 = vmax.f32 %v16731_v35, 0.0 }
 0x476   :  { %13998 = vmatmul.mubr.msk.f32.gmra.mrb[30].mxu0 %vm1902_vm4, %v5257_v15 }
 0x477   :  { %14008 = vmatprep.mubr.msk.f32.mxu0 %vm1902_vm4, %v17824_v43  ;;  %v18213_v43 = vpack.c.bf16 %v11876_v7, %v11875_v55 }
 0x479   :  { %14875 = vmatprep.subr.bf16.mxu1 %v18213_v43 }
 0x47a   :  { %14009 = vmatmul.mubr.msk.f32.vlgmr.msra.gmra.mrb[16].mxu0 %vm1902_vm4, %v17831_v48  ;;  %v5779_v48 = vsel %vm128_vm2, %v21238_v37, %v5778_v31 }
 0x47b   :  { %14011 = vmatprep.mubr.msk.f32.mxu0 %vm1902_vm4, %v17838_v61  ;;  %14040 = vmatprep.mubr.msk.f32.mxu1 %vm1902_vm4, %v5779_v48  ;;  %v18223_v61 = vld [vmem:[%s21169_s3 + $0x2] ss:$0 sm:$0xff]  ;;  %v21297_v48 = vld [vmem:[#allocation9_spill] sm:$0xff] }
 0x47e   :  { %14012 = vmatmul.mubr.msk.f32.gmra.mrb[18].mxu0 %vm1902_vm4, %v17846_v51 }
 0x47f   :  { %14014 = vmatprep.mubr.msk.f32.mxu0 %vm1902_vm4, %v17853_v22  ;;  %v18228_v22 = vld [vmem:[%s21170_s4 + $0x2] ss:$0 sm:$0xff] }
 0x482   :  { %14015 = vmatmul.mubr.msk.f32.gmra.mrb[20].mxu0 %vm1902_vm4, %v17861_v0 }
 0x483   :  { %14017 = vmatprep.mubr.msk.f32.mxu0 %vm1902_vm4, %v18049_v24 }
 0x486   :  { %14018 = vmatmul.mubr.msk.f32.gmra.mrb[22].mxu0 %vm1902_vm4, %v5430_v3  ;;  %v11878_v3 = vld [vmem:[%s21168_s2 + $0x258] sm:$0xff] }
 0x487   :  { %14020 = vmatprep.mubr.msk.f32.mxu0 %vm1902_vm4, %v17878_v13 }
 0x48a   :  { %14021 = vmatmul.mubr.msk.f32.gmra.mrb[24].mxu0 %vm1902_vm4, %v17885_v17 }
 0x48b   :  { %14023 = vmatprep.mubr.msk.f32.mxu0 %vm1902_vm4, %v17892_v8 }
 0x48e   :  { %14024 = vmatmul.mubr.msk.f32.gmra.mrb[26].mxu0 %vm1902_vm4, %v17899_v56 }
 0x48f   :  { %14026 = vmatprep.mubr.msk.f32.mxu0 %vm1902_vm4, %v17906_v49 }
 0x492   :  { %14027 = vmatmul.mubr.msk.f32.gmra.mrb[28].mxu0 %vm1902_vm4, %v17911_v62  ;;  %v21285_v62 = vmax.f32 %v16728_v1, 0.0 }
 0x493   :  { %14029 = vmatprep.mubr.msk.f32.mxu0 %vm1902_vm4, %v18069_v2 }
 0x496   :  { %14030 = vmatmul.mubr.msk.f32.gmra.mrb[30].mxu0 %vm1902_vm4, %v5433_v45 }
 0x54d   :  { %v14010_v51 = vpop.f32.mrb[16].mxu0 }
 0x54e   :  { %v5613_v0 = vmul.f32 %v14010_v51, %v18223_v61  ;;  %v5509_v13 = vpop.f32.mrb[17].mxu0  ;;  %v21298_v51 = vmax.f32 %v21297_v48, 0.0 }
 0x54f   :  { %v5612_v17 = vmul.f32 %v18223_v61, %v5509_v13 }
 0x550   :  { %v5637_v8 = vadd.f32 %v18228_v22, %v5613_v0 }
 0x551   :  { %v5636_v56 = vadd.f32 %v18228_v22, %v5612_v17  ;;  %v14013_v49 = vpop.f32.mrb[18].mxu0 }
 0x552   :  { %v18236_v28 = vadd.f32 %v5637_v8, %v21285_v62  ;;  %v5615_v4 = vmul.f32 %v14013_v49, %v18223_v61  ;;  %v5519_v16 = vpop.f32.mrb[19].mxu0  ;;  %v14878_v62 = vpack.c.bf16 %v11878_v3, %v11877_v46 }
 0x553   :  { %v18241_v54 = vadd.f32 %v5636_v56, %v21286_v42  ;;  %v5614_v40 = vmul.f32 %v18223_v61, %v5519_v16 }
 0x554   :  { %v21236_v57 = vmax.f32 %v18236_v28, 0.0  ;;  %v5639_v59 = vadd.f32 %v18228_v22, %v5615_v4  ;;  %v11915_v4 = vld [vmem:[%s21168_s2 + $0x280] sm:$0xff] }
 0x555   :  { %v21234_v18 = vmax.f32 %v18241_v54, 0.0  ;;  %v5638_v26 = vadd.f32 %v18228_v22, %v5614_v40  ;;  %v14016_v1 = vpop.f32.mrb[20].mxu0 }
 0x556   :  { %5685 = vst.msk [vmem:[#allocation2 + $0x21] sm:$0xff] %vm1902_vm4, %v21236_v57  ;;  %v18253_v35 = vadd.f32 %v5639_v59, %v21287_v63  ;;  %v5617_v24 = vmul.f32 %v14016_v1, %v18223_v61  ;;  %v5529_v20 = vpop.f32.mrb[21].mxu0 }
 0x557   :  { %5684 = vst.msk [vmem:[#allocation2 + $0x11] sm:$0xff] %vm1902_vm4, %v21234_v18  ;;  %v18261_v2 = vadd.f32 %v5638_v26, %v21288_v47  ;;  %v5616_v32 = vmul.f32 %v18223_v61, %v5529_v20  ;;  %v21300_v20 = vld [vmem:[#allocation10_spill] sm:$0xff] }
 0x558   :  { %v21233_v25 = vmax.f32 %v18253_v35, 0.0  ;;  %v5641_v38 = vadd.f32 %v18228_v22, %v5617_v24  ;;  %v11916_v24 = vld [vmem:[%s21168_s2 + $0x288] sm:$0xff]  ;;  %v21301_v47 = vmax.f32 %v21300_v20, 0.0 }
 0x559   :  { %v21229_v6 = vmax.f32 %v18261_v2, 0.0  ;;  %v5640_v10 = vadd.f32 %v18228_v22, %v5616_v32  ;;  %v14019_v12 = vpop.f32.mrb[22].mxu0 }
 0x55a   :  { %5687 = vst.msk [vmem:[#allocation2 + $0x41] sm:$0xff] %vm1902_vm4, %v21233_v25  ;;  %v18273_v14 = vadd.f32 %v5641_v38, %v21289_v58  ;;  %v5619_v11 = vmul.f32 %v14019_v12, %v18223_v61  ;;  %v5539_v30 = vpop.f32.mrb[23].mxu0 }
 0x55b   :  { %5686 = vst.msk [vmem:[#allocation2 + $0x31] sm:$0xff] %vm1902_vm4, %v21229_v6  ;;  %v18281_v52 = vadd.f32 %v5640_v10, %v21292_v34  ;;  %v5618_v27 = vmul.f32 %v18223_v61, %v5539_v30  ;;  %v21303_v34 = vmax.f32 %v21302_v36, 0.0 }
 0x55c   :  { %21290 = vst [vmem:[#allocation18_spill] sm:$0xff] %v18273_v14  ;;  %v21221_v41 = vmax.f32 %v18273_v14, 0.0  ;;  %v5643_v23 = vadd.f32 %v18228_v22, %v5619_v11 }
 0x55d   :  { %21293 = vst [vmem:[#allocation7_spill] sm:$0xff] %v18281_v52  ;;  %v21228_v19 = vmax.f32 %v18281_v52, 0.0  ;;  %v5642_v60 = vadd.f32 %v18228_v22, %v5618_v27  ;;  %v14022_v15 = vpop.f32.mrb[24].mxu0  ;;  %v18291_v50 = vld [vmem:[#allocation2 + $0x20] sm:$0xff]  ;;  %v18293_v5 = vld [vmem:[#allocation2 + $0x28] sm:$0x3] }
 0x55e   :  { %5689 = vst.msk [vmem:[#allocation2 + $0x61] sm:$0xff] %vm1902_vm4, %v21221_v41  ;;  %v18303_v45 = vadd.f32 %v5643_v23, %v21295_v21  ;;  %v5621_v44 = vmul.f32 %v14022_v15, %v18223_v61  ;;  %v5549_v9 = vpop.f32.mrb[25].mxu0  ;;  %v18306_v33 = vld [vmem:[#allocation2 + $0x10] sm:$0xff]  ;;  %v18308_v31 = vld [vmem:[#allocation2 + $0x18] sm:$0x3]  ;;  %v5783_v55 = vrot.slane %v18291_v50, 1  ;;  %v18375_v21 = vpack.c.bf16 %v11916_v24, %v11915_v4 }
 0x55f   :  { %v5784_v7 = vrot.slane %v18293_v5, 1  ;;  %5688 = vst.msk [vmem:[#allocation2 + $0x51] sm:$0xff] %vm1902_vm4, %v21228_v19  ;;  %v18317_v0 = vadd.f32 %v5642_v60, %v21298_v51  ;;  %v5620_v13 = vmul.f32 %v18223_v61, %v5549_v9  ;;  %v5780_v17 = vrot.slane %v18306_v33, 1  ;;  %v12140_v52 = vld [vmem:[%s21168_s2 + $0x3e8] sm:$0xff] }
 0x560   :  { %21296 = vst [vmem:[#allocation8_spill] sm:$0xff] %v18303_v45  ;;  %v5781_v8 = vrot.slane %v18308_v31, 1  ;;  %v21225_v56 = vmax.f32 %v18303_v45, 0.0  ;;  %v5645_v49 = vadd.f32 %v18228_v22, %v5621_v44 }
 0x561   :  { %21299 = vst [vmem:[#allocation9_spill] sm:$0xff] %v18317_v0  ;;  %v21222_v16 = vmax.f32 %v18317_v0, 0.0  ;;  %v5644_v42 = vadd.f32 %v18228_v22, %v5620_v13  ;;  %v14025_v40 = vpop.f32.mrb[26].mxu0  ;;  %v18333_v26 = vsel %vm128_vm2, %v5783_v55, %v5784_v7  ;;  %v18335_v1 = vld [vmem:[#allocation2 + $0x40] sm:$0xff]  ;;  %v18337_v63 = vld [vmem:[#allocation2 + $0x48] sm:$0x3] }
 0x562   :  { %v18330_v59 = vsel %vm128_vm2, %v5780_v17, %v5781_v8  ;;  %5691 = vst.msk [vmem:[#allocation2 + $0x81] sm:$0xff] %vm1902_vm4, %v21225_v56  ;;  %v18347_v32 = vadd.f32 %v5645_v49, %v21301_v47  ;;  %v5623_v38 = vmul.f32 %v14025_v40, %v18223_v61  ;;  %v5559_v10 = vpop.f32.mrb[27].mxu0  ;;  %v18352_v12 = vld [vmem:[#allocation2 + $0x30] sm:$0xff]  ;;  %v18354_v58 = vld [vmem:[#allocation2 + $0x38] sm:$0x3]  ;;  %v5789_v11 = vrot.slane %v18335_v1, 1 }
 0x563   :  { %14041 = vmatmul.mubr.msk.f32.vlgmr.msra.gmra.mrb[32].mxu1 %vm1902_vm4, %v18330_v59  ;;  %v5790_v30 = vrot.slane %v18337_v63, 1  ;;  %5690 = vst.msk [vmem:[#allocation2 + $0x71] sm:$0xff] %vm1902_vm4, %v21222_v16  ;;  %v18363_v27 = vadd.f32 %v5644_v42, %v21303_v34  ;;  %v5622_v23 = vmul.f32 %v18223_v61, %v5559_v10  ;;  %v5786_v46 = vrot.slane %v18352_v12, 1  ;;  %v18389_v13 = vld [vmem:[#allocation2 + $0xa0] sm:$0xff]  ;;  %v21305_v17 = vld [vmem:[#allocation12_spill] sm:$0xff] }
 0x564   :  { %14043 = vmatprep.mubr.msk.f32.mxu1 %vm1902_vm4, %v18333_v26  ;;  %14877 = vmatpush3.bf16.msra.mxu1 %v18213_v43  ;;  %v5787_v60 = vrot.slane %v18354_v58, 1  ;;  %v21230_v15 = vmax.f32 %v18347_v32, 0.0  ;;  %v5647_v3 = vadd.f32 %v18228_v22, %v5623_v38  ;;  %v21306_v8 = vmax.f32 %v21305_v17, 0.0  ;;  %v21308_v38 = vld [vmem:[#allocation13_spill] sm:$0xff] }
 0x565   :  { %21304 = vst [vmem:[#allocation10_spill] sm:$0xff] %v18363_v27  ;;  %14879 = vmatprep.subr.bf16.mxu1 %v14878_v62  ;;  %v21227_v44 = vmax.f32 %v18363_v27, 0.0  ;;  %v5646_v9 = vadd.f32 %v18228_v22, %v5622_v23  ;;  %v14028_v55 = vpop.f32.mrb[28].mxu0  ;;  %v18383_v7 = vsel %vm128_vm2, %v5789_v11, %v5790_v30  ;;  %v18385_v48 = vld [vmem:[#allocation2 + $0x60] sm:$0xff]  ;;  %v18387_v51 = vld [vmem:[#allocation2 + $0x68] sm:$0x3] }
 0x566   :  { %v18380_v43 = vsel %vm128_vm2, %v5786_v46, %v5787_v60  ;;  %5693 = vst.msk [vmem:[#allocation2 + $0xc1] sm:$0xff] %vm1902_vm4, %v21230_v15  ;;  %v18396_v49 = vadd.f32 %v5647_v3, %v21306_v8  ;;  %v5625_v4 = vmul.f32 %v14028_v55, %v18223_v61  ;;  %v5569_v42 = vpop.f32.mrb[29].mxu0  ;;  %v18401_v40 = vld [vmem:[#allocation2 + $0x50] sm:$0xff]  ;;  %v18403_v24 = vld [vmem:[#allocation2 + $0x58] sm:$0x3]  ;;  %v5795_v20 = vrot.slane %v18385_v48, 1 }
 0x567   :  { %14044 = vmatmul.mubr.msk.f32.gmra.mrb[34].mxu1 %vm1902_vm4, %v18380_v43  ;;  %v5796_v47 = vrot.slane %v18387_v51, 1  ;;  %5692 = vst.msk [vmem:[#allocation2 + $0xb1] sm:$0xff] %vm1902_vm4, %v21227_v44  ;;  %v21309_v10 = vmax.f32 %v21308_v38, 0.0  ;;  %v5624_v30 = vmul.f32 %v18223_v61, %v5569_v42  ;;  %v5792_v36 = vrot.slane %v18401_v40, 1  ;;  %v11956_v27 = vld [vmem:[%s21168_s2 + $0x2c8] sm:$0xff] }
 0x568   :  { %21307 = vst [vmem:[#allocation11_spill] sm:$0xff] %v18396_v49  ;;  %14046 = vmatprep.mubr.msk.f32.mxu1 %vm1902_vm4, %v18383_v7  ;;  %v5793_v34 = vrot.slane %v18403_v24, 1  ;;  %14881 = vmatpush3.bf16.msra.mxu1 %v14878_v62  ;;  %v21224_v23 = vmax.f32 %v18396_v49, 0.0  ;;  %v5649_v46 = vadd.f32 %v18228_v22, %v5625_v4  ;;  %v21237_v60 = vrot.slane %v18389_v13, 1  ;;  %v21311_v62 = vld [vmem:[#allocation14_spill] sm:$0xff] }
 0x569   :  { %v18412_v11 = vadd.f32 %v5646_v9, %v21309_v10  ;;  %v5802_v3 = vrot.slane %v18373_v53, 1  ;;  %14883 = vmatprep.subr.bf16.mxu1 %v18375_v21  ;;  %v5648_v55 = vadd.f32 %v18228_v22, %v5624_v30  ;;  %v14031_v17 = vpop.f32.mrb[30].mxu0  ;;  %v21312_v4 = vmax.f32 %v21311_v62, 0.0 }
 0x56a   :  { %v18427_v8 = vsel %vm128_vm2, %v5792_v36, %v5793_v34  ;;  %5695 = vst.msk [vmem:[#allocation2 + $0xe1] sm:$0xff] %vm1902_vm4, %v21224_v23  ;;  %v5627_v38 = vmul.f32 %v14031_v17, %v18223_v61  ;;  %v5579_v10 = vpop.f32.mrb[31].mxu0  ;;  %v18440_v30 = vsel %vm128_vm2, %v5795_v20, %v5796_v47  ;;  %v18442_v41 = vld [vmem:[#allocation2 + $0x70] sm:$0xff]  ;;  %v18444_v36 = vld [vmem:[#allocation2 + $0x78] sm:$0x3]  ;;  %v21314_v34 = vld [vmem:[#allocation15_spill] sm:$0xff] }
 0x56b   :  { %21310 = vst [vmem:[#allocation12_spill] sm:$0xff] %v18412_v11  ;;  %v21223_v9 = vmax.f32 %v18412_v11, 0.0  ;;  %v18434_v42 = vadd.f32 %v5649_v46, %v21312_v4  ;;  %14047 = vmatmul.mubr.msk.f32.gmra.mrb[36].mxu1 %vm1902_vm4, %v18427_v8  ;;  %v21315_v46 = vmax.f32 %v21314_v34, 0.0  ;;  %v5626_v17 = vmul.f32 %v18223_v61, %v5579_v10 }
 0x56c   :  { %14049 = vmatprep.mubr.msk.f32.mxu1 %vm1902_vm4, %v18440_v30  ;;  %v5798_v20 = vrot.slane %v18442_v41, 1  ;;  %v5799_v47 = vrot.slane %v18444_v36, 1  ;;  %v5651_v16 = vadd.f32 %v18228_v22, %v5627_v38  ;;  %v21317_v38 = vld [vmem:[#allocation16_spill] sm:$0xff]  ;;  %v6190_v49 = vrot.slane %v18291_v50, 2 }
 0x56d   :  { %21313 = vst [vmem:[#allocation13_spill] sm:$0xff] %v18434_v42  ;;  %5694 = vst.msk [vmem:[#allocation2 + $0xd1] sm:$0xff] %vm1902_vm4, %v21223_v9  ;;  %v18451_v62 = vadd.f32 %v5648_v55, %v21315_v46  ;;  %v21226_v4 = vmax.f32 %v18434_v42, 0.0  ;;  %v5803_v9 = vsel %vm128_vm2, %v21237_v60, %v5802_v3  ;;  %v5650_v34 = vadd.f32 %v18228_v22, %v5626_v17  ;;  %v18468_v10 = vld [vmem:[#allocation2 + $0xc0] sm:$0xff]  ;;  %v18470_v46 = vld [vmem:[#allocation2 + $0xc8] sm:$0x3] }
 0x56e   :  { %v18466_v61 = vsel %vm128_vm2, %v5798_v20, %v5799_v47  ;;  %v21318_v23 = vmax.f32 %v21317_v38, 0.0  ;;  %v18481_v3 = vld [vmem:[#allocation2 + $0xb0] sm:$0xff]  ;;  %v18483_v22 = vld [vmem:[#allocation2 + $0xb8] sm:$0x3]  ;;  %v5807_v17 = vrot.slane %v18468_v10, 1  ;;  %v5808_v20 = vrot.slane %v18470_v46, 1 }
 0x56f   :  { %21316 = vst [vmem:[#allocation14_spill] sm:$0xff] %v18451_v62  ;;  %v21231_v55 = vmax.f32 %v18451_v62, 0.0  ;;  %5697 = vst.msk [vmem:[#allocation2 + $0x101] sm:$0xff] %vm1902_vm4, %v21226_v4  ;;  %14050 = vmatmul.mubr.msk.f32.gmra.mrb[38].mxu1 %vm1902_vm4, %v18466_v61  ;;  %v21320_v47 = vld [vmem:[#allocation17_spill] sm:$0xff]  ;;  %v6191_v62 = vrot.slane %v18293_v5, 2  ;;  %v6194_v45 = vrot.slane %v18354_v58, 2 }
 0x570   :  { %v18477_v56 = vadd.f32 %v5651_v16, %v21318_v23  ;;  %v21321_v4 = vmax.f32 %v21320_v47, 0.0  ;;  %14052 = vmatprep.mubr.msk.f32.mxu1 %vm1902_vm4, %v5803_v9  ;;  %v5804_v16 = vrot.slane %v18481_v3, 1  ;;  %v5805_v23 = vrot.slane %v18483_v22, 1  ;;  %v11955_v42 = vld [vmem:[%s21168_s2 + $0x2c0] sm:$0xff] }
 0x571   :  { %5696 = vst.msk [vmem:[#allocation2 + $0xf1] sm:$0xff] %vm1902_vm4, %v21231_v55  ;;  %v18502_v15 = vld [vmem:[#allocation2 + $0xe0] sm:$0xff]  ;;  %v18504_v55 = vld [vmem:[#allocation2 + $0xe8] sm:$0x3]  ;;  %v18512_v9 = vsel %vm128_vm2, %v5807_v17, %v5808_v20  ;;  %v18645_v5 = vsel %vm541_vm3, %v6190_v49, %v6191_v62  ;;  %v14898_v58 = vpack.c.bf16 %v11956_v27, %v11955_v42  ;;  %v6203_v62 = vrot.slane %v18387_v51, 2 }
 0x572   :  { %21319 = vst [vmem:[#allocation15_spill] sm:$0xff] %v18477_v56  ;;  %v18492_v38 = vadd.f32 %v5650_v34, %v21321_v4  ;;  %v21232_v44 = vmax.f32 %v18477_v56, 0.0  ;;  %v18500_v6 = vsel %vm128_vm2, %v5804_v16, %v5805_v23  ;;  %v5813_v47 = vrot.slane %v18502_v15, 1 }
 0x573   :  { %14053 = vmatmul.mubr.msk.f32.gmra.mrb[40].mxu1 %vm1902_vm4, %v18500_v6  ;;  %v5814_v16 = vrot.slane %v18504_v55, 1  ;;  %v6206_v42 = vrot.slane %v18444_v36, 2  ;;  %v6212_v36 = vrot.slane %v18483_v22, 2 }
 0x574   :  { %21322 = vst [vmem:[#allocation16_spill] sm:$0xff] %v18492_v38  ;;  %v21235_v19 = vmax.f32 %v18492_v38, 0.0  ;;  %5699 = vst.msk [vmem:[#allocation2 + $0x121] sm:$0xff] %vm1902_vm4, %v21232_v44  ;;  %v18514_v4 = vld [vmem:[#allocation2 + $0xd0] sm:$0xff]  ;;  %v18516_v34 = vld [vmem:[#allocation2 + $0xd8] sm:$0x3]  ;;  %14055 = vmatprep.mubr.msk.f32.mxu1 %vm1902_vm4, %v18512_v9 }
 0x575   :  { %v5810_v23 = vrot.slane %v18514_v4, 1  ;;  %v5811_v17 = vrot.slane %v18516_v34, 1  ;;  %v18537_v18 = vsel %vm128_vm2, %v5813_v47, %v5814_v16 }
 0x576   :  { %5698 = vst.msk [vmem:[#allocation2 + $0x111] sm:$0xff] %vm1902_vm4, %v21235_v19  ;;  %v18530_v44 = vld [vmem:[#allocation2 + $0x100] sm:$0xff]  ;;  %v18532_v25 = vld [vmem:[#allocation2 + $0x108] sm:$0x3] }
 0x577   :  { %v18528_v20 = vsel %vm128_vm2, %v5810_v23, %v5811_v17  ;;  %v5819_v60 = vrot.slane %v18530_v44, 1  ;;  %v5820_v37 = vrot.slane %v18532_v25, 1 }
 0x578   :  { %14056 = vmatmul.mubr.msk.f32.gmra.mrb[42].mxu1 %vm1902_vm4, %v18528_v20  ;;  %v18539_v19 = vld [vmem:[#allocation2 + $0xf0] sm:$0xff]  ;;  %v18541_v57 = vld [vmem:[#allocation2 + $0xf8] sm:$0x3] }
 0x579   :  { %14058 = vmatprep.mubr.msk.f32.mxu1 %vm1902_vm4, %v18537_v18  ;;  %v5816_v23 = vrot.slane %v18539_v19, 1  ;;  %v5817_v17 = vrot.slane %v18541_v57, 1  ;;  %v18555_v47 = vsel %vm128_vm2, %v5819_v60, %v5820_v37  ;;  %v11918_v37 = vld [vmem:[%s21168_s2 + $0x298] sm:$0xff] }
 0x57b   :  { %v18550_v11 = vsel %vm128_vm2, %v5816_v23, %v5817_v17  ;;  %v11917_v17 = vld [vmem:[%s21168_s2 + $0x290] sm:$0xff] }
 0x57c   :  { %14059 = vmatmul.mubr.msk.f32.gmra.mrb[44].mxu1 %vm1902_vm4, %v18550_v11  ;;  %v14886_v60 = vpack.c.bf16 %v11918_v37, %v11917_v17  ;;  %v6185_v17 = vrot.slane %v18203_v29, 2  ;;  %v11938_v29 = vld [vmem:[%s21168_s2 + $0x2b8] sm:$0xff] }
 0x57d   :  { %v18557_v16 = vld [vmem:[#allocation2 + $0x110] sm:$0xff]  ;;  %v18559_v14 = vld [vmem:[#allocation2 + $0x118] sm:$0x3]  ;;  %14061 = vmatprep.mubr.msk.f32.mxu1 %vm1902_vm4, %v18555_v47 }
 0x57e   :  { %v5822_v38 = vrot.slane %v18557_v16, 1  ;;  %v5823_v56 = vrot.slane %v18559_v14, 1 }
 0x580   :  { %v18566_v23 = vsel %vm128_vm2, %v5822_v38, %v5823_v56  ;;  %v11935_v56 = vld [vmem:[%s21168_s2 + $0x2a0] sm:$0xff]  ;;  %v11936_v38 = vld [vmem:[%s21168_s2 + $0x2a8] sm:$0xff] }
 0x581   :  { %14062 = vmatmul.mubr.msk.f32.gmra.mrb[46].mxu1 %vm1902_vm4, %v18566_v23  ;;  %v14890_v0 = vpack.c.bf16 %v11936_v38, %v11935_v56  ;;  %v6188_v56 = vrot.slane %v18308_v31, 2  ;;  %v11937_v38 = vld [vmem:[%s21168_s2 + $0x2b0] sm:$0xff] }
 0x582   :  { %14072 = vmatprep.mubr.msk.f32.mxu1 %vm1902_vm4, %v18201_v39 }
 0x585   :  { %14073 = vmatmul.mubr.msk.f32.vlgmr.msra.gmra.mrb[32].mxu1 %vm1902_vm4, %v18306_v33 }
 0x586   :  { %14075 = vmatprep.mubr.msk.f32.mxu1 %vm1902_vm4, %v18291_v50  ;;  %14885 = vmatpush3.bf16.msra.mxu1 %v18375_v21  ;;  %v21246_v21 = vrot.slane %v18201_v39, 2 }
 0x587   :  { %14887 = vmatprep.subr.bf16.mxu1 %v14886_v60 }
 0x588   :  { %v6186_v37 = vsel %vm541_vm3, %v21246_v21, %v6185_v17  ;;  %v14894_v17 = vpack.c.bf16 %v11938_v29, %v11937_v38  ;;  %v6193_v21 = vrot.slane %v18352_v12, 2  ;;  %v6199_v38 = vrot.slane %v18401_v40, 2 }
 0x589   :  { %14076 = vmatmul.mubr.msk.f32.gmra.mrb[34].mxu1 %vm1902_vm4, %v18352_v12  ;;  %v6200_v29 = vrot.slane %v18403_v24, 2  ;;  %v6205_v24 = vrot.slane %v18442_v41, 2 }
 0x58a   :  { %14078 = vmatprep.mubr.msk.f32.mxu1 %vm1902_vm4, %v18335_v1  ;;  %14889 = vmatpush3.bf16.msra.mxu1 %v14886_v60  ;;  %v6187_v60 = vrot.slane %v18306_v33, 2 }
 0x58b   :  { %14891 = vmatprep.subr.bf16.mxu1 %v14890_v0  ;;  %v18668_v27 = vsel %vm541_vm3, %v6199_v38, %v6200_v29  ;;  %v6217_v29 = vrot.slane %v18514_v4, 2 }
 0x58c   :  { %v18632_v31 = vsel %vm541_vm3, %v6187_v60, %v6188_v56  ;;  %v6197_v60 = vrot.slane %v18337_v63, 2  ;;  %v18652_v56 = vsel %vm541_vm3, %v6193_v21, %v6194_v45  ;;  %v6202_v63 = vrot.slane %v18385_v48, 2 }
 0x58d   :  { %14079 = vmatmul.mubr.msk.f32.gmra.mrb[36].mxu1 %vm1902_vm4, %v18401_v40  ;;  %v21254_v45 = vrot.slane %v18389_v13, 2  ;;  %v18683_v21 = vsel %vm541_vm3, %v6205_v24, %v6206_v42  ;;  %v6223_v24 = vrot.slane %v18539_v19, 2 }
 0x58e   :  { %14081 = vmatprep.mubr.msk.f32.mxu1 %vm1902_vm4, %v18385_v48  ;;  %v18675_v51 = vsel %vm541_vm3, %v6202_v63, %v6203_v62  ;;  %v6218_v63 = vrot.slane %v18516_v34, 2  ;;  %v6220_v62 = vrot.slane %v18502_v15, 2  ;;  %v6224_v34 = vrot.slane %v18541_v57, 2 }
 0x58f   :  { %v6230_v57 = vrot.slane %v18559_v14, 2  ;;  %v11958_v14 = vld [vmem:[%s21168_s2 + $0x2d8] sm:$0xff] }
 0x591   :  { %14082 = vmatmul.mubr.msk.f32.gmra.mrb[38].mxu1 %vm1902_vm4, %v18442_v41 }
 0x592   :  { %14084 = vmatprep.mubr.msk.f32.mxu1 %vm1902_vm4, %v18389_v13 }
 0x595   :  { %14085 = vmatmul.mubr.msk.f32.gmra.mrb[40].mxu1 %vm1902_vm4, %v18481_v3 }
 0x596   :  { %14087 = vmatprep.mubr.msk.f32.mxu1 %vm1902_vm4, %v18468_v10 }
 0x599   :  { %14088 = vmatmul.mubr.msk.f32.gmra.mrb[42].mxu1 %vm1902_vm4, %v18514_v4 }
 0x59a   :  { %14090 = vmatprep.mubr.msk.f32.mxu1 %vm1902_vm4, %v18502_v15 }
 0x59d   :  { %14091 = vmatmul.mubr.msk.f32.gmra.mrb[44].mxu1 %vm1902_vm4, %v18539_v19 }
 0x59e   :  { %14093 = vmatprep.mubr.msk.f32.mxu1 %vm1902_vm4, %v18530_v44 }
 0x5a1   :  { %14094 = vmatmul.mubr.msk.f32.gmra.mrb[46].mxu1 %vm1902_vm4, %v18557_v16 }
 0x5a2   :  { %14104 = vmatprep.mubr.msk.f32.mxu1 %vm1902_vm4, %v6186_v37  ;;  %v6196_v37 = vrot.slane %v18335_v1, 2 }
 0x5a4   :  { %v18659_v49 = vsel %vm541_vm3, %v6196_v37, %v6197_v60  ;;  %v6214_v37 = vrot.slane %v18468_v10, 2  ;;  %v6215_v60 = vrot.slane %v18470_v46, 2  ;;  %v18707_v46 = vsel %vm541_vm3, %v6217_v29, %v6218_v63  ;;  %v11975_v63 = vld [vmem:[%s21168_s2 + $0x2e0] sm:$0xff] }
 0x5a5   :  { %14105 = vmatmul.mubr.msk.f32.vlgmr.msra.gmra.mrb[32].mxu1 %vm1902_vm4, %v18632_v31 }
 0x5a6   :  { %14107 = vmatprep.mubr.msk.f32.mxu1 %vm1902_vm4, %v18645_v5  ;;  %14893 = vmatpush3.bf16.msra.mxu1 %v14890_v0  ;;  %v6209_v0 = vrot.slane %v18373_v53, 2  ;;  %v18700_v22 = vsel %vm541_vm3, %v6214_v37, %v6215_v60  ;;  %v11957_v60 = vld [vmem:[%s21168_s2 + $0x2d0] sm:$0xff] }
 0x5a7   :  { %14895 = vmatprep.subr.bf16.mxu1 %v14894_v17  ;;  %v14902_v29 = vpack.c.bf16 %v11958_v14, %v11957_v60 }
 0x5a8   :  { %v6210_v53 = vsel %vm541_vm3, %v21254_v45, %v6209_v0  ;;  %v6221_v0 = vrot.slane %v18504_v55, 2  ;;  %v6227_v55 = vrot.slane %v18532_v25, 2  ;;  %v12139_v45 = vld [vmem:[%s21168_s2 + $0x3e0] sm:$0xff] }
 0x5a9   :  { %14108 = vmatmul.mubr.msk.f32.gmra.mrb[34].mxu1 %vm1902_vm4, %v18652_v56 }
 0x5aa   :  { %14110 = vmatprep.mubr.msk.f32.mxu1 %vm1902_vm4, %v18659_v49  ;;  %14897 = vmatpush3.bf16.msra.mxu1 %v14894_v17  ;;  %v6211_v17 = vrot.slane %v18481_v3, 2  ;;  %v18714_v42 = vsel %vm541_vm3, %v6220_v62, %v6221_v0  ;;  %v11976_v62 = vld [vmem:[%s21168_s2 + $0x2e8] sm:$0xff] }
 0x5ab   :  { %14899 = vmatprep.subr.bf16.mxu1 %v14898_v58  ;;  %v14906_v0 = vpack.c.bf16 %v11976_v62, %v11975_v63 }
 0x5ac   :  { %v18693_v38 = vsel %vm541_vm3, %v6211_v17, %v6212_v36  ;;  %v18721_v17 = vsel %vm541_vm3, %v6223_v24, %v6224_v34  ;;  %v6229_v36 = vrot.slane %v18557_v16, 2  ;;  %v11978_v24 = vld [vmem:[%s21168_s2 + $0x2f8] sm:$0xff] }
 0x5ad   :  { %14111 = vmatmul.mubr.msk.f32.gmra.mrb[36].mxu1 %vm1902_vm4, %v18668_v27 }
 0x5ae   :  { %14113 = vmatprep.mubr.msk.f32.mxu1 %vm1902_vm4, %v18675_v51  ;;  %v18733_v25 = vsel %vm541_vm3, %v6229_v36, %v6230_v57 }
 0x5b1   :  { %14114 = vmatmul.mubr.msk.f32.gmra.mrb[38].mxu1 %vm1902_vm4, %v18683_v21 }
 0x5b2   :  { %14116 = vmatprep.mubr.msk.f32.mxu1 %vm1902_vm4, %v6210_v53  ;;  %v6226_v53 = vrot.slane %v18530_v44, 2 }
 0x5b4   :  { %v18728_v37 = vsel %vm541_vm3, %v6226_v53, %v6227_v55  ;;  %v11995_v53 = vld [vmem:[%s21168_s2 + $0x300] sm:$0xff]  ;;  %v11996_v55 = vld [vmem:[%s21168_s2 + $0x308] sm:$0xff] }
 0x5b5   :  { %14117 = vmatmul.mubr.msk.f32.gmra.mrb[40].mxu1 %vm1902_vm4, %v18693_v38  ;;  %v14914_v36 = vpack.c.bf16 %v11996_v55, %v11995_v53 }
 0x5b6   :  { %14119 = vmatprep.mubr.msk.f32.mxu1 %vm1902_vm4, %v18700_v22 }
 0x5b9   :  { %14120 = vmatmul.mubr.msk.f32.gmra.mrb[42].mxu1 %vm1902_vm4, %v18707_v46 }
 0x5ba   :  { %14122 = vmatprep.mubr.msk.f32.mxu1 %vm1902_vm4, %v18714_v42 }
 0x5bd   :  { %14123 = vmatmul.mubr.msk.f32.gmra.mrb[44].mxu1 %vm1902_vm4, %v18721_v17 }
 0x5be   :  { %14125 = vmatprep.mubr.msk.f32.mxu1 %vm1902_vm4, %v18728_v37 }
 0x5c1   :  { %14126 = vmatmul.mubr.msk.f32.gmra.mrb[46].mxu1 %vm1902_vm4, %v18733_v25 }
 0x5c2   :  { %14136 = vmatprep.mubr.msk.f32.mxu1 %vm1902_vm4, %v18306_v33  ;;  %v18763_v33 = vld [vmem:[#allocation2 + $0x80] sm:$0xff] }
 0x5c3   :  { %v6604_v57 = vrot.slane %v18763_v33, 1 }
 0x5c5   :  { %14137 = vmatmul.mubr.msk.f32.vlgmr.msra.gmra.mrb[32].mxu1 %vm1902_vm4, %v18291_v50 }
 0x5c6   :  { %14139 = vmatprep.mubr.msk.f32.mxu1 %vm1902_vm4, %v18352_v12  ;;  %14901 = vmatpush3.bf16.msra.mxu1 %v14898_v58  ;;  %v18781_v58 = vld [vmem:[#allocation2 + $0x120] sm:$0xff] }
 0x5c7   :  { %14903 = vmatprep.subr.bf16.mxu1 %v14902_v29  ;;  %v6607_v63 = vrot.slane %v18781_v58, 1 }
 0x5c9   :  { %14140 = vmatmul.mubr.msk.f32.gmra.mrb[34].mxu1 %vm1902_vm4, %v18335_v1 }
 0x5ca   :  { %14142 = vmatprep.mubr.msk.f32.mxu1 %vm1902_vm4, %v18401_v40  ;;  %14905 = vmatpush3.bf16.msra.mxu1 %v14902_v29  ;;  %v5737_v29 = vld [vmem:[#allocation2 + $0x128] sm:$0x3] }
 0x5cb   :  { %14907 = vmatprep.subr.bf16.mxu1 %v14906_v0  ;;  %v6608_v62 = vrot.slane %v5737_v29, 1 }
 0x5cd   :  { %14143 = vmatmul.mubr.msk.f32.gmra.mrb[36].mxu1 %vm1902_vm4, %v18385_v48 }
 0x5ce   :  { %14145 = vmatprep.mubr.msk.f32.mxu1 %vm1902_vm4, %v18442_v41 }
 0x5d1   :  { %14146 = vmatmul.mubr.msk.f32.gmra.mrb[38].mxu1 %vm1902_vm4, %v18763_v33 }
 0x5d2   :  { %14148 = vmatprep.mubr.msk.f32.mxu1 %vm1902_vm4, %v18481_v3  ;;  %v11977_v3 = vld [vmem:[%s21168_s2 + $0x2f0] sm:$0xff] }
 0x5d3   :  { %v14910_v34 = vpack.c.bf16 %v11978_v24, %v11977_v3  ;;  %v11998_v3 = vld [vmem:[%s21168_s2 + $0x318] sm:$0xff]  ;;  %v12063_v24 = vld [vmem:[%s21168_s2 + $0x380] sm:$0xff] }
 0x5d5   :  { %14149 = vmatmul.mubr.msk.f32.gmra.mrb[40].mxu1 %vm1902_vm4, %v18468_v10 }
 0x5d6   :  { %14151 = vmatprep.mubr.msk.f32.mxu1 %vm1902_vm4, %v18514_v4 }
 0x5d9   :  { %14152 = vmatmul.mubr.msk.f32.gmra.mrb[42].mxu1 %vm1902_vm4, %v18502_v15 }
 0x5da   :  { %14154 = vmatprep.mubr.msk.f32.mxu1 %vm1902_vm4, %v18539_v19 }
 0x5dd   :  { %14155 = vmatmul.mubr.msk.f32.gmra.mrb[44].mxu1 %vm1902_vm4, %v18530_v44 }
 0x5de   :  { %14157 = vmatprep.mubr.msk.f32.mxu1 %vm1902_vm4, %v18557_v16 }
 0x5e1   :  { %14158 = vmatmul.mubr.msk.f32.gmra.mrb[46].mxu1 %vm1902_vm4, %v18781_v58 }
 0x5e2   :  { %14168 = vmatprep.mubr.msk.f32.mxu1 %vm1902_vm4, %v18330_v59  ;;  %v5717_v59 = vld [vmem:[#allocation2 + $0x88] sm:$0x3] }
 0x5e3   :  { %v6605_v60 = vrot.slane %v5717_v59, 1 }
 0x5e5   :  { %14169 = vmatmul.mubr.msk.f32.vlgmr.msra.gmra.mrb[32].mxu1 %vm1902_vm4, %v18333_v26  ;;  %v18813_v14 = vsel %vm128_vm2, %v6604_v57, %v6605_v60  ;;  %v12015_v57 = vld [vmem:[%s21168_s2 + $0x320] sm:$0xff]  ;;  %v12016_v60 = vld [vmem:[%s21168_s2 + $0x328] sm:$0xff] }
 0x5e6   :  { %14171 = vmatprep.mubr.msk.f32.mxu1 %vm1902_vm4, %v18380_v43  ;;  %14909 = vmatpush3.bf16.msra.mxu1 %v14906_v0  ;;  %v11997_v0 = vld [vmem:[%s21168_s2 + $0x310] sm:$0xff] }
 0x5e7   :  { %14911 = vmatprep.subr.bf16.mxu1 %v14910_v34  ;;  %v14918_v55 = vpack.c.bf16 %v11998_v3, %v11997_v0  ;;  %v6784_v0 = vrot.slane %v5737_v29, 2  ;;  %v12017_v3 = vld [vmem:[%s21168_s2 + $0x330] sm:$0xff] }
 0x5e9   :  { %14172 = vmatmul.mubr.msk.f32.gmra.mrb[34].mxu1 %vm1902_vm4, %v18383_v7 }
 0x5ea   :  { %14174 = vmatprep.mubr.msk.f32.mxu1 %vm1902_vm4, %v18427_v8  ;;  %14913 = vmatpush3.bf16.msra.mxu1 %v14910_v34  ;;  %v12064_v34 = vld [vmem:[%s21168_s2 + $0x388] sm:$0xff] }
 0x5eb   :  { %14915 = vmatprep.subr.bf16.mxu1 %v14914_v36  ;;  %v14938_v53 = vpack.c.bf16 %v12064_v34, %v12063_v24  ;;  %v12018_v24 = vld [vmem:[%s21168_s2 + $0x338] sm:$0xff]  ;;  %v12035_v34 = vld [vmem:[%s21168_s2 + $0x340] sm:$0xff] }
 0x5ec   :  { %v14926_v29 = vpack.c.bf16 %v12018_v24, %v12017_v3 }
 0x5ed   :  { %14175 = vmatmul.mubr.msk.f32.gmra.mrb[36].mxu1 %vm1902_vm4, %v18440_v30  ;;  %14939 = vmatprep.subr.bf16.mxu0 %v14938_v53 }
 0x5ee   :  { %14177 = vmatprep.mubr.msk.f32.mxu1 %vm1902_vm4, %v18466_v61  ;;  %14941 = vmatpush3.bf16.msra.mxu0 %v14938_v53  ;;  %v12036_v53 = vld [vmem:[%s21168_s2 + $0x348] sm:$0xff] }
 0x5f1   :  { %14178 = vmatmul.mubr.msk.f32.gmra.mrb[38].mxu1 %vm1902_vm4, %v18813_v14 }
 0x5f2   :  { %14180 = vmatprep.mubr.msk.f32.mxu1 %vm1902_vm4, %v18500_v6  ;;  %v18833_v6 = vsel %vm128_vm2, %v6607_v63, %v6608_v62  ;;  %v6780_v63 = vrot.slane %v18763_v33, 2  ;;  %v6781_v62 = vrot.slane %v5717_v59, 2  ;;  %v6783_v59 = vrot.slane %v18781_v58, 2 }
 0x5f5   :  { %14181 = vmatmul.mubr.msk.f32.gmra.mrb[40].mxu1 %vm1902_vm4, %v18512_v9 }
 0x5f6   :  { %14183 = vmatprep.mubr.msk.f32.mxu1 %vm1902_vm4, %v18528_v20 }
 0x5f9   :  { %14184 = vmatmul.mubr.msk.f32.gmra.mrb[42].mxu1 %vm1902_vm4, %v18537_v18 }
 0x5fa   :  { %14186 = vmatprep.mubr.msk.f32.mxu1 %vm1902_vm4, %v18550_v11 }
 0x5fd   :  { %14187 = vmatmul.mubr.msk.f32.gmra.mrb[44].mxu1 %vm1902_vm4, %v18555_v47 }
 0x5fe   :  { %14189 = vmatprep.mubr.msk.f32.mxu1 %vm1902_vm4, %v18566_v23 }
 0x601   :  { %14190 = vmatmul.mubr.msk.f32.gmra.mrb[46].mxu1 %vm1902_vm4, %v18833_v6 }
 0x602   :  { %14200 = vmatprep.mubr.msk.f32.mxu1 %vm1902_vm4, %v18632_v31  ;;  %v14922_v31 = vpack.c.bf16 %v12016_v60, %v12015_v57 }
 0x605   :  { %14201 = vmatmul.mubr.msk.f32.vlgmr.msra.gmra.mrb[32].mxu1 %vm1902_vm4, %v18645_v5 }
 0x606   :  { %14203 = vmatprep.mubr.msk.f32.mxu1 %vm1902_vm4, %v18652_v56  ;;  %14917 = vmatpush3.bf16.msra.mxu1 %v14914_v36  ;;  %v18871_v36 = vsel %vm541_vm3, %v6780_v63, %v6781_v62 }
 0x607   :  { %14919 = vmatprep.subr.bf16.mxu1 %v14918_v55 }
 0x609   :  { %14204 = vmatmul.mubr.msk.f32.gmra.mrb[34].mxu1 %vm1902_vm4, %v18659_v49 }
 0x60a   :  { %14206 = vmatprep.mubr.msk.f32.mxu1 %vm1902_vm4, %v18668_v27  ;;  %14921 = vmatpush3.bf16.msra.mxu1 %v14918_v55  ;;  %v14930_v55 = vpack.c.bf16 %v12036_v53, %v12035_v34 }
 0x60b   :  { %14923 = vmatprep.subr.bf16.mxu1 %v14922_v31 }
 0x60d   :  { %14207 = vmatmul.mubr.msk.f32.gmra.mrb[36].mxu1 %vm1902_vm4, %v18675_v51 }
 0x60e   :  { %14209 = vmatprep.mubr.msk.f32.mxu1 %vm1902_vm4, %v18683_v21 }
 0x611   :  { %14210 = vmatmul.mubr.msk.f32.gmra.mrb[38].mxu1 %vm1902_vm4, %v18871_v36 }
 0x612   :  { %14212 = vmatprep.mubr.msk.f32.mxu1 %vm1902_vm4, %v18693_v38  ;;  %v18891_v38 = vsel %vm541_vm3, %v6783_v59, %v6784_v0 }
 0x615   :  { %14213 = vmatmul.mubr.msk.f32.gmra.mrb[40].mxu1 %vm1902_vm4, %v18700_v22 }
 0x616   :  { %14215 = vmatprep.mubr.msk.f32.mxu1 %vm1902_vm4, %v18707_v46 }
 0x619   :  { %14216 = vmatmul.mubr.msk.f32.gmra.mrb[42].mxu1 %vm1902_vm4, %v18714_v42 }
 0x61a   :  { %14218 = vmatprep.mubr.msk.f32.mxu1 %vm1902_vm4, %v18721_v17 }
 0x61d   :  { %14219 = vmatmul.mubr.msk.f32.gmra.mrb[44].mxu1 %vm1902_vm4, %v18728_v37 }
 0x61e   :  { %14221 = vmatprep.mubr.msk.f32.mxu1 %vm1902_vm4, %v18733_v25 }
 0x621   :  { %14222 = vmatmul.mubr.msk.f32.gmra.mrb[46].mxu1 %vm1902_vm4, %v18891_v38 }
 0x622   :  { %14232 = vmatprep.mubr.msk.f32.mxu1 %vm1902_vm4, %v18291_v50  ;;  %v18921_v50 = vld [vmem:[#allocation2 + $0x90] sm:$0xff] }
 0x625   :  { %14233 = vmatmul.mubr.msk.f32.vlgmr.msra.gmra.mrb[32].mxu1 %vm1902_vm4, %v18352_v12  ;;  %v12038_v12 = vld [vmem:[%s21168_s2 + $0x358] sm:$0xff] }
 0x626   :  { %14235 = vmatprep.mubr.msk.f32.mxu1 %vm1902_vm4, %v18335_v1  ;;  %14925 = vmatpush3.bf16.msra.mxu1 %v14922_v31  ;;  %v12037_v1 = vld [vmem:[%s21168_s2 + $0x350] sm:$0xff] }
 0x627   :  { %14927 = vmatprep.subr.bf16.mxu1 %v14926_v29 }
 0x629   :  { %14236 = vmatmul.mubr.msk.f32.gmra.mrb[34].mxu1 %vm1902_vm4, %v18401_v40 }
 0x62a   :  { %14238 = vmatprep.mubr.msk.f32.mxu1 %vm1902_vm4, %v18385_v48  ;;  %14929 = vmatpush3.bf16.msra.mxu1 %v14926_v29 }
 0x62b   :  { %14931 = vmatprep.subr.bf16.mxu1 %v14930_v55 }
 0x62d   :  { %14239 = vmatmul.mubr.msk.f32.gmra.mrb[36].mxu1 %vm1902_vm4, %v18442_v41  ;;  %v18939_v41 = vld [vmem:[#allocation2 + $0x130] sm:$0xff] }
 0x62e   :  { %14241 = vmatprep.mubr.msk.f32.mxu1 %vm1902_vm4, %v18763_v33 }
 0x631   :  { %14242 = vmatmul.mubr.msk.f32.gmra.mrb[38].mxu1 %vm1902_vm4, %v18921_v50 }
 0x632   :  { %14244 = vmatprep.mubr.msk.f32.mxu1 %vm1902_vm4, %v18468_v10 }
 0x635   :  { %14245 = vmatmul.mubr.msk.f32.gmra.mrb[40].mxu1 %vm1902_vm4, %v18514_v4  ;;  %v12065_v4 = vld [vmem:[%s21168_s2 + $0x390] sm:$0xff] }
 0x636   :  { %14247 = vmatprep.mubr.msk.f32.mxu1 %vm1902_vm4, %v18502_v15  ;;  %v5719_v15 = vld [vmem:[#allocation2 + $0x98] sm:$0x3] }
 0x637   :  { %v7131_v48 = vrot.slane %v5719_v15, 1 }
 0x639   :  { %14248 = vmatmul.mubr.msk.f32.gmra.mrb[42].mxu1 %vm1902_vm4, %v18539_v19  ;;  %v14934_v19 = vpack.c.bf16 %v12038_v12, %v12037_v1 }
 0x63a   :  { %14250 = vmatprep.mubr.msk.f32.mxu1 %vm1902_vm4, %v18530_v44  ;;  %v21253_v44 = vrot.slane %v18921_v50, 1 }
 0x63d   :  { %14251 = vmatmul.mubr.msk.f32.gmra.mrb[44].mxu1 %vm1902_vm4, %v18557_v16  ;;  %v19031_v16 = vld [vmem:[#allocation2 + $0x8] sm:$0x3] }
 0x63e   :  { %14253 = vmatprep.mubr.msk.f32.mxu1 %vm1902_vm4, %v18781_v58 }
 0x641   :  { %14254 = vmatmul.mubr.msk.f32.gmra.mrb[46].mxu1 %vm1902_vm4, %v18939_v41 }
 0x642   :  { %14264 = vmatprep.mubr.msk.f32.mxu1 %vm1902_vm4, %v18333_v26  ;;  %v7132_v26 = vsel %vm128_vm2, %v21253_v44, %v7131_v48 }
 0x645   :  { %14265 = vmatmul.mubr.msk.f32.vlgmr.msra.gmra.mrb[32].mxu1 %vm1902_vm4, %v18380_v43  ;;  %v5739_v43 = vld [vmem:[#allocation2 + $0x138] sm:$0x3] }
 0x646   :  { %14267 = vmatprep.mubr.msk.f32.mxu1 %vm1902_vm4, %v18383_v7  ;;  %14933 = vmatpush3.bf16.msra.mxu1 %v14930_v55  ;;  %v21252_v7 = vrot.slane %v18939_v41, 1  ;;  %v7134_v40 = vrot.slane %v5739_v43, 1  ;;  %v7310_v10 = vrot.slane %v5739_v43, 2 }
 0x647   :  { %14935 = vmatprep.subr.bf16.mxu1 %v14934_v19 }
 0x649   :  { %14268 = vmatmul.mubr.msk.f32.gmra.mrb[34].mxu1 %vm1902_vm4, %v18427_v8  ;;  %v7307_v8 = vrot.slane %v5719_v15, 2 }
 0x64a   :  { %14270 = vmatprep.mubr.msk.f32.mxu1 %vm1902_vm4, %v18440_v30  ;;  %14937 = vmatpush3.bf16.msra.mxu1 %v14934_v19  ;;  %v12061_v19 = vld [vmem:[%s21168_s2 + $0x370] sm:$0xff] }
 0x64d   :  { %14271 = vmatmul.mubr.msk.f32.gmra.mrb[36].mxu1 %vm1902_vm4, %v18466_v61  ;;  %v21250_v61 = vrot.slane %v18939_v41, 2 }
 0x64e   :  { %14273 = vmatprep.mubr.msk.f32.mxu1 %vm1902_vm4, %v18813_v14 }
 0x651   :  { %14274 = vmatmul.mubr.msk.f32.gmra.mrb[38].mxu1 %vm1902_vm4, %v7132_v26 }
 0x652   :  { %14276 = vmatprep.mubr.msk.f32.mxu1 %vm1902_vm4, %v18512_v9  ;;  %v7311_v9 = vsel %vm541_vm3, %v21250_v61, %v7310_v10 }
 0x655   :  { %14277 = vmatmul.mubr.msk.f32.gmra.mrb[40].mxu1 %vm1902_vm4, %v18528_v20  ;;  %v12066_v20 = vld [vmem:[%s21168_s2 + $0x398] sm:$0xff] }
 0x656   :  { %14279 = vmatprep.mubr.msk.f32.mxu1 %vm1902_vm4, %v18537_v18  ;;  %v7135_v18 = vsel %vm128_vm2, %v21252_v7, %v7134_v40  ;;  %v12062_v40 = vld [vmem:[%s21168_s2 + $0x378] sm:$0xff] }
 0x659   :  { %14280 = vmatmul.mubr.msk.f32.gmra.mrb[42].mxu1 %vm1902_vm4, %v18550_v11  ;;  %v21251_v11 = vrot.slane %v18921_v50, 2 }
 0x65a   :  { %14282 = vmatprep.mubr.msk.f32.mxu1 %vm1902_vm4, %v18555_v47  ;;  %v14942_v47 = vpack.c.bf16 %v12066_v20, %v12065_v4 }
 0x65b   :  { %v7308_v30 = vsel %vm541_vm3, %v21251_v11, %v7307_v8 }
 0x65c   :  { %14943 = vmatprep.subr.bf16.mxu0 %v14942_v47 }
 0x65d   :  { %14283 = vmatmul.mubr.msk.f32.gmra.mrb[44].mxu1 %vm1902_vm4, %v18566_v23  ;;  %14945 = vmatpush3.bf16.msra.mxu0 %v14942_v47  ;;  %v12059_v23 = vld [vmem:[%s21168_s2 + $0x360] sm:$0xff] }
 0x65e   :  { %14285 = vmatprep.mubr.msk.f32.mxu1 %vm1902_vm4, %v18833_v6 }
 0x661   :  { %14286 = vmatmul.mubr.msk.f32.gmra.mrb[46].mxu1 %vm1902_vm4, %v7135_v18 }
 0x662   :  { %14296 = vmatprep.mubr.msk.f32.mxu1 %vm1902_vm4, %v18645_v5  ;;  %v12060_v5 = vld [vmem:[%s21168_s2 + $0x368] sm:$0xff] }
 0x665   :  { %14297 = vmatmul.mubr.msk.f32.vlgmr.msra.gmra.mrb[32].mxu1 %vm1902_vm4, %v18652_v56  ;;  %v7640_v56 = vrot.slane %v19031_v16, 1 }
 0x666   :  { %14299 = vmatprep.mubr.msk.f32.mxu1 %vm1902_vm4, %v18659_v49  ;;  %v19040_v49 = vpack.c.bf16 %v12060_v5, %v12059_v23 }
 0x668   :  { %14947 = vmatprep.subr.bf16.mxu0 %v19040_v49 }
 0x669   :  { %14300 = vmatmul.mubr.msk.f32.gmra.mrb[34].mxu1 %vm1902_vm4, %v18668_v27  ;;  %v21323_v27 = vrot.slane %v18201_v39, 1 }
 0x66a   :  { %14302 = vmatprep.mubr.msk.f32.mxu1 %vm1902_vm4, %v18675_v51 }
 0x66b   :  { %v7641_v51 = vsel %vm128_vm2, %v21323_v27, %v7640_v56 }
 0x66c   :  { %14328 = vmatprep.mubr.msk.f32.mxu0 %vm1902_vm4, %v7641_v51  ;;  %v14950_v51 = vpack.c.bf16 %v12062_v40, %v12061_v19 }
 0x66d   :  { %14303 = vmatmul.mubr.msk.f32.gmra.mrb[36].mxu1 %vm1902_vm4, %v18683_v21  ;;  %v19050_v21 = vld [vmem:[%s21169_s3 + $0x3] ss:$0 sm:$0xff] }
 0x66e   :  { %14305 = vmatprep.mubr.msk.f32.mxu1 %vm1902_vm4, %v18871_v36 }
 0x671   :  { %14306 = vmatmul.mubr.msk.f32.gmra.mrb[38].mxu1 %vm1902_vm4, %v7308_v30 }
 0x672   :  { %14308 = vmatprep.mubr.msk.f32.mxu1 %vm1902_vm4, %v18700_v22 }
 0x675   :  { %14309 = vmatmul.mubr.msk.f32.gmra.mrb[40].mxu1 %vm1902_vm4, %v18707_v46  ;;  %v19055_v46 = vld [vmem:[%s21170_s4 + $0x3] ss:$0 sm:$0xff] }
 0x676   :  { %14311 = vmatprep.mubr.msk.f32.mxu1 %vm1902_vm4, %v18714_v42 }
 0x679   :  { %14312 = vmatmul.mubr.msk.f32.gmra.mrb[42].mxu1 %vm1902_vm4, %v18721_v17 }
 0x67a   :  { %14314 = vmatprep.mubr.msk.f32.mxu1 %vm1902_vm4, %v18728_v37 }
 0x67d   :  { %14315 = vmatmul.mubr.msk.f32.gmra.mrb[44].mxu1 %vm1902_vm4, %v18733_v25 }
 0x67e   :  { %14317 = vmatprep.mubr.msk.f32.mxu1 %vm1902_vm4, %v18891_v38 }
 0x681   :  { %14318 = vmatmul.mubr.msk.f32.gmra.mrb[46].mxu1 %vm1902_vm4, %v7311_v9 }
 0x738   :  { %v14298_v22 = vpop.f32.mrb[32].mxu1 }
 0x739   :  { %v7491_v42 = vmul.f32 %v14298_v22, %v19050_v21  ;;  %v7387_v17 = vpop.f32.mrb[33].mxu1  ;;  %v12099_v22 = vld [vmem:[%s21168_s2 + $0x3a0] sm:$0xff] }
 0x73a   :  { %v7490_v37 = vmul.f32 %v19050_v21, %v7387_v17 }
 0x73b   :  { %v7515_v25 = vadd.f32 %v19055_v46, %v7491_v42 }
 0x73c   :  { %v7514_v33 = vadd.f32 %v19055_v46, %v7490_v37  ;;  %v14301_v58 = vpop.f32.mrb[34].mxu1 }
 0x73d   :  { %v7531_v14 = vmax.f32 %v7515_v25, 0.0  ;;  %v7493_v6 = vmul.f32 %v14301_v58, %v19050_v21  ;;  %v7397_v57 = vpop.f32.mrb[35].mxu1  ;;  %v12100_v58 = vld [vmem:[%s21168_s2 + $0x3a8] sm:$0xff] }
 0x73e   :  { %v7530_v60 = vmax.f32 %v7514_v33, 0.0  ;;  %v7492_v31 = vmul.f32 %v19050_v21, %v7397_v57 }
 0x73f   :  { %7547 = vst.msk [vmem:[#allocation2 + $0x21] sm:$0xff] %vm1902_vm4, %v7531_v14  ;;  %v7517_v63 = vadd.f32 %v19055_v46, %v7493_v6 }
 0x740   :  { %7546 = vst.msk [vmem:[#allocation2 + $0x11] sm:$0xff] %vm1902_vm4, %v7530_v60  ;;  %v7516_v62 = vadd.f32 %v19055_v46, %v7492_v31  ;;  %v14304_v36 = vpop.f32.mrb[36].mxu1 }
 0x741   :  { %v7533_v59 = vmax.f32 %v7517_v63, 0.0  ;;  %v7495_v0 = vmul.f32 %v14304_v36, %v19050_v21  ;;  %v7407_v38 = vpop.f32.mrb[37].mxu1 }
 0x742   :  { %v7532_v3 = vmax.f32 %v7516_v62, 0.0  ;;  %v7494_v24 = vmul.f32 %v19050_v21, %v7407_v38 }
 0x743   :  { %7549 = vst.msk [vmem:[#allocation2 + $0x41] sm:$0xff] %vm1902_vm4, %v7533_v59  ;;  %v7519_v29 = vadd.f32 %v19055_v46, %v7495_v0 }
 0x744   :  { %7548 = vst.msk [vmem:[#allocation2 + $0x31] sm:$0xff] %vm1902_vm4, %v7532_v3  ;;  %v7518_v34 = vadd.f32 %v19055_v46, %v7494_v24  ;;  %v14307_v53 = vpop.f32.mrb[38].mxu1 }
 0x745   :  { %v7535_v55 = vmax.f32 %v7519_v29, 0.0  ;;  %v7497_v1 = vmul.f32 %v14307_v53, %v19050_v21  ;;  %v7417_v12 = vpop.f32.mrb[39].mxu1  ;;  %v19133_v29 = vpack.c.bf16 %v12100_v58, %v12099_v22 }
 0x746   :  { %v7534_v15 = vmax.f32 %v7518_v34, 0.0  ;;  %v7496_v48 = vmul.f32 %v19050_v21, %v7417_v12  ;;  %v19078_v26 = vld [vmem:[#allocation2 + $0x20] sm:$0xff]  ;;  %v19080_v43 = vld [vmem:[#allocation2 + $0x28] sm:$0x3] }
 0x747   :  { %7551 = vst.msk [vmem:[#allocation2 + $0x61] sm:$0xff] %vm1902_vm4, %v7535_v55  ;;  %v7521_v18 = vadd.f32 %v19055_v46, %v7497_v1  ;;  %v19087_v8 = vld [vmem:[#allocation2 + $0x10] sm:$0xff]  ;;  %v19089_v30 = vld [vmem:[#allocation2 + $0x18] sm:$0x3]  ;;  %v7645_v10 = vrot.slane %v19078_v26, 1  ;;  %v7646_v9 = vrot.slane %v19080_v43, 1 }
 0x748   :  { %7550 = vst.msk [vmem:[#allocation2 + $0x51] sm:$0xff] %vm1902_vm4, %v7534_v15  ;;  %v7520_v4 = vadd.f32 %v19055_v46, %v7496_v48  ;;  %v14310_v20 = vpop.f32.mrb[40].mxu1  ;;  %v7642_v47 = vrot.slane %v19087_v8, 1  ;;  %v7643_v23 = vrot.slane %v19089_v30, 1  ;;  %v19143_v12 = vld [vmem:[#allocation2 + $0xa8] sm:$0x3] }
 0x749   :  { %v7537_v5 = vmax.f32 %v7521_v18, 0.0  ;;  %v7499_v56 = vmul.f32 %v14310_v20, %v19050_v21  ;;  %v7427_v27 = vpop.f32.mrb[41].mxu1  ;;  %v19117_v6 = vsel %vm128_vm2, %v7645_v10, %v7646_v9 }
 0x74a   :  { %v7536_v42 = vmax.f32 %v7520_v4, 0.0  ;;  %v7498_v17 = vmul.f32 %v19050_v21, %v7427_v27  ;;  %v19103_v37 = vsel %vm128_vm2, %v7642_v47, %v7643_v23  ;;  %v19105_v25 = vld [vmem:[#allocation2 + $0x40] sm:$0xff]  ;;  %v19107_v33 = vld [vmem:[#allocation2 + $0x48] sm:$0x3]  ;;  %v7664_v27 = vrot.slane %v19143_v12, 1 }
 0x74b   :  { %7553 = vst.msk [vmem:[#allocation2 + $0x81] sm:$0xff] %vm1902_vm4, %v7537_v5  ;;  %v7523_v14 = vadd.f32 %v19055_v46, %v7499_v56  ;;  %14329 = vmatmul.mubr.msk.f32.vlgmr.msra.gmra.mrb[32].mxu0 %vm1902_vm4, %v19103_v37  ;;  %v19119_v57 = vld [vmem:[#allocation2 + $0x30] sm:$0xff]  ;;  %v19121_v60 = vld [vmem:[#allocation2 + $0x38] sm:$0x3]  ;;  %v7651_v31 = vrot.slane %v19105_v25, 1  ;;  %v7652_v63 = vrot.slane %v19107_v33, 1 }
 0x74c   :  { %7552 = vst.msk [vmem:[#allocation2 + $0x71] sm:$0xff] %vm1902_vm4, %v7536_v42  ;;  %v7522_v62 = vadd.f32 %v19055_v46, %v7498_v17  ;;  %v14313_v36 = vpop.f32.mrb[42].mxu1  ;;  %14331 = vmatprep.mubr.msk.f32.mxu0 %vm1902_vm4, %v19117_v6  ;;  %14949 = vmatpush3.bf16.msra.mxu0 %v19040_v49  ;;  %v7648_v59 = vrot.slane %v19119_v57, 1  ;;  %v7649_v0 = vrot.slane %v19121_v60, 1  ;;  %v8056_v44 = vrot.slane %v19121_v60, 2 }
 0x74d   :  { %v7539_v38 = vmax.f32 %v7523_v14, 0.0  ;;  %v7501_v3 = vmul.f32 %v14313_v36, %v19050_v21  ;;  %v7437_v24 = vpop.f32.mrb[43].mxu1  ;;  %14951 = vmatprep.subr.bf16.mxu0 %v14950_v51  ;;  %v19150_v15 = vsel %vm128_vm2, %v7651_v31, %v7652_v63  ;;  %v14970_v60 = vpack.c.bf16 %v12140_v52, %v12139_v45 }
 0x74e   :  { %v7538_v34 = vmax.f32 %v7522_v62, 0.0  ;;  %v7500_v53 = vmul.f32 %v19050_v21, %v7437_v24  ;;  %v19137_v55 = vsel %vm128_vm2, %v7648_v59, %v7649_v0  ;;  %v19139_v1 = vld [vmem:[#allocation2 + $0x60] sm:$0xff]  ;;  %v19141_v49 = vld [vmem:[#allocation2 + $0x68] sm:$0x3]  ;;  %v21324_v24 = vrot.slane %v18389_v13, 1 }
 0x74f   :  { %7555 = vst.msk [vmem:[#allocation2 + $0xc1] sm:$0xff] %vm1902_vm4, %v7539_v38  ;;  %v7525_v19 = vadd.f32 %v19055_v46, %v7501_v3  ;;  %14332 = vmatmul.mubr.msk.f32.gmra.mrb[34].mxu0 %vm1902_vm4, %v19137_v55  ;;  %v19152_v48 = vld [vmem:[#allocation2 + $0x50] sm:$0xff]  ;;  %v19154_v40 = vld [vmem:[#allocation2 + $0x58] sm:$0x3]  ;;  %v7657_v18 = vrot.slane %v19139_v1, 1  ;;  %v7658_v10 = vrot.slane %v19141_v49, 1 }
 0x750   :  { %7554 = vst.msk [vmem:[#allocation2 + $0xb1] sm:$0xff] %vm1902_vm4, %v7538_v34  ;;  %v7524_v9 = vadd.f32 %v19055_v46, %v7500_v53  ;;  %v14316_v4 = vpop.f32.mrb[44].mxu1  ;;  %14334 = vmatprep.mubr.msk.f32.mxu0 %vm1902_vm4, %v19150_v15  ;;  %v7654_v20 = vrot.slane %v19152_v48, 1  ;;  %v7655_v47 = vrot.slane %v19154_v40, 1  ;;  %14953 = vmatpush3.bf16.msra.mxu0 %v14950_v51  ;;  %v7665_v34 = vsel %vm128_vm2, %v21324_v24, %v7664_v27 }
 0x751   :  { %v7541_v23 = vmax.f32 %v7525_v19, 0.0  ;;  %v7503_v5 = vmul.f32 %v14316_v4, %v19050_v21  ;;  %v7447_v56 = vpop.f32.mrb[45].mxu1  ;;  %14955 = vmatprep.subr.bf16.mxu0 %v19133_v29  ;;  %v19176_v51 = vsel %vm128_vm2, %v7657_v18, %v7658_v10  ;;  %v8071_v52 = vrot.slane %v19143_v12, 2 }
 0x752   :  { %v7540_v22 = vmax.f32 %v7524_v9, 0.0  ;;  %v7502_v42 = vmul.f32 %v19050_v21, %v7447_v56  ;;  %v19169_v17 = vsel %vm128_vm2, %v7654_v20, %v7655_v47 }
 0x753   :  { %7557 = vst.msk [vmem:[#allocation2 + $0xe1] sm:$0xff] %vm1902_vm4, %v7541_v23  ;;  %v7527_v58 = vadd.f32 %v19055_v46, %v7503_v5  ;;  %14335 = vmatmul.mubr.msk.f32.gmra.mrb[36].mxu0 %vm1902_vm4, %v19169_v17  ;;  %v19178_v14 = vld [vmem:[#allocation2 + $0x70] sm:$0xff]  ;;  %v19180_v31 = vld [vmem:[#allocation2 + $0x78] sm:$0x3] }
 0x754   :  { %7556 = vst.msk [vmem:[#allocation2 + $0xd1] sm:$0xff] %vm1902_vm4, %v7540_v22  ;;  %v7526_v63 = vadd.f32 %v19055_v46, %v7502_v42  ;;  %v14319_v62 = vpop.f32.mrb[46].mxu1  ;;  %14337 = vmatprep.mubr.msk.f32.mxu0 %vm1902_vm4, %v19176_v51  ;;  %v7660_v36 = vrot.slane %v19178_v14, 1  ;;  %v7661_v59 = vrot.slane %v19180_v31, 1 }
 0x755   :  { %v7543_v0 = vmax.f32 %v7527_v58, 0.0  ;;  %v7505_v38 = vmul.f32 %v14319_v62, %v19050_v21  ;;  %v7457_v3 = vpop.f32.mrb[47].mxu1 }
 0x756   :  { %v7542_v53 = vmax.f32 %v7526_v63, 0.0  ;;  %v7504_v19 = vmul.f32 %v19050_v21, %v7457_v3  ;;  %v19194_v18 = vsel %vm128_vm2, %v7660_v36, %v7661_v59  ;;  %v19196_v10 = vld [vmem:[#allocation2 + $0xc0] sm:$0xff]  ;;  %v19198_v9 = vld [vmem:[#allocation2 + $0xc8] sm:$0x3] }
 0x757   :  { %7559 = vst.msk [vmem:[#allocation2 + $0x101] sm:$0xff] %vm1902_vm4, %v7543_v0  ;;  %v7529_v4 = vadd.f32 %v19055_v46, %v7505_v38  ;;  %14338 = vmatmul.mubr.msk.f32.gmra.mrb[38].mxu0 %vm1902_vm4, %v19194_v18  ;;  %v19204_v20 = vld [vmem:[#allocation2 + $0xb0] sm:$0xff]  ;;  %v19206_v47 = vld [vmem:[#allocation2 + $0xb8] sm:$0x3]  ;;  %v7669_v21 = vrot.slane %v19196_v10, 1  ;;  %v7670_v23 = vrot.slane %v19198_v9, 1 }
 0x758   :  { %7558 = vst.msk [vmem:[#allocation2 + $0xf1] sm:$0xff] %vm1902_vm4, %v7542_v53  ;;  %v7528_v5 = vadd.f32 %v19055_v46, %v7504_v19  ;;  %14340 = vmatprep.mubr.msk.f32.mxu0 %vm1902_vm4, %v7665_v34  ;;  %v7666_v56 = vrot.slane %v19204_v20, 1  ;;  %v7667_v27 = vrot.slane %v19206_v47, 1 }
 0x759   :  { %v7545_v22 = vmax.f32 %v7529_v4, 0.0  ;;  %v19226_v46 = vsel %vm128_vm2, %v7669_v21, %v7670_v23 }
 0x75a   :  { %v7544_v42 = vmax.f32 %v7528_v5, 0.0  ;;  %v19216_v58 = vsel %vm128_vm2, %v7666_v56, %v7667_v27  ;;  %v19218_v63 = vld [vmem:[#allocation2 + $0xe0] sm:$0xff]  ;;  %v19220_v62 = vld [vmem:[#allocation2 + $0xe8] sm:$0x3] }
 0x75b   :  { %7561 = vst.msk [vmem:[#allocation2 + $0x121] sm:$0xff] %vm1902_vm4, %v7545_v22  ;;  %14341 = vmatmul.mubr.msk.f32.gmra.mrb[40].mxu0 %vm1902_vm4, %v19216_v58  ;;  %v19228_v36 = vld [vmem:[#allocation2 + $0xd0] sm:$0xff]  ;;  %v19230_v59 = vld [vmem:[#allocation2 + $0xd8] sm:$0x3]  ;;  %v7675_v0 = vrot.slane %v19218_v63, 1  ;;  %v7676_v38 = vrot.slane %v19220_v62, 1 }
 0x75c   :  { %7560 = vst.msk [vmem:[#allocation2 + $0x111] sm:$0xff] %vm1902_vm4, %v7544_v42  ;;  %14343 = vmatprep.mubr.msk.f32.mxu0 %vm1902_vm4, %v19226_v46  ;;  %v7672_v3 = vrot.slane %v19228_v36, 1  ;;  %v7673_v24 = vrot.slane %v19230_v59, 1 }
 0x75d   :  { %v19249_v4 = vsel %vm128_vm2, %v7675_v0, %v7676_v38 }
 0x75e   :  { %v19240_v34 = vsel %vm128_vm2, %v7672_v3, %v7673_v24  ;;  %v19242_v53 = vld [vmem:[#allocation2 + $0x100] sm:$0xff]  ;;  %v19244_v19 = vld [vmem:[#allocation2 + $0x108] sm:$0x3] }
 0x75f   :  { %14344 = vmatmul.mubr.msk.f32.gmra.mrb[42].mxu0 %vm1902_vm4, %v19240_v34  ;;  %v19251_v21 = vld [vmem:[#allocation2 + $0xf0] sm:$0xff]  ;;  %v19253_v23 = vld [vmem:[#allocation2 + $0xf8] sm:$0x3]  ;;  %v7681_v5 = vrot.slane %v19242_v53, 1  ;;  %v7682_v56 = vrot.slane %v19244_v19, 1 }
 0x760   :  { %14346 = vmatprep.mubr.msk.f32.mxu0 %vm1902_vm4, %v19249_v4  ;;  %v7678_v27 = vrot.slane %v19251_v21, 1  ;;  %v7679_v22 = vrot.slane %v19253_v23, 1 }
 0x761   :  { %v19267_v0 = vsel %vm128_vm2, %v7681_v5, %v7682_v56  ;;  %v12102_v5 = vld [vmem:[%s21168_s2 + $0x3b8] sm:$0xff]  ;;  %v15771_v56 = vld [vmem:[#allocation2] sm:$0xff] }
 0x762   :  { %v19262_v42 = vsel %vm128_vm2, %v7678_v27, %v7679_v22  ;;  %v12101_v22 = vld [vmem:[%s21168_s2 + $0x3b0] sm:$0xff] }
 0x763   :  { %14347 = vmatmul.mubr.msk.f32.gmra.mrb[44].mxu0 %vm1902_vm4, %v19262_v42  ;;  %v19269_v38 = vld [vmem:[#allocation2 + $0x110] sm:$0xff]  ;;  %v19271_v3 = vld [vmem:[#allocation2 + $0x118] sm:$0x3]  ;;  %v14958_v11 = vpack.c.bf16 %v12102_v5, %v12101_v22  ;;  %v21325_v22 = vrot.slane %v18201_v39, 2  ;;  %v8053_v39 = vrot.slane %v19080_v43, 2 }
 0x764   :  { %14349 = vmatprep.mubr.msk.f32.mxu0 %vm1902_vm4, %v19267_v0  ;;  %v7684_v24 = vrot.slane %v19269_v38, 1  ;;  %v7685_v61 = vrot.slane %v19271_v3, 1 }
 0x766   :  { %v19278_v27 = vsel %vm128_vm2, %v7684_v24, %v7685_v61  ;;  %v12119_v61 = vld [vmem:[%s21168_s2 + $0x3c0] sm:$0xff]  ;;  %v12120_v24 = vld [vmem:[%s21168_s2 + $0x3c8] sm:$0xff] }
 0x767   :  { %14350 = vmatmul.mubr.msk.f32.gmra.mrb[46].mxu0 %vm1902_vm4, %v19278_v27  ;;  %v14962_v7 = vpack.c.bf16 %v12120_v24, %v12119_v61  ;;  %v8050_v61 = vrot.slane %v19089_v30, 2  ;;  %v12121_v24 = vld [vmem:[%s21168_s2 + $0x3d0] sm:$0xff] }
 0x768   :  { %14360 = vmatprep.mubr.msk.f32.mxu0 %vm1902_vm4, %v15771_v56  ;;  %v8049_v56 = vrot.slane %v19087_v8, 2 }
 0x76a   :  { %v19341_v30 = vsel %vm541_vm3, %v8049_v56, %v8050_v61  ;;  %v8059_v56 = vrot.slane %v19107_v33, 2  ;;  %v8064_v33 = vrot.slane %v19139_v1, 2 }
 0x76b   :  { %14361 = vmatmul.mubr.msk.f32.vlgmr.msra.gmra.mrb[32].mxu0 %vm1902_vm4, %v19087_v8 }
 0x76c   :  { %14363 = vmatprep.mubr.msk.f32.mxu0 %vm1902_vm4, %v19078_v26  ;;  %14957 = vmatpush3.bf16.msra.mxu0 %v19133_v29  ;;  %v15772_v29 = vld [vmem:[#allocation2 + $0xa0] sm:$0xff] }
 0x76d   :  { %14959 = vmatprep.subr.bf16.mxu0 %v14958_v11 }
 0x76f   :  { %14364 = vmatmul.mubr.msk.f32.gmra.mrb[34].mxu0 %vm1902_vm4, %v19119_v57 }
 0x770   :  { %14366 = vmatprep.mubr.msk.f32.mxu0 %vm1902_vm4, %v19105_v25  ;;  %14961 = vmatpush3.bf16.msra.mxu0 %v14958_v11  ;;  %v8047_v11 = vrot.slane %v19031_v16, 2  ;;  %v12122_v16 = vld [vmem:[%s21168_s2 + $0x3d8] sm:$0xff] }
 0x771   :  { %14963 = vmatprep.subr.bf16.mxu0 %v14962_v7 }
 0x772   :  { %v8048_v5 = vsel %vm541_vm3, %v21325_v22, %v8047_v11  ;;  %v14966_v11 = vpack.c.bf16 %v12122_v16, %v12121_v24  ;;  %v8055_v22 = vrot.slane %v19119_v57, 2  ;;  %v8061_v24 = vrot.slane %v19152_v48, 2 }
 0x773   :  { %14367 = vmatmul.mubr.msk.f32.gmra.mrb[36].mxu0 %vm1902_vm4, %v19152_v48  ;;  %v8062_v16 = vrot.slane %v19154_v40, 2 }
 0x774   :  { %14369 = vmatprep.mubr.msk.f32.mxu0 %vm1902_vm4, %v19139_v1  ;;  %v19361_v61 = vsel %vm541_vm3, %v8055_v22, %v8056_v44  ;;  %v8067_v44 = vrot.slane %v19178_v14, 2  ;;  %v8073_v22 = vrot.slane %v19204_v20, 2 }
 0x775   :  { %v19376_v45 = vsel %vm541_vm3, %v8061_v24, %v8062_v16  ;;  %v8079_v24 = vrot.slane %v19228_v36, 2  ;;  %v8080_v16 = vrot.slane %v19230_v59, 2  ;;  %v8086_v59 = vrot.slane %v19253_v23, 2 }
 0x776   :  { %v8092_v23 = vrot.slane %v19271_v3, 2  ;;  %v12142_v3 = vld [vmem:[%s21168_s2 + $0x3f8] sm:$0xff] }
 0x777   :  { %14370 = vmatmul.mubr.msk.f32.gmra.mrb[38].mxu0 %vm1902_vm4, %v19178_v14 }
 0x778   :  { %14372 = vmatprep.mubr.msk.f32.mxu0 %vm1902_vm4, %v15772_v29  ;;  %v8052_v29 = vrot.slane %v19078_v26, 2 }
 0x77a   :  { %v19354_v43 = vsel %vm541_vm3, %v8052_v29, %v8053_v39  ;;  %v8065_v39 = vrot.slane %v19141_v49, 2  ;;  %v21326_v49 = vrot.slane %v18389_v13, 2 }
 0x77b   :  { %14373 = vmatmul.mubr.msk.f32.gmra.mrb[40].mxu0 %vm1902_vm4, %v19204_v20 }
 0x77c   :  { %14375 = vmatprep.mubr.msk.f32.mxu0 %vm1902_vm4, %v19196_v10  ;;  %v19383_v40 = vsel %vm541_vm3, %v8064_v33, %v8065_v39  ;;  %v8072_v12 = vsel %vm541_vm3, %v21326_v49, %v8071_v52  ;;  %v8082_v33 = vrot.slane %v19218_v63, 2  ;;  %v8083_v39 = vrot.slane %v19220_v62, 2 }
 0x77d   :  { %v8085_v52 = vrot.slane %v19251_v21, 2  ;;  %v8089_v62 = vrot.slane %v19244_v19, 2 }
 0x77f   :  { %14376 = vmatmul.mubr.msk.f32.gmra.mrb[42].mxu0 %vm1902_vm4, %v19228_v36  ;;  %v19429_v49 = vsel %vm541_vm3, %v8085_v52, %v8086_v59  ;;  %v12179_v52 = vld [vmem:[%s21168_s2 + $0x420] sm:$0xff]  ;;  %v12180_v59 = vld [vmem:[%s21168_s2 + $0x428] sm:$0xff] }
 0x780   :  { %14378 = vmatprep.mubr.msk.f32.mxu0 %vm1902_vm4, %v19218_v63 }
 0x783   :  { %14379 = vmatmul.mubr.msk.f32.gmra.mrb[44].mxu0 %vm1902_vm4, %v19251_v21 }
 0x784   :  { %14381 = vmatprep.mubr.msk.f32.mxu0 %vm1902_vm4, %v19242_v53 }
 0x787   :  { %14382 = vmatmul.mubr.msk.f32.gmra.mrb[46].mxu0 %vm1902_vm4, %v19269_v38 }
 0x788   :  { %14392 = vmatprep.mubr.msk.f32.mxu0 %vm1902_vm4, %v8048_v5  ;;  %v8058_v5 = vrot.slane %v19105_v25, 2 }
 0x78a   :  { %v19368_v29 = vsel %vm541_vm3, %v8058_v5, %v8059_v56  ;;  %v8076_v5 = vrot.slane %v19196_v10, 2  ;;  %v8077_v56 = vrot.slane %v19198_v9, 2  ;;  %v19415_v9 = vsel %vm541_vm3, %v8079_v24, %v8080_v16  ;;  %v12160_v24 = vld [vmem:[%s21168_s2 + $0x408] sm:$0xff] }
 0x78b   :  { %14393 = vmatmul.mubr.msk.f32.vlgmr.msra.gmra.mrb[32].mxu0 %vm1902_vm4, %v19341_v30 }
 0x78c   :  { %14395 = vmatprep.mubr.msk.f32.mxu0 %vm1902_vm4, %v19354_v43  ;;  %14965 = vmatpush3.bf16.msra.mxu0 %v14962_v7  ;;  %v8068_v7 = vrot.slane %v19180_v31, 2  ;;  %v8074_v31 = vrot.slane %v19206_v47, 2  ;;  %v19408_v47 = vsel %vm541_vm3, %v8076_v5, %v8077_v56  ;;  %v12159_v56 = vld [vmem:[%s21168_s2 + $0x400] sm:$0xff] }
 0x78d   :  { %14967 = vmatprep.subr.bf16.mxu0 %v14966_v11  ;;  %v14978_v16 = vpack.c.bf16 %v12160_v24, %v12159_v56  ;;  %v12181_v56 = vld [vmem:[%s21168_s2 + $0x430] sm:$0xff]  ;;  %v12182_v24 = vld [vmem:[%s21168_s2 + $0x438] sm:$0xff] }
 0x78e   :  { %v19401_v13 = vsel %vm541_vm3, %v8073_v22, %v8074_v31  ;;  %v12141_v31 = vld [vmem:[%s21168_s2 + $0x3f0] sm:$0xff] }
 0x78f   :  { %14396 = vmatmul.mubr.msk.f32.gmra.mrb[34].mxu0 %vm1902_vm4, %v19361_v61  ;;  %v14974_v5 = vpack.c.bf16 %v12142_v3, %v12141_v31  ;;  %v7599_v31 = vld [vmem:[#allocation2 + $0x128] sm:$0x3] }
 0x790   :  { %14398 = vmatprep.mubr.msk.f32.mxu0 %vm1902_vm4, %v19368_v29  ;;  %14969 = vmatpush3.bf16.msra.mxu0 %v14966_v11  ;;  %v19391_v11 = vsel %vm541_vm3, %v8067_v44, %v8068_v7  ;;  %v19422_v44 = vsel %vm541_vm3, %v8082_v33, %v8083_v39  ;;  %v8088_v7 = vrot.slane %v19242_v53, 2  ;;  %v12162_v33 = vld [vmem:[%s21168_s2 + $0x418] sm:$0xff] }
 0x791   :  { %14971 = vmatprep.subr.bf16.mxu0 %v14970_v60 }
 0x792   :  { %v19436_v22 = vsel %vm541_vm3, %v8088_v7, %v8089_v62  ;;  %v14986_v7 = vpack.c.bf16 %v12180_v59, %v12179_v52  ;;  %v12200_v52 = vld [vmem:[%s21168_s2 + $0x448] sm:$0xff] }
 0x793   :  { %14399 = vmatmul.mubr.msk.f32.gmra.mrb[36].mxu0 %vm1902_vm4, %v19376_v45 }
 0x794   :  { %14401 = vmatprep.mubr.msk.f32.mxu0 %vm1902_vm4, %v19383_v40 }
 0x797   :  { %14402 = vmatmul.mubr.msk.f32.gmra.mrb[38].mxu0 %vm1902_vm4, %v19391_v11 }
 0x798   :  { %14404 = vmatprep.mubr.msk.f32.mxu0 %vm1902_vm4, %v8072_v12  ;;  %v8091_v12 = vrot.slane %v19269_v38, 2 }
 0x79a   :  { %v19441_v19 = vsel %vm541_vm3, %v8091_v12, %v8092_v23 }
 0x79b   :  { %14405 = vmatmul.mubr.msk.f32.gmra.mrb[40].mxu0 %vm1902_vm4, %v19401_v13 }
 0x79c   :  { %14407 = vmatprep.mubr.msk.f32.mxu0 %vm1902_vm4, %v19408_v47 }
 0x79f   :  { %14408 = vmatmul.mubr.msk.f32.gmra.mrb[42].mxu0 %vm1902_vm4, %v19415_v9 }
 0x7a0   :  { %14410 = vmatprep.mubr.msk.f32.mxu0 %vm1902_vm4, %v19422_v44 }
 0x7a3   :  { %14411 = vmatmul.mubr.msk.f32.gmra.mrb[44].mxu0 %vm1902_vm4, %v19429_v49 }
 0x7a4   :  { %14413 = vmatprep.mubr.msk.f32.mxu0 %vm1902_vm4, %v19436_v22 }
 0x7a7   :  { %14414 = vmatmul.mubr.msk.f32.gmra.mrb[46].mxu0 %vm1902_vm4, %v19441_v19 }
 0x7a8   :  { %14424 = vmatprep.mubr.msk.f32.mxu0 %vm1902_vm4, %v19087_v8  ;;  %v19471_v8 = vld [vmem:[#allocation2 + $0x80] sm:$0xff] }
 0x7a9   :  { %v8466_v62 = vrot.slane %v19471_v8, 1  ;;  %v8642_v59 = vrot.slane %v19471_v8, 2 }
 0x7ab   :  { %14425 = vmatmul.mubr.msk.f32.vlgmr.msra.gmra.mrb[32].mxu0 %vm1902_vm4, %v19078_v26 }
 0x7ac   :  { %14427 = vmatprep.mubr.msk.f32.mxu0 %vm1902_vm4, %v19119_v57  ;;  %14973 = vmatpush3.bf16.msra.mxu0 %v14970_v60  ;;  %v19489_v60 = vld [vmem:[#allocation2 + $0x120] sm:$0xff] }
 0x7ad   :  { %14975 = vmatprep.subr.bf16.mxu0 %v14974_v5  ;;  %v8469_v3 = vrot.slane %v19489_v60, 1 }
 0x7af   :  { %14428 = vmatmul.mubr.msk.f32.gmra.mrb[34].mxu0 %vm1902_vm4, %v19105_v25 }
 0x7b0   :  { %14430 = vmatprep.mubr.msk.f32.mxu0 %vm1902_vm4, %v19152_v48  ;;  %14977 = vmatpush3.bf16.msra.mxu0 %v14974_v5  ;;  %v8470_v5 = vrot.slane %v7599_v31, 1 }
 0x7b1   :  { %14979 = vmatprep.subr.bf16.mxu0 %v14978_v16 }
 0x7b3   :  { %14431 = vmatmul.mubr.msk.f32.gmra.mrb[36].mxu0 %vm1902_vm4, %v19139_v1 }
 0x7b4   :  { %14433 = vmatprep.mubr.msk.f32.mxu0 %vm1902_vm4, %v19178_v14 }
 0x7b7   :  { %14434 = vmatmul.mubr.msk.f32.gmra.mrb[38].mxu0 %vm1902_vm4, %v19471_v8 }
 0x7b8   :  { %14436 = vmatprep.mubr.msk.f32.mxu0 %vm1902_vm4, %v19204_v20  ;;  %v12161_v20 = vld [vmem:[%s21168_s2 + $0x410] sm:$0xff] }
 0x7b9   :  { %v14982_v39 = vpack.c.bf16 %v12162_v33, %v12161_v20  ;;  %v14990_v33 = vpack.c.bf16 %v12182_v24, %v12181_v56  ;;  %v12219_v56 = vld [vmem:[%s21168_s2 + $0x460] sm:$0xff]  ;;  %v12220_v24 = vld [vmem:[%s21168_s2 + $0x468] sm:$0xff] }
 0x7bb   :  { %14437 = vmatmul.mubr.msk.f32.gmra.mrb[40].mxu0 %vm1902_vm4, %v19196_v10 }
 0x7bc   :  { %14439 = vmatprep.mubr.msk.f32.mxu0 %vm1902_vm4, %v19228_v36 }
 0x7bf   :  { %14440 = vmatmul.mubr.msk.f32.gmra.mrb[42].mxu0 %vm1902_vm4, %v19218_v63 }
 0x7c0   :  { %14442 = vmatprep.mubr.msk.f32.mxu0 %vm1902_vm4, %v19251_v21 }
 0x7c3   :  { %14443 = vmatmul.mubr.msk.f32.gmra.mrb[44].mxu0 %vm1902_vm4, %v19242_v53 }
 0x7c4   :  { %14445 = vmatprep.mubr.msk.f32.mxu0 %vm1902_vm4, %v19269_v38 }
 0x7c7   :  { %14446 = vmatmul.mubr.msk.f32.gmra.mrb[46].mxu0 %vm1902_vm4, %v19489_v60 }
 0x7c8   :  { %14456 = vmatprep.mubr.msk.f32.mxu0 %vm1902_vm4, %v19103_v37  ;;  %v7579_v37 = vld [vmem:[#allocation2 + $0x88] sm:$0x3] }
 0x7c9   :  { %v8467_v12 = vrot.slane %v7579_v37, 1 }
 0x7cb   :  { %14457 = vmatmul.mubr.msk.f32.vlgmr.msra.gmra.mrb[32].mxu0 %vm1902_vm4, %v19117_v6  ;;  %v19521_v23 = vsel %vm128_vm2, %v8466_v62, %v8467_v12  ;;  %v8643_v62 = vrot.slane %v7579_v37, 2  ;;  %v8645_v37 = vrot.slane %v19489_v60, 2  ;;  %v8646_v12 = vrot.slane %v7599_v31, 2 }
 0x7cc   :  { %14459 = vmatprep.mubr.msk.f32.mxu0 %vm1902_vm4, %v19137_v55  ;;  %14981 = vmatpush3.bf16.msra.mxu0 %v14978_v16  ;;  %v9424_v16 = vld [vmem:[%s21172_s6] sm:$0x3]  ;;  %s15800_s6 = smov 125  }
 0x7cd   :  { %14983 = vmatprep.subr.bf16.mxu0 %v14982_v39  ;;  %10133 = vrot.lane.b32.xlu1 %v9424_v16, %s15798_s30  ;;  %v9524_v20 = vrot.slane %v9424_v16, 1  ;;  %15732 = vpush %v9424_v16 }
 0x7ce   :  { %9826 = vrot.lane.b32.xlu0 %v9424_v16, %s15799_s0 }
 0x7cf   :  { %14460 = vmatmul.mubr.msk.f32.gmra.mrb[34].mxu0 %vm1902_vm4, %v19150_v15  ;;  %15734 = vpush %v9524_v20 }
 0x7d0   :  { %14462 = vmatprep.mubr.msk.f32.mxu0 %vm1902_vm4, %v19169_v17  ;;  %14985 = vmatpush3.bf16.msra.mxu0 %v14982_v39  ;;  %v12199_v39 = vld [vmem:[%s21168_s2 + $0x440] sm:$0xff] }
 0x7d1   :  { %14987 = vmatprep.subr.bf16.mxu0 %v14986_v7  ;;  %10154 = vrot.lane.b32.xlu1 %v9524_v20, %s15798_s30 }
 0x7d2   :  { %9847 = vrot.lane.b32.xlu0 %v9524_v20, %s15799_s0 }
 0x7d3   :  { %14463 = vmatmul.mubr.msk.f32.gmra.mrb[36].mxu0 %vm1902_vm4, %v19176_v51 }
 0x7d4   :  { %14465 = vmatprep.mubr.msk.f32.mxu0 %vm1902_vm4, %v19194_v18 }
 0x7d5   :  { %10440 = vrot.lane.b32.xlu1 %v9424_v16, %s15800_s6  ;;  %v15002_v16 = vpack.c.bf16 %v12220_v24, %v12219_v56  ;;  %v21333_v24 = vmax.f32 %v18253_v35, 0.0 }
 0x7d6   :  { %10461 = vrot.lane.b32.xlu0 %v9524_v20, %s15800_s6 }
 0x7d7   :  { %14466 = vmatmul.mubr.msk.f32.gmra.mrb[38].mxu0 %vm1902_vm4, %v19521_v23 }
 0x7d8   :  { %14468 = vmatprep.mubr.msk.f32.mxu0 %vm1902_vm4, %v19216_v58  ;;  %v19541_v58 = vsel %vm128_vm2, %v8469_v3, %v8470_v5  ;;  %v12201_v3 = vld [vmem:[%s21168_s2 + $0x450] sm:$0xff]  ;;  %v12202_v5 = vld [vmem:[%s21168_s2 + $0x458] sm:$0xff] }
 0x7d9   :  { %v14998_v31 = vpack.c.bf16 %v12202_v5, %v12201_v3  ;;  %v19780_v3 = vld [vmem:[%s21171_s5 + $0x3] ss:$0 sm:$0xff]  ;;  %v19785_v5 = vld [vmem:[%s21176_s10] sm:$0x3] }
 0x7db   :  { %14469 = vmatmul.mubr.msk.f32.gmra.mrb[40].mxu0 %vm1902_vm4, %v19226_v46 }
 0x7dc   :  { %14471 = vmatprep.mubr.msk.f32.mxu0 %vm1902_vm4, %v19240_v34 }
 0x7df   :  { %14472 = vmatmul.mubr.msk.f32.gmra.mrb[42].mxu0 %vm1902_vm4, %v19249_v4 }
 0x7e0   :  { %14474 = vmatprep.mubr.msk.f32.mxu0 %vm1902_vm4, %v19262_v42 }
 0x7e3   :  { %14475 = vmatmul.mubr.msk.f32.gmra.mrb[44].mxu0 %vm1902_vm4, %v19267_v0 }
 0x7e4   :  { %14477 = vmatprep.mubr.msk.f32.mxu0 %vm1902_vm4, %v19278_v27 }
 0x7e7   :  { %14478 = vmatmul.mubr.msk.f32.gmra.mrb[46].mxu0 %vm1902_vm4, %v19541_v58 }
 0x7e8   :  { %14488 = vmatprep.mubr.msk.f32.mxu0 %vm1902_vm4, %v19341_v30  ;;  %v14994_v30 = vpack.c.bf16 %v12200_v52, %v12199_v39 }
 0x7eb   :  { %14489 = vmatmul.mubr.msk.f32.vlgmr.msra.gmra.mrb[32].mxu0 %vm1902_vm4, %v19354_v43 }
 0x7ec   :  { %14491 = vmatprep.mubr.msk.f32.mxu0 %vm1902_vm4, %v19361_v61  ;;  %14989 = vmatpush3.bf16.msra.mxu0 %v14986_v7  ;;  %v19578_v7 = vsel %vm541_vm3, %v8642_v59, %v8643_v62 }
 0x7ed   :  { %14991 = vmatprep.subr.bf16.mxu0 %v14990_v33 }
 0x7ef   :  { %14492 = vmatmul.mubr.msk.f32.gmra.mrb[34].mxu0 %vm1902_vm4, %v19368_v29 }
 0x7f0   :  { %14494 = vmatprep.mubr.msk.f32.mxu0 %vm1902_vm4, %v19376_v45  ;;  %14993 = vmatpush3.bf16.msra.mxu0 %v14990_v33 }
 0x7f1   :  { %14995 = vmatprep.subr.bf16.mxu0 %v14994_v30 }
 0x7f3   :  { %14495 = vmatmul.mubr.msk.f32.gmra.mrb[36].mxu0 %vm1902_vm4, %v19383_v40 }
 0x7f4   :  { %14497 = vmatprep.mubr.msk.f32.mxu0 %vm1902_vm4, %v19391_v11 }
 0x7f7   :  { %14498 = vmatmul.mubr.msk.f32.gmra.mrb[38].mxu0 %vm1902_vm4, %v19578_v7 }
 0x7f8   :  { %14500 = vmatprep.mubr.msk.f32.mxu0 %vm1902_vm4, %v19401_v13  ;;  %v19598_v13 = vsel %vm541_vm3, %v8645_v37, %v8646_v12 }
 0x7fb   :  { %14501 = vmatmul.mubr.msk.f32.gmra.mrb[40].mxu0 %vm1902_vm4, %v19408_v47 }
 0x7fc   :  { %14503 = vmatprep.mubr.msk.f32.mxu0 %vm1902_vm4, %v19415_v9 }
 0x7ff   :  { %14504 = vmatmul.mubr.msk.f32.gmra.mrb[42].mxu0 %vm1902_vm4, %v19422_v44 }
 0x800   :  { %14506 = vmatprep.mubr.msk.f32.mxu0 %vm1902_vm4, %v19429_v49 }
 0x803   :  { %14507 = vmatmul.mubr.msk.f32.gmra.mrb[44].mxu0 %vm1902_vm4, %v19436_v22 }
 0x804   :  { %14509 = vmatprep.mubr.msk.f32.mxu0 %vm1902_vm4, %v19441_v19 }
 0x807   :  { %14510 = vmatmul.mubr.msk.f32.gmra.mrb[46].mxu0 %vm1902_vm4, %v19598_v13 }
 0x808   :  { %14520 = vmatprep.mubr.msk.f32.mxu0 %vm1902_vm4, %v19078_v26  ;;  %v12221_v26 = vld [vmem:[%s21168_s2 + $0x470] sm:$0xff] }
 0x80b   :  { %14521 = vmatmul.mubr.msk.f32.vlgmr.msra.gmra.mrb[32].mxu0 %vm1902_vm4, %v19119_v57 }
 0x80c   :  { %14523 = vmatprep.mubr.msk.f32.mxu0 %vm1902_vm4, %v19105_v25  ;;  %14997 = vmatpush3.bf16.msra.mxu0 %v14994_v30  ;;  %v12222_v25 = vld [vmem:[%s21168_s2 + $0x478] sm:$0xff] }
 0x80d   :  { %14999 = vmatprep.subr.bf16.mxu0 %v14998_v31  ;;  %v15006_v57 = vpack.c.bf16 %v12222_v25, %v12221_v26 }
 0x80f   :  { %14524 = vmatmul.mubr.msk.f32.gmra.mrb[34].mxu0 %vm1902_vm4, %v19152_v48 }
 0x810   :  { %14526 = vmatprep.mubr.msk.f32.mxu0 %vm1902_vm4, %v19139_v1  ;;  %15001 = vmatpush3.bf16.msra.mxu0 %v14998_v31  ;;  %v7581_v1 = vld [vmem:[#allocation2 + $0x98] sm:$0x3] }
 0x811   :  { %15003 = vmatprep.subr.bf16.mxu0 %v15002_v16  ;;  %v8993_v48 = vrot.slane %v7581_v1, 1 }
 0x813   :  { %14527 = vmatmul.mubr.msk.f32.gmra.mrb[36].mxu0 %vm1902_vm4, %v19178_v14 }
 0x814   :  { %14529 = vmatprep.mubr.msk.f32.mxu0 %vm1902_vm4, %v19471_v8  ;;  %v19746_v8 = vld [vmem:[%s21171_s5 + $0x1] ss:$0 sm:$0xff] }
 0x817   :  { %14530 = vmatmul.mubr.msk.f32.gmra.mrb[38].mxu0 %vm1902_vm4, %v18921_v50 }
 0x818   :  { %14532 = vmatprep.mubr.msk.f32.mxu0 %vm1902_vm4, %v19196_v10  ;;  %v21329_v10 = vrot.slane %v18921_v50, 2 }
 0x81b   :  { %14533 = vmatmul.mubr.msk.f32.gmra.mrb[40].mxu0 %vm1902_vm4, %v19228_v36 }
 0x81c   :  { %14535 = vmatprep.mubr.msk.f32.mxu0 %vm1902_vm4, %v19218_v63 }
 0x81f   :  { %14536 = vmatmul.mubr.msk.f32.gmra.mrb[42].mxu0 %vm1902_vm4, %v19251_v21 }
 0x820   :  { %14538 = vmatprep.mubr.msk.f32.mxu0 %vm1902_vm4, %v19242_v53 }
 0x823   :  { %14539 = vmatmul.mubr.msk.f32.gmra.mrb[44].mxu0 %vm1902_vm4, %v19269_v38 }
 0x824   :  { %14541 = vmatprep.mubr.msk.f32.mxu0 %vm1902_vm4, %v19489_v60  ;;  %v19751_v60 = vld [vmem:[%s21171_s5] ss:$0 sm:$0xff] }
 0x827   :  { %14542 = vmatmul.mubr.msk.f32.gmra.mrb[46].mxu0 %vm1902_vm4, %v18939_v41 }
 0x828   :  { %14552 = vmatprep.mubr.msk.f32.mxu0 %vm1902_vm4, %v19117_v6  ;;  %v21327_v6 = vrot.slane %v18921_v50, 1 }
 0x82b   :  { %14553 = vmatmul.mubr.msk.f32.vlgmr.msra.gmra.mrb[32].mxu0 %vm1902_vm4, %v19137_v55  ;;  %v8994_v55 = vsel %vm128_vm2, %v21327_v6, %v8993_v48 }
 0x82c   :  { %14555 = vmatprep.mubr.msk.f32.mxu0 %vm1902_vm4, %v19150_v15  ;;  %15005 = vmatpush3.bf16.msra.mxu0 %v15002_v16  ;;  %v7601_v15 = vld [vmem:[#allocation2 + $0x138] sm:$0x3] }
 0x82d   :  { %15007 = vmatprep.subr.bf16.mxu0 %v15006_v57  ;;  %v9172_v50 = vrot.slane %v7601_v15, 2 }
 0x82f   :  { %14556 = vmatmul.mubr.msk.f32.gmra.mrb[34].mxu0 %vm1902_vm4, %v19169_v17  ;;  %v8996_v17 = vrot.slane %v7601_v15, 1 }
 0x830   :  { %14558 = vmatprep.mubr.msk.f32.mxu0 %vm1902_vm4, %v19176_v51  ;;  %15009 = vmatpush3.bf16.msra.mxu0 %v15006_v57  ;;  %v21328_v51 = vrot.slane %v18939_v41, 1 }
 0x832   :  { %v8997_v14 = vsel %vm128_vm2, %v21328_v51, %v8996_v17 }
 0x833   :  { %14559 = vmatmul.mubr.msk.f32.gmra.mrb[36].mxu0 %vm1902_vm4, %v19194_v18  ;;  %v9169_v18 = vrot.slane %v7581_v1, 2 }
 0x834   :  { %14561 = vmatprep.mubr.msk.f32.mxu0 %vm1902_vm4, %v19521_v23 }
 0x835   :  { %v9170_v63 = vsel %vm541_vm3, %v21329_v10, %v9169_v18 }
 0x837   :  { %14562 = vmatmul.mubr.msk.f32.gmra.mrb[38].mxu0 %vm1902_vm4, %v8994_v55 }
 0x838   :  { %14564 = vmatprep.mubr.msk.f32.mxu0 %vm1902_vm4, %v19226_v46  ;;  %v21330_v46 = vrot.slane %v18939_v41, 2  ;;  %v19727_v41 = vld [vmem:[%s21169_s3 + $0x4] ss:$0 sm:$0xff]  ;;  %s20178_s3 = spop %15732 }
 0x83a   :  { %v9173_v36 = vsel %vm541_vm3, %v21330_v46, %v9172_v50 }
 0x83b   :  { %14565 = vmatmul.mubr.msk.f32.gmra.mrb[40].mxu0 %vm1902_vm4, %v19240_v34 }
 0x83c   :  { %14567 = vmatprep.mubr.msk.f32.mxu0 %vm1902_vm4, %v19249_v4 }
 0x83f   :  { %14568 = vmatmul.mubr.msk.f32.gmra.mrb[42].mxu0 %vm1902_vm4, %v19262_v42  ;;  %v10134_v34 = vpop.permute.xlu1 %10133 }
 0x840   :  { %14570 = vmatprep.mubr.msk.f32.mxu0 %vm1902_vm4, %v19267_v0  ;;  %v9827_v53 = vpop.permute.xlu0 %9826 }
 0x841   :  { %15736 = vpush %v9827_v53 }
 0x843   :  { %14571 = vmatmul.mubr.msk.f32.gmra.mrb[44].mxu0 %vm1902_vm4, %v19278_v27  ;;  %v10155_v4 = vpop.permute.xlu1 %10154  ;;  %v19732_v27 = vld [vmem:[%s21170_s4 + $0x4] ss:$0 sm:$0xff]  ;;  %s20182_s4 = spop %15734 }
 0x844   :  { %14573 = vmatprep.mubr.msk.f32.mxu0 %vm1902_vm4, %v19541_v58  ;;  %v9848_v21 = vpop.permute.xlu0 %9847 }
 0x845   :  { %15738 = vpush %v9848_v21 }
 0x846   :  { %15740 = vpush %v10134_v34  ;;  %v21334_v34 = vmax.f32 %v18347_v32, 0.0 }
 0x847   :  { %14574 = vmatmul.mubr.msk.f32.gmra.mrb[46].mxu0 %vm1902_vm4, %v8997_v14  ;;  %15742 = vpush %v10155_v4  ;;  %v10441_v42 = vpop.permute.xlu1 %10440 }
 0x848   :  { %14584 = vmatprep.mubr.msk.f32.mxu0 %vm1902_vm4, %v19354_v43  ;;  %v10462_v0 = vpop.permute.xlu0 %10461  ;;  %15744 = vpush %v10441_v42 }
 0x849   :  { %15746 = vpush %v10462_v0 }
 0x84a   :  { %15748 = vpush %v19785_v5 }
 0x84b   :  { %14585 = vmatmul.mubr.msk.f32.vlgmr.msra.gmra.mrb[32].mxu0 %vm1902_vm4, %v19361_v61 }
 0x84c   :  { %14587 = vmatprep.mubr.msk.f32.mxu0 %vm1902_vm4, %v19368_v29 }
 0x84f   :  { %14588 = vmatmul.mubr.msk.f32.gmra.mrb[34].mxu0 %vm1902_vm4, %v19376_v45 }
 0x850   :  { %14590 = vmatprep.mubr.msk.f32.mxu0 %vm1902_vm4, %v19383_v40 }
 0x853   :  { %14591 = vmatmul.mubr.msk.f32.gmra.mrb[36].mxu0 %vm1902_vm4, %v19391_v11 }
 0x854   :  { %14593 = vmatprep.mubr.msk.f32.mxu0 %vm1902_vm4, %v19578_v7 }
 0x857   :  { %14594 = vmatmul.mubr.msk.f32.gmra.mrb[38].mxu0 %vm1902_vm4, %v9170_v63 }
 0x858   :  { %14596 = vmatprep.mubr.msk.f32.mxu0 %vm1902_vm4, %v19408_v47  ;;  %v21331_v47 = vmax.f32 %v18236_v28, 0.0  ;;  %v19758_v28 = vld [vmem:[%s21171_s5 + $0x2] ss:$0 sm:$0xff] }
 0x85b   :  { %14597 = vmatmul.mubr.msk.f32.gmra.mrb[40].mxu0 %vm1902_vm4, %v19415_v9 }
 0x85c   :  { %14599 = vmatprep.mubr.msk.f32.mxu0 %vm1902_vm4, %v19422_v44 }
 0x85f   :  { %14600 = vmatmul.mubr.msk.f32.gmra.mrb[42].mxu0 %vm1902_vm4, %v19429_v49  ;;  %v21332_v49 = vmax.f32 %v18241_v54, 0.0 }
 0x860   :  { %14602 = vmatprep.mubr.msk.f32.mxu0 %vm1902_vm4, %v19436_v22 }
 0x863   :  { %14603 = vmatmul.mubr.msk.f32.gmra.mrb[44].mxu0 %vm1902_vm4, %v19441_v19 }
 0x864   :  { %14605 = vmatprep.mubr.msk.f32.mxu0 %vm1902_vm4, %v19598_v13 }
 0x867   :  { %14606 = vmatmul.mubr.msk.f32.gmra.mrb[46].mxu0 %vm1902_vm4, %v9173_v36 }
 0x872   :  { %s20192_s1 = spop %15736 }
 0x876   :  { %s20194_s23 = spop %15738 }
 0x877   :  { %s20196_s24 = spop %15740 }
 0x878   :  { %s20199_s25 = spop %15742 }
 0x879   :  { %s15745_s5 = spop %15744 }
 0x87a   :  { %s15747_s10 = spop %15746 }
 0x91e   :  { %v14586_v38 = vpop.f32.mrb[32].mxu0 }
 0x91f   :  { %v9353_v43 = vmul.f32 %v14586_v38, %v19727_v41  ;;  %v9249_v61 = vpop.f32.mrb[33].mxu0 }
 0x920   :  { %v9352_v29 = vmul.f32 %v19727_v41, %v9249_v61 }
 0x921   :  { %v9377_v45 = vadd.f32 %v19732_v27, %v9353_v43 }
 0x922   :  { %v9376_v40 = vadd.f32 %v19732_v27, %v9352_v29  ;;  %v14589_v11 = vpop.f32.mrb[34].mxu0 }
 0x923   :  { %v9393_v9 = vadd.f32 %v9377_v45, %v21331_v47  ;;  %v9259_v44 = vpop.f32.mrb[35].mxu0  ;;  %v9355_v19 = vmul.f32 %v14589_v11, %v19727_v41 }
 0x924   :  { %v9392_v22 = vadd.f32 %v9376_v40, %v21332_v49  ;;  %v9354_v36 = vmul.f32 %v19727_v41, %v9259_v44 }
 0x925   :  { %v19753_v23 = vmax.f32 %v9393_v9, 0.0  ;;  %v9379_v52 = vadd.f32 %v19732_v27, %v9355_v19 }
 0x926   :  { %v19760_v54 = vmax.f32 %v9392_v22, 0.0  ;;  %v19762_v58 = vpop.f32.mrb[36].mxu0  ;;  %v9378_v29 = vadd.f32 %v19732_v27, %v9354_v36 }
 0x927   :  { %v9269_v20 = vpop.f32.mrb[37].mxu0  ;;  %v9763_v33 = vmul.f32 %v19746_v8, %v19753_v23  ;;  %v9441_v39 = vmul.f32 %v19751_v60, %v19753_v23  ;;  %v10070_v59 = vmul.f32 %v19758_v28, %v19753_v23  ;;  %v9395_v16 = vadd.f32 %v9379_v52, %v21333_v24 }
 0x928   :  { %v9356_v30 = vmul.f32 %v19727_v41, %v9269_v20  ;;  %v9762_v37 = vmul.f32 %v19746_v8, %v19760_v54  ;;  %v10377_v48 = vmul.f32 %v19780_v3, %v19753_v23  ;;  %v10069_v6 = vmul.f32 %v19758_v28, %v19760_v54 }
 0x929   :  { %v9781_v62 = vsel %vm1902_vm4, %v9763_v33, 0.0  ;;  %v9459_v7 = vsel %vm1902_vm4, %v9441_v39, 0.0  ;;  %v10088_v25 = vsel %vm1902_vm4, %v10070_v59, 0.0  ;;  %v19805_v51 = vmax.f32 %v9395_v16, 0.0  ;;  %v21336_v59 = vld [vmem:[#allocation7_spill] sm:$0xff] }
 0x92a   :  { %v9380_v12 = vadd.f32 %v19732_v27, %v9356_v30  ;;  %9782 = vadd.xlane.f32.xlu0 %v9781_v62  ;;  %9460 = vadd.xlane.f32.xlu1 %v9459_v7  ;;  %v14595_v13 = vpop.f32.mrb[38].mxu0  ;;  %v9778_v1 = vsel %vm1902_vm4, %v9762_v37, 0.0  ;;  %v10376_v14 = vmul.f32 %v19780_v3, %v19760_v54  ;;  %v10395_v10 = vsel %vm1902_vm4, %v10377_v48, 0.0 }
 0x92b   :  { %v9359_v31 = vmul.f32 %v14595_v13, %v19727_v41  ;;  %v9279_v56 = vpop.f32.mrb[39].mxu0  ;;  %v10085_v63 = vsel %vm1902_vm4, %v10069_v6, 0.0  ;;  %v9440_v50 = vmul.f32 %v19751_v60, %v19760_v54  ;;  %v9443_v42 = vmul.f32 %v19751_v60, %v19805_v51 }
 0x92c   :  { %v9358_v26 = vmul.f32 %v19727_v41, %v9279_v56  ;;  %v10392_v38 = vsel %vm1902_vm4, %v10376_v14, 0.0  ;;  %v9765_v44 = vmul.f32 %v19746_v8, %v19805_v51  ;;  %v21335_v52 = vmax.f32 %v18261_v2, 0.0  ;;  %v21338_v56 = vld [vmem:[#allocation10_spill] sm:$0xff] }
 0x92d   :  { %v19794_v57 = vadd.f32 %v19732_v27, %v9359_v31  ;;  %v9456_v43 = vsel %vm1902_vm4, %v9440_v50, 0.0  ;;  %v9465_v9 = vsel %vm1902_vm4, %v9443_v42, 0.0  ;;  %v21337_v62 = vmax.f32 %v21336_v59, 0.0 }
 0x92e   :  { %v19802_v55 = vadd.f32 %v19732_v27, %v9358_v26  ;;  %10089 = vadd.xlane.f32.xlu0 %v10088_v25  ;;  %9779 = vadd.xlane.f32.xlu1 %v9778_v1  ;;  %v14598_v35 = vpop.f32.mrb[40].mxu0  ;;  %v9394_v30 = vadd.f32 %v9378_v29, %v21335_v52  ;;  %v10072_v31 = vmul.f32 %v19758_v28, %v19805_v51  ;;  %v21339_v24 = vmax.f32 %v21338_v56, 0.0  ;;  %v21340_v26 = vld [vmem:[#allocation13_spill] sm:$0xff]  ;;  %v21352_v56 = vld [vmem:[#allocation16_spill] sm:$0xff] }
 0x92f   :  { %v9361_v15 = vmul.f32 %v14598_v35, %v19727_v41  ;;  %v9289_v17 = vpop.f32.mrb[41].mxu0  ;;  %v9396_v7 = vadd.f32 %v9380_v12, %v21337_v62  ;;  %v21341_v25 = vmax.f32 %v21340_v26, 0.0  ;;  %v9787_v2 = vsel %vm1902_vm4, %v9765_v44, 0.0 }
 0x930   :  { %v9360_v21 = vmul.f32 %v19727_v41, %v9289_v17  ;;  %v9357_v17 = vmul.f32 %v19762_v58, %v19727_v41  ;;  %v10094_v58 = vsel %vm1902_vm4, %v10072_v31, 0.0 }
 0x931   :  { %v9385_v18 = vadd.f32 %v19732_v27, %v9361_v15 }
 0x932   :  { %10396 = vadd.xlane.f32.xlu0 %v10395_v10  ;;  %10086 = vadd.xlane.f32.xlu1 %v10085_v63  ;;  %v14601_v46 = vpop.f32.mrb[42].mxu0  ;;  %v9384_v11 = vadd.f32 %v19732_v27, %v9360_v21  ;;  %v21342_v10 = vld [vmem:[#allocation8_spill] sm:$0xff]  ;;  %v19871_v21 = vmax.f32 %v9394_v30, 0.0 }
 0x933   :  { %v9401_v53 = vadd.f32 %v9385_v18, %v21334_v34  ;;  %v19817_v4 = vpop.f32.mrb[43].mxu0  ;;  %v9363_v49 = vmul.f32 %v14601_v46, %v19727_v41  ;;  %v19862_v18 = vmax.f32 %v9396_v7, 0.0  ;;  %v21343_v63 = vmax.f32 %v21342_v10, 0.0  ;;  %v21344_v46 = vld [vmem:[#allocation14_spill] sm:$0xff] }
 0x934   :  { %v9400_v16 = vadd.f32 %v9384_v11, %v21339_v24  ;;  %v21345_v36 = vmax.f32 %v21344_v46, 0.0  ;;  %v9442_v7 = vmul.f32 %v19751_v60, %v19871_v21  ;;  %v21353_v24 = vmax.f32 %v21352_v56, 0.0 }
 0x935   :  { %v19822_v0 = vmax.f32 %v9401_v53, 0.0  ;;  %v9387_v6 = vadd.f32 %v19732_v27, %v9363_v49  ;;  %v9399_v50 = vadd.f32 %v19794_v57, %v21343_v63  ;;  %v10379_v53 = vmul.f32 %v19780_v3, %v19805_v51 }
 0x936   :  { %10393 = vadd.xlane.f32.xlu1 %v10392_v38  ;;  %9457 = vadd.xlane.f32.xlu0 %v9456_v43  ;;  %v14604_v61 = vpop.f32.mrb[44].mxu0  ;;  %v19876_v38 = vmax.f32 %v9400_v16, 0.0  ;;  %v21346_v43 = vld [vmem:[#allocation11_spill] sm:$0xff]  ;;  %v19908_v52 = vmul.f32 %v19758_v28, %v19862_v18  ;;  %v9764_v26 = vmul.f32 %v19746_v8, %v19871_v21 }
 0x937   :  { %v9365_v32 = vmul.f32 %v14604_v61, %v19727_v41  ;;  %v9309_v45 = vpop.f32.mrb[45].mxu0  ;;  %v9449_v40 = vmul.f32 %v19751_v60, %v19822_v0  ;;  %v9771_v20 = vmul.f32 %v19746_v8, %v19822_v0  ;;  %v10078_v15 = vmul.f32 %v19758_v28, %v19822_v0 }
 0x938   :  { %v9364_v47 = vmul.f32 %v19727_v41, %v9309_v45  ;;  %v21347_v61 = vmax.f32 %v21346_v43, 0.0  ;;  %v10385_v57 = vmul.f32 %v19780_v3, %v19822_v0  ;;  %v9381_v45 = vadd.f32 %v19732_v27, %v9357_v17 }
 0x939   :  { %v9389_v22 = vadd.f32 %v19732_v27, %v9365_v32  ;;  %v9483_v19 = vsel %vm1902_vm4, %v9449_v40, 0.0  ;;  %v9805_v35 = vsel %vm1902_vm4, %v9771_v20, 0.0  ;;  %v10112_v32 = vsel %vm1902_vm4, %v10078_v15, 0.0  ;;  %v21348_v40 = vld [vmem:[#allocation9_spill] sm:$0xff] }
 0x93a   :  { %v9388_v33 = vadd.f32 %v19732_v27, %v9364_v47  ;;  %9466 = vadd.xlane.f32.xlu1 %v9465_v9  ;;  %9484 = vadd.xlane.f32.xlu0 %v9483_v19  ;;  %v14607_v39 = vpop.f32.mrb[46].mxu0  ;;  %v9403_v29 = vadd.f32 %v9387_v6, %v21347_v61  ;;  %v21349_v11 = vmax.f32 %v21348_v40, 0.0  ;;  %v21350_v9 = vld [vmem:[#allocation15_spill] sm:$0xff]  ;;  %v10401_v20 = vsel %vm1902_vm4, %v10379_v53, 0.0 }
 0x93b   :  { %v9367_v37 = vmul.f32 %v14607_v39, %v19727_v41  ;;  %v9319_v13 = vpop.f32.mrb[47].mxu0  ;;  %v9405_v1 = vadd.f32 %v9389_v22, %v21341_v25  ;;  %v21351_v44 = vmax.f32 %v21350_v9, 0.0  ;;  %v19889_v22 = vmax.f32 %v9399_v50, 0.0  ;;  %v21354_v50 = vld [vmem:[#allocation18_spill] sm:$0xff] }
 0x93c   :  { %v9366_v48 = vmul.f32 %v19727_v41, %v9319_v13  ;;  %v9404_v34 = vadd.f32 %v9388_v33, %v21345_v36  ;;  %v9398_v47 = vadd.f32 %v19802_v55, %v21349_v11  ;;  %v19896_v33 = vmul.f32 %v19751_v60, %v19862_v18 }
 0x93d   :  { %v9391_v12 = vadd.f32 %v19732_v27, %v9367_v37  ;;  %v19873_v42 = vmax.f32 %v9405_v1, 0.0  ;;  %v19900_v39 = vmul.f32 %v19746_v8, %v19862_v18  ;;  %v19914_v59 = vmax.f32 %v9403_v29, 0.0 }
 0x93e   :  { %v9390_v14 = vadd.f32 %v19732_v27, %v9366_v48  ;;  %9788 = vadd.xlane.f32.xlu1 %v9787_v2  ;;  %9806 = vadd.xlane.f32.xlu0 %v9805_v35  ;;  %v19891_v19 = vmax.f32 %v9404_v34, 0.0  ;;  %v10419_v62 = vsel %vm1902_vm4, %v10385_v57, 0.0  ;;  %v9448_v37 = vmul.f32 %v19751_v60, %v19876_v38 }
 0x93f   :  { %v9407_v49 = vadd.f32 %v9391_v12, %v21351_v44  ;;  %v19904_v55 = vmul.f32 %v19751_v60, %v19873_v42  ;;  %v19912_v30 = vmul.f32 %v19746_v8, %v19873_v42  ;;  %v19921_v13 = vmax.f32 %v9398_v47, 0.0 }
 0x940   :  { %v9406_v16 = vadd.f32 %v9390_v14, %v21353_v24  ;;  %v19931_v25 = vmul.f32 %v19780_v3, %v19862_v18  ;;  %v19935_v1 = vmul.f32 %v19758_v28, %v19873_v42  ;;  %v19939_v48 = vmul.f32 %v19751_v60, %v19889_v22 }
 0x941   :  { %v19923_v31 = vmax.f32 %v9407_v49, 0.0  ;;  %v19943_v2 = vmul.f32 %v19751_v60, %v19891_v19  ;;  %v19947_v6 = vmul.f32 %v19746_v8, %v19889_v22  ;;  %v19951_v12 = vmul.f32 %v19746_v8, %v19891_v19 }
 0x942   :  { %10095 = vadd.xlane.f32.xlu1 %v10094_v58  ;;  %10113 = vadd.xlane.f32.xlu0 %v10112_v32  ;;  %v19955_v35 = vmul.f32 %v19758_v28, %v19889_v22  ;;  %v19959_v15 = vmul.f32 %v19758_v28, %v19891_v19  ;;  %v9362_v17 = vmul.f32 %v19727_v41, %v19817_v4  ;;  %v9462_v14 = vsel %vm1902_vm4, %v9442_v7, 0.0 }
 0x943   :  { %v9480_v10 = vsel %vm1902_vm4, %v9448_v37, 0.0  ;;  %v9451_v63 = vmul.f32 %v19751_v60, %v19914_v59  ;;  %v21355_v46 = vmax.f32 %v21354_v50, 0.0  ;;  %v19969_v34 = vmax.f32 %v9406_v16, 0.0  ;;  %v21356_v16 = vld [vmem:[#allocation12_spill] sm:$0xff] }
 0x944   :  { %v10071_v53 = vmul.f32 %v19758_v28, %v19871_v21  ;;  %v19975_v41 = vmul.f32 %v19751_v60, %v19921_v13  ;;  %v19979_v4 = vmul.f32 %v19780_v3, %v19891_v19  ;;  %v19983_v58 = vmul.f32 %v19746_v8, %v19921_v13 }
 0x945   :  { %v9397_v36 = vadd.f32 %v9381_v45, %v21355_v46  ;;  %v19987_v43 = vmul.f32 %v19751_v60, %v19923_v31  ;;  %v19991_v61 = vmul.f32 %v19758_v28, %v19921_v13  ;;  %v19995_v29 = vmul.f32 %v19746_v8, %v19923_v31 }
 0x946   :  { %10402 = vadd.xlane.f32.xlu1 %v10401_v20  ;;  %10420 = vadd.xlane.f32.xlu0 %v10419_v62  ;;  %v19999_v32 = vmul.f32 %v19746_v8, %v19876_v38  ;;  %v20003_v57 = vmul.f32 %v19758_v28, %v19923_v31  ;;  %v9386_v45 = vadd.f32 %v19732_v27, %v9362_v17  ;;  %v9784_v40 = vsel %vm1902_vm4, %v9764_v26, 0.0 }
 0x947   :  { %v9489_v11 = vsel %vm1902_vm4, %v9451_v63, 0.0  ;;  %v9773_v47 = vmul.f32 %v19746_v8, %v19914_v59  ;;  %v20010_v9 = vmax.f32 %v9397_v36, 0.0  ;;  %v10378_v44 = vmul.f32 %v19780_v3, %v19871_v21 }
 0x948   :  { %v20016_v49 = vmul.f32 %v19758_v28, %v19876_v38  ;;  %v20020_v27 = vmul.f32 %v19751_v60, %v19969_v34  ;;  %v20024_v20 = vmul.f32 %v19780_v3, %v19876_v38  ;;  %v20028_v62 = vmul.f32 %v19780_v3, %v19873_v42 }
 0x949   :  { %v20032_v7 = vmul.f32 %v19780_v3, %v19921_v13  ;;  %v20036_v37 = vmul.f32 %v19780_v3, %v19923_v31  ;;  %v20040_v56 = vmul.f32 %v19780_v3, %v19889_v22  ;;  %v20044_v24 = vmul.f32 %v19746_v8, %v19969_v34 }
 0x94a   :  { %9463 = vadd.xlane.f32.xlu1 %v9462_v14  ;;  %9481 = vadd.xlane.f32.xlu0 %v9480_v10  ;;  %v21357_v26 = vmax.f32 %v21356_v16, 0.0  ;;  %v10091_v14 = vsel %vm1902_vm4, %v10071_v53, 0.0  ;;  %v9811_v10 = vsel %vm1902_vm4, %v9773_v47, 0.0  ;;  %v10080_v63 = vmul.f32 %v19758_v28, %v19914_v59 }
 0x94b   :  { %v20054_v50 = vmul.f32 %v19758_v28, %v19969_v34  ;;  %v10398_v46 = vsel %vm1902_vm4, %v10378_v44, 0.0  ;;  %v20059_v36 = vmul.f32 %v19780_v3, %v19969_v34  ;;  %v10788_v47 = vrot.slane %v19785_v5, 1 }
 0x94c   :  { %v9402_v17 = vadd.f32 %v9386_v45, %v21357_v26  ;;  %v10118_v53 = vsel %vm1902_vm4, %v10080_v63, 0.0  ;;  %v9767_v26 = vmul.f32 %v19746_v8, %v20010_v9  ;;  %v10074_v63 = vmul.f32 %v19758_v28, %v20010_v9 }
 0x94d   :  { %15750 = vpush %v10788_v47 }
 0x94e   :  { %9785 = vadd.xlane.f32.xlu1 %v9784_v40  ;;  %9490 = vadd.xlane.f32.xlu0 %v9489_v11  ;;  %v20061_v45 = vmax.f32 %v9402_v17, 0.0  ;;  %v9445_v40 = vmul.f32 %v19751_v60, %v20010_v9  ;;  %v10387_v11 = vmul.f32 %v19780_v3, %v19914_v59 }
 0x950   :  { %v9471_v44 = vsel %vm1902_vm4, %v9445_v40, 0.0  ;;  %v10425_v16 = vsel %vm1902_vm4, %v10387_v11, 0.0  ;;  %v9450_v17 = vmul.f32 %v19751_v60, %v20061_v45  ;;  %v10381_v60 = vmul.f32 %v19780_v3, %v20010_v9 }
 0x951   :  { %v10079_v11 = vmul.f32 %v19758_v28, %v20061_v45  ;;  %v9790_v28 = vsel %vm1902_vm4, %v19900_v39, 0.0  ;;  %v9477_v39 = vsel %vm1902_vm4, %v19939_v48, 0.0  ;;  %v9474_v48 = vsel %vm1902_vm4, %v19975_v41, 0.0 }
 0x952   :  { %10092 = vadd.xlane.f32.xlu1 %v10091_v14  ;;  %9812 = vadd.xlane.f32.xlu0 %v9811_v10  ;;  %v9793_v14 = vsel %vm1902_vm4, %v9767_v26, 0.0  ;;  %v9486_v10 = vsel %vm1902_vm4, %v9450_v17, 0.0  ;;  %v9468_v26 = vsel %vm1902_vm4, %v19896_v33, 0.0  ;;  %v10404_v33 = vsel %vm1902_vm4, %v19931_v25, 0.0 }
 0x953   :  { %v10106_v25 = vsel %vm1902_vm4, %v19955_v35, 0.0  ;;  %v10103_v35 = vsel %vm1902_vm4, %v19991_v61, 0.0  ;;  %v9802_v41 = vsel %vm1902_vm4, %v19999_v32, 0.0  ;;  %v9498_v61 = vsel %vm1902_vm4, %v20020_v27, 0.0  ;;  %v9561_v32 = vld [vmem:[%s21173_s7 + $0x8] sm:$0xff] }
 0x954   :  { %v10410_v27 = vsel %vm1902_vm4, %v20032_v7, 0.0 }
 0x956   :  { %10399 = vadd.xlane.f32.xlu1 %v10398_v46  ;;  %10119 = vadd.xlane.f32.xlu0 %v10118_v53  ;;  %v9772_v46 = vmul.f32 %v19746_v8, %v20061_v45  ;;  %v10100_v53 = vsel %vm1902_vm4, %v10074_v63, 0.0  ;;  %v10386_v8 = vmul.f32 %v19780_v3, %v20061_v45  ;;  %v10097_v3 = vsel %vm1902_vm4, %v19908_v52, 0.0 }
 0x957   :  { %v10124_v63 = vsel %vm1902_vm4, %v19935_v1, 0.0  ;;  %v9799_v52 = vsel %vm1902_vm4, %v19947_v6, 0.0  ;;  %v10121_v1 = vsel %vm1902_vm4, %v19959_v15, 0.0  ;;  %v9796_v6 = vsel %vm1902_vm4, %v19983_v58, 0.0 }
 0x958   :  { %v9808_v40 = vsel %vm1902_vm4, %v9772_v46, 0.0  ;;  %v10422_v17 = vsel %vm1902_vm4, %v10386_v8, 0.0  ;;  %v9823_v15 = vsel %vm1902_vm4, %v19995_v29, 0.0  ;;  %v21256_v58 = vmov 0.0|0.0   ;;  %v9560_v29 = vld [vmem:[%s21173_s7] sm:$0xff] }
 0x959   :  { %15010 = vmatprep.subr.bf16.mxu1 %v21256_v58  ;;  %v10416_v46 = vsel %vm1902_vm4, %v20024_v20, 0.0  ;;  %v9562_v20 = vld [vmem:[%s21173_s7 + $0x10] sm:$0xff]  ;;  %v21358_v8 = vmov 0.0  }
 0x95a   :  { %9472 = vadd.xlane.f32.xlu1 %v9471_v44  ;;  %10426 = vadd.xlane.f32.xlu0 %v10425_v16  ;;  %v10407_v44 = vsel %vm1902_vm4, %v10381_v60, 0.0  ;;  %v10115_v16 = vsel %vm1902_vm4, %v10079_v11, 0.0  ;;  %v9820_v60 = vsel %vm1902_vm4, %v20044_v24, 0.0  ;;  %v10434_v11 = vsel %vm1902_vm4, %v20059_v36, 0.0  ;;  %v9565_v24 = vld [vmem:[%s21173_s7 + $0x28] sm:$0xff]  ;;  %v9567_v36 = vld [vmem:[%s21173_s7 + $0x38] sm:$0xff] }
 0x95b   :  { %14624 = vmatprep.mubr.msk.f32.mxu1 %vm15802_vm6, %v21358_v8 }
 0x95e   :  { %9794 = vadd.xlane.f32.xlu1 %v9793_v14  ;;  %9487 = vadd.xlane.f32.xlu0 %v9486_v10  ;;  %v9495_v14 = vsel %vm1902_vm4, %v19904_v55, 0.0  ;;  %v9817_v10 = vsel %vm1902_vm4, %v19912_v30, 0.0  ;;  %v9492_v55 = vsel %vm1902_vm4, %v19943_v2, 0.0  ;;  %v9814_v30 = vsel %vm1902_vm4, %v19951_v12, 0.0 }
 0x95f   :  { %v10428_v2 = vsel %vm1902_vm4, %v19979_v4, 0.0  ;;  %v9501_v12 = vsel %vm1902_vm4, %v19987_v43, 0.0  ;;  %v10130_v4 = vsel %vm1902_vm4, %v20003_v57, 0.0  ;;  %v10109_v43 = vsel %vm1902_vm4, %v20016_v49, 0.0 }
 0x960   :  { %v15011_v57 = vpack.c.bf16 %v9561_v32, %v9560_v29  ;;  %v10431_v49 = vsel %vm1902_vm4, %v20028_v62, 0.0  ;;  %v9563_v62 = vld [vmem:[%s21173_s7 + $0x18] sm:$0xff] }
 0x961   :  { %v15014_v7 = vpack.c.bf16 %v9563_v62, %v9562_v20 }
 0x962   :  { %10101 = vadd.xlane.f32.xlu1 %v10100_v53  ;;  %9809 = vadd.xlane.f32.xlu0 %v9808_v40  ;;  %v10437_v53 = vsel %vm1902_vm4, %v20036_v37, 0.0  ;;  %v10413_v40 = vsel %vm1902_vm4, %v20040_v56, 0.0  ;;  %v10127_v37 = vsel %vm1902_vm4, %v20054_v50, 0.0  ;;  %v9564_v56 = vld [vmem:[%s21173_s7 + $0x20] sm:$0xff]  ;;  %v9566_v50 = vld [vmem:[%s21173_s7 + $0x30] sm:$0xff] }
 0x963   :  { %15012 = vmatpush3.bf16.msra.mxu1 %v15011_v57 }
 0x964   :  { %15013 = vmatprep.subr.bf16.mxu1 %v21256_v58 }
 0x966   :  { %10408 = vadd.xlane.f32.xlu1 %v10407_v44  ;;  %10116 = vadd.xlane.f32.xlu0 %v10115_v16  ;;  %v15017_v44 = vpack.c.bf16 %v9565_v24, %v9564_v56  ;;  %v15020_v16 = vpack.c.bf16 %v9567_v36, %v9566_v50  ;;  %v20263_v56 = vstv %s20196_s24 }
 0x967   :  { %15015 = vmatpush3.bf16.msra.mxu1 %v15014_v7  ;;  %v20256_v7 = vstv %s20194_s23  ;;  %s15749_s23 = spop %15748 }
 0x968   :  { %15016 = vmatprep.subr.bf16.mxu1 %v21256_v58 }
 0x96a   :  { %9469 = vadd.xlane.f32.xlu1 %v9468_v26  ;;  %10423 = vadd.xlane.f32.xlu0 %v10422_v17 }
 0x96b   :  { %15018 = vmatpush3.bf16.msra.mxu1 %v15017_v44 }
 0x96c   :  { %15019 = vmatprep.subr.bf16.mxu1 %v21256_v58 }
 0x96e   :  { %9791 = vadd.xlane.f32.xlu1 %v9790_v28  ;;  %9496 = vadd.xlane.f32.xlu0 %v9495_v14 }
 0x96f   :  { %15021 = vmatpush3.bf16.msra.mxu1 %v15020_v16 }
 0x970   :  { %15022 = vmatprep.subr.bf16.mxu1 %v21256_v58 }
 0x972   :  { %10098 = vadd.xlane.f32.xlu1 %v10097_v3  ;;  %9818 = vadd.xlane.f32.xlu0 %v9817_v10  ;;  %v9584_v3 = vlaneseq  ;;  %v20203_v10 = vstv %s15745_s5 }
 0x976   :  { %10405 = vadd.xlane.f32.xlu1 %v10404_v33  ;;  %10125 = vadd.xlane.f32.xlu0 %v10124_v63 }
 0x97a   :  { %9478 = vadd.xlane.f32.xlu1 %v9477_v39  ;;  %9493 = vadd.xlane.f32.xlu0 %v9492_v55  ;;  %v20207_v39 = vand.u32 127, %v9584_v3 }
 0x97c   :  { %v9604_v36 = vadd.s32 4294967272, %v20207_v39 }
 0x97e   :  { %9800 = vadd.xlane.f32.xlu1 %v9799_v52  ;;  %9815 = vadd.xlane.f32.xlu0 %v9814_v30  ;;  %v20213_v52 = vstv %s15747_s10  ;;  %s15751_s24 = spop %15750 }
 0x982   :  { %10107 = vadd.xlane.f32.xlu1 %v10106_v25  ;;  %10122 = vadd.xlane.f32.xlu0 %v10121_v1 }
 0x986   :  { %9475 = vadd.xlane.f32.xlu1 %v9474_v48  ;;  %10429 = vadd.xlane.f32.xlu0 %v10428_v2  ;;  %v20216_v48 = vshrl.u32 %v9584_v3, 7  ;;  %v9590_v2 = vadd.s32 4294967288, %v20207_v39 }
 0x98a   :  { %9797 = vadd.xlane.f32.xlu1 %v9796_v6  ;;  %9502 = vadd.xlane.f32.xlu0 %v9501_v12 }
 0x98e   :  { %10104 = vadd.xlane.f32.xlu1 %v10103_v35  ;;  %9824 = vadd.xlane.f32.xlu0 %v9823_v15 }
 0x992   :  { %9803 = vadd.xlane.f32.xlu1 %v9802_v41  ;;  %10131 = vadd.xlane.f32.xlu0 %v10130_v4  ;;  %v20226_v41 = vsub.s32 %v20207_v39, %v20216_v48 }
 0x996   :  { %10110 = vadd.xlane.f32.xlu1 %v10109_v43  ;;  %9499 = vadd.xlane.f32.xlu0 %v9498_v61 }
 0x99a   :  { %10417 = vadd.xlane.f32.xlu1 %v10416_v46  ;;  %10432 = vadd.xlane.f32.xlu0 %v10431_v49  ;;  %v20238_v46 = vld [vmem:[%s21175_s9] ss:$0 sm:$0xff]  ;;  %v20241_v49 = vstv %s20178_s3 }
 0x99b   :  { %v10706_v50 = vmul.f32 %v20238_v46, %v19871_v21  ;;  %v10707_v3 = vmul.f32 %v20238_v46, %v19805_v51 }
 0x99e   :  { %10411 = vadd.xlane.f32.xlu1 %v10410_v27  ;;  %10438 = vadd.xlane.f32.xlu0 %v10437_v53  ;;  %v20244_v27 = vstv %s20192_s1 }
 0x9a2   :  { %10414 = vadd.xlane.f32.xlu1 %v10413_v40  ;;  %9821 = vadd.xlane.f32.xlu0 %v9820_v60  ;;  %v20253_v60 = vstv %s20182_s4 }
 0x9a6   :  { %10128 = vadd.xlane.f32.xlu0 %v10127_v37  ;;  %v10704_v37 = vmul.f32 %v20238_v46, %v19760_v54 }
 0x9aa   :  { %10435 = vadd.xlane.f32.xlu0 %v10434_v11  ;;  %v10712_v11 = vmul.f32 %v20238_v46, %v19876_v38 }
 0x9b3   :  { %11072 = vrot.lane.b32.xlu1 %v19785_v5, %s15799_s0 }
 0x9b7   :  { %v9783_v26 = vpop.xlane.xlu0 %9782  ;;  %v9461_v17 = vpop.xlane.xlu1 %9460 }
 0x9b8   :  { %v9832_v53 = vmul.f32 %v20244_v27, %v9783_v26  ;;  %v9509_v24 = vmul.f32 %v20241_v49, %v9461_v17  ;;  %v10705_v26 = vmul.f32 %v20238_v46, %v19753_v23 }
 0x9bb   :  { %v20201_v28 = vpop.xlane.xlu0 %10089  ;;  %v9780_v14 = vpop.xlane.xlu1 %9779 }
 0x9bc   :  { %v9831_v44 = vmul.f32 %v20244_v27, %v9780_v14 }
 0x9bf   :  { %v10397_v33 = vpop.xlane.xlu0 %10396  ;;  %v20205_v63 = vpop.xlane.xlu1 %10086 }
 0x9c0   :  { %v10446_v55 = vmul.f32 %v20203_v10, %v10397_v33  ;;  %11093 = vrot.lane.b32.xlu0 %v10788_v47, %s15799_s0  ;;  %v20222_v47 = vsub.s32 %v9590_v2, %v20216_v48  ;;  %v20276_v33 = vstv %s20199_s25  ;;  %v10720_v2 = vsel %vm1902_vm4, %v10704_v37, 0.0 }
 0x9c2   :  { %v10467_v30 = vadd.f32 %v20213_v52, %v10446_v55  ;;  %21359 = vst [vmem:[#allocation17_spill] sm:$0xff] %v20222_v47  ;;  %v9853_v55 = vadd.f32 %v20256_v7, %v9832_v53  ;;  %v10729_v53 = vsel %vm1902_vm4, %v10707_v3, 0.0  ;;  %v10139_v3 = vmul.f32 %v20263_v56, %v20201_v28 }
 0x9c3   :  { %v10394_v25 = vpop.xlane.xlu1 %10393  ;;  %v9458_v1 = vpop.xlane.xlu0 %9457 }
 0x9c4   :  { %v10445_v6 = vmul.f32 %v20203_v10, %v10394_v25  ;;  %v10483_v12 = vmax.f32 %v10467_v30, 0.0  ;;  %v9508_v20 = vmul.f32 %v20241_v49, %v9458_v1  ;;  %v9597_v1 = vadd.s32 4294967280, %v20207_v39 }
 0x9c6   :  { %v10466_v35 = vadd.f32 %v20213_v52, %v10445_v6  ;;  %v10530_v43 = vrot.slane %v10483_v12, %v20222_v47  ;;  %v9528_v17 = vadd.f32 %v20253_v60, %v9508_v20  ;;  %v10744_v6 = vsel %vm1902_vm4, %v10712_v11, 0.0 }
 0x9c7   :  { %v9467_v15 = vpop.xlane.xlu1 %9466  ;;  %v9485_v5 = vpop.xlane.xlu0 %9484  ;;  %v10713_v12 = vmul.f32 %v20238_v46, %v19822_v0  ;;  %v9869_v20 = vmax.f32 %v9853_v55, 0.0 }
 0x9c8   :  { %v10482_v4 = vmax.f32 %v10466_v35, 0.0  ;;  %v9517_v16 = vmul.f32 %v20241_v49, %v9485_v5  ;;  %v9511_v14 = vmul.f32 %v20241_v49, %v9467_v15  ;;  %v9529_v35 = vadd.f32 %v20253_v60, %v9509_v24 }
 0x9c9   :  { %v9852_v5 = vadd.f32 %v20256_v7, %v9831_v44  ;;  %v20292_v15 = vsub.s32 %v9604_v36, %v20216_v48  ;;  %v9544_v37 = vmax.f32 %v9528_v17, 0.0  ;;  %v20307_v17 = vsub.s32 %v9597_v1, %v20216_v48 }
 0x9ca   :  { %v10526_v61 = vrot.slane %v10482_v4, %v20226_v41  ;;  %v10726_v4 = vsel %vm1902_vm4, %v10706_v50, 0.0  ;;  %v9531_v11 = vadd.f32 %v20253_v60, %v9511_v14  ;;  %v10138_v50 = vmul.f32 %v20263_v56, %v20205_v63 }
 0x9cb   :  { %v9789_v29 = vpop.xlane.xlu1 %9788  ;;  %v20230_v32 = vpop.xlane.xlu0 %9806  ;;  %21361 = vst [vmem:[#allocation10_spill] sm:$0xff] %v20292_v15  ;;  %v9545_v8 = vmax.f32 %v9529_v35, 0.0  ;;  %v9868_v55 = vmax.f32 %v9852_v5, 0.0  ;;  %21362 = vst [vmem:[#allocation13_spill] sm:$0xff] %v20307_v17  ;;  %v9589_v63 = vrot.slane %v9544_v37, %v20226_v41 }
 0x9cc   :  { %v20233_v57 = vsel %vm9595_vm7, %v10530_v43, %v10526_v61  ;;  %v9537_v43 = vadd.f32 %v20253_v60, %v9517_v16  ;;  %v10723_v61 = vsel %vm1902_vm4, %v10705_v26, 0.0  ;;  %v9834_v24 = vmul.f32 %v20244_v27, %v9789_v29 }
 0x9cd   :  { %v10747_v26 = vsel %vm1902_vm4, %v10713_v12, 0.0  ;;  %v10159_v5 = vadd.f32 %v20276_v33, %v10138_v50 }
 0x9ce   :  { %v9553_v29 = vmax.f32 %v9537_v43, 0.0  ;;  %v9855_v12 = vadd.f32 %v20256_v7, %v9834_v24 }
 0x9cf   :  { %v20248_v62 = vpop.xlane.xlu1 %10095  ;;  %v20250_v40 = vpop.xlane.xlu0 %10113 }
 0x9d0   :  { %v10141_v37 = vmul.f32 %v20263_v56, %v20248_v62  ;;  %v10175_v62 = vmax.f32 %v10159_v5, 0.0  ;;  %v10714_v5 = vmul.f32 %v20238_v46, %v20061_v45 }
 0x9d3   :  { %v10403_v30 = vpop.xlane.xlu1 %10402  ;;  %v20281_v25 = vpop.xlane.xlu0 %10420 }
 0x9d4   :  { %21360 = vst [vmem:[#allocation7_spill] sm:$0xff] %v20281_v25 }
 0x9d7   :  { %v9464_v58 = vpop.xlane.xlu1 %9463  ;;  %10721 = vadd.xlane.f32.xlu1 %v10720_v2  ;;  %v9482_v44 = vpop.xlane.xlu0 %9481 }
 0x9d8   :  { %v9510_v36 = vmul.f32 %v20241_v49, %v9464_v58  ;;  %v9516_v16 = vmul.f32 %v20241_v49, %v9482_v44  ;;  %v9916_v58 = vrot.slane %v9869_v20, %v20222_v47  ;;  %v9547_v44 = vmax.f32 %v9531_v11, 0.0 }
 0x9d9   :  { %v9912_v20 = vrot.slane %v9868_v55, %v20226_v41  ;;  %v9646_v11 = vrot.slane %v9553_v29, %v20222_v47 }
 0x9da   :  { %v9530_v14 = vadd.f32 %v20253_v60, %v9510_v36  ;;  %v9536_v2 = vadd.f32 %v20253_v60, %v9516_v16  ;;  %v9594_v36 = vrot.slane %v9545_v8, %v20222_v47  ;;  %v10160_v16 = vadd.f32 %v20276_v33, %v10139_v3 }
 0x9db   :  { %v9786_v35 = vpop.xlane.xlu1 %9785  ;;  %10745 = vadd.xlane.f32.xlu1 %v10744_v6  ;;  %v9491_v28 = vpop.xlane.xlu0 %9490  ;;  %v9871_v8 = vmax.f32 %v9855_v12, 0.0  ;;  %v10448_v3 = vmul.f32 %v20203_v10, %v10403_v30 }
 0x9dc   :  { %v9546_v1 = vmax.f32 %v9530_v14, 0.0  ;;  %v9552_v25 = vmax.f32 %v9536_v2, 0.0  ;;  %v9833_v43 = vmul.f32 %v20244_v27, %v9786_v35  ;;  %v9596_v14 = vsel %vm9595_vm7, %v9594_v36, %v9589_v63 }
 0x9dd   :  { %v9608_v2 = vrot.slane %v9547_v44, %v20292_v15  ;;  %v10708_v44 = vmul.f32 %v20238_v46, %v19862_v18  ;;  %v9926_v36 = vrot.slane %v9871_v8, %v20292_v15  ;;  %v10715_v8 = vmul.f32 %v20238_v46, %v19914_v59 }
 0x9de   :  { %v9601_v6 = vrot.slane %v9546_v1, %v20307_v17  ;;  %v9642_v24 = vrot.slane %v9552_v25, %v20226_v41  ;;  %v9854_v50 = vadd.f32 %v20256_v7, %v9833_v43  ;;  %v10162_v43 = vadd.f32 %v20276_v33, %v10141_v37 }
 0x9df   :  { %v10093_v35 = vpop.xlane.xlu1 %10092  ;;  %10727 = vadd.xlane.f32.xlu1 %v10726_v4  ;;  %v20328_v55 = vpop.xlane.xlu0 %9812  ;;  %10724 = vadd.xlane.f32.xlu0 %v10723_v61  ;;  %v10176_v4 = vmax.f32 %v10160_v16, 0.0  ;;  %v9917_v61 = vsel %vm9595_vm7, %v9916_v58, %v9912_v20  ;;  %v10469_v37 = vadd.f32 %v20213_v52, %v10448_v3  ;;  %v10219_v16 = vrot.slane %v10175_v62, %v20226_v41 }
 0x9e0   :  { %v9603_v29 = vsel %vm9602_vm8, %v9601_v6, %v9596_v14  ;;  %v20332_v1 = vsel %vm9595_vm7, %v9646_v11, %v9642_v24  ;;  %v9870_v25 = vmax.f32 %v9854_v50, 0.0  ;;  %v10140_v63 = vmul.f32 %v20263_v56, %v10093_v35 }
 0x9e1   :  { %v20339_v30 = vsel %vm9609_vm9, %v9608_v2, %v9603_v29  ;;  %v10709_v50 = vmul.f32 %v20238_v46, %v20010_v9  ;;  %v10178_v14 = vmax.f32 %v10162_v43, 0.0  ;;  %v10732_v35 = vsel %vm1902_vm4, %v10708_v44, 0.0 }
 0x9e2   :  { %v9921_v12 = vrot.slane %v9870_v25, %v20307_v17  ;;  %v10161_v11 = vadd.f32 %v20276_v33, %v10140_v63  ;;  %v10750_v62 = vsel %vm1902_vm4, %v10714_v5, 0.0  ;;  %v10485_v29 = vmax.f32 %v10469_v37, 0.0 }
 0x9e3   :  { %v10400_v6 = vpop.xlane.xlu1 %10399  ;;  %10730 = vadd.xlane.f32.xlu1 %v10729_v53  ;;  %v20348_v24 = vpop.xlane.xlu0 %10119  ;;  %10748 = vadd.xlane.f32.xlu0 %v10747_v26  ;;  %v10223_v53 = vrot.slane %v10176_v4, %v20222_v47  ;;  %v10233_v4 = vrot.slane %v10178_v14, %v20292_v15  ;;  %v10710_v5 = vmul.f32 %v20238_v46, %v19921_v13 }
 0x9e4   :  { %v9922_v58 = vsel %vm9602_vm8, %v9921_v12, %v9917_v61  ;;  %v10447_v20 = vmul.f32 %v20203_v10, %v10400_v6  ;;  %v10177_v2 = vmax.f32 %v10161_v11, 0.0  ;;  %v10735_v11 = vsel %vm1902_vm4, %v10709_v50, 0.0 }
 0x9e5   :  { %v20358_v3 = vsel %vm9609_vm9, %v9926_v36, %v9922_v58  ;;  %v10224_v61 = vsel %vm9595_vm7, %v10223_v53, %v10219_v16  ;;  %v9519_v36 = vmul.f32 %v20241_v49, %v9491_v28  ;;  %v10753_v6 = vsel %vm1902_vm4, %v10715_v8, 0.0 }
 0x9e6   :  { %v10468_v26 = vadd.f32 %v20213_v52, %v10447_v20  ;;  %v10228_v25 = vrot.slane %v10177_v2, %v20307_v17  ;;  %v10716_v58 = vmul.f32 %v20238_v46, %v19891_v19  ;;  %v10540_v16 = vrot.slane %v10485_v29, %v20292_v15 }
 0x9e7   :  { %v20365_v63 = vpop.xlane.xlu1 %9472  ;;  %10733 = vadd.xlane.f32.xlu1 %v10732_v35  ;;  %v20367_v43 = vpop.xlane.xlu0 %10426  ;;  %10751 = vadd.xlane.f32.xlu0 %v10750_v62  ;;  %v9539_v53 = vadd.f32 %v20253_v60, %v9519_v36  ;;  %v10711_v62 = vmul.f32 %v20238_v46, %v19889_v22  ;;  %v10717_v29 = vmul.f32 %v20238_v46, %v19873_v42 }
 0x9e8   :  { %v10484_v12 = vmax.f32 %v10468_v26, 0.0  ;;  %v10229_v44 = vsel %vm9602_vm8, %v10228_v25, %v10224_v61  ;;  %v10738_v26 = vsel %vm1902_vm4, %v10710_v5, 0.0  ;;  %v10756_v35 = vsel %vm1902_vm4, %v10716_v58, 0.0 }
 0x9e9   :  { %v20382_v28 = vsel %vm9609_vm9, %v10233_v4, %v10229_v44  ;;  %v9555_v4 = vmax.f32 %v9539_v53, 0.0  ;;  %v10741_v44 = vsel %vm1902_vm4, %v10711_v62, 0.0  ;;  %v10759_v5 = vsel %vm1902_vm4, %v10717_v29, 0.0 }
 0x9ea   :  { %v10535_v37 = vrot.slane %v10484_v12, %v20307_v17  ;;  %v20403_v12 = vld [vmem:[%s21175_s9 + $0x1] ss:$0 sm:$0xff] }
 0x9eb   :  { %v9795_v20 = vpop.xlane.xlu1 %9794  ;;  %10736 = vadd.xlane.f32.xlu1 %v10735_v11  ;;  %v9488_v14 = vpop.xlane.xlu0 %9487  ;;  %10754 = vadd.xlane.f32.xlu0 %v10753_v6  ;;  %v10719_v11 = vmul.f32 %v20238_v46, %v19923_v31 }
 0x9ec   :  { %v10536_v2 = vsel %vm9602_vm8, %v10535_v37, %v20233_v57  ;;  %v9518_v50 = vmul.f32 %v20241_v49, %v9488_v14  ;;  %v11008_v37 = vmul.f32 %v20403_v12, %v19760_v54  ;;  %v9656_v14 = vrot.slane %v9555_v4, %v20292_v15 }
 0x9ed   :  { %v20389_v8 = vsel %vm9609_vm9, %v10540_v16, %v10536_v2  ;;  %v11016_v54 = vmul.f32 %v20403_v12, %v19876_v38  ;;  %v11010_v38 = vmul.f32 %v20403_v12, %v19871_v21  ;;  %v11011_v21 = vmul.f32 %v20403_v12, %v19805_v51 }
 0x9ee   :  { %v9538_v25 = vadd.f32 %v20253_v60, %v9518_v50  ;;  %v11024_v53 = vsel %vm1902_vm4, %v11008_v37, 0.0  ;;  %v10765_v50 = vsel %vm1902_vm4, %v10719_v11, 0.0  ;;  %v9611_v37 = vadd.s32 4294967264, %v20207_v39 }
 0x9ef   :  { %v10102_v57 = vpop.xlane.xlu1 %10101  ;;  %10739 = vadd.xlane.f32.xlu1 %v10738_v26  ;;  %v20398_v61 = vpop.xlane.xlu0 %9809  ;;  %10757 = vadd.xlane.f32.xlu0 %v10756_v35  ;;  %v11009_v26 = vmul.f32 %v20403_v12, %v19753_v23  ;;  %v9836_v35 = vmul.f32 %v20244_v27, %v9795_v20  ;;  %v11017_v23 = vmul.f32 %v20403_v12, %v19822_v0 }
 0x9f0   :  { %v9554_v36 = vmax.f32 %v9538_v25, 0.0  ;;  %v11048_v25 = vsel %vm1902_vm4, %v11016_v54, 0.0  ;;  %v11018_v0 = vmul.f32 %v20403_v12, %v20061_v45  ;;  %v20456_v51 = vsub.s32 %v9611_v37, %v20216_v48 }
 0x9f1   :  { %v11027_v4 = vsel %vm1902_vm4, %v11009_v26, 0.0  ;;  %v9857_v20 = vadd.f32 %v20256_v7, %v9836_v35 }
 0x9f2   :  { %v9651_v6 = vrot.slane %v9554_v36, %v20307_v17  ;;  %v10143_v36 = vmul.f32 %v20263_v56, %v10102_v57  ;;  %v11030_v57 = vsel %vm1902_vm4, %v11010_v38, 0.0  ;;  %v11033_v38 = vsel %vm1902_vm4, %v11011_v21, 0.0 }
 0x9f3   :  { %v10409_v58 = vpop.xlane.xlu1 %10408  ;;  %10742 = vadd.xlane.f32.xlu1 %v10741_v44  ;;  %v20412_v16 = vpop.xlane.xlu0 %10116  ;;  %10760 = vadd.xlane.f32.xlu0 %v10759_v5 }
 0x9f4   :  { %v9652_v2 = vsel %vm9602_vm8, %v9651_v6, %v20332_v1  ;;  %v9618_v6 = vadd.s32 4294967256, %v20207_v39  ;;  %v10450_v54 = vmul.f32 %v20203_v10, %v10409_v58 }
 0x9f5   :  { %v20429_v1 = vsel %vm9609_vm9, %v9656_v14, %v9652_v2  ;;  %v11051_v2 = vsel %vm1902_vm4, %v11017_v23, 0.0  ;;  %v11054_v23 = vsel %vm1902_vm4, %v11018_v0, 0.0 }
 0x9f7   :  { %v20424_v62 = vpop.xlane.xlu1 %9469  ;;  %11025 = vadd.xlane.f32.xlu1 %v11024_v53  ;;  %v20426_v29 = vpop.xlane.xlu0 %10423  ;;  %10766 = vadd.xlane.f32.xlu0 %v10765_v50  ;;  %v9873_v53 = vmax.f32 %v9857_v20, 0.0  ;;  %v10164_v50 = vadd.f32 %v20276_v33, %v10143_v36  ;;  %v11012_v36 = vmul.f32 %v20403_v12, %v19862_v18 }
 0x9fb   :  { %v9792_v44 = vpop.xlane.xlu1 %9791  ;;  %11049 = vadd.xlane.f32.xlu1 %v11048_v25  ;;  %v20439_v5 = vpop.xlane.xlu0 %9496  ;;  %11028 = vadd.xlane.f32.xlu0 %v11027_v4  ;;  %v20460_v4 = vsub.s32 %v9618_v6, %v20216_v48  ;;  %v10471_v6 = vadd.f32 %v20213_v52, %v10450_v54 }
 0x9fc   :  { %v9835_v11 = vmul.f32 %v20244_v27, %v9792_v44  ;;  %v11019_v44 = vmul.f32 %v20403_v12, %v19914_v59  ;;  %v11013_v59 = vmul.f32 %v20403_v12, %v20010_v9 }
 0x9fd   :  { %v9936_v37 = vrot.slane %v9873_v53, %v20460_v4 }
 0x9fe   :  { %v9856_v14 = vadd.f32 %v20256_v7, %v9835_v11  ;;  %v10180_v11 = vmax.f32 %v10164_v50, 0.0 }
 0x9ff   :  { %v10099_v26 = vpop.xlane.xlu1 %10098  ;;  %11031 = vadd.xlane.f32.xlu1 %v11030_v57  ;;  %v20453_v35 = vpop.xlane.xlu0 %9818  ;;  %11052 = vadd.xlane.f32.xlu0 %v11051_v2  ;;  %v10718_v2 = vmul.f32 %v20238_v46, %v19969_v34 }
 0xa00   :  { %v9872_v45 = vmax.f32 %v9856_v14, 0.0  ;;  %v10142_v25 = vmul.f32 %v20263_v56, %v10099_v26  ;;  %v11036_v26 = vsel %vm1902_vm4, %v11012_v36, 0.0 }
 0xa02   :  { %v9931_v58 = vrot.slane %v9872_v45, %v20456_v51  ;;  %v10163_v20 = vadd.f32 %v20276_v33, %v10142_v25  ;;  %v10243_v45 = vrot.slane %v10180_v11, %v20460_v4  ;;  %v10487_v25 = vmax.f32 %v10471_v6, 0.0 }
 0xa03   :  { %v10406_v14 = vpop.xlane.xlu1 %10405  ;;  %11034 = vadd.xlane.f32.xlu1 %v11033_v38  ;;  %v20472_v21 = vpop.xlane.xlu0 %10125  ;;  %11055 = vadd.xlane.f32.xlu0 %v11054_v23  ;;  %v11039_v11 = vsel %vm1902_vm4, %v11013_v59, 0.0  ;;  %v10762_v6 = vsel %vm1902_vm4, %v10718_v2, 0.0  ;;  %v21363_v59 = vld [vmem:[#allocation7_spill] sm:$0xff] }
 0xa04   :  { %v9932_v0 = vsel %vm9616_vm10, %v9931_v58, %v20358_v3  ;;  %v10179_v57 = vmax.f32 %v10163_v20, 0.0  ;;  %v10449_v18 = vmul.f32 %v20203_v10, %v10406_v14  ;;  %v11057_v3 = vsel %vm1902_vm4, %v11019_v44, 0.0 }
 0xa05   :  { %v20482_v53 = vsel %vm9623_vm11, %v9936_v37, %v9932_v0  ;;  %v11014_v58 = vmul.f32 %v20403_v12, %v19921_v13  ;;  %v11020_v20 = vmul.f32 %v20403_v12, %v19891_v19  ;;  %v9840_v44 = vmul.f32 %v20244_v27, %v20230_v32 }
 0xa06   :  { %v10238_v50 = vrot.slane %v10179_v57, %v20456_v51  ;;  %v10470_v54 = vadd.f32 %v20213_v52, %v10449_v18  ;;  %v10550_v13 = vrot.slane %v10487_v25, %v20460_v4  ;;  %v11015_v32 = vmul.f32 %v20403_v12, %v19889_v22 }
 0xa07   :  { %v20489_v38 = vpop.xlane.xlu1 %9478  ;;  %11037 = vadd.xlane.f32.xlu1 %v11036_v26  ;;  %v20491_v9 = vpop.xlane.xlu0 %9493  ;;  %11058 = vadd.xlane.f32.xlu0 %v11057_v3  ;;  %v11021_v57 = vmul.f32 %v20403_v12, %v19873_v42  ;;  %v11023_v18 = vmul.f32 %v20403_v12, %v19923_v31  ;;  %v10454_v2 = vmul.f32 %v20203_v10, %v21363_v59  ;;  %v9625_v26 = vadd.s32 4294967248, %v20207_v39 }
 0xa08   :  { %v10239_v46 = vsel %vm9616_vm10, %v10238_v50, %v20382_v28  ;;  %v10486_v23 = vmax.f32 %v10470_v54, 0.0  ;;  %v10147_v28 = vmul.f32 %v20263_v56, %v20250_v40  ;;  %v11022_v40 = vmul.f32 %v20403_v12, %v19969_v34 }
 0xa09   :  { %v20500_v36 = vsel %vm9623_vm11, %v10243_v45, %v10239_v46  ;;  %v9632_v50 = vadd.s32 4294967240, %v20207_v39  ;;  %v11042_v54 = vsel %vm1902_vm4, %v11014_v58, 0.0  ;;  %v9512_v42 = vmul.f32 %v20241_v49, %v20424_v62  ;;  %v20549_v39 = vld [vmem:[%s21173_s7 + $0x40] sm:$0xff] }
 0xa0a   :  { %v10545_v37 = vrot.slane %v10486_v23, %v20456_v51  ;;  %v11060_v34 = vsel %vm1902_vm4, %v11020_v20, 0.0  ;;  %v10168_v31 = vadd.f32 %v20276_v33, %v10147_v28  ;;  %v9842_v12 = vmul.f32 %v20244_v27, %v20328_v55  ;;  %v20554_v55 = vld [vmem:[%s21173_s7 + $0x48] sm:$0xff]  ;;  %v20564_v20 = vld [vmem:[%s21173_s7 + $0x50] sm:$0xff]  ;;  %v20582_v28 = vld [vmem:[%s21173_s7 + $0x60] sm:$0xff] }
 0xa0b   :  { %v20510_v14 = vpop.xlane.xlu1 %9800  ;;  %11040 = vadd.xlane.f32.xlu1 %v11039_v11  ;;  %v20512_v19 = vpop.xlane.xlu0 %9815  ;;  %10763 = vadd.xlane.f32.xlu0 %v10762_v6  ;;  %v10149_v3 = vmul.f32 %v20263_v56, %v20348_v24  ;;  %v11045_v62 = vsel %vm1902_vm4, %v11015_v32, 0.0  ;;  %v9513_v24 = vmul.f32 %v20241_v49, %v20365_v63  ;;  %v11063_v46 = vsel %vm1902_vm4, %v11021_v57, 0.0 }
 0xa0c   :  { %v10546_v0 = vsel %vm9616_vm10, %v10545_v37, %v20389_v8  ;;  %v9861_v8 = vadd.f32 %v20256_v7, %v9840_v44  ;;  %v11066_v23 = vsel %vm1902_vm4, %v11022_v40, 0.0  ;;  %v11069_v58 = vsel %vm1902_vm4, %v11023_v18, 0.0  ;;  %v20569_v44 = vld [vmem:[%s21173_s7 + $0x58] sm:$0xff] }
 0xa0d   :  { %v20529_v22 = vsel %vm9623_vm11, %v10550_v13, %v10546_v0  ;;  %v10475_v37 = vadd.f32 %v20213_v52, %v10454_v2  ;;  %v10456_v63 = vmul.f32 %v20203_v10, %v20367_v43  ;;  %v9841_v11 = vmul.f32 %v20244_v27, %v20398_v61  ;;  %v20587_v13 = vld [vmem:[%s21173_s7 + $0x68] sm:$0xff] }
 0xa0e   :  { %v20577_v6 = vsub.s32 %v9632_v50, %v20216_v48  ;;  %v9877_v32 = vmax.f32 %v9861_v8, 0.0  ;;  %v9532_v0 = vadd.f32 %v20253_v60, %v9512_v42  ;;  %v20591_v43 = vsub.s32 %v9625_v26, %v20216_v48  ;;  %v20602_v48 = vld [vmem:[%s21173_s7 + $0x70] sm:$0xff] }
 0xa0f   :  { %v20541_v45 = vpop.xlane.xlu1 %10107  ;;  %11043 = vadd.xlane.f32.xlu1 %v11042_v54  ;;  %v20543_v25 = vpop.xlane.xlu0 %10122  ;;  %11061 = vadd.xlane.f32.xlu0 %v11060_v34  ;;  %v10184_v57 = vmax.f32 %v10168_v31, 0.0  ;;  %v9863_v40 = vadd.f32 %v20256_v7, %v9842_v12  ;;  %v10170_v18 = vadd.f32 %v20276_v33, %v10149_v3  ;;  %v20607_v54 = vld [vmem:[%s21173_s7 + $0x78] sm:$0xff]  ;;  %v9533_v8 = vadd.f32 %v20253_v60, %v9513_v24 }
 0xa10   :  { %v10148_v42 = vmul.f32 %v20263_v56, %v20412_v16  ;;  %v10455_v34 = vmul.f32 %v20203_v10, %v20426_v29  ;;  %v10491_v31 = vmax.f32 %v10475_v37, 0.0  ;;  %v10477_v12 = vadd.f32 %v20213_v52, %v10456_v63 }
 0xa11   :  { %v9862_v3 = vadd.f32 %v20256_v7, %v9841_v11  ;;  %v9548_v24 = vmax.f32 %v9532_v0, 0.0  ;;  %v9520_v16 = vmul.f32 %v20241_v49, %v20491_v9  ;;  %v20628_v26 = vrot.slane %v10184_v57, %v20222_v47 }
 0xa12   :  { %v9879_v37 = vmax.f32 %v9863_v40, 0.0  ;;  %v10186_v63 = vmax.f32 %v10170_v18, 0.0  ;;  %v10151_v11 = vmul.f32 %v20263_v56, %v20472_v21  ;;  %v10169_v0 = vadd.f32 %v20276_v33, %v10148_v42 }
 0xa13   :  { %v9476_v59 = vpop.xlane.xlu1 %9475  ;;  %11046 = vadd.xlane.f32.xlu1 %v11045_v62  ;;  %v10430_v2 = vpop.xlane.xlu0 %10429  ;;  %11064 = vadd.xlane.f32.xlu0 %v11063_v46  ;;  %v9521_v62 = vmul.f32 %v20241_v49, %v20439_v5  ;;  %v20621_v46 = vrot.slane %v9877_v32, %v20222_v47  ;;  %v9549_v32 = vmax.f32 %v9533_v8, 0.0  ;;  %v10476_v61 = vadd.f32 %v20213_v52, %v10455_v34 }
 0xa14   :  { %v9515_v9 = vmul.f32 %v20241_v49, %v20489_v38  ;;  %v20637_v29 = vrot.slane %v10491_v31, %v20222_v47  ;;  %v10493_v57 = vmax.f32 %v10477_v12, 0.0  ;;  %v9878_v40 = vmax.f32 %v9862_v3, 0.0 }
 0xa15   :  { %v9541_v18 = vadd.f32 %v20253_v60, %v9521_v62  ;;  %v9615_v21 = vrot.slane %v9548_v24, %v20456_v51  ;;  %v9540_v8 = vadd.f32 %v20253_v60, %v9520_v16  ;;  %v9843_v42 = vmul.f32 %v20244_v27, %v20512_v19 }
 0xa16   :  { %v20647_v34 = vrot.slane %v9879_v37, %v20292_v15  ;;  %v20650_v38 = vrot.slane %v10186_v63, %v20292_v15  ;;  %v10172_v31 = vadd.f32 %v20276_v33, %v10151_v11  ;;  %v9514_v12 = vmul.f32 %v20241_v49, %v9476_v59 }
 0xa17   :  { %v9798_v50 = vpop.xlane.xlu1 %9797  ;;  %v9503_v5 = vpop.xlane.xlu0 %9502  ;;  %11067 = vadd.xlane.f32.xlu0 %v11066_v23  ;;  %v9844_v23 = vmul.f32 %v20244_v27, %v20453_v35  ;;  %v9622_v35 = vrot.slane %v9549_v32, %v20460_v4  ;;  %v10185_v24 = vmax.f32 %v10169_v0, 0.0  ;;  %v10492_v16 = vmax.f32 %v10476_v61, 0.0 }
 0xa18   :  { %v9535_v19 = vadd.f32 %v20253_v60, %v9515_v9  ;;  %v20661_v37 = vrot.slane %v10493_v57, %v20292_v15  ;;  %v9960_v63 = vrot.slane %v9878_v40, %v20307_v17  ;;  %v9557_v47 = vmax.f32 %v9541_v18, 0.0 }
 0xa19   :  { %v9838_v59 = vmul.f32 %v20244_v27, %v20510_v14  ;;  %v9617_v11 = vsel %vm9616_vm10, %v9615_v21, %v20339_v30  ;;  %v9556_v32 = vmax.f32 %v9540_v8, 0.0  ;;  %v9864_v61 = vadd.f32 %v20256_v7, %v9843_v42 }
 0xa1a   :  { %v10188_v0 = vmax.f32 %v10172_v31, 0.0  ;;  %v10150_v9 = vmul.f32 %v20263_v56, %v20543_v25  ;;  %v9534_v57 = vadd.f32 %v20253_v60, %v9514_v12  ;;  %v10457_v40 = vmul.f32 %v20203_v10, %v10430_v2 }
 0xa1b   :  { %v20654_v3 = vpop.xlane.xlu1 %10104  ;;  %v20656_v62 = vpop.xlane.xlu0 %9824  ;;  %11070 = vadd.xlane.f32.xlu0 %v11069_v58  ;;  %v20669_v58 = vadd.f32 %v20256_v7, %v9844_v23  ;;  %v20679_v14 = vrot.slane %v10185_v24, %v20307_v17  ;;  %v20682_v30 = vrot.slane %v10492_v16, %v20307_v17  ;;  %v9551_v21 = vmax.f32 %v9535_v19, 0.0 }
 0xa1c   :  { %v9666_v8 = vrot.slane %v9557_v47, %v20460_v4  ;;  %v20687_v25 = vadd.f32 %v20256_v7, %v9838_v59  ;;  %v9624_v42 = vsel %vm9623_vm11, %v9622_v35, %v9617_v11  ;;  %v9523_v2 = vmul.f32 %v20241_v49, %v9503_v5 }
 0xa1d   :  { %v9661_v12 = vrot.slane %v9556_v32, %v20456_v51  ;;  %v9880_v24 = vmax.f32 %v9864_v61, 0.0  ;;  %v20695_v19 = vrot.slane %v10188_v0, %v20460_v4  ;;  %v10171_v47 = vadd.f32 %v20276_v33, %v10150_v9 }
 0xa1e   :  { %v10478_v59 = vadd.f32 %v20213_v52, %v10457_v40  ;;  %v9636_v11 = vrot.slane %v9551_v21, %v20577_v6  ;;  %v9837_v5 = vmul.f32 %v20244_v27, %v9798_v50  ;;  %v10145_v0 = vmul.f32 %v20263_v56, %v20541_v45 }
 0xa1f   :  { %v9804_v18 = vpop.xlane.xlu1 %9803  ;;  %v20676_v15 = vpop.xlane.xlu0 %10131  ;;  %v9543_v9 = vadd.f32 %v20253_v60, %v9523_v2  ;;  %v9662_v40 = vsel %vm9616_vm10, %v9661_v12, %v20429_v1  ;;  %v20710_v21 = vrot.slane %v9880_v24, %v20456_v51 }
 0xa20   :  { %v9839_v23 = vmul.f32 %v20244_v27, %v9804_v18  ;;  %v9550_v18 = vmax.f32 %v9534_v57, 0.0  ;;  %v10494_v45 = vmax.f32 %v10478_v59, 0.0 }
 0xa22   :  { %v9860_v16 = vadd.f32 %v20256_v7, %v9839_v23  ;;  %v10187_v23 = vmax.f32 %v10171_v47, 0.0 }
 0xa23   :  { %v10111_v17 = vpop.xlane.xlu1 %10110  ;;  %v9500_v35 = vpop.xlane.xlu0 %9499 }
 0xa24   :  { %v9876_v31 = vmax.f32 %v9860_v16, 0.0  ;;  %v10146_v32 = vmul.f32 %v20263_v56, %v10111_v17  ;;  %v9522_v57 = vmul.f32 %v20241_v49, %v9500_v35  ;;  %v9629_v16 = vrot.slane %v9550_v18, %v20591_v43 }
 0xa25   :  { %v9858_v35 = vadd.f32 %v20256_v7, %v9837_v5 }
 0xa26   :  { %v9951_v50 = vrot.slane %v9876_v31, %v20226_v41  ;;  %v10167_v17 = vadd.f32 %v20276_v33, %v10146_v32  ;;  %v9542_v2 = vadd.f32 %v20253_v60, %v9522_v57  ;;  %v9559_v31 = vmax.f32 %v9543_v9, 0.0 }
 0xa27   :  { %v10418_v61 = vpop.xlane.xlu1 %10417  ;;  %v10433_v49 = vpop.xlane.xlu0 %10432  ;;  %v10144_v32 = vmul.f32 %v20263_v56, %v20654_v3  ;;  %v9846_v60 = vmul.f32 %v20244_v27, %v20656_v62  ;;  %v20730_v57 = vadd.f32 %v20276_v33, %v10145_v0  ;;  %v9667_v3 = vsel %vm9623_vm11, %v9666_v8, %v9662_v40 }
 0xa28   :  { %v9956_v1 = vsel %vm9595_vm7, %v20621_v46, %v9951_v50  ;;  %v10183_v12 = vmax.f32 %v10167_v17, 0.0  ;;  %v10453_v24 = vmul.f32 %v20203_v10, %v10418_v61  ;;  %v9558_v18 = vmax.f32 %v9542_v2, 0.0 }
 0xa29   :  { %v9961_v47 = vsel %vm9602_vm8, %v9960_v63, %v9956_v1  ;;  %v10277_v61 = vrot.slane %v10187_v23, %v20456_v51  ;;  %v9631_v62 = vsel %vm9630_vm12, %v9629_v16, %v9624_v42  ;;  %v10584_v17 = vrot.slane %v10494_v45, %v20456_v51 }
 0xa2a   :  { %v9966_v59 = vsel %vm9609_vm9, %v20647_v34, %v9961_v47  ;;  %v10258_v5 = vrot.slane %v10183_v12, %v20226_v41  ;;  %v10474_v46 = vadd.f32 %v20213_v52, %v10453_v24  ;;  %v9671_v63 = vrot.slane %v9558_v18, %v20591_v43 }
 0xa2b   :  { %v10412_v9 = vpop.xlane.xlu1 %10411  ;;  %v10439_v50 = vpop.xlane.xlu0 %10438  ;;  %v9874_v1 = vmax.f32 %v9858_v35, 0.0  ;;  %v9676_v0 = vrot.slane %v9559_v31, %v20577_v6  ;;  %v10165_v40 = vadd.f32 %v20276_v33, %v10144_v32  ;;  %v9867_v12 = vadd.f32 %v20256_v7, %v9846_v60 }
 0xa2c   :  { %v10263_v34 = vsel %vm9595_vm7, %v20628_v26, %v10258_v5  ;;  %v10490_v2 = vmax.f32 %v10474_v46, 0.0  ;;  %v9672_v8 = vsel %vm9630_vm12, %v9671_v63, %v9667_v3  ;;  %v10153_v26 = vmul.f32 %v20263_v56, %v20676_v15 }
 0xa2d   :  { %v10268_v23 = vsel %vm9602_vm8, %v20679_v14, %v10263_v34  ;;  %v9638_v35 = vsel %vm9637_vm13, %v9636_v11, %v9631_v62  ;;  %v9677_v24 = vsel %vm9637_vm13, %v9676_v0, %v9672_v8  ;;  %v10458_v47 = vmul.f32 %v20203_v10, %v10433_v49 }
 0xa2e   :  { %v10273_v42 = vsel %vm9609_vm9, %v20650_v38, %v10268_v23  ;;  %v10565_v16 = vrot.slane %v10490_v2, %v20226_v41  ;;  %v10451_v38 = vmul.f32 %v20203_v10, %v10412_v9  ;;  %v9679_v18 = vsel %vm9678_vm14, %v9677_v24, %v9638_v35 }
 0xa2f   :  { %v10415_v45 = vpop.xlane.xlu1 %10414  ;;  %v9822_v14 = vpop.xlane.xlu0 %9821  ;;  %v10278_v31 = vsel %vm9616_vm10, %v10277_v61, %v10273_v42  ;;  %14625 = vmatmul.mubr.msk.f32.vlgmr.msra.gmra.mrb[48].mxu1 %vm9680_vm15, %v9679_v18  ;;  %v10181_v46 = vmax.f32 %v10165_v40, 0.0  ;;  %v9883_v49 = vmax.f32 %v9867_v12, 0.0  ;;  %v21364_v3 = vpack.c.bf16 %v20554_v55, %v20549_v39 }
 0xa30   :  { %v10570_v32 = vsel %vm9595_vm7, %v20637_v29, %v10565_v16  ;;  %v10452_v60 = vmul.f32 %v20203_v10, %v10415_v45  ;;  %v9845_v11 = vmul.f32 %v20244_v27, %v9822_v14  ;;  %v10283_v5 = vsel %vm9623_vm11, %v20695_v19, %v10278_v31 }
 0xa31   :  { %v10575_v15 = vsel %vm9602_vm8, %v20682_v30, %v10570_v32  ;;  %v9941_v29 = vrot.slane %v9874_v1, %v20591_v43  ;;  %15024 = vmatpush3.bf16.msra.mxu1 %v21364_v3  ;;  %v21365_v30 = vmov 0.0   ;;  %v10174_v63 = vadd.f32 %v20276_v33, %v10153_v26 }
 0xa32   :  { %v10580_v61 = vsel %vm9609_vm9, %v20661_v37, %v10575_v15  ;;  %14643 = vmatprep.mubr.msk.f32.mxu1 %vm15802_vm6, %v21365_v30  ;;  %v10460_v19 = vmul.f32 %v20203_v10, %v10439_v50  ;;  %v9866_v9 = vadd.f32 %v20256_v7, %v9845_v11  ;;  %v21366_v62 = vmov 0.0|0.0  }
 0xa33   :  { %v10585_v27 = vsel %vm9616_vm10, %v10584_v17, %v10580_v61  ;;  %15025 = vmatprep.subr.bf16.mxu1 %v21366_v62  ;;  %v10129_v34 = vpop.xlane.xlu0 %10128  ;;  %v11073_v2 = vpop.permute.xlu1 %11072  ;;  %v21367_v37 = vmax.f32 %v20669_v58, 0.0  ;;  %v21368_v55 = vmax.f32 %v20687_v25, 0.0  ;;  %v10472_v0 = vadd.f32 %v20213_v52, %v10451_v38 }
 0xa34   :  { %v10152_v17 = vmul.f32 %v20263_v56, %v10129_v34  ;;  %15752 = vpush %v11073_v2  ;;  %v10479_v50 = vadd.f32 %v20213_v52, %v10458_v47  ;;  %v10473_v7 = vadd.f32 %v20213_v52, %v10452_v60  ;;  %v9971_v23 = vsel %vm9616_vm10, %v20710_v21, %v9966_v59 }
 0xa35   :  { %v9975_v39 = vrot.slane %v21367_v37, %v20460_v4  ;;  %v9946_v1 = vrot.slane %v21368_v55, %v20577_v6  ;;  %v9882_v8 = vmax.f32 %v9866_v9, 0.0  ;;  %v10182_v58 = vmax.f32 %v20730_v57, 0.0  ;;  %v12261_v37 = vld [vmem:[%s21173_s7 + $0x90] sm:$0xff] }
 0xa36   :  { %v9942_v40 = vsel %vm9630_vm12, %v9941_v29, %v20482_v53  ;;  %v10248_v25 = vrot.slane %v10181_v46, %v20591_v43  ;;  %v21369_v12 = vpack.c.bf16 %v20569_v44, %v20564_v20  ;;  %v10173_v56 = vadd.f32 %v20276_v33, %v10152_v17  ;;  %v12264_v17 = vld [vmem:[%s21173_s7 + $0xa8] sm:$0xff] }
 0xa37   :  { %v9985_v42 = vrot.slane %v9883_v49, %v20577_v6  ;;  %v10190_v16 = vmax.f32 %v10174_v63, 0.0  ;;  %v10481_v26 = vadd.f32 %v20213_v52, %v10460_v19  ;;  %v9980_v21 = vrot.slane %v9882_v8, %v20591_v43  ;;  %v10436_v59 = vpop.xlane.xlu0 %10435 }
 0xa38   :  { %15027 = vmatpush3.bf16.msra.mxu1 %v21369_v12  ;;  %v10488_v57 = vmax.f32 %v10472_v0, 0.0  ;;  %v9976_v53 = vsel %vm9623_vm11, %v9975_v39, %v9971_v23  ;;  %v10189_v45 = vmax.f32 %v10173_v56, 0.0  ;;  %v10459_v35 = vmul.f32 %v20203_v10, %v10436_v59  ;;  %v12262_v39 = vld [vmem:[%s21173_s7 + $0x98] sm:$0xff]  ;;  %v12272_v12 = vld [vmem:[%s21173_s7 + $0xd0] sm:$0xff] }
 0xa39   :  { %15028 = vmatprep.subr.bf16.mxu1 %v21366_v62  ;;  %v10495_v20 = vmax.f32 %v10479_v50, 0.0  ;;  %v10489_v44 = vmax.f32 %v10473_v7, 0.0  ;;  %v9981_v33 = vsel %vm9630_vm12, %v9980_v21, %v9976_v53  ;;  %v9947_v24 = vsel %vm9637_vm13, %v9946_v1, %v9942_v40  ;;  %v12265_v7 = vld [vmem:[%s21173_s7 + $0xb0] sm:$0xff]  ;;  %v12266_v23 = vld [vmem:[%s21173_s7 + $0xb8] sm:$0xff]  ;;  %v12271_v40 = vld [vmem:[%s21173_s7 + $0xc8] sm:$0xff] }
 0xa3a   :  { %v10249_v14 = vsel %vm9630_vm12, %v10248_v25, %v20500_v36  ;;  %v10287_v31 = vrot.slane %v10189_v45, %v20591_v43  ;;  %v21370_v32 = vpack.c.bf16 %v20587_v13, %v20582_v28  ;;  %v10480_v47 = vadd.f32 %v20213_v52, %v10459_v35  ;;  %v12259_v36 = vld [vmem:[%s21173_s7 + $0x80] sm:$0xff]  ;;  %v12260_v28 = vld [vmem:[%s21173_s7 + $0x88] sm:$0xff]  ;;  %v12273_v56 = vld [vmem:[%s21173_s7 + $0xd8] sm:$0xff] }
 0xa3b   :  { %v9986_v38 = vsel %vm9637_vm13, %v9985_v42, %v9981_v33  ;;  %v10253_v10 = vrot.slane %v10182_v58, %v20577_v6  ;;  %v10292_v18 = vrot.slane %v10190_v16, %v20577_v6  ;;  %v10497_v15 = vmax.f32 %v10481_v26, 0.0  ;;  %v11094_v52 = vpop.permute.xlu0 %11093  ;;  %v12270_v58 = vld [vmem:[%s21173_s7 + $0xc0] sm:$0xff]  ;;  %v12275_v26 = vld [vmem:[%s21173_s7 + $0xe8] sm:$0xff]  ;;  %v12276_v59 = vld [vmem:[%s21173_s7 + $0xf0] sm:$0xff] }
 0xa3c   :  { %15030 = vmatpush3.bf16.msra.mxu1 %v21370_v32  ;;  %v9987_v60 = vsel %vm9678_vm14, %v9986_v38, %v9947_v24  ;;  %v10555_v13 = vrot.slane %v10488_v57, %v20591_v43  ;;  %v10288_v11 = vsel %vm9630_vm12, %v10287_v31, %v10283_v5  ;;  %v10496_v29 = vmax.f32 %v10480_v47, 0.0  ;;  %15754 = vpush %v11094_v52  ;;  %v12274_v16 = vld [vmem:[%s21173_s7 + $0xe0] sm:$0xff]  ;;  %v12277_v57 = vld [vmem:[%s21173_s7 + $0xf8] sm:$0xff]  ;;  %v10825_v35 = vld [vmem:[%s21177_s11 + $0x8] sm:$0xff] }
 0xa3d   :  { %15031 = vmatprep.subr.bf16.mxu1 %v21366_v62  ;;  %v10589_v46 = vrot.slane %v10495_v20, %v20460_v4  ;;  %v10560_v49 = vrot.slane %v10489_v44, %v20577_v6  ;;  %v10254_v61 = vsel %vm9637_vm13, %v10253_v10, %v10249_v14  ;;  %v10293_v3 = vsel %vm9637_vm13, %v10292_v18, %v10288_v11  ;;  %v10824_v45 = vld [vmem:[%s21177_s11] sm:$0xff]  ;;  %v10826_v44 = vld [vmem:[%s21177_s11 + $0x10] sm:$0xff]  ;;  %v10827_v33 = vld [vmem:[%s21177_s11 + $0x18] sm:$0xff] }
 0xa3e   :  { %v10594_v63 = vrot.slane %v10496_v29, %v20591_v43  ;;  %v21371_v19 = vpack.c.bf16 %v20607_v54, %v20602_v48  ;;  %v15035_v9 = vpack.c.bf16 %v12260_v28, %v12259_v36  ;;  %v10294_v34 = vsel %vm9678_vm14, %v10293_v3, %v10254_v61  ;;  %v10828_v14 = vld [vmem:[%s21177_s11 + $0x20] sm:$0xff]  ;;  %v10829_v31 = vld [vmem:[%s21177_s11 + $0x28] sm:$0xff]  ;;  %v10830_v38 = vld [vmem:[%s21177_s11 + $0x30] sm:$0xff] }
 0xa3f   :  { %v10590_v5 = vsel %vm9623_vm11, %v10589_v46, %v10585_v27  ;;  %v10599_v2 = vrot.slane %v10497_v15, %v20577_v6  ;;  %v10556_v48 = vsel %vm9630_vm12, %v10555_v13, %v20529_v22  ;;  %v15038_v1 = vpack.c.bf16 %v12262_v39, %v12261_v37  ;;  %v12263_v22 = vld [vmem:[%s21173_s7 + $0xa0] sm:$0xff]  ;;  %v10831_v10 = vld [vmem:[%s21177_s11 + $0x38] sm:$0xff] }
 0xa40   :  { %15033 = vmatpush3.bf16.msra.mxu1 %v21371_v19  ;;  %v10595_v54 = vsel %vm9630_vm12, %v10594_v63, %v10590_v5  ;;  %v10561_v27 = vsel %vm9637_vm13, %v10560_v49, %v10556_v48  ;;  %v15041_v50 = vpack.c.bf16 %v12264_v17, %v12263_v22  ;;  %v15044_v8 = vpack.c.bf16 %v12266_v23, %v12265_v7 }
 0xa41   :  { %15034 = vmatprep.subr.bf16.mxu1 %v21366_v62  ;;  %v10600_v55 = vsel %vm9637_vm13, %v10599_v2, %v10595_v54  ;;  %v15047_v25 = vpack.c.bf16 %v12271_v40, %v12270_v58  ;;  %v15050_v42 = vpack.c.bf16 %v12273_v56, %v12272_v12  ;;  %v15053_v21 = vpack.c.bf16 %v12275_v26, %v12274_v16  ;;  %v20961_v16 = vld [vmem:[%s21177_s11 + $0x40] sm:$0xff]  ;;  %v20966_v26 = vld [vmem:[%s21177_s11 + $0x48] sm:$0xff] }
 0xa42   :  { %v10601_v0 = vsel %vm9678_vm14, %v10600_v55, %v10561_v27  ;;  %v15056_v53 = vpack.c.bf16 %v12277_v57, %v12276_v59  ;;  %v15059_v20 = vpack.c.bf16 %v10825_v35, %v10824_v45  ;;  %v15062_v24 = vpack.c.bf16 %v10827_v33, %v10826_v44 }
 0xa43   :  { %14644 = vmatmul.mubr.msk.f32.vlgmr.msra.gmra.mrb[48].mxu1 %vm9680_vm15, %v9987_v60  ;;  %v15065_v47 = vpack.c.bf16 %v10829_v31, %v10828_v14  ;;  %v15068_v15 = vpack.c.bf16 %v10831_v10, %v10830_v38  ;;  %v20931_v3 = vstv %s15749_s23  ;;  %v20935_v5 = vstv %s15751_s24 }
 0xa44   :  { %15036 = vmatpush3.bf16.msra.mxu1 %v15035_v9  ;;  %14662 = vmatprep.mubr.msk.f32.mxu1 %vm15802_vm6, %v21365_v30 }
 0xa45   :  { %15037 = vmatprep.subr.bf16.mxu1 %v21366_v62 }
 0xa48   :  { %15039 = vmatpush3.bf16.msra.mxu1 %v15038_v1 }
 0xa49   :  { %15040 = vmatprep.subr.bf16.mxu1 %v21366_v62 }
 0xa4c   :  { %15042 = vmatpush3.bf16.msra.mxu1 %v15041_v50 }
 0xa4d   :  { %15043 = vmatprep.subr.bf16.mxu1 %v21366_v62 }
 0xa50   :  { %15045 = vmatpush3.bf16.msra.mxu1 %v15044_v8 }
 0xa51   :  { %15046 = vmatprep.subr.bf16.mxu1 %v21366_v62 }
 0xa53   :  { %14663 = vmatmul.mubr.msk.f32.vlgmr.msra.gmra.mrb[48].mxu1 %vm9680_vm15, %v10294_v34 }
 0xa54   :  { %15048 = vmatpush3.bf16.msra.mxu1 %v15047_v25  ;;  %14681 = vmatprep.mubr.msk.f32.mxu1 %vm15802_vm6, %v21365_v30 }
 0xa55   :  { %15049 = vmatprep.subr.bf16.mxu1 %v21366_v62 }
 0xa58   :  { %15051 = vmatpush3.bf16.msra.mxu1 %v15050_v42 }
 0xa59   :  { %15052 = vmatprep.subr.bf16.mxu1 %v21366_v62 }
 0xa5c   :  { %15054 = vmatpush3.bf16.msra.mxu1 %v15053_v21 }
 0xa5d   :  { %15055 = vmatprep.subr.bf16.mxu1 %v21366_v62 }
 0xa60   :  { %15057 = vmatpush3.bf16.msra.mxu1 %v15056_v53 }
 0xa61   :  { %15058 = vmatprep.subr.bf16.mxu1 %v21366_v62 }
 0xa63   :  { %14682 = vmatmul.mubr.msk.f32.vlgmr.msra.gmra.mrb[48].mxu1 %vm9680_vm15, %v10601_v0 }
 0xa64   :  { %15060 = vmatpush3.bf16.msra.mxu1 %v15059_v20  ;;  %14700 = vmatprep.mubr.msk.f32.mxu1 %vm15802_vm6, %v21365_v30  ;;  %v10722_v32 = vpop.xlane.xlu1 %10721  ;;  %v21372_v20 = vld [vmem:[#allocation17_spill] sm:$0xff] }
 0xa65   :  { %15061 = vmatprep.subr.bf16.mxu1 %v21366_v62  ;;  %v10772_v34 = vmul.f32 %v20931_v3, %v10722_v32  ;;  %s15753_s26 = spop %15752 }
 0xa67   :  { %v10792_v54 = vadd.f32 %v20935_v5, %v10772_v34 }
 0xa68   :  { %15063 = vmatpush3.bf16.msra.mxu1 %v15062_v24  ;;  %v10746_v18 = vpop.xlane.xlu1 %10745 }
 0xa69   :  { %15064 = vmatprep.subr.bf16.mxu1 %v21366_v62  ;;  %v10780_v1 = vmul.f32 %v20931_v3, %v10746_v18  ;;  %v10808_v25 = vmax.f32 %v10792_v54, 0.0 }
 0xa6b   :  { %v10800_v21 = vadd.f32 %v20935_v5, %v10780_v1  ;;  %v10851_v38 = vrot.slane %v10808_v25, %v20226_v41 }
 0xa6c   :  { %15066 = vmatpush3.bf16.msra.mxu1 %v15065_v47  ;;  %v10728_v60 = vpop.xlane.xlu1 %10727  ;;  %v10725_v36 = vpop.xlane.xlu0 %10724  ;;  %v15071_v47 = vpack.c.bf16 %v20966_v26, %v20961_v16  ;;  %v12290_v26 = vld [vmem:[%s21177_s11 + $0x70] sm:$0xff] }
 0xa6d   :  { %15067 = vmatprep.subr.bf16.mxu1 %v21366_v62  ;;  %v10773_v9 = vmul.f32 %v20931_v3, %v10725_v36  ;;  %v10774_v39 = vmul.f32 %v20931_v3, %v10728_v60  ;;  %v10816_v60 = vmax.f32 %v10800_v21, 0.0  ;;  %s15755_s27 = spop %15754 }
 0xa6f   :  { %v10793_v48 = vadd.f32 %v20935_v5, %v10773_v9  ;;  %v10794_v7 = vadd.f32 %v20935_v5, %v10774_v39 }
 0xa70   :  { %15069 = vmatpush3.bf16.msra.mxu1 %v15068_v15  ;;  %v10731_v28 = vpop.xlane.xlu1 %10730  ;;  %v10749_v52 = vpop.xlane.xlu0 %10748 }
 0xa71   :  { %15070 = vmatprep.subr.bf16.mxu1 %v21366_v62  ;;  %v10775_v27 = vmul.f32 %v20931_v3, %v10731_v28  ;;  %v10781_v55 = vmul.f32 %v20931_v3, %v10749_v52  ;;  %v10809_v23 = vmax.f32 %v10793_v48, 0.0  ;;  %v10810_v35 = vmax.f32 %v10794_v7, 0.0 }
 0xa72   :  { %v20985_v52 = vstv %s15753_s26 }
 0xa73   :  { %v10795_v12 = vadd.f32 %v20935_v5, %v10775_v27  ;;  %v10801_v56 = vadd.f32 %v20935_v5, %v10781_v55  ;;  %v10855_v44 = vrot.slane %v10809_v23, %v21372_v20  ;;  %v21374_v27 = vld [vmem:[#allocation10_spill] sm:$0xff] }
 0xa74   :  { %v10734_v13 = vpop.xlane.xlu1 %10733  ;;  %v10752_v11 = vpop.xlane.xlu0 %10751 }
 0xa75   :  { %v10776_v0 = vmul.f32 %v20931_v3, %v10734_v13  ;;  %v10782_v22 = vmul.f32 %v20931_v3, %v10752_v11  ;;  %v10811_v10 = vmax.f32 %v10795_v12, 0.0  ;;  %v10817_v18 = vmax.f32 %v10801_v56, 0.0  ;;  %v21020_v12 = vld [vmem:[%s21177_s11 + $0x68] sm:$0xff] }
 0xa76   :  { %v10890_v56 = vrot.slane %v10816_v60, %v20226_v41 }
 0xa77   :  { %v10796_v59 = vadd.f32 %v20935_v5, %v10776_v0  ;;  %v10802_v57 = vadd.f32 %v20935_v5, %v10782_v22  ;;  %v10865_v55 = vrot.slane %v10811_v10, %v21374_v27  ;;  %v10894_v1 = vrot.slane %v10817_v18, %v21372_v20 }
 0xa78   :  { %v10737_v29 = vpop.xlane.xlu1 %10736  ;;  %v10755_v46 = vpop.xlane.xlu0 %10754 }
 0xa79   :  { %v10777_v8 = vmul.f32 %v20931_v3, %v10737_v29  ;;  %v10783_v58 = vmul.f32 %v20931_v3, %v10755_v46  ;;  %v10812_v36 = vmax.f32 %v10796_v59, 0.0  ;;  %v10818_v28 = vmax.f32 %v10802_v57, 0.0  ;;  %v20990_v29 = vld [vmem:[%s21177_s11 + $0x50] sm:$0xff]  ;;  %v20995_v46 = vld [vmem:[%s21177_s11 + $0x58] sm:$0xff] }
 0xa7a   :  { %v15074_v22 = vpack.c.bf16 %v20995_v46, %v20990_v29 }
 0xa7b   :  { %v10797_v33 = vadd.f32 %v20935_v5, %v10777_v8  ;;  %v10803_v14 = vadd.f32 %v20935_v5, %v10783_v58  ;;  %v10870_v7 = vrot.slane %v10812_v36, %v20456_v51  ;;  %v21010_v58 = vstv %s15755_s27 }
 0xa7c   :  { %v10740_v49 = vpop.xlane.xlu1 %10739  ;;  %v10758_v61 = vpop.xlane.xlu0 %10757 }
 0xa7d   :  { %v10778_v40 = vmul.f32 %v20931_v3, %v10740_v49  ;;  %v10784_v42 = vmul.f32 %v20931_v3, %v10758_v61  ;;  %v21373_v49 = vld [vmem:[#allocation13_spill] sm:$0xff]  ;;  %v10819_v34 = vmax.f32 %v10803_v14, 0.0 }
 0xa7e   :  { %v10860_v61 = vrot.slane %v10810_v35, %v21373_v49  ;;  %v10899_v23 = vrot.slane %v10818_v28, %v21373_v49 }
 0xa7f   :  { %v10798_v31 = vadd.f32 %v20935_v5, %v10778_v40  ;;  %v10804_v15 = vadd.f32 %v20935_v5, %v10784_v42  ;;  %v10904_v59 = vrot.slane %v10819_v34, %v21374_v27 }
 0xa80   :  { %v10743_v63 = vpop.xlane.xlu1 %10742  ;;  %v10761_v19 = vpop.xlane.xlu0 %10760 }
 0xa81   :  { %v10779_v24 = vmul.f32 %v20931_v3, %v10743_v63  ;;  %v10785_v32 = vmul.f32 %v20931_v3, %v10761_v19  ;;  %v10856_v63 = vsel %vm9595_vm7, %v10855_v44, %v10851_v38  ;;  %v10813_v19 = vmax.f32 %v10797_v33, 0.0 }
 0xa82   :  { %v10814_v39 = vmax.f32 %v10798_v31, 0.0  ;;  %v10820_v0 = vmax.f32 %v10804_v15, 0.0  ;;  %v10861_v42 = vsel %vm9602_vm8, %v10860_v61, %v10856_v63 }
 0xa83   :  { %v10799_v9 = vadd.f32 %v20935_v5, %v10779_v24  ;;  %v10805_v48 = vadd.f32 %v20935_v5, %v10785_v32  ;;  %v10866_v33 = vsel %vm9609_vm9, %v10865_v55, %v10861_v42  ;;  %v10895_v24 = vsel %vm9595_vm7, %v10894_v1, %v10890_v56 }
 0xa84   :  { %v20937_v2 = vpop.xlane.xlu1 %11025  ;;  %v10767_v37 = vpop.xlane.xlu0 %10766  ;;  %v10880_v57 = vrot.slane %v10814_v39, %v20591_v43  ;;  %v10909_v14 = vrot.slane %v10820_v0, %v20456_v51  ;;  %v10871_v32 = vsel %vm9616_vm10, %v10870_v7, %v10866_v33  ;;  %v10900_v38 = vsel %vm9602_vm8, %v10899_v23, %v10895_v24 }
 0xa85   :  { %v10787_v54 = vmul.f32 %v20931_v3, %v10767_v37  ;;  %v11077_v8 = vmul.f32 %v20985_v52, %v20937_v2  ;;  %v21015_v37 = vld [vmem:[%s21177_s11 + $0x60] sm:$0xff]  ;;  %v10875_v2 = vrot.slane %v10813_v19, %v20460_v4  ;;  %v10815_v21 = vmax.f32 %v10799_v9, 0.0 }
 0xa86   :  { %v10821_v35 = vmax.f32 %v10805_v48, 0.0  ;;  %v15077_v31 = vpack.c.bf16 %v21020_v12, %v21015_v37  ;;  %v10905_v19 = vsel %vm9609_vm9, %v10904_v59, %v10900_v38 }
 0xa87   :  { %v10807_v44 = vadd.f32 %v20935_v5, %v10787_v54  ;;  %v11098_v18 = vadd.f32 %v21010_v58, %v11077_v8  ;;  %v10876_v36 = vsel %vm9623_vm11, %v10875_v2, %v10871_v32  ;;  %v10885_v28 = vrot.slane %v10815_v21, %v20577_v6 }
 0xa88   :  { %v20947_v17 = vpop.xlane.xlu1 %11049  ;;  %v20949_v50 = vpop.xlane.xlu0 %11028  ;;  %v10881_v9 = vsel %vm9630_vm12, %v10880_v57, %v10876_v36  ;;  %v10914_v34 = vrot.slane %v10821_v35, %v20460_v4  ;;  %v10910_v39 = vsel %vm9616_vm10, %v10909_v14, %v10905_v19 }
 0xa89   :  { %v11085_v10 = vmul.f32 %v20985_v52, %v20947_v17  ;;  %v11078_v61 = vmul.f32 %v20985_v52, %v20949_v50  ;;  %v10823_v17 = vmax.f32 %v10807_v44, 0.0 }
 0xa8b   :  { %v11106_v50 = vadd.f32 %v21010_v58, %v11085_v10  ;;  %v11099_v8 = vadd.f32 %v21010_v58, %v11078_v61 }
 0xa8c   :  { %v20971_v53 = vpop.xlane.xlu1 %11031  ;;  %v20973_v45 = vpop.xlane.xlu0 %11052 }
 0xa8d   :  { %v11079_v48 = vmul.f32 %v20985_v52, %v20971_v53  ;;  %v11086_v54 = vmul.f32 %v20985_v52, %v20973_v45  ;;  %v10886_v53 = vsel %vm9637_vm13, %v10885_v28, %v10881_v9  ;;  %v10915_v45 = vsel %vm9623_vm11, %v10914_v34, %v10910_v39 }
 0xa90   :  { %v11035_v13 = vpop.xlane.xlu1 %11034  ;;  %v11056_v11 = vpop.xlane.xlu0 %11055 }
 0xa91   :  { %v11080_v1 = vmul.f32 %v20985_v52, %v11035_v13  ;;  %v11087_v0 = vmul.f32 %v20985_v52, %v11056_v11  ;;  %v11100_v13 = vadd.f32 %v21010_v58, %v11079_v48  ;;  %v11107_v11 = vadd.f32 %v21010_v58, %v11086_v54 }
 0xa93   :  { %v11101_v35 = vadd.f32 %v21010_v58, %v11080_v1  ;;  %v11108_v44 = vadd.f32 %v21010_v58, %v11087_v0  ;;  %v11116_v28 = vmax.f32 %v11100_v13, 0.0  ;;  %v11123_v61 = vmax.f32 %v11107_v11, 0.0 }
 0xa94   :  { %v11038_v40 = vpop.xlane.xlu1 %11037  ;;  %v11059_v25 = vpop.xlane.xlu0 %11058 }
 0xa95   :  { %v11088_v56 = vmul.f32 %v20985_v52, %v11059_v25  ;;  %v11081_v2 = vmul.f32 %v20985_v52, %v11038_v40  ;;  %v11122_v25 = vmax.f32 %v11106_v50, 0.0  ;;  %v11115_v40 = vmax.f32 %v11099_v8, 0.0 }
 0xa96   :  { %v11117_v9 = vmax.f32 %v11101_v35, 0.0  ;;  %v11124_v34 = vmax.f32 %v11108_v44, 0.0 }
 0xa97   :  { %v11109_v32 = vadd.f32 %v21010_v58, %v11088_v56  ;;  %v11197_v0 = vrot.slane %v11122_v25, %v20226_v41 }
 0xa98   :  { %v11041_v15 = vpop.xlane.xlu1 %11040  ;;  %v10764_v60 = vpop.xlane.xlu0 %10763 }
 0xa99   :  { %v10786_v63 = vmul.f32 %v20931_v3, %v10764_v60  ;;  %v11114_v3 = vmax.f32 %v11098_v18, 0.0  ;;  %v11082_v59 = vmul.f32 %v20985_v52, %v11041_v15  ;;  %v11102_v18 = vadd.f32 %v21010_v58, %v11081_v2 }
 0xa9b   :  { %v10806_v55 = vadd.f32 %v20935_v5, %v10786_v63  ;;  %v10924_v5 = vrot.slane %v10823_v17, %v20577_v6  ;;  %v11103_v63 = vadd.f32 %v21010_v58, %v11082_v59  ;;  %v11158_v54 = vrot.slane %v11114_v3, %v20226_v41  ;;  %v12291_v41 = vld [vmem:[%s21177_s11 + $0x78] sm:$0xff] }
 0xa9c   :  { %v11044_v7 = vpop.xlane.xlu1 %11043  ;;  %v11062_v23 = vpop.xlane.xlu0 %11061  ;;  %v11201_v3 = vrot.slane %v11123_v61, %v21372_v20 }
 0xa9d   :  { %v10822_v42 = vmax.f32 %v10806_v55, 0.0  ;;  %v11089_v21 = vmul.f32 %v20985_v52, %v11062_v23  ;;  %v11083_v33 = vmul.f32 %v20985_v52, %v11044_v7  ;;  %v11125_v55 = vmax.f32 %v11109_v32, 0.0 }
 0xa9e   :  { %v11162_v7 = vrot.slane %v11115_v40, %v21372_v20  ;;  %v11118_v23 = vmax.f32 %v11102_v18, 0.0  ;;  %v11119_v56 = vmax.f32 %v11103_v63, 0.0  ;;  %v11202_v25 = vsel %vm9595_vm7, %v11201_v3, %v11197_v0 }
 0xa9f   :  { %v10919_v57 = vrot.slane %v10822_v42, %v20591_v43  ;;  %v11110_v15 = vadd.f32 %v21010_v58, %v11089_v21  ;;  %v11104_v17 = vadd.f32 %v21010_v58, %v11083_v33 }
 0xaa0   :  { %v11047_v24 = vpop.xlane.xlu1 %11046  ;;  %v11065_v14 = vpop.xlane.xlu0 %11064  ;;  %v11163_v11 = vsel %vm9595_vm7, %v11162_v7, %v11158_v54  ;;  %v11177_v59 = vrot.slane %v11118_v23, %v20456_v51 }
 0xaa1   :  { %v10920_v38 = vsel %vm9630_vm12, %v10919_v57, %v10915_v45  ;;  %v11084_v10 = vmul.f32 %v20985_v52, %v11047_v24  ;;  %v11090_v60 = vmul.f32 %v20985_v52, %v11065_v14  ;;  %v11126_v8 = vmax.f32 %v11110_v15, 0.0 }
 0xaa2   :  { %v10925_v36 = vsel %vm9637_vm13, %v10924_v5, %v10920_v38  ;;  %v11120_v45 = vmax.f32 %v11104_v17, 0.0  ;;  %v11211_v5 = vrot.slane %v11125_v55, %v21374_v27 }
 0xaa3   :  { %v10926_v19 = vsel %vm9678_vm14, %v10925_v36, %v10886_v53  ;;  %v11111_v39 = vadd.f32 %v21010_v58, %v11090_v60  ;;  %v11105_v50 = vadd.f32 %v21010_v58, %v11084_v10  ;;  %v11206_v53 = vrot.slane %v11124_v34, %v21373_v49  ;;  %v12279_v36 = vld [vmem:[%s21178_s12] ss:$0 sm:$0xff] }
 0xaa4   :  { %14701 = vmatmul.mubr.msk.f32.vlgmr.msra.gmra.mrb[50].mxu1 %vm9680_vm15, %v10926_v19  ;;  %v11068_v48 = vpop.xlane.xlu0 %11067  ;;  %v11216_v57 = vrot.slane %v11126_v8, %v20456_v51  ;;  %v12293_v19 = vld [vmem:[%s21179_s13] ss:$0 sm:$0xff]  ;;  %s15803_s13 = smov [#allocation4]  }
 0xaa5   :  { %15072 = vmatpush3.bf16.msra.mxu1 %v15071_v47  ;;  %v11091_v1 = vmul.f32 %v20985_v52, %v11068_v48  ;;  %14719 = vmatprep.mubr.msk.f32.mxu1 %vm15802_vm6, %v21365_v30  ;;  %v11127_v42 = vmax.f32 %v11111_v39, 0.0  ;;  %v11167_v30 = vrot.slane %v11116_v28, %v21373_v49  ;;  %v11172_v47 = vrot.slane %v11117_v9, %v21374_v27  ;;  %s11336_s23 = sshll.u32 %s15803_s13, 4  ;;  %s11337_s23 = int_to_ptr.vmem [resolvable:$true] %s11336_s23 }
 0xaa6   :  { %15073 = vmatprep.subr.bf16.mxu1 %v21366_v62  ;;  %v11121_v2 = vmax.f32 %v11105_v50, 0.0  ;;  %v15080_v49 = vpack.c.bf16 %v12291_v41, %v12290_v26  ;;  %v11182_v27 = vrot.slane %v11119_v56, %v20460_v4  ;;  %s15773_s24 = scalar_lea.vmem %s11337_s23, 32  ;;  %p15778_p1 = scmp.lt.s32.totalorder %s11337_s23, %s11337_s23 }
 0xaa7   :  { %v11112_v16 = vadd.f32 %v21010_v58, %v11091_v1  ;;  %v11221_v35 = vrot.slane %v11127_v42, %v20460_v4  ;;  %v11168_v46 = vsel %vm9602_vm8, %v11167_v30, %v11163_v11  ;;  %v12294_v1 = vld [vmem:[#allocation3] ss:$0 sm:$0xff]  ;;  %p15774_p0 = scmp.ne.s32.totalorder %s11337_s23, %s15773_s24  ;;  %p15779_p2 = scmp.lt.s32.totalorder %s15773_s24, %s15773_s24 }
 0xaa8   :  { %v11071_v20 = vpop.xlane.xlu0 %11070  ;;  %v11173_v51 = vsel %vm9609_vm9, %v11172_v47, %v11168_v46  ;;  %v11192_v24 = vrot.slane %v11121_v2, %v20577_v6 }
 0xaa9   :  { %v11128_v21 = vmax.f32 %v11112_v16, 0.0  ;;  %15075 = vmatpush3.bf16.msra.mxu1 %v15074_v22  ;;  %v11092_v13 = vmul.f32 %v20985_v52, %v11071_v20  ;;  %v11207_v52 = vsel %vm9602_vm8, %v11206_v53, %v11202_v25  ;;  %v11187_v22 = vrot.slane %v11120_v45, %v20591_v43  ;;  %p15780_p3 = por %p15779_p2, %p15778_p1 }
 0xaaa   :  { %15076 = vmatprep.subr.bf16.mxu1 %v21366_v62  ;;  %v11212_v33 = vsel %vm9609_vm9, %v11211_v5, %v11207_v52  ;;  %v11178_v4 = vsel %vm9616_vm10, %v11177_v59, %v11173_v51 }
 0xaab   :  { %v11113_v29 = vadd.f32 %v21010_v58, %v11092_v13  ;;  %v11226_v44 = vrot.slane %v11128_v21, %v20591_v43  ;;  %v11217_v58 = vsel %vm9616_vm10, %v11216_v57, %v11212_v33  ;;  %v11183_v40 = vsel %vm9623_vm11, %v11182_v27, %v11178_v4  ;;  %p15781_p4 = pnand %p15780_p3, %p15774_p0 }
 0xaac   :  { %v11222_v43 = vsel %vm9623_vm11, %v11221_v35, %v11217_v58  ;;  %v11188_v38 = vsel %vm9630_vm12, %v11187_v22, %v11183_v40 }
 0xaad   :  { %v11129_v14 = vmax.f32 %v11113_v29, 0.0  ;;  %15078 = vmatpush3.bf16.msra.mxu1 %v15077_v31  ;;  %v11227_v10 = vsel %vm9630_vm12, %v11226_v44, %v11222_v43  ;;  %v11193_v37 = vsel %vm9637_vm13, %v11192_v24, %v11188_v38 }
 0xaae   :  { %15079 = vmatprep.subr.bf16.mxu1 %v21366_v62  ;;  %v12243_v62 = vld [vmem:[%s21174_s8] ss:$0 sm:$0xff] }
 0xaaf   :  { %v11231_v32 = vrot.slane %v11129_v14, %v20577_v6 }
 0xab1   :  { %15081 = vmatpush3.bf16.msra.mxu1 %v15080_v49  ;;  %v11232_v12 = vsel %vm9637_vm13, %v11231_v32, %v11227_v10 }
 0xab2   :  { %v11233_v31 = vsel %vm9678_vm14, %v11232_v12, %v11193_v37 }
 0xab4   :  { %14720 = vmatmul.mubr.msk.f32.vlgmr.msra.gmra.mrb[50].mxu1 %vm9680_vm15, %v11233_v31 }
 0xb36   :  { %v10670_v18 = vpop.f32.mrb[48].mxu1 }
 0xb37   :  { %v15098_v6 = vadd.f32 %v12243_v62, %v10670_v18  ;;  %v14683_v15 = vpop.f32.mrb[49].mxu1 }
 0xb39   :  { %v10676_v60 = vsel %vm10675_vm0, %v15098_v6, -inf }
 0xb3a   :  { %10677 = vmax.xlane.f32.xlu1 %v10676_v60 }
 0xb87   :  { %v11302_v28 = vpop.f32.mrb[50].mxu1 }
 0xb88   :  { %v15099_v61 = vadd.f32 %v12279_v36, %v11302_v28  ;;  %v14721_v63 = vpop.f32.mrb[51].mxu1 }
 0xb8a   :  { %v11307_v9 = vmax.f32 %v15099_v61, 0.0 }
 0xb8c   :  { %v11315_v34 = vmul.f32 %v12293_v19, %v11307_v9 }
 0xb8e   :  { %v11316_v17 = vsel %vm10675_vm0, %v11315_v34, 0.0 }
 0xb8f   :  { %11317 = vadd.xlane.f32.xlu1 %v11316_v17 }
 0xbc7   :  { %v10678_v39 = vpop.xlane.xlu1 %10677 }
 0xbc8   :  { %v10679_v48 = vsub.f32 %v15098_v6, %v10678_v39 }
 0xbca   :  { %v10680_v54 = vmul.f32 1.442695, %v10679_v48 }
 0xbcc   :  { %15763 = vpow2.f32 %v10680_v54 }
 0xbd6   :  { %v15764_v55 = vpop.eup %15763 }
 0xbd7   :  { %v10682_v50 = vsel %vm10675_vm0, %v15764_v55, 0.0 }
 0xbd8   :  { %10683 = vadd.xlane.f32.xlu0 %v10682_v50 }
 0xc1c   :  { %v11318_v0 = vpop.xlane.xlu1 %11317 }
 0xc1d   :  { %v11326_v7 = vadd.f32 %v12294_v1, %v11318_v0 }
 0xc1f   :  { %15765 = vtanh.f32 %v11326_v7 }
 0xc29   :  { %v15766_v23 = vpop.eup %15765 }
 0xc2a   :  { %11329 = vst.msk [vmem:[%s21182_s16] sm:$0x3] %vm11328_vm1, %v15766_v23 }
 0xc65   :  { %v10684_v8 = vpop.xlane.xlu0 %10683 }
 0xc66   :  { %15767 = vrcp.f32 %v10684_v8 }
 0xc70   :  { %v15768_v3 = vpop.eup %15767 }
 0xc71   :  { %v10686_v56 = vmul.f32 %v15768_v3, %v15764_v55 }
 0xc73   :  { %10687 = vst.msk [vmem:[#allocation4] sm:$0x3] %vm10675_vm0, %v10686_v56 }
 0xc74   :  { %15784 = shalt.err (!%p15781_p4)
}
 0xc75   :  { %s15785_s16 = scalar_lea.hbm %s21181_s15, 32 }
 0xc76   :  { %p15786_p5 = scmp.ne.s32.totalorder %s21181_s15, %s15785_s16  ;;  %p15789_p6 = scmp.lt.u32.totalorder %s15785_s16, %s21181_s15 }
 0xc78   :  { %p15791_p7 = pnand %p15789_p6, %p15786_p5 }
 0xc7a   :  { %15794 = shalt.err (!%p15791_p7)
}
 0xc7b   :  { %11339 = dma.vmem_to_hbm [thread:$0]  %s11337_s23, 32, %s21181_s15, [#allocation5]  }
 0xc7c   :  { %15795 = dma.done.wait [#allocation5], 32  }
 0xc7d   :  { %15796 = vsyncadd [#allocation5], 4294967264 }
 0xc7e   :  { %11347 = vsyncpa [#allocation5], 1 }

</bundles_post_ra>
